<compile_context>
chip_gen: v7x
topology: tpu7x:2x2x1
jax: 0.10.0
libtpu: 0.0.40
codegen_flags: <defaults>
</compile_context>

<pallas_src>
import functools
import math

import jax
import jax.numpy as jnp
from jax import lax
from jax.experimental import pallas as pl
from jax.experimental.pallas import tpu as pltpu


def _round_up(n, m):
    return ((n + m - 1) // m) * m


def birnn_kernel(T, B_pad, H,
                 # inputs
                 x_ref, w1_ref, b1_ref,
                 wih0_ref, whh0_ref, bias0_ref,
                 wih1_ref, whh1_ref, bias1_ref,
                 w2_ref, b2_ref,
                 # outputs
                 mu_ref, sigma_ref, hN_ref, cN_ref,
                 # scratch (hoisted x-projections, full sequence)
                 gx0_ref, gx1_ref):
    G = 4 * H                       # per-direction gate width (= 128 for H=32)
    HP = hN_ref.shape[1]            # lane-padded hidden width (128)
    P = mu_ref.shape[1]             # lane-padded output width (128)
    f32 = jnp.float32

    # ---- dropout (eval identity) + fc1 + ReLU: one batched matmul ----------
    xe = jnp.maximum(
        jnp.dot(x_ref[...], w1_ref[...], preferred_element_type=f32) + b1_ref[...],
        0.0)                                                      # (T*B_pad, HP)

    # ---- hoisted, direction-fused input projection for layer 0 -------------
    gx0_ref[...] = (jnp.dot(xe, wih0_ref[...], preferred_element_type=f32)
                    + bias0_ref[...])                             # (T*B_pad, 8H)

    def run_layer(gx_ref, whh_blk):
        """One bidirectional LSTM layer. gx_ref holds [fwd|bwd] x-projections
        (incl. biases); whh_blk is block_diag(whh_f, whh_b) of shape (2H, 8H)."""
        hf_t = [None] * T           # fwd hidden, indexed by absolute time
        hb_t = [None] * T           # bwd hidden, indexed by absolute time
        h_cat = jnp.zeros((B_pad, 2 * H), f32)     # [h_f | h_b]
        c_f = jnp.zeros((B_pad, H), f32)
        c_b = jnp.zeros((B_pad, H), f32)
        h_f = jnp.zeros((B_pad, H), f32)
        h_b = jnp.zeros((B_pad, H), f32)

        # Fully unrolled (T static & small); fwd processes t=s while bwd
        # processes t=T-1-s, so the two independent chains hide each other's
        # MXU/EUP latency.  All slices below are (8,128)-tile aligned.
        for s in range(T):
            tb = T - 1 - s
            gxf = gx_ref[s * B_pad:(s + 1) * B_pad, 0:G]          # (B_pad, 4H)
            gxb = gx_ref[tb * B_pad:(tb + 1) * B_pad, G:2 * G]    # (B_pad, 4H)
            gates = (jnp.concatenate([gxf, gxb], axis=-1)
                     + jnp.dot(h_cat, whh_blk, preferred_element_type=f32))

            # Full-width nonlinearities once per step, then lane slices
            # (PyTorch gate order i, f, g, o within each direction block).
            sg = jax.nn.sigmoid(gates)                            # (B_pad, 8H)
            tg = jnp.tanh(gates)                                  # (B_pad, 8H)

            c_f = sg[:, H:2 * H] * c_f + sg[:, 0:H] * tg[:, 2 * H:3 * H]
            c_b = sg[:, 5 * H:6 * H] * c_b + sg[:, 4 * H:5 * H] * tg[:, 6 * H:7 * H]
            h_f = sg[:, 3 * H:4 * H] * jnp.tanh(c_f)
            h_b = sg[:, 7 * H:8 * H] * jnp.tanh(c_b)

            h_cat = jnp.concatenate([h_f, h_b], axis=-1)
            hf_t[s] = h_f
            hb_t[tb] = h_b

        # One dense assembly of the layer output sequence (no per-step stores).
        seq = jnp.concatenate(
            [jnp.concatenate(hf_t, axis=0),
             jnp.concatenate(hb_t, axis=0)], axis=-1)             # (T*B_pad, 2H)
        return seq, h_f, c_f, h_b, c_b

    # ---- layer 0 ------------------------------------------------------------
    l0, h0f, c0f, h0b, c0b = run_layer(gx0_ref, whh0_ref[...])

    # ---- hoisted, direction-fused input projection for layer 1 -------------
    gx1_ref[...] = (jnp.dot(l0, wih1_ref[...], preferred_element_type=f32)
                    + bias1_ref[...])                             # (T*B_pad, 8H)

    # ---- layer 1 ------------------------------------------------------------
    l1, h1f, c1f, h1b, c1b = run_layer(gx1_ref, whh1_ref[...])

    # ---- combined output heads: one (T*B_pad, 2H) @ (2H, 2P) matmul ---------
    y = jnp.dot(l1, w2_ref[...], preferred_element_type=f32) + b2_ref[...]
    mu_ref[...] = y[:, 0:P]
    s_ = y[:, P:2 * P]
    # numerically stable softplus
    sigma_ref[...] = jnp.maximum(s_, 0.0) + jnp.log1p(jnp.exp(-jnp.abs(s_)))

    # ---- final h / c: one lane/sublane-dense (4*B_pad, HP) store each -------
    h_all = jnp.concatenate([h0f, h0b, h1f, h1b], axis=0)         # (4*B_pad, H)
    c_all = jnp.concatenate([c0f, c0b, c1f, c1b], axis=0)
    if HP > H:
        lane_pad = jnp.zeros((4 * B_pad, HP - H), f32)
        h_all = jnp.concatenate([h_all, lane_pad], axis=-1)
        c_all = jnp.concatenate([c_all, lane_pad], axis=-1)
    hN_ref[...] = h_all
    cN_ref[...] = c_all


@jax.jit
def birnn_forward(x, params):
    """x: (B, T, D_in) batch_first. Returns (mu, sigma, h, c) matching PyTorch."""
    B, T, DIN = x.shape
    H = params["w1"].shape[1]
    Dout = params["w2a"].shape[1]
    G = 4 * H

    DPAD = _round_up(DIN, 128)      # lane-dense fc1 input
    HP = _round_up(H, 128)          # lane-dense fc1 output / hN width
    P = _round_up(Dout, 128)        # lane-dense output heads
    B_pad = _round_up(B, 8)         # sublane-aligned batch

    # time-major flatten with padded batch: row index = t*B_pad + b
    x_tm = jnp.transpose(x, (1, 0, 2))                              # (T, B, DIN)
    x_tm = jnp.pad(x_tm, ((0, 0), (0, B_pad - B), (0, DPAD - DIN)))
    x_flat = x_tm.reshape(T * B_pad, DPAD)

    # fc1 weights padded to lane-dense in/out widths
    w1_p = jnp.pad(params["w1"], ((0, DPAD - DIN), (0, HP - H)))    # (DPAD, HP)
    b1_p = jnp.pad(params["b1"], ((0, 0), (0, HP - H)))             # (1, HP)

    # layer-0 x-projection: fuse directions along N, pad K to HP (xe width)
    wih0_c = jnp.concatenate([params["wih0"][0], params["wih0"][1]], axis=-1)
    wih0_c = jnp.pad(wih0_c, ((0, HP - H), (0, 0)))                 # (HP, 8H)
    bias0_c = jnp.concatenate([params["bias0"][0], params["bias0"][1]], axis=-1)

    # layer-1 x-projection: fuse directions along N (K = 2H)
    wih1_c = jnp.concatenate([params["wih1"][0], params["wih1"][1]], axis=-1)  # (2H, 8H)
    bias1_c = jnp.concatenate([params["bias1"][0], params["bias1"][1]], axis=-1)

    # recurrence weights: block_diag(whh_f, whh_b) -> one matmul per step
    def blkdiag(w):                                                  # w: (2, H, 4H)
        z = jnp.zeros((H, G), jnp.float32)
        return jnp.concatenate(
            [jnp.concatenate([w[0], z], axis=-1),
             jnp.concatenate([z, w[1]], axis=-1)], axis=0)           # (2H, 8H)

    whh0_b = blkdiag(params["whh0"])
    whh1_b = blkdiag(params["whh1"])

    # combined, lane-padded output heads: [mu | sigma]
    w2_c = jnp.concatenate(
        [jnp.pad(params["w2a"], ((0, 0), (0, P - Dout))),
         jnp.pad(params["w2b"], ((0, 0), (0, P - Dout)))], axis=-1)  # (2H, 2P)
    b2_c = jnp.concatenate(
        [jnp.pad(params["b2a"], ((0, 0), (0, P - Dout))),
         jnp.pad(params["b2b"], ((0, 0), (0, P - Dout)))], axis=-1)  # (1, 2P)

    vmem = pl.BlockSpec(memory_space=pltpu.MemorySpace.VMEM)
    out_shapes = (
        jax.ShapeDtypeStruct((T * B_pad, P), jnp.float32),    # mu    (padded, time-major)
        jax.ShapeDtypeStruct((T * B_pad, P), jnp.float32),    # sigma (padded, time-major)
        jax.ShapeDtypeStruct((4 * B_pad, HP), jnp.float32),   # h (padded)
        jax.ShapeDtypeStruct((4 * B_pad, HP), jnp.float32),   # c (padded)
    )
    # NOTE(v7x VMEM budget): total resident footprint here is a few hundred KiB;
    # if T/B/H are scaled up, tile the hoisted gx projections over time chunks.
    scratch = [pltpu.VMEM((T * B_pad, 2 * G), jnp.float32) for _ in range(2)]

    mu_p, sigma_p, hN, cN = pl.pallas_call(
        functools.partial(birnn_kernel, T, B_pad, H),
        out_shape=out_shapes,
        in_specs=[vmem] * 11,
        out_specs=(vmem, vmem, vmem, vmem),
        scratch_shapes=scratch,
    )(x_flat, w1_p, b1_p,
      wih0_c, whh0_b, bias0_c,
      wih1_c, whh1_b, bias1_c,
      w2_c, b2_c)

    mu = mu_p.reshape(T, B_pad, P)[:, :B, :Dout].transpose(1, 0, 2)     # (B, T, Dout)
    sigma = sigma_p.reshape(T, B_pad, P)[:, :B, :Dout].transpose(1, 0, 2)
    h = hN[:, :H].reshape(4, B_pad, H)[:, :B, :]
    c = cN[:, :H].reshape(4, B_pad, H)[:, :B, :]
    return mu, sigma, h, c


def make_params(key, din, H, dout):
    """Deterministic synthetic params (PyTorch-style uniform bounds).
    Weights are stored transposed for right-multiplication (x @ W)."""
    ks = jax.random.split(key, 12)

    def u(k, shape, bound):
        return jax.random.uniform(k, shape, jnp.float32, -bound, bound)

    k1 = 1.0 / math.sqrt(din)
    kh = 1.0 / math.sqrt(H)
    kf = 1.0 / math.sqrt(2 * H)
    return {
        "w1":    u(ks[0], (din, H), k1),
        "b1":    u(ks[1], (1, H), k1),
        # per-layer LSTM weights stacked over direction: [fwd, bwd]
        "wih0":  u(ks[2], (2, H, 4 * H), kh),
        "whh0":  u(ks[3], (2, H, 4 * H), kh),
        "bias0": u(ks[4], (2, 1, 4 * H), kh),   # combined b_ih + b_hh
        "wih1":  u(ks[5], (2, 2 * H, 4 * H), kh),
        "whh1":  u(ks[6], (2, H, 4 * H), kh),
        "bias1": u(ks[7], (2, 1, 4 * H), kh),
        "w2a":   u(ks[8], (2 * H, dout), kf),
        "b2a":   u(ks[9], (1, dout), kf),
        "w2b":   u(ks[10], (2 * H, dout), kf),
        "b2b":   u(ks[11], (1, dout), kf),
    }


def birnn_reference(x, p):
    """Pure-JAX reference implementing the same forward semantics."""
    H = p["w1"].shape[1]
    xe = jax.nn.relu(jnp.einsum("btd,dh->bth", x, p["w1"]) + p["b1"][0])

    def run(seq, wih, whh, b, reverse):
        B = seq.shape[0]

        def step(carry, x_t):
            h, c = carry
            gates = x_t @ wih + h @ whh + b
            i = jax.nn.sigmoid(gates[:, :H])
            f = jax.nn.sigmoid(gates[:, H:2 * H])
            g = jnp.tanh(gates[:, 2 * H:3 * H])
            o = jax.nn.sigmoid(gates[:, 3 * H:])
            c = f * c + i * g
            h = o * jnp.tanh(c)
            return (h, c), h

        xs = jnp.transpose(seq, (1, 0, 2))
        if reverse:
            xs = xs[::-1]
        (h, c), ys = lax.scan(step, (jnp.zeros((B, H)), jnp.zeros((B, H))), xs)
        if reverse:
            ys = ys[::-1]
        return jnp.transpose(ys, (1, 0, 2)), h, c

    f0, h0, c0 = run(xe, p["wih0"][0], p["whh0"][0], p["bias0"][0], False)
    r0, h1, c1 = run(xe, p["wih0"][1], p["whh0"][1], p["bias0"][1], True)
    l0 = jnp.concatenate([f0, r0], -1)
    f1, h2, c2 = run(l0, p["wih1"][0], p["whh1"][0], p["bias1"][0], False)
    r1, h3, c3 = run(l0, p["wih1"][1], p["whh1"][1], p["bias1"][1], True)
    l1 = jnp.concatenate([f1, r1], -1)

    mu = jnp.einsum("btf,fd->btd", l1, p["w2a"]) + p["b2a"][0]
    sigma = jax.nn.softplus(jnp.einsum("btf,fd->btd", l1, p["w2b"]) + p["b2b"][0])
    h = jnp.stack([h0, h1, h2, h3])
    c = jnp.stack([c0, c1, c2, c3])
    return mu, sigma, h, c


if __name__ == "__main__":
    # Keep both kernel and reference matmuls at full f32 precision so the
    # tolerance check is about the kernel, not MXU bf16-pass rounding.
    jax.config.update("jax_default_matmul_precision", "highest")

    B, T, DIN, H, DOUT = 2, 8, 12, 32, 15   # 1 IMU sensor: 9 + 3 = 12 features
    key = jax.random.PRNGKey(0)
    kp, kx = jax.random.split(key)
    params = make_params(kp, DIN, H, DOUT)
    x = jax.random.normal(kx, (B, T, DIN), jnp.float32)

    mu, sigma, h, c = jax.block_until_ready(birnn_forward(x, params))

    mu_r, sigma_r, h_r, c_r = birnn_reference(x, params)
    ok = (jnp.allclose(mu, mu_r, rtol=1e-3, atol=1e-3)
          and jnp.allclose(sigma, sigma_r, rtol=1e-3, atol=1e-3)
          and jnp.allclose(h, h_r, rtol=1e-3, atol=1e-3)
          and jnp.allclose(c, c_r, rtol=1e-3, atol=1e-3))
    assert ok, "Pallas kernel output mismatch vs JAX reference"
    print("KERNEL_OK")
</pallas_src>

<mosaic_0001>
module attributes {stable_mosaic.version = 11 : i64} {
  func.func @birnn_kernel(%arg0: memref<64x128xf32, #tpu.memory_space<vmem>>, %arg1: memref<128x128xf32, #tpu.memory_space<vmem>>, %arg2: memref<1x128xf32, #tpu.memory_space<vmem>>, %arg3: memref<128x256xf32, #tpu.memory_space<vmem>>, %arg4: memref<64x256xf32, #tpu.memory_space<vmem>>, %arg5: memref<1x256xf32, #tpu.memory_space<vmem>>, %arg6: memref<64x256xf32, #tpu.memory_space<vmem>>, %arg7: memref<64x256xf32, #tpu.memory_space<vmem>>, %arg8: memref<1x256xf32, #tpu.memory_space<vmem>>, %arg9: memref<64x256xf32, #tpu.memory_space<vmem>>, %arg10: memref<1x256xf32, #tpu.memory_space<vmem>>, %arg11: memref<64x128xf32, #tpu.memory_space<vmem>>, %arg12: memref<64x128xf32, #tpu.memory_space<vmem>>, %arg13: memref<32x128xf32, #tpu.memory_space<vmem>>, %arg14: memref<32x128xf32, #tpu.memory_space<vmem>>, %arg15: memref<64x256xf32, #tpu.memory_space<vmem>>, %arg16: memref<64x256xf32, #tpu.memory_space<vmem>>) attributes {dimension_semantics = [], scalar_prefetch = 0 : i64, scratch_operands = 2 : i64, tpu.core_type = #tpu.core_type<tc>} {
    %c0 = arith.constant 0 : index
    %c0_0 = arith.constant 0 : index
    %0 = vector.load %arg0[%c0, %c0_0] : memref<64x128xf32, #tpu.memory_space<vmem>>, vector<64x128xf32>
    %c0_1 = arith.constant 0 : index
    %c0_2 = arith.constant 0 : index
    %1 = vector.load %arg1[%c0_1, %c0_2] : memref<128x128xf32, #tpu.memory_space<vmem>>, vector<128x128xf32>
    %cst = arith.constant dense<0.000000e+00> : vector<64x128xf32>
    %2 = tpu.matmul %0, %1, %cst {dimension_numbers = #tpu.dot_dimension_numbers<[1], [0], [0], [1], [0, 0, 1, 1], [], []>, precision = #tpu.contract_precision<fp32>} : vector<64x128xf32>, vector<128x128xf32>, vector<64x128xf32> -> vector<64x128xf32>
    %c0_3 = arith.constant 0 : index
    %c0_4 = arith.constant 0 : index
    %3 = vector.load %arg2[%c0_3, %c0_4] : memref<1x128xf32, #tpu.memory_space<vmem>>, vector<1x128xf32>
    %4 = vector.broadcast %3 : vector<1x128xf32> to vector<64x128xf32>
    %5 = arith.addf %2, %4 : vector<64x128xf32>
    %cst_5 = arith.constant 0.000000e+00 : f32
    %6 = vector.broadcast %cst_5 : f32 to vector<64x128xf32>
    %7 = arith.maximumf %5, %6 : vector<64x128xf32>
    %c0_6 = arith.constant 0 : index
    %c0_7 = arith.constant 0 : index
    %8 = vector.load %arg3[%c0_6, %c0_7] : memref<128x256xf32, #tpu.memory_space<vmem>>, vector<128x256xf32>
    %cst_8 = arith.constant dense<0.000000e+00> : vector<64x256xf32>
    %9 = tpu.matmul %7, %8, %cst_8 {dimension_numbers = #tpu.dot_dimension_numbers<[1], [0], [0], [1], [0, 0, 1, 1], [], []>, precision = #tpu.contract_precision<fp32>} : vector<64x128xf32>, vector<128x256xf32>, vector<64x256xf32> -> vector<64x256xf32>
    %c0_9 = arith.constant 0 : index
    %c0_10 = arith.constant 0 : index
    %10 = vector.load %arg5[%c0_9, %c0_10] : memref<1x256xf32, #tpu.memory_space<vmem>>, vector<1x256xf32>
    %11 = vector.broadcast %10 : vector<1x256xf32> to vector<64x256xf32>
    %12 = arith.addf %9, %11 : vector<64x256xf32>
    %c0_11 = arith.constant 0 : index
    %c0_12 = arith.constant 0 : index
    %13 = vector.load %arg15[%c0_11, %c0_12] : memref<64x256xf32, #tpu.memory_space<vmem>>, vector<64x256xf32>
    tpu.vector_store %arg15[%c0_11, %c0_12], %12 {strides = array<i32>} : memref<64x256xf32, #tpu.memory_space<vmem>>, vector<64x256xf32>,
    %c0_13 = arith.constant 0 : index
    %c0_14 = arith.constant 0 : index
    %14 = vector.load %arg4[%c0_13, %c0_14] : memref<64x256xf32, #tpu.memory_space<vmem>>, vector<64x256xf32>
    %cst_15 = arith.constant 0.000000e+00 : f32
    %15 = vector.broadcast %cst_15 : f32 to vector<8x64xf32>
    %cst_16 = arith.constant 0.000000e+00 : f32
    %16 = vector.broadcast %cst_16 : f32 to vector<8x32xf32>
    %cst_17 = arith.constant 0.000000e+00 : f32
    %17 = vector.broadcast %cst_17 : f32 to vector<8x32xf32>
    %c0_18 = arith.constant 0 : index
    %c0_19 = arith.constant 0 : index
    %18 = vector.load %arg15[%c0_18, %c0_19] : memref<64x256xf32, #tpu.memory_space<vmem>>, vector<8x128xf32>
    %c56 = arith.constant 56 : index
    %c128 = arith.constant 128 : index
    %19 = vector.load %arg15[%c56, %c128] : memref<64x256xf32, #tpu.memory_space<vmem>>, vector<8x128xf32>
    %20 = tpu.concatenate %18, %19 in 1 : vector<8x128xf32>, vector<8x128xf32> -> vector<8x256xf32>
    %cst_20 = arith.constant dense<0.000000e+00> : vector<8x256xf32>
    %21 = tpu.matmul %15, %14, %cst_20 {dimension_numbers = #tpu.dot_dimension_numbers<[1], [0], [0], [1], [0, 0, 1, 1], [], []>, precision = #tpu.contract_precision<fp32>} : vector<8x64xf32>, vector<64x256xf32>, vector<8x256xf32> -> vector<8x256xf32>
    %22 = arith.addf %20, %21 : vector<8x256xf32>
    %23 = arith.negf %22 : vector<8x256xf32>
    %24 = math.exp %23 : vector<8x256xf32>
    %cst_21 = arith.constant 1.000000e+00 : f32
    %25 = vector.broadcast %cst_21 : f32 to vector<8x256xf32>
    %26 = arith.addf %25, %24 : vector<8x256xf32>
    %27 = arith.divf %25, %26 : vector<8x256xf32>
    %28 = math.tanh %22 : vector<8x256xf32>
    %29 = vector.extract_strided_slice %27 {offsets = [0, 32], sizes = [8, 32], strides = [1, 1]} : vector<8x256xf32> to vector<8x32xf32>
    %30 = arith.mulf %29, %16 : vector<8x32xf32>
    %31 = vector.extract_strided_slice %27 {offsets = [0, 0], sizes = [8, 32], strides = [1, 1]} : vector<8x256xf32> to vector<8x32xf32>
    %32 = vector.extract_strided_slice %28 {offsets = [0, 64], sizes = [8, 32], strides = [1, 1]} : vector<8x256xf32> to vector<8x32xf32>
    %33 = arith.mulf %31, %32 : vector<8x32xf32>
    %34 = arith.addf %30, %33 : vector<8x32xf32>
    %35 = vector.extract_strided_slice %27 {offsets = [0, 160], sizes = [8, 32], strides = [1, 1]} : vector<8x256xf32> to vector<8x32xf32>
    %36 = arith.mulf %35, %17 : vector<8x32xf32>
    %37 = vector.extract_strided_slice %27 {offsets = [0, 128], sizes = [8, 32], strides = [1, 1]} : vector<8x256xf32> to vector<8x32xf32>
    %38 = vector.extract_strided_slice %28 {offsets = [0, 192], sizes = [8, 32], strides = [1, 1]} : vector<8x256xf32> to vector<8x32xf32>
    %39 = arith.mulf %37, %38 : vector<8x32xf32>
    %40 = arith.addf %36, %39 : vector<8x32xf32>
    %41 = vector.extract_strided_slice %27 {offsets = [0, 96], sizes = [8, 32], strides = [1, 1]} : vector<8x256xf32> to vector<8x32xf32>
    %42 = math.tanh %34 : vector<8x32xf32>
    %43 = arith.mulf %41, %42 : vector<8x32xf32>
    %44 = vector.extract_strided_slice %27 {offsets = [0, 224], sizes = [8, 32], strides = [1, 1]} : vector<8x256xf32> to vector<8x32xf32>
    %45 = math.tanh %40 : vector<8x32xf32>
    %46 = arith.mulf %44, %45 : vector<8x32xf32>
    %47 = tpu.concatenate %43, %46 in 1 : vector<8x32xf32>, vector<8x32xf32> -> vector<8x64xf32>
    %c8 = arith.constant 8 : index
    %c0_22 = arith.constant 0 : index
    %48 = vector.load %arg15[%c8, %c0_22] : memref<64x256xf32, #tpu.memory_space<vmem>>, vector<8x128xf32>
    %c48 = arith.constant 48 : index
    %c128_23 = arith.constant 128 : index
    %49 = vector.load %arg15[%c48, %c128_23] : memref<64x256xf32, #tpu.memory_space<vmem>>, vector<8x128xf32>
    %50 = tpu.concatenate %48, %49 in 1 : vector<8x128xf32>, vector<8x128xf32> -> vector<8x256xf32>
    %cst_24 = arith.constant dense<0.000000e+00> : vector<8x256xf32>
    %51 = tpu.matmul %47, %14, %cst_24 {dimension_numbers = #tpu.dot_dimension_numbers<[1], [0], [0], [1], [0, 0, 1, 1], [], []>, precision = #tpu.contract_precision<fp32>} : vector<8x64xf32>, vector<64x256xf32>, vector<8x256xf32> -> vector<8x256xf32>
    %52 = arith.addf %50, %51 : vector<8x256xf32>
    %53 = arith.negf %52 : vector<8x256xf32>
    %54 = math.exp %53 : vector<8x256xf32>
    %cst_25 = arith.constant 1.000000e+00 : f32
    %55 = vector.broadcast %cst_25 : f32 to vector<8x256xf32>
    %56 = arith.addf %55, %54 : vector<8x256xf32>
    %57 = arith.divf %55, %56 : vector<8x256xf32>
    %58 = math.tanh %52 : vector<8x256xf32>
    %59 = vector.extract_strided_slice %57 {offsets = [0, 32], sizes = [8, 32], strides = [1, 1]} : vector<8x256xf32> to vector<8x32xf32>
    %60 = arith.mulf %59, %34 : vector<8x32xf32>
    %61 = vector.extract_strided_slice %57 {offsets = [0, 0], sizes = [8, 32], strides = [1, 1]} : vector<8x256xf32> to vector<8x32xf32>
    %62 = vector.extract_strided_slice %58 {offsets = [0, 64], sizes = [8, 32], strides = [1, 1]} : vector<8x256xf32> to vector<8x32xf32>
    %63 = arith.mulf %61, %62 : vector<8x32xf32>
    %64 = arith.addf %60, %63 : vector<8x32xf32>
    %65 = vector.extract_strided_slice %57 {offsets = [0, 160], sizes = [8, 32], strides = [1, 1]} : vector<8x256xf32> to vector<8x32xf32>
    %66 = arith.mulf %65, %40 : vector<8x32xf32>
    %67 = vector.extract_strided_slice %57 {offsets = [0, 128], sizes = [8, 32], strides = [1, 1]} : vector<8x256xf32> to vector<8x32xf32>
    %68 = vector.extract_strided_slice %58 {offsets = [0, 192], sizes = [8, 32], strides = [1, 1]} : vector<8x256xf32> to vector<8x32xf32>
    %69 = arith.mulf %67, %68 : vector<8x32xf32>
    %70 = arith.addf %66, %69 : vector<8x32xf32>
    %71 = vector.extract_strided_slice %57 {offsets = [0, 96], sizes = [8, 32], strides = [1, 1]} : vector<8x256xf32> to vector<8x32xf32>
    %72 = math.tanh %64 : vector<8x32xf32>
    %73 = arith.mulf %71, %72 : vector<8x32xf32>
    %74 = vector.extract_strided_slice %57 {offsets = [0, 224], sizes = [8, 32], strides = [1, 1]} : vector<8x256xf32> to vector<8x32xf32>
    %75 = math.tanh %70 : vector<8x32xf32>
    %76 = arith.mulf %74, %75 : vector<8x32xf32>
    %77 = tpu.concatenate %73, %76 in 1 : vector<8x32xf32>, vector<8x32xf32> -> vector<8x64xf32>
    %c16 = arith.constant 16 : index
    %c0_26 = arith.constant 0 : index
    %78 = vector.load %arg15[%c16, %c0_26] : memref<64x256xf32, #tpu.memory_space<vmem>>, vector<8x128xf32>
    %c40 = arith.constant 40 : index
    %c128_27 = arith.constant 128 : index
    %79 = vector.load %arg15[%c40, %c128_27] : memref<64x256xf32, #tpu.memory_space<vmem>>, vector<8x128xf32>
    %80 = tpu.concatenate %78, %79 in 1 : vector<8x128xf32>, vector<8x128xf32> -> vector<8x256xf32>
    %cst_28 = arith.constant dense<0.000000e+00> : vector<8x256xf32>
    %81 = tpu.matmul %77, %14, %cst_28 {dimension_numbers = #tpu.dot_dimension_numbers<[1], [0], [0], [1], [0, 0, 1, 1], [], []>, precision = #tpu.contract_precision<fp32>} : vector<8x64xf32>, vector<64x256xf32>, vector<8x256xf32> -> vector<8x256xf32>
    %82 = arith.addf %80, %81 : vector<8x256xf32>
    %83 = arith.negf %82 : vector<8x256xf32>
    %84 = math.exp %83 : vector<8x256xf32>
    %cst_29 = arith.constant 1.000000e+00 : f32
    %85 = vector.broadcast %cst_29 : f32 to vector<8x256xf32>
    %86 = arith.addf %85, %84 : vector<8x256xf32>
    %87 = arith.divf %85, %86 : vector<8x256xf32>
    %88 = math.tanh %82 : vector<8x256xf32>
    %89 = vector.extract_strided_slice %87 {offsets = [0, 32], sizes = [8, 32], strides = [1, 1]} : vector<8x256xf32> to vector<8x32xf32>
    %90 = arith.mulf %89, %64 : vector<8x32xf32>
    %91 = vector.extract_strided_slice %87 {offsets = [0, 0], sizes = [8, 32], strides = [1, 1]} : vector<8x256xf32> to vector<8x32xf32>
    %92 = vector.extract_strided_slice %88 {offsets = [0, 64], sizes = [8, 32], strides = [1, 1]} : vector<8x256xf32> to vector<8x32xf32>
    %93 = arith.mulf %91, %92 : vector<8x32xf32>
    %94 = arith.addf %90, %93 : vector<8x32xf32>
    %95 = vector.extract_strided_slice %87 {offsets = [0, 160], sizes = [8, 32], strides = [1, 1]} : vector<8x256xf32> to vector<8x32xf32>
    %96 = arith.mulf %95, %70 : vector<8x32xf32>
    %97 = vector.extract_strided_slice %87 {offsets = [0, 128], sizes = [8, 32], strides = [1, 1]} : vector<8x256xf32> to vector<8x32xf32>
    %98 = vector.extract_strided_slice %88 {offsets = [0, 192], sizes = [8, 32], strides = [1, 1]} : vector<8x256xf32> to vector<8x32xf32>
    %99 = arith.mulf %97, %98 : vector<8x32xf32>
    %100 = arith.addf %96, %99 : vector<8x32xf32>
    %101 = vector.extract_strided_slice %87 {offsets = [0, 96], sizes = [8, 32], strides = [1, 1]} : vector<8x256xf32> to vector<8x32xf32>
    %102 = math.tanh %94 : vector<8x32xf32>
    %103 = arith.mulf %101, %102 : vector<8x32xf32>
    %104 = vector.extract_strided_slice %87 {offsets = [0, 224], sizes = [8, 32], strides = [1, 1]} : vector<8x256xf32> to vector<8x32xf32>
    %105 = math.tanh %100 : vector<8x32xf32>
    %106 = arith.mulf %104, %105 : vector<8x32xf32>
    %107 = tpu.concatenate %103, %106 in 1 : vector<8x32xf32>, vector<8x32xf32> -> vector<8x64xf32>
    %c24 = arith.constant 24 : index
    %c0_30 = arith.constant 0 : index
    %108 = vector.load %arg15[%c24, %c0_30] : memref<64x256xf32, #tpu.memory_space<vmem>>, vector<8x128xf32>
    %c32 = arith.constant 32 : index
    %c128_31 = arith.constant 128 : index
    %109 = vector.load %arg15[%c32, %c128_31] : memref<64x256xf32, #tpu.memory_space<vmem>>, vector<8x128xf32>
    %110 = tpu.concatenate %108, %109 in 1 : vector<8x128xf32>, vector<8x128xf32> -> vector<8x256xf32>
    %cst_32 = arith.constant dense<0.000000e+00> : vector<8x256xf32>
    %111 = tpu.matmul %107, %14, %cst_32 {dimension_numbers = #tpu.dot_dimension_numbers<[1], [0], [0], [1], [0, 0, 1, 1], [], []>, precision = #tpu.contract_precision<fp32>} : vector<8x64xf32>, vector<64x256xf32>, vector<8x256xf32> -> vector<8x256xf32>
    %112 = arith.addf %110, %111 : vector<8x256xf32>
    %113 = arith.negf %112 : vector<8x256xf32>
    %114 = math.exp %113 : vector<8x256xf32>
    %cst_33 = arith.constant 1.000000e+00 : f32
    %115 = vector.broadcast %cst_33 : f32 to vector<8x256xf32>
    %116 = arith.addf %115, %114 : vector<8x256xf32>
    %117 = arith.divf %115, %116 : vector<8x256xf32>
    %118 = math.tanh %112 : vector<8x256xf32>
    %119 = vector.extract_strided_slice %117 {offsets = [0, 32], sizes = [8, 32], strides = [1, 1]} : vector<8x256xf32> to vector<8x32xf32>
    %120 = arith.mulf %119, %94 : vector<8x32xf32>
    %121 = vector.extract_strided_slice %117 {offsets = [0, 0], sizes = [8, 32], strides = [1, 1]} : vector<8x256xf32> to vector<8x32xf32>
    %122 = vector.extract_strided_slice %118 {offsets = [0, 64], sizes = [8, 32], strides = [1, 1]} : vector<8x256xf32> to vector<8x32xf32>
    %123 = arith.mulf %121, %122 : vector<8x32xf32>
    %124 = arith.addf %120, %123 : vector<8x32xf32>
    %125 = vector.extract_strided_slice %117 {offsets = [0, 160], sizes = [8, 32], strides = [1, 1]} : vector<8x256xf32> to vector<8x32xf32>
    %126 = arith.mulf %125, %100 : vector<8x32xf32>
    %127 = vector.extract_strided_slice %117 {offsets = [0, 128], sizes = [8, 32], strides = [1, 1]} : vector<8x256xf32> to vector<8x32xf32>
    %128 = vector.extract_strided_slice %118 {offsets = [0, 192], sizes = [8, 32], strides = [1, 1]} : vector<8x256xf32> to vector<8x32xf32>
    %129 = arith.mulf %127, %128 : vector<8x32xf32>
    %130 = arith.addf %126, %129 : vector<8x32xf32>
    %131 = vector.extract_strided_slice %117 {offsets = [0, 96], sizes = [8, 32], strides = [1, 1]} : vector<8x256xf32> to vector<8x32xf32>
    %132 = math.tanh %124 : vector<8x32xf32>
    %133 = arith.mulf %131, %132 : vector<8x32xf32>
    %134 = vector.extract_strided_slice %117 {offsets = [0, 224], sizes = [8, 32], strides = [1, 1]} : vector<8x256xf32> to vector<8x32xf32>
    %135 = math.tanh %130 : vector<8x32xf32>
    %136 = arith.mulf %134, %135 : vector<8x32xf32>
    %137 = tpu.concatenate %133, %136 in 1 : vector<8x32xf32>, vector<8x32xf32> -> vector<8x64xf32>
    %c32_34 = arith.constant 32 : index
    %c0_35 = arith.constant 0 : index
    %138 = vector.load %arg15[%c32_34, %c0_35] : memref<64x256xf32, #tpu.memory_space<vmem>>, vector<8x128xf32>
    %c24_36 = arith.constant 24 : index
    %c128_37 = arith.constant 128 : index
    %139 = vector.load %arg15[%c24_36, %c128_37] : memref<64x256xf32, #tpu.memory_space<vmem>>, vector<8x128xf32>
    %140 = tpu.concatenate %138, %139 in 1 : vector<8x128xf32>, vector<8x128xf32> -> vector<8x256xf32>
    %cst_38 = arith.constant dense<0.000000e+00> : vector<8x256xf32>
    %141 = tpu.matmul %137, %14, %cst_38 {dimension_numbers = #tpu.dot_dimension_numbers<[1], [0], [0], [1], [0, 0, 1, 1], [], []>, precision = #tpu.contract_precision<fp32>} : vector<8x64xf32>, vector<64x256xf32>, vector<8x256xf32> -> vector<8x256xf32>
    %142 = arith.addf %140, %141 : vector<8x256xf32>
    %143 = arith.negf %142 : vector<8x256xf32>
    %144 = math.exp %143 : vector<8x256xf32>
    %cst_39 = arith.constant 1.000000e+00 : f32
    %145 = vector.broadcast %cst_39 : f32 to vector<8x256xf32>
    %146 = arith.addf %145, %144 : vector<8x256xf32>
    %147 = arith.divf %145, %146 : vector<8x256xf32>
    %148 = math.tanh %142 : vector<8x256xf32>
    %149 = vector.extract_strided_slice %147 {offsets = [0, 32], sizes = [8, 32], strides = [1, 1]} : vector<8x256xf32> to vector<8x32xf32>
    %150 = arith.mulf %149, %124 : vector<8x32xf32>
    %151 = vector.extract_strided_slice %147 {offsets = [0, 0], sizes = [8, 32], strides = [1, 1]} : vector<8x256xf32> to vector<8x32xf32>
    %152 = vector.extract_strided_slice %148 {offsets = [0, 64], sizes = [8, 32], strides = [1, 1]} : vector<8x256xf32> to vector<8x32xf32>
    %153 = arith.mulf %151, %152 : vector<8x32xf32>
    %154 = arith.addf %150, %153 : vector<8x32xf32>
    %155 = vector.extract_strided_slice %147 {offsets = [0, 160], sizes = [8, 32], strides = [1, 1]} : vector<8x256xf32> to vector<8x32xf32>
    %156 = arith.mulf %155, %130 : vector<8x32xf32>
    %157 = vector.extract_strided_slice %147 {offsets = [0, 128], sizes = [8, 32], strides = [1, 1]} : vector<8x256xf32> to vector<8x32xf32>
    %158 = vector.extract_strided_slice %148 {offsets = [0, 192], sizes = [8, 32], strides = [1, 1]} : vector<8x256xf32> to vector<8x32xf32>
    %159 = arith.mulf %157, %158 : vector<8x32xf32>
    %160 = arith.addf %156, %159 : vector<8x32xf32>
    %161 = vector.extract_strided_slice %147 {offsets = [0, 96], sizes = [8, 32], strides = [1, 1]} : vector<8x256xf32> to vector<8x32xf32>
    %162 = math.tanh %154 : vector<8x32xf32>
    %163 = arith.mulf %161, %162 : vector<8x32xf32>
    %164 = vector.extract_strided_slice %147 {offsets = [0, 224], sizes = [8, 32], strides = [1, 1]} : vector<8x256xf32> to vector<8x32xf32>
    %165 = math.tanh %160 : vector<8x32xf32>
    %166 = arith.mulf %164, %165 : vector<8x32xf32>
    %167 = tpu.concatenate %163, %166 in 1 : vector<8x32xf32>, vector<8x32xf32> -> vector<8x64xf32>
    %c40_40 = arith.constant 40 : index
    %c0_41 = arith.constant 0 : index
    %168 = vector.load %arg15[%c40_40, %c0_41] : memref<64x256xf32, #tpu.memory_space<vmem>>, vector<8x128xf32>
    %c16_42 = arith.constant 16 : index
    %c128_43 = arith.constant 128 : index
    %169 = vector.load %arg15[%c16_42, %c128_43] : memref<64x256xf32, #tpu.memory_space<vmem>>, vector<8x128xf32>
    %170 = tpu.concatenate %168, %169 in 1 : vector<8x128xf32>, vector<8x128xf32> -> vector<8x256xf32>
    %cst_44 = arith.constant dense<0.000000e+00> : vector<8x256xf32>
    %171 = tpu.matmul %167, %14, %cst_44 {dimension_numbers = #tpu.dot_dimension_numbers<[1], [0], [0], [1], [0, 0, 1, 1], [], []>, precision = #tpu.contract_precision<fp32>} : vector<8x64xf32>, vector<64x256xf32>, vector<8x256xf32> -> vector<8x256xf32>
    %172 = arith.addf %170, %171 : vector<8x256xf32>
    %173 = arith.negf %172 : vector<8x256xf32>
    %174 = math.exp %173 : vector<8x256xf32>
    %cst_45 = arith.constant 1.000000e+00 : f32
    %175 = vector.broadcast %cst_45 : f32 to vector<8x256xf32>
    %176 = arith.addf %175, %174 : vector<8x256xf32>
    %177 = arith.divf %175, %176 : vector<8x256xf32>
    %178 = math.tanh %172 : vector<8x256xf32>
    %179 = vector.extract_strided_slice %177 {offsets = [0, 32], sizes = [8, 32], strides = [1, 1]} : vector<8x256xf32> to vector<8x32xf32>
    %180 = arith.mulf %179, %154 : vector<8x32xf32>
    %181 = vector.extract_strided_slice %177 {offsets = [0, 0], sizes = [8, 32], strides = [1, 1]} : vector<8x256xf32> to vector<8x32xf32>
    %182 = vector.extract_strided_slice %178 {offsets = [0, 64], sizes = [8, 32], strides = [1, 1]} : vector<8x256xf32> to vector<8x32xf32>
    %183 = arith.mulf %181, %182 : vector<8x32xf32>
    %184 = arith.addf %180, %183 : vector<8x32xf32>
    %185 = vector.extract_strided_slice %177 {offsets = [0, 160], sizes = [8, 32], strides = [1, 1]} : vector<8x256xf32> to vector<8x32xf32>
    %186 = arith.mulf %185, %160 : vector<8x32xf32>
    %187 = vector.extract_strided_slice %177 {offsets = [0, 128], sizes = [8, 32], strides = [1, 1]} : vector<8x256xf32> to vector<8x32xf32>
    %188 = vector.extract_strided_slice %178 {offsets = [0, 192], sizes = [8, 32], strides = [1, 1]} : vector<8x256xf32> to vector<8x32xf32>
    %189 = arith.mulf %187, %188 : vector<8x32xf32>
    %190 = arith.addf %186, %189 : vector<8x32xf32>
    %191 = vector.extract_strided_slice %177 {offsets = [0, 96], sizes = [8, 32], strides = [1, 1]} : vector<8x256xf32> to vector<8x32xf32>
    %192 = math.tanh %184 : vector<8x32xf32>
    %193 = arith.mulf %191, %192 : vector<8x32xf32>
    %194 = vector.extract_strided_slice %177 {offsets = [0, 224], sizes = [8, 32], strides = [1, 1]} : vector<8x256xf32> to vector<8x32xf32>
    %195 = math.tanh %190 : vector<8x32xf32>
    %196 = arith.mulf %194, %195 : vector<8x32xf32>
    %197 = tpu.concatenate %193, %196 in 1 : vector<8x32xf32>, vector<8x32xf32> -> vector<8x64xf32>
    %c48_46 = arith.constant 48 : index
    %c0_47 = arith.constant 0 : index
    %198 = vector.load %arg15[%c48_46, %c0_47] : memref<64x256xf32, #tpu.memory_space<vmem>>, vector<8x128xf32>
    %c8_48 = arith.constant 8 : index
    %c128_49 = arith.constant 128 : index
    %199 = vector.load %arg15[%c8_48, %c128_49] : memref<64x256xf32, #tpu.memory_space<vmem>>, vector<8x128xf32>
    %200 = tpu.concatenate %198, %199 in 1 : vector<8x128xf32>, vector<8x128xf32> -> vector<8x256xf32>
    %cst_50 = arith.constant dense<0.000000e+00> : vector<8x256xf32>
    %201 = tpu.matmul %197, %14, %cst_50 {dimension_numbers = #tpu.dot_dimension_numbers<[1], [0], [0], [1], [0, 0, 1, 1], [], []>, precision = #tpu.contract_precision<fp32>} : vector<8x64xf32>, vector<64x256xf32>, vector<8x256xf32> -> vector<8x256xf32>
    %202 = arith.addf %200, %201 : vector<8x256xf32>
    %203 = arith.negf %202 : vector<8x256xf32>
    %204 = math.exp %203 : vector<8x256xf32>
    %cst_51 = arith.constant 1.000000e+00 : f32
    %205 = vector.broadcast %cst_51 : f32 to vector<8x256xf32>
    %206 = arith.addf %205, %204 : vector<8x256xf32>
    %207 = arith.divf %205, %206 : vector<8x256xf32>
    %208 = math.tanh %202 : vector<8x256xf32>
    %209 = vector.extract_strided_slice %207 {offsets = [0, 32], sizes = [8, 32], strides = [1, 1]} : vector<8x256xf32> to vector<8x32xf32>
    %210 = arith.mulf %209, %184 : vector<8x32xf32>
    %211 = vector.extract_strided_slice %207 {offsets = [0, 0], sizes = [8, 32], strides = [1, 1]} : vector<8x256xf32> to vector<8x32xf32>
    %212 = vector.extract_strided_slice %208 {offsets = [0, 64], sizes = [8, 32], strides = [1, 1]} : vector<8x256xf32> to vector<8x32xf32>
    %213 = arith.mulf %211, %212 : vector<8x32xf32>
    %214 = arith.addf %210, %213 : vector<8x32xf32>
    %215 = vector.extract_strided_slice %207 {offsets = [0, 160], sizes = [8, 32], strides = [1, 1]} : vector<8x256xf32> to vector<8x32xf32>
    %216 = arith.mulf %215, %190 : vector<8x32xf32>
    %217 = vector.extract_strided_slice %207 {offsets = [0, 128], sizes = [8, 32], strides = [1, 1]} : vector<8x256xf32> to vector<8x32xf32>
    %218 = vector.extract_strided_slice %208 {offsets = [0, 192], sizes = [8, 32], strides = [1, 1]} : vector<8x256xf32> to vector<8x32xf32>
    %219 = arith.mulf %217, %218 : vector<8x32xf32>
    %220 = arith.addf %216, %219 : vector<8x32xf32>
    %221 = vector.extract_strided_slice %207 {offsets = [0, 96], sizes = [8, 32], strides = [1, 1]} : vector<8x256xf32> to vector<8x32xf32>
    %222 = math.tanh %214 : vector<8x32xf32>
    %223 = arith.mulf %221, %222 : vector<8x32xf32>
    %224 = vector.extract_strided_slice %207 {offsets = [0, 224], sizes = [8, 32], strides = [1, 1]} : vector<8x256xf32> to vector<8x32xf32>
    %225 = math.tanh %220 : vector<8x32xf32>
    %226 = arith.mulf %224, %225 : vector<8x32xf32>
    %227 = tpu.concatenate %223, %226 in 1 : vector<8x32xf32>, vector<8x32xf32> -> vector<8x64xf32>
    %c56_52 = arith.constant 56 : index
    %c0_53 = arith.constant 0 : index
    %228 = vector.load %arg15[%c56_52, %c0_53] : memref<64x256xf32, #tpu.memory_space<vmem>>, vector<8x128xf32>
    %c0_54 = arith.constant 0 : index
    %c128_55 = arith.constant 128 : index
    %229 = vector.load %arg15[%c0_54, %c128_55] : memref<64x256xf32, #tpu.memory_space<vmem>>, vector<8x128xf32>
    %230 = tpu.concatenate %228, %229 in 1 : vector<8x128xf32>, vector<8x128xf32> -> vector<8x256xf32>
    %cst_56 = arith.constant dense<0.000000e+00> : vector<8x256xf32>
    %231 = tpu.matmul %227, %14, %cst_56 {dimension_numbers = #tpu.dot_dimension_numbers<[1], [0], [0], [1], [0, 0, 1, 1], [], []>, precision = #tpu.contract_precision<fp32>} : vector<8x64xf32>, vector<64x256xf32>, vector<8x256xf32> -> vector<8x256xf32>
    %232 = arith.addf %230, %231 : vector<8x256xf32>
    %233 = arith.negf %232 : vector<8x256xf32>
    %234 = math.exp %233 : vector<8x256xf32>
    %cst_57 = arith.constant 1.000000e+00 : f32
    %235 = vector.broadcast %cst_57 : f32 to vector<8x256xf32>
    %236 = arith.addf %235, %234 : vector<8x256xf32>
    %237 = arith.divf %235, %236 : vector<8x256xf32>
    %238 = math.tanh %232 : vector<8x256xf32>
    %239 = vector.extract_strided_slice %237 {offsets = [0, 32], sizes = [8, 32], strides = [1, 1]} : vector<8x256xf32> to vector<8x32xf32>
    %240 = arith.mulf %239, %214 : vector<8x32xf32>
    %241 = vector.extract_strided_slice %237 {offsets = [0, 0], sizes = [8, 32], strides = [1, 1]} : vector<8x256xf32> to vector<8x32xf32>
    %242 = vector.extract_strided_slice %238 {offsets = [0, 64], sizes = [8, 32], strides = [1, 1]} : vector<8x256xf32> to vector<8x32xf32>
    %243 = arith.mulf %241, %242 : vector<8x32xf32>
    %244 = arith.addf %240, %243 : vector<8x32xf32>
    %245 = vector.extract_strided_slice %237 {offsets = [0, 160], sizes = [8, 32], strides = [1, 1]} : vector<8x256xf32> to vector<8x32xf32>
    %246 = arith.mulf %245, %220 : vector<8x32xf32>
    %247 = vector.extract_strided_slice %237 {offsets = [0, 128], sizes = [8, 32], strides = [1, 1]} : vector<8x256xf32> to vector<8x32xf32>
    %248 = vector.extract_strided_slice %238 {offsets = [0, 192], sizes = [8, 32], strides = [1, 1]} : vector<8x256xf32> to vector<8x32xf32>
    %249 = arith.mulf %247, %248 : vector<8x32xf32>
    %250 = arith.addf %246, %249 : vector<8x32xf32>
    %251 = vector.extract_strided_slice %237 {offsets = [0, 96], sizes = [8, 32], strides = [1, 1]} : vector<8x256xf32> to vector<8x32xf32>
    %252 = math.tanh %244 : vector<8x32xf32>
    %253 = arith.mulf %251, %252 : vector<8x32xf32>
    %254 = vector.extract_strided_slice %237 {offsets = [0, 224], sizes = [8, 32], strides = [1, 1]} : vector<8x256xf32> to vector<8x32xf32>
    %255 = math.tanh %250 : vector<8x32xf32>
    %256 = arith.mulf %254, %255 : vector<8x32xf32>
    %257 = tpu.concatenate %43, %73, %103, %133, %163, %193, %223, %253 in 0 : vector<8x32xf32>, vector<8x32xf32>, vector<8x32xf32>, vector<8x32xf32>, vector<8x32xf32>, vector<8x32xf32>, vector<8x32xf32>, vector<8x32xf32> -> vector<64x32xf32>
    %258 = tpu.concatenate %256, %226, %196, %166, %136, %106, %76, %46 in 0 : vector<8x32xf32>, vector<8x32xf32>, vector<8x32xf32>, vector<8x32xf32>, vector<8x32xf32>, vector<8x32xf32>, vector<8x32xf32>, vector<8x32xf32> -> vector<64x32xf32>
    %259 = tpu.concatenate %257, %258 in 1 : vector<64x32xf32>, vector<64x32xf32> -> vector<64x64xf32>
    %c0_58 = arith.constant 0 : index
    %c0_59 = arith.constant 0 : index
    %260 = vector.load %arg6[%c0_58, %c0_59] : memref<64x256xf32, #tpu.memory_space<vmem>>, vector<64x256xf32>
    %cst_60 = arith.constant dense<0.000000e+00> : vector<64x256xf32>
    %261 = tpu.matmul %259, %260, %cst_60 {dimension_numbers = #tpu.dot_dimension_numbers<[1], [0], [0], [1], [0, 0, 1, 1], [], []>, precision = #tpu.contract_precision<fp32>} : vector<64x64xf32>, vector<64x256xf32>, vector<64x256xf32> -> vector<64x256xf32>
    %c0_61 = arith.constant 0 : index
    %c0_62 = arith.constant 0 : index
    %262 = vector.load %arg8[%c0_61, %c0_62] : memref<1x256xf32, #tpu.memory_space<vmem>>, vector<1x256xf32>
    %263 = vector.broadcast %262 : vector<1x256xf32> to vector<64x256xf32>
    %264 = arith.addf %261, %263 : vector<64x256xf32>
    %c0_63 = arith.constant 0 : index
    %c0_64 = arith.constant 0 : index
    %265 = vector.load %arg16[%c0_63, %c0_64] : memref<64x256xf32, #tpu.memory_space<vmem>>, vector<64x256xf32>
    tpu.vector_store %arg16[%c0_63, %c0_64], %264 {strides = array<i32>} : memref<64x256xf32, #tpu.memory_space<vmem>>, vector<64x256xf32>,
    %c0_65 = arith.constant 0 : index
    %c0_66 = arith.constant 0 : index
    %266 = vector.load %arg7[%c0_65, %c0_66] : memref<64x256xf32, #tpu.memory_space<vmem>>, vector<64x256xf32>
    %cst_67 = arith.constant 0.000000e+00 : f32
    %267 = vector.broadcast %cst_67 : f32 to vector<8x64xf32>
    %cst_68 = arith.constant 0.000000e+00 : f32
    %268 = vector.broadcast %cst_68 : f32 to vector<8x32xf32>
    %cst_69 = arith.constant 0.000000e+00 : f32
    %269 = vector.broadcast %cst_69 : f32 to vector<8x32xf32>
    %c0_70 = arith.constant 0 : index
    %c0_71 = arith.constant 0 : index
    %270 = vector.load %arg16[%c0_70, %c0_71] : memref<64x256xf32, #tpu.memory_space<vmem>>, vector<8x128xf32>
    %c56_72 = arith.constant 56 : index
    %c128_73 = arith.constant 128 : index
    %271 = vector.load %arg16[%c56_72, %c128_73] : memref<64x256xf32, #tpu.memory_space<vmem>>, vector<8x128xf32>
    %272 = tpu.concatenate %270, %271 in 1 : vector<8x128xf32>, vector<8x128xf32> -> vector<8x256xf32>
    %cst_74 = arith.constant dense<0.000000e+00> : vector<8x256xf32>
    %273 = tpu.matmul %267, %266, %cst_74 {dimension_numbers = #tpu.dot_dimension_numbers<[1], [0], [0], [1], [0, 0, 1, 1], [], []>, precision = #tpu.contract_precision<fp32>} : vector<8x64xf32>, vector<64x256xf32>, vector<8x256xf32> -> vector<8x256xf32>
    %274 = arith.addf %272, %273 : vector<8x256xf32>
    %275 = arith.negf %274 : vector<8x256xf32>
    %276 = math.exp %275 : vector<8x256xf32>
    %cst_75 = arith.constant 1.000000e+00 : f32
    %277 = vector.broadcast %cst_75 : f32 to vector<8x256xf32>
    %278 = arith.addf %277, %276 : vector<8x256xf32>
    %279 = arith.divf %277, %278 : vector<8x256xf32>
    %280 = math.tanh %274 : vector<8x256xf32>
    %281 = vector.extract_strided_slice %279 {offsets = [0, 32], sizes = [8, 32], strides = [1, 1]} : vector<8x256xf32> to vector<8x32xf32>
    %282 = arith.mulf %281, %268 : vector<8x32xf32>
    %283 = vector.extract_strided_slice %279 {offsets = [0, 0], sizes = [8, 32], strides = [1, 1]} : vector<8x256xf32> to vector<8x32xf32>
    %284 = vector.extract_strided_slice %280 {offsets = [0, 64], sizes = [8, 32], strides = [1, 1]} : vector<8x256xf32> to vector<8x32xf32>
    %285 = arith.mulf %283, %284 : vector<8x32xf32>
    %286 = arith.addf %282, %285 : vector<8x32xf32>
    %287 = vector.extract_strided_slice %279 {offsets = [0, 160], sizes = [8, 32], strides = [1, 1]} : vector<8x256xf32> to vector<8x32xf32>
    %288 = arith.mulf %287, %269 : vector<8x32xf32>
    %289 = vector.extract_strided_slice %279 {offsets = [0, 128], sizes = [8, 32], strides = [1, 1]} : vector<8x256xf32> to vector<8x32xf32>
    %290 = vector.extract_strided_slice %280 {offsets = [0, 192], sizes = [8, 32], strides = [1, 1]} : vector<8x256xf32> to vector<8x32xf32>
    %291 = arith.mulf %289, %290 : vector<8x32xf32>
    %292 = arith.addf %288, %291 : vector<8x32xf32>
    %293 = vector.extract_strided_slice %279 {offsets = [0, 96], sizes = [8, 32], strides = [1, 1]} : vector<8x256xf32> to vector<8x32xf32>
    %294 = math.tanh %286 : vector<8x32xf32>
    %295 = arith.mulf %293, %294 : vector<8x32xf32>
    %296 = vector.extract_strided_slice %279 {offsets = [0, 224], sizes = [8, 32], strides = [1, 1]} : vector<8x256xf32> to vector<8x32xf32>
    %297 = math.tanh %292 : vector<8x32xf32>
    %298 = arith.mulf %296, %297 : vector<8x32xf32>
    %299 = tpu.concatenate %295, %298 in 1 : vector<8x32xf32>, vector<8x32xf32> -> vector<8x64xf32>
    %c8_76 = arith.constant 8 : index
    %c0_77 = arith.constant 0 : index
    %300 = vector.load %arg16[%c8_76, %c0_77] : memref<64x256xf32, #tpu.memory_space<vmem>>, vector<8x128xf32>
    %c48_78 = arith.constant 48 : index
    %c128_79 = arith.constant 128 : index
    %301 = vector.load %arg16[%c48_78, %c128_79] : memref<64x256xf32, #tpu.memory_space<vmem>>, vector<8x128xf32>
    %302 = tpu.concatenate %300, %301 in 1 : vector<8x128xf32>, vector<8x128xf32> -> vector<8x256xf32>
    %cst_80 = arith.constant dense<0.000000e+00> : vector<8x256xf32>
    %303 = tpu.matmul %299, %266, %cst_80 {dimension_numbers = #tpu.dot_dimension_numbers<[1], [0], [0], [1], [0, 0, 1, 1], [], []>, precision = #tpu.contract_precision<fp32>} : vector<8x64xf32>, vector<64x256xf32>, vector<8x256xf32> -> vector<8x256xf32>
    %304 = arith.addf %302, %303 : vector<8x256xf32>
    %305 = arith.negf %304 : vector<8x256xf32>
    %306 = math.exp %305 : vector<8x256xf32>
    %cst_81 = arith.constant 1.000000e+00 : f32
    %307 = vector.broadcast %cst_81 : f32 to vector<8x256xf32>
    %308 = arith.addf %307, %306 : vector<8x256xf32>
    %309 = arith.divf %307, %308 : vector<8x256xf32>
    %310 = math.tanh %304 : vector<8x256xf32>
    %311 = vector.extract_strided_slice %309 {offsets = [0, 32], sizes = [8, 32], strides = [1, 1]} : vector<8x256xf32> to vector<8x32xf32>
    %312 = arith.mulf %311, %286 : vector<8x32xf32>
    %313 = vector.extract_strided_slice %309 {offsets = [0, 0], sizes = [8, 32], strides = [1, 1]} : vector<8x256xf32> to vector<8x32xf32>
    %314 = vector.extract_strided_slice %310 {offsets = [0, 64], sizes = [8, 32], strides = [1, 1]} : vector<8x256xf32> to vector<8x32xf32>
    %315 = arith.mulf %313, %314 : vector<8x32xf32>
    %316 = arith.addf %312, %315 : vector<8x32xf32>
    %317 = vector.extract_strided_slice %309 {offsets = [0, 160], sizes = [8, 32], strides = [1, 1]} : vector<8x256xf32> to vector<8x32xf32>
    %318 = arith.mulf %317, %292 : vector<8x32xf32>
    %319 = vector.extract_strided_slice %309 {offsets = [0, 128], sizes = [8, 32], strides = [1, 1]} : vector<8x256xf32> to vector<8x32xf32>
    %320 = vector.extract_strided_slice %310 {offsets = [0, 192], sizes = [8, 32], strides = [1, 1]} : vector<8x256xf32> to vector<8x32xf32>
    %321 = arith.mulf %319, %320 : vector<8x32xf32>
    %322 = arith.addf %318, %321 : vector<8x32xf32>
    %323 = vector.extract_strided_slice %309 {offsets = [0, 96], sizes = [8, 32], strides = [1, 1]} : vector<8x256xf32> to vector<8x32xf32>
    %324 = math.tanh %316 : vector<8x32xf32>
    %325 = arith.mulf %323, %324 : vector<8x32xf32>
    %326 = vector.extract_strided_slice %309 {offsets = [0, 224], sizes = [8, 32], strides = [1, 1]} : vector<8x256xf32> to vector<8x32xf32>
    %327 = math.tanh %322 : vector<8x32xf32>
    %328 = arith.mulf %326, %327 : vector<8x32xf32>
    %329 = tpu.concatenate %325, %328 in 1 : vector<8x32xf32>, vector<8x32xf32> -> vector<8x64xf32>
    %c16_82 = arith.constant 16 : index
    %c0_83 = arith.constant 0 : index
    %330 = vector.load %arg16[%c16_82, %c0_83] : memref<64x256xf32, #tpu.memory_space<vmem>>, vector<8x128xf32>
    %c40_84 = arith.constant 40 : index
    %c128_85 = arith.constant 128 : index
    %331 = vector.load %arg16[%c40_84, %c128_85] : memref<64x256xf32, #tpu.memory_space<vmem>>, vector<8x128xf32>
    %332 = tpu.concatenate %330, %331 in 1 : vector<8x128xf32>, vector<8x128xf32> -> vector<8x256xf32>
    %cst_86 = arith.constant dense<0.000000e+00> : vector<8x256xf32>
    %333 = tpu.matmul %329, %266, %cst_86 {dimension_numbers = #tpu.dot_dimension_numbers<[1], [0], [0], [1], [0, 0, 1, 1], [], []>, precision = #tpu.contract_precision<fp32>} : vector<8x64xf32>, vector<64x256xf32>, vector<8x256xf32> -> vector<8x256xf32>
    %334 = arith.addf %332, %333 : vector<8x256xf32>
    %335 = arith.negf %334 : vector<8x256xf32>
    %336 = math.exp %335 : vector<8x256xf32>
    %cst_87 = arith.constant 1.000000e+00 : f32
    %337 = vector.broadcast %cst_87 : f32 to vector<8x256xf32>
    %338 = arith.addf %337, %336 : vector<8x256xf32>
    %339 = arith.divf %337, %338 : vector<8x256xf32>
    %340 = math.tanh %334 : vector<8x256xf32>
    %341 = vector.extract_strided_slice %339 {offsets = [0, 32], sizes = [8, 32], strides = [1, 1]} : vector<8x256xf32> to vector<8x32xf32>
    %342 = arith.mulf %341, %316 : vector<8x32xf32>
    %343 = vector.extract_strided_slice %339 {offsets = [0, 0], sizes = [8, 32], strides = [1, 1]} : vector<8x256xf32> to vector<8x32xf32>
    %344 = vector.extract_strided_slice %340 {offsets = [0, 64], sizes = [8, 32], strides = [1, 1]} : vector<8x256xf32> to vector<8x32xf32>
    %345 = arith.mulf %343, %344 : vector<8x32xf32>
    %346 = arith.addf %342, %345 : vector<8x32xf32>
    %347 = vector.extract_strided_slice %339 {offsets = [0, 160], sizes = [8, 32], strides = [1, 1]} : vector<8x256xf32> to vector<8x32xf32>
    %348 = arith.mulf %347, %322 : vector<8x32xf32>
    %349 = vector.extract_strided_slice %339 {offsets = [0, 128], sizes = [8, 32], strides = [1, 1]} : vector<8x256xf32> to vector<8x32xf32>
    %350 = vector.extract_strided_slice %340 {offsets = [0, 192], sizes = [8, 32], strides = [1, 1]} : vector<8x256xf32> to vector<8x32xf32>
    %351 = arith.mulf %349, %350 : vector<8x32xf32>
    %352 = arith.addf %348, %351 : vector<8x32xf32>
    %353 = vector.extract_strided_slice %339 {offsets = [0, 96], sizes = [8, 32], strides = [1, 1]} : vector<8x256xf32> to vector<8x32xf32>
    %354 = math.tanh %346 : vector<8x32xf32>
    %355 = arith.mulf %353, %354 : vector<8x32xf32>
    %356 = vector.extract_strided_slice %339 {offsets = [0, 224], sizes = [8, 32], strides = [1, 1]} : vector<8x256xf32> to vector<8x32xf32>
    %357 = math.tanh %352 : vector<8x32xf32>
    %358 = arith.mulf %356, %357 : vector<8x32xf32>
    %359 = tpu.concatenate %355, %358 in 1 : vector<8x32xf32>, vector<8x32xf32> -> vector<8x64xf32>
    %c24_88 = arith.constant 24 : index
    %c0_89 = arith.constant 0 : index
    %360 = vector.load %arg16[%c24_88, %c0_89] : memref<64x256xf32, #tpu.memory_space<vmem>>, vector<8x128xf32>
    %c32_90 = arith.constant 32 : index
    %c128_91 = arith.constant 128 : index
    %361 = vector.load %arg16[%c32_90, %c128_91] : memref<64x256xf32, #tpu.memory_space<vmem>>, vector<8x128xf32>
    %362 = tpu.concatenate %360, %361 in 1 : vector<8x128xf32>, vector<8x128xf32> -> vector<8x256xf32>
    %cst_92 = arith.constant dense<0.000000e+00> : vector<8x256xf32>
    %363 = tpu.matmul %359, %266, %cst_92 {dimension_numbers = #tpu.dot_dimension_numbers<[1], [0], [0], [1], [0, 0, 1, 1], [], []>, precision = #tpu.contract_precision<fp32>} : vector<8x64xf32>, vector<64x256xf32>, vector<8x256xf32> -> vector<8x256xf32>
    %364 = arith.addf %362, %363 : vector<8x256xf32>
    %365 = arith.negf %364 : vector<8x256xf32>
    %366 = math.exp %365 : vector<8x256xf32>
    %cst_93 = arith.constant 1.000000e+00 : f32
    %367 = vector.broadcast %cst_93 : f32 to vector<8x256xf32>
    %368 = arith.addf %367, %366 : vector<8x256xf32>
    %369 = arith.divf %367, %368 : vector<8x256xf32>
    %370 = math.tanh %364 : vector<8x256xf32>
    %371 = vector.extract_strided_slice %369 {offsets = [0, 32], sizes = [8, 32], strides = [1, 1]} : vector<8x256xf32> to vector<8x32xf32>
    %372 = arith.mulf %371, %346 : vector<8x32xf32>
    %373 = vector.extract_strided_slice %369 {offsets = [0, 0], sizes = [8, 32], strides = [1, 1]} : vector<8x256xf32> to vector<8x32xf32>
    %374 = vector.extract_strided_slice %370 {offsets = [0, 64], sizes = [8, 32], strides = [1, 1]} : vector<8x256xf32> to vector<8x32xf32>
    %375 = arith.mulf %373, %374 : vector<8x32xf32>
    %376 = arith.addf %372, %375 : vector<8x32xf32>
    %377 = vector.extract_strided_slice %369 {offsets = [0, 160], sizes = [8, 32], strides = [1, 1]} : vector<8x256xf32> to vector<8x32xf32>
    %378 = arith.mulf %377, %352 : vector<8x32xf32>
    %379 = vector.extract_strided_slice %369 {offsets = [0, 128], sizes = [8, 32], strides = [1, 1]} : vector<8x256xf32> to vector<8x32xf32>
    %380 = vector.extract_strided_slice %370 {offsets = [0, 192], sizes = [8, 32], strides = [1, 1]} : vector<8x256xf32> to vector<8x32xf32>
    %381 = arith.mulf %379, %380 : vector<8x32xf32>
    %382 = arith.addf %378, %381 : vector<8x32xf32>
    %383 = vector.extract_strided_slice %369 {offsets = [0, 96], sizes = [8, 32], strides = [1, 1]} : vector<8x256xf32> to vector<8x32xf32>
    %384 = math.tanh %376 : vector<8x32xf32>
    %385 = arith.mulf %383, %384 : vector<8x32xf32>
    %386 = vector.extract_strided_slice %369 {offsets = [0, 224], sizes = [8, 32], strides = [1, 1]} : vector<8x256xf32> to vector<8x32xf32>
    %387 = math.tanh %382 : vector<8x32xf32>
    %388 = arith.mulf %386, %387 : vector<8x32xf32>
    %389 = tpu.concatenate %385, %388 in 1 : vector<8x32xf32>, vector<8x32xf32> -> vector<8x64xf32>
    %c32_94 = arith.constant 32 : index
    %c0_95 = arith.constant 0 : index
    %390 = vector.load %arg16[%c32_94, %c0_95] : memref<64x256xf32, #tpu.memory_space<vmem>>, vector<8x128xf32>
    %c24_96 = arith.constant 24 : index
    %c128_97 = arith.constant 128 : index
    %391 = vector.load %arg16[%c24_96, %c128_97] : memref<64x256xf32, #tpu.memory_space<vmem>>, vector<8x128xf32>
    %392 = tpu.concatenate %390, %391 in 1 : vector<8x128xf32>, vector<8x128xf32> -> vector<8x256xf32>
    %cst_98 = arith.constant dense<0.000000e+00> : vector<8x256xf32>
    %393 = tpu.matmul %389, %266, %cst_98 {dimension_numbers = #tpu.dot_dimension_numbers<[1], [0], [0], [1], [0, 0, 1, 1], [], []>, precision = #tpu.contract_precision<fp32>} : vector<8x64xf32>, vector<64x256xf32>, vector<8x256xf32> -> vector<8x256xf32>
    %394 = arith.addf %392, %393 : vector<8x256xf32>
    %395 = arith.negf %394 : vector<8x256xf32>
    %396 = math.exp %395 : vector<8x256xf32>
    %cst_99 = arith.constant 1.000000e+00 : f32
    %397 = vector.broadcast %cst_99 : f32 to vector<8x256xf32>
    %398 = arith.addf %397, %396 : vector<8x256xf32>
    %399 = arith.divf %397, %398 : vector<8x256xf32>
    %400 = math.tanh %394 : vector<8x256xf32>
    %401 = vector.extract_strided_slice %399 {offsets = [0, 32], sizes = [8, 32], strides = [1, 1]} : vector<8x256xf32> to vector<8x32xf32>
    %402 = arith.mulf %401, %376 : vector<8x32xf32>
    %403 = vector.extract_strided_slice %399 {offsets = [0, 0], sizes = [8, 32], strides = [1, 1]} : vector<8x256xf32> to vector<8x32xf32>
    %404 = vector.extract_strided_slice %400 {offsets = [0, 64], sizes = [8, 32], strides = [1, 1]} : vector<8x256xf32> to vector<8x32xf32>
    %405 = arith.mulf %403, %404 : vector<8x32xf32>
    %406 = arith.addf %402, %405 : vector<8x32xf32>
    %407 = vector.extract_strided_slice %399 {offsets = [0, 160], sizes = [8, 32], strides = [1, 1]} : vector<8x256xf32> to vector<8x32xf32>
    %408 = arith.mulf %407, %382 : vector<8x32xf32>
    %409 = vector.extract_strided_slice %399 {offsets = [0, 128], sizes = [8, 32], strides = [1, 1]} : vector<8x256xf32> to vector<8x32xf32>
    %410 = vector.extract_strided_slice %400 {offsets = [0, 192], sizes = [8, 32], strides = [1, 1]} : vector<8x256xf32> to vector<8x32xf32>
    %411 = arith.mulf %409, %410 : vector<8x32xf32>
    %412 = arith.addf %408, %411 : vector<8x32xf32>
    %413 = vector.extract_strided_slice %399 {offsets = [0, 96], sizes = [8, 32], strides = [1, 1]} : vector<8x256xf32> to vector<8x32xf32>
    %414 = math.tanh %406 : vector<8x32xf32>
    %415 = arith.mulf %413, %414 : vector<8x32xf32>
    %416 = vector.extract_strided_slice %399 {offsets = [0, 224], sizes = [8, 32], strides = [1, 1]} : vector<8x256xf32> to vector<8x32xf32>
    %417 = math.tanh %412 : vector<8x32xf32>
    %418 = arith.mulf %416, %417 : vector<8x32xf32>
    %419 = tpu.concatenate %415, %418 in 1 : vector<8x32xf32>, vector<8x32xf32> -> vector<8x64xf32>
    %c40_100 = arith.constant 40 : index
    %c0_101 = arith.constant 0 : index
    %420 = vector.load %arg16[%c40_100, %c0_101] : memref<64x256xf32, #tpu.memory_space<vmem>>, vector<8x128xf32>
    %c16_102 = arith.constant 16 : index
    %c128_103 = arith.constant 128 : index
    %421 = vector.load %arg16[%c16_102, %c128_103] : memref<64x256xf32, #tpu.memory_space<vmem>>, vector<8x128xf32>
    %422 = tpu.concatenate %420, %421 in 1 : vector<8x128xf32>, vector<8x128xf32> -> vector<8x256xf32>
    %cst_104 = arith.constant dense<0.000000e+00> : vector<8x256xf32>
    %423 = tpu.matmul %419, %266, %cst_104 {dimension_numbers = #tpu.dot_dimension_numbers<[1], [0], [0], [1], [0, 0, 1, 1], [], []>, precision = #tpu.contract_precision<fp32>} : vector<8x64xf32>, vector<64x256xf32>, vector<8x256xf32> -> vector<8x256xf32>
    %424 = arith.addf %422, %423 : vector<8x256xf32>
    %425 = arith.negf %424 : vector<8x256xf32>
    %426 = math.exp %425 : vector<8x256xf32>
    %cst_105 = arith.constant 1.000000e+00 : f32
    %427 = vector.broadcast %cst_105 : f32 to vector<8x256xf32>
    %428 = arith.addf %427, %426 : vector<8x256xf32>
    %429 = arith.divf %427, %428 : vector<8x256xf32>
    %430 = math.tanh %424 : vector<8x256xf32>
    %431 = vector.extract_strided_slice %429 {offsets = [0, 32], sizes = [8, 32], strides = [1, 1]} : vector<8x256xf32> to vector<8x32xf32>
    %432 = arith.mulf %431, %406 : vector<8x32xf32>
    %433 = vector.extract_strided_slice %429 {offsets = [0, 0], sizes = [8, 32], strides = [1, 1]} : vector<8x256xf32> to vector<8x32xf32>
    %434 = vector.extract_strided_slice %430 {offsets = [0, 64], sizes = [8, 32], strides = [1, 1]} : vector<8x256xf32> to vector<8x32xf32>
    %435 = arith.mulf %433, %434 : vector<8x32xf32>
    %436 = arith.addf %432, %435 : vector<8x32xf32>
    %437 = vector.extract_strided_slice %429 {offsets = [0, 160], sizes = [8, 32], strides = [1, 1]} : vector<8x256xf32> to vector<8x32xf32>
    %438 = arith.mulf %437, %412 : vector<8x32xf32>
    %439 = vector.extract_strided_slice %429 {offsets = [0, 128], sizes = [8, 32], strides = [1, 1]} : vector<8x256xf32> to vector<8x32xf32>
    %440 = vector.extract_strided_slice %430 {offsets = [0, 192], sizes = [8, 32], strides = [1, 1]} : vector<8x256xf32> to vector<8x32xf32>
    %441 = arith.mulf %439, %440 : vector<8x32xf32>
    %442 = arith.addf %438, %441 : vector<8x32xf32>
    %443 = vector.extract_strided_slice %429 {offsets = [0, 96], sizes = [8, 32], strides = [1, 1]} : vector<8x256xf32> to vector<8x32xf32>
    %444 = math.tanh %436 : vector<8x32xf32>
    %445 = arith.mulf %443, %444 : vector<8x32xf32>
    %446 = vector.extract_strided_slice %429 {offsets = [0, 224], sizes = [8, 32], strides = [1, 1]} : vector<8x256xf32> to vector<8x32xf32>
    %447 = math.tanh %442 : vector<8x32xf32>
    %448 = arith.mulf %446, %447 : vector<8x32xf32>
    %449 = tpu.concatenate %445, %448 in 1 : vector<8x32xf32>, vector<8x32xf32> -> vector<8x64xf32>
    %c48_106 = arith.constant 48 : index
    %c0_107 = arith.constant 0 : index
    %450 = vector.load %arg16[%c48_106, %c0_107] : memref<64x256xf32, #tpu.memory_space<vmem>>, vector<8x128xf32>
    %c8_108 = arith.constant 8 : index
    %c128_109 = arith.constant 128 : index
    %451 = vector.load %arg16[%c8_108, %c128_109] : memref<64x256xf32, #tpu.memory_space<vmem>>, vector<8x128xf32>
    %452 = tpu.concatenate %450, %451 in 1 : vector<8x128xf32>, vector<8x128xf32> -> vector<8x256xf32>
    %cst_110 = arith.constant dense<0.000000e+00> : vector<8x256xf32>
    %453 = tpu.matmul %449, %266, %cst_110 {dimension_numbers = #tpu.dot_dimension_numbers<[1], [0], [0], [1], [0, 0, 1, 1], [], []>, precision = #tpu.contract_precision<fp32>} : vector<8x64xf32>, vector<64x256xf32>, vector<8x256xf32> -> vector<8x256xf32>
    %454 = arith.addf %452, %453 : vector<8x256xf32>
    %455 = arith.negf %454 : vector<8x256xf32>
    %456 = math.exp %455 : vector<8x256xf32>
    %cst_111 = arith.constant 1.000000e+00 : f32
    %457 = vector.broadcast %cst_111 : f32 to vector<8x256xf32>
    %458 = arith.addf %457, %456 : vector<8x256xf32>
    %459 = arith.divf %457, %458 : vector<8x256xf32>
    %460 = math.tanh %454 : vector<8x256xf32>
    %461 = vector.extract_strided_slice %459 {offsets = [0, 32], sizes = [8, 32], strides = [1, 1]} : vector<8x256xf32> to vector<8x32xf32>
    %462 = arith.mulf %461, %436 : vector<8x32xf32>
    %463 = vector.extract_strided_slice %459 {offsets = [0, 0], sizes = [8, 32], strides = [1, 1]} : vector<8x256xf32> to vector<8x32xf32>
    %464 = vector.extract_strided_slice %460 {offsets = [0, 64], sizes = [8, 32], strides = [1, 1]} : vector<8x256xf32> to vector<8x32xf32>
    %465 = arith.mulf %463, %464 : vector<8x32xf32>
    %466 = arith.addf %462, %465 : vector<8x32xf32>
    %467 = vector.extract_strided_slice %459 {offsets = [0, 160], sizes = [8, 32], strides = [1, 1]} : vector<8x256xf32> to vector<8x32xf32>
    %468 = arith.mulf %467, %442 : vector<8x32xf32>
    %469 = vector.extract_strided_slice %459 {offsets = [0, 128], sizes = [8, 32], strides = [1, 1]} : vector<8x256xf32> to vector<8x32xf32>
    %470 = vector.extract_strided_slice %460 {offsets = [0, 192], sizes = [8, 32], strides = [1, 1]} : vector<8x256xf32> to vector<8x32xf32>
    %471 = arith.mulf %469, %470 : vector<8x32xf32>
    %472 = arith.addf %468, %471 : vector<8x32xf32>
    %473 = vector.extract_strided_slice %459 {offsets = [0, 96], sizes = [8, 32], strides = [1, 1]} : vector<8x256xf32> to vector<8x32xf32>
    %474 = math.tanh %466 : vector<8x32xf32>
    %475 = arith.mulf %473, %474 : vector<8x32xf32>
    %476 = vector.extract_strided_slice %459 {offsets = [0, 224], sizes = [8, 32], strides = [1, 1]} : vector<8x256xf32> to vector<8x32xf32>
    %477 = math.tanh %472 : vector<8x32xf32>
    %478 = arith.mulf %476, %477 : vector<8x32xf32>
    %479 = tpu.concatenate %475, %478 in 1 : vector<8x32xf32>, vector<8x32xf32> -> vector<8x64xf32>
    %c56_112 = arith.constant 56 : index
    %c0_113 = arith.constant 0 : index
    %480 = vector.load %arg16[%c56_112, %c0_113] : memref<64x256xf32, #tpu.memory_space<vmem>>, vector<8x128xf32>
    %c0_114 = arith.constant 0 : index
    %c128_115 = arith.constant 128 : index
    %481 = vector.load %arg16[%c0_114, %c128_115] : memref<64x256xf32, #tpu.memory_space<vmem>>, vector<8x128xf32>
    %482 = tpu.concatenate %480, %481 in 1 : vector<8x128xf32>, vector<8x128xf32> -> vector<8x256xf32>
    %cst_116 = arith.constant dense<0.000000e+00> : vector<8x256xf32>
    %483 = tpu.matmul %479, %266, %cst_116 {dimension_numbers = #tpu.dot_dimension_numbers<[1], [0], [0], [1], [0, 0, 1, 1], [], []>, precision = #tpu.contract_precision<fp32>} : vector<8x64xf32>, vector<64x256xf32>, vector<8x256xf32> -> vector<8x256xf32>
    %484 = arith.addf %482, %483 : vector<8x256xf32>
    %485 = arith.negf %484 : vector<8x256xf32>
    %486 = math.exp %485 : vector<8x256xf32>
    %cst_117 = arith.constant 1.000000e+00 : f32
    %487 = vector.broadcast %cst_117 : f32 to vector<8x256xf32>
    %488 = arith.addf %487, %486 : vector<8x256xf32>
    %489 = arith.divf %487, %488 : vector<8x256xf32>
    %490 = math.tanh %484 : vector<8x256xf32>
    %491 = vector.extract_strided_slice %489 {offsets = [0, 32], sizes = [8, 32], strides = [1, 1]} : vector<8x256xf32> to vector<8x32xf32>
    %492 = arith.mulf %491, %466 : vector<8x32xf32>
    %493 = vector.extract_strided_slice %489 {offsets = [0, 0], sizes = [8, 32], strides = [1, 1]} : vector<8x256xf32> to vector<8x32xf32>
    %494 = vector.extract_strided_slice %490 {offsets = [0, 64], sizes = [8, 32], strides = [1, 1]} : vector<8x256xf32> to vector<8x32xf32>
    %495 = arith.mulf %493, %494 : vector<8x32xf32>
    %496 = arith.addf %492, %495 : vector<8x32xf32>
    %497 = vector.extract_strided_slice %489 {offsets = [0, 160], sizes = [8, 32], strides = [1, 1]} : vector<8x256xf32> to vector<8x32xf32>
    %498 = arith.mulf %497, %472 : vector<8x32xf32>
    %499 = vector.extract_strided_slice %489 {offsets = [0, 128], sizes = [8, 32], strides = [1, 1]} : vector<8x256xf32> to vector<8x32xf32>
    %500 = vector.extract_strided_slice %490 {offsets = [0, 192], sizes = [8, 32], strides = [1, 1]} : vector<8x256xf32> to vector<8x32xf32>
    %501 = arith.mulf %499, %500 : vector<8x32xf32>
    %502 = arith.addf %498, %501 : vector<8x32xf32>
    %503 = vector.extract_strided_slice %489 {offsets = [0, 96], sizes = [8, 32], strides = [1, 1]} : vector<8x256xf32> to vector<8x32xf32>
    %504 = math.tanh %496 : vector<8x32xf32>
    %505 = arith.mulf %503, %504 : vector<8x32xf32>
    %506 = vector.extract_strided_slice %489 {offsets = [0, 224], sizes = [8, 32], strides = [1, 1]} : vector<8x256xf32> to vector<8x32xf32>
    %507 = math.tanh %502 : vector<8x32xf32>
    %508 = arith.mulf %506, %507 : vector<8x32xf32>
    %509 = tpu.concatenate %295, %325, %355, %385, %415, %445, %475, %505 in 0 : vector<8x32xf32>, vector<8x32xf32>, vector<8x32xf32>, vector<8x32xf32>, vector<8x32xf32>, vector<8x32xf32>, vector<8x32xf32>, vector<8x32xf32> -> vector<64x32xf32>
    %510 = tpu.concatenate %508, %478, %448, %418, %388, %358, %328, %298 in 0 : vector<8x32xf32>, vector<8x32xf32>, vector<8x32xf32>, vector<8x32xf32>, vector<8x32xf32>, vector<8x32xf32>, vector<8x32xf32>, vector<8x32xf32> -> vector<64x32xf32>
    %511 = tpu.concatenate %509, %510 in 1 : vector<64x32xf32>, vector<64x32xf32> -> vector<64x64xf32>
    %c0_118 = arith.constant 0 : index
    %c0_119 = arith.constant 0 : index
    %512 = vector.load %arg9[%c0_118, %c0_119] : memref<64x256xf32, #tpu.memory_space<vmem>>, vector<64x256xf32>
    %cst_120 = arith.constant dense<0.000000e+00> : vector<64x256xf32>
    %513 = tpu.matmul %511, %512, %cst_120 {dimension_numbers = #tpu.dot_dimension_numbers<[1], [0], [0], [1], [0, 0, 1, 1], [], []>, precision = #tpu.contract_precision<fp32>} : vector<64x64xf32>, vector<64x256xf32>, vector<64x256xf32> -> vector<64x256xf32>
    %c0_121 = arith.constant 0 : index
    %c0_122 = arith.constant 0 : index
    %514 = vector.load %arg10[%c0_121, %c0_122] : memref<1x256xf32, #tpu.memory_space<vmem>>, vector<1x256xf32>
    %515 = vector.broadcast %514 : vector<1x256xf32> to vector<64x256xf32>
    %516 = arith.addf %513, %515 : vector<64x256xf32>
    %517 = vector.extract_strided_slice %516 {offsets = [0, 0], sizes = [64, 128], strides = [1, 1]} : vector<64x256xf32> to vector<64x128xf32>
    %c0_123 = arith.constant 0 : index
    %c0_124 = arith.constant 0 : index
    %518 = vector.load %arg11[%c0_123, %c0_124] : memref<64x128xf32, #tpu.memory_space<vmem>>, vector<64x128xf32>
    tpu.vector_store %arg11[%c0_123, %c0_124], %517 {strides = array<i32>} : memref<64x128xf32, #tpu.memory_space<vmem>>, vector<64x128xf32>,
    %519 = vector.extract_strided_slice %516 {offsets = [0, 128], sizes = [64, 128], strides = [1, 1]} : vector<64x256xf32> to vector<64x128xf32>
    %cst_125 = arith.constant 0.000000e+00 : f32
    %520 = vector.broadcast %cst_125 : f32 to vector<64x128xf32>
    %521 = arith.maximumf %519, %520 : vector<64x128xf32>
    %522 = math.absf %519 : vector<64x128xf32>
    %cst_126 = arith.constant 0.000000e+00 : f32
    %523 = vector.broadcast %cst_126 : f32 to vector<64x128xf32>
    %524 = arith.subf %523, %522 : vector<64x128xf32>
    %525 = math.exp %524 : vector<64x128xf32>
    %526 = math.log1p %525 : vector<64x128xf32>
    %527 = arith.addf %521, %526 : vector<64x128xf32>
    %c0_127 = arith.constant 0 : index
    %c0_128 = arith.constant 0 : index
    %528 = vector.load %arg12[%c0_127, %c0_128] : memref<64x128xf32, #tpu.memory_space<vmem>>, vector<64x128xf32>
    tpu.vector_store %arg12[%c0_127, %c0_128], %527 {strides = array<i32>} : memref<64x128xf32, #tpu.memory_space<vmem>>, vector<64x128xf32>,
    %529 = tpu.concatenate %253, %256, %505, %508 in 0 : vector<8x32xf32>, vector<8x32xf32>, vector<8x32xf32>, vector<8x32xf32> -> vector<32x32xf32>
    %530 = tpu.concatenate %244, %250, %496, %502 in 0 : vector<8x32xf32>, vector<8x32xf32>, vector<8x32xf32>, vector<8x32xf32> -> vector<32x32xf32>
    %cst_129 = arith.constant 0.000000e+00 : f32
    %531 = vector.broadcast %cst_129 : f32 to vector<32x96xf32>
    %532 = tpu.concatenate %529, %531 in 1 : vector<32x32xf32>, vector<32x96xf32> -> vector<32x128xf32>
    %533 = tpu.concatenate %530, %531 in 1 : vector<32x32xf32>, vector<32x96xf32> -> vector<32x128xf32>
    %c0_130 = arith.constant 0 : index
    %c0_131 = arith.constant 0 : index
    %534 = vector.load %arg13[%c0_130, %c0_131] : memref<32x128xf32, #tpu.memory_space<vmem>>, vector<32x128xf32>
    tpu.vector_store %arg13[%c0_130, %c0_131], %532 {strides = array<i32>} : memref<32x128xf32, #tpu.memory_space<vmem>>, vector<32x128xf32>,
    %c0_132 = arith.constant 0 : index
    %c0_133 = arith.constant 0 : index
    %535 = vector.load %arg14[%c0_132, %c0_133] : memref<32x128xf32, #tpu.memory_space<vmem>>, vector<32x128xf32>
    tpu.vector_store %arg14[%c0_132, %c0_133], %533 {strides = array<i32>} : memref<32x128xf32, #tpu.memory_space<vmem>>, vector<32x128xf32>,
    return
  }
}

</mosaic_0001>

<bundles_post_ra>
// kernel: birnn_forward.1
= control target key start
LH: loop header
LB: loop body
LE: loop exit
PB: predicated region body
PF: predicated region fallthrough
CT: control target
= control target key end

     0   :  { %vm3008_vm0 = vcmask 261120   ;;  %vm2299_vm1 = vcmask 523264   ;;  %s23981_s1 = inlined_call_operand.vmem [shape: f32[128,128], index: 1, kind: input, shape index: {}]   ;;  %s23982_s0 = inlined_call_operand.vmem [shape: f32[64,128], index: 0, kind: input, shape index: {}]   ;;  %s23983_s3 = inlined_call_operand.vmem [shape: f32[128,256], index: 3, kind: input, shape index: {}]   ;;  %s23984_s4 = inlined_call_operand.vmem [shape: f32[64,256], index: 4, kind: input, shape index: {}]   ;;  %s23985_s2 = inlined_call_operand.vmem [shape: f32[1,128], index: 2, kind: input, shape index: {}]   ;;  %s23986_s5 = inlined_call_operand.vmem [shape: f32[1,256], index: 5, kind: input, shape index: {}]   ;;  %s23987_s6 = inlined_call_operand.vmem [shape: f32[64,256], index: 6, kind: input, shape index: {}]   ;;  %s23988_s7 = inlined_call_operand.vmem [shape: f32[64,256], index: 7, kind: input, shape index: {}]   ;;  %s23989_s13 = inlined_call_operand.vmem [shape: f32[32,128], index: 13, kind: output, shape index: {2}]   ;;  %s23990_s8 = inlined_call_operand.vmem [shape: f32[1,256], index: 8, kind: input, shape index: {}]   ;;  %s23991_s9 = inlined_call_operand.vmem [shape: f32[64,256], index: 9, kind: input, shape index: {}]   ;;  %s23992_s14 = inlined_call_operand.vmem [shape: f32[32,128], index: 14, kind: output, shape index: {3}]   ;;  %s23993_s10 = inlined_call_operand.vmem [shape: f32[1,256], index: 10, kind: input, shape index: {}]   ;;  %s23994_s11 = inlined_call_operand.vmem [shape: f32[64,128], index: 11, kind: output, shape index: {0}]   ;;  %s23995_s12 = inlined_call_operand.vmem [shape: f32[64,128], index: 12, kind: output, shape index: {1}]  }
   0x1   :  { %v50_v0 = vld [vmem:[%s23981_s1] sm:$0xff]  ;;  %v51_v1 = vld [vmem:[%s23981_s1 + $0x8] sm:$0xff]  ;;  %v52_v2 = vld [vmem:[%s23981_s1 + $0x10] sm:$0xff] }
   0x2   :  { %v74_v3 = vand.u32 4294901760, %v50_v0  ;;  %v77_v4 = vand.u32 4294901760, %v51_v1  ;;  %v53_v5 = vld [vmem:[%s23981_s1 + $0x18] sm:$0xff]  ;;  %v80_v6 = vand.u32 4294901760, %v52_v2  ;;  %v54_v7 = vld [vmem:[%s23981_s1 + $0x20] sm:$0xff]  ;;  %v19430_v8 = vld [vmem:[%s23981_s1 + $0x28] sm:$0xff] }
   0x3   :  { %v83_v9 = vand.u32 4294901760, %v53_v5  ;;  %v86_v11 = vand.u32 4294901760, %v54_v7  ;;  %v89_v12 = vand.u32 4294901760, %v19430_v8  ;;  %v19440_v14 = vld [vmem:[%s23981_s1 + $0x30] sm:$0xff]  ;;  %v19445_v15 = vld [vmem:[%s23981_s1 + $0x38] sm:$0xff]  ;;  %v42_v16 = vld [vmem:[%s23982_s0] sm:$0xff] }
   0x4   :  { %v19432_v10 = vpack.c.bf16 %v77_v4, %v74_v3  ;;  %v19454_v17 = vand.u32 4294901760, %v42_v16  ;;  %v43_v18 = vld [vmem:[%s23982_s0 + $0x8] sm:$0xff]  ;;  %v92_v20 = vand.u32 4294901760, %v19440_v14  ;;  %v95_v21 = vand.u32 4294901760, %v19445_v15  ;;  %v58_v22 = vld [vmem:[%s23981_s1 + $0x40] sm:$0xff]  ;;  %v19479_v25 = vld [vmem:[%s23981_s1 + $0x50] sm:$0xff] }
   0x5   :  { %v19435_v13 = vpack.c.bf16 %v83_v9, %v80_v6  ;;  %v19463_v19 = vpack.c.bf16 %v89_v12, %v86_v11  ;;  %v59_v23 = vld [vmem:[%s23981_s1 + $0x48] sm:$0xff]  ;;  %v19484_v26 = vld [vmem:[%s23981_s1 + $0x58] sm:$0xff]  ;;  %v19486_v27 = vsub.f32 %v50_v0, %v74_v3  ;;  %v19488_v28 = vsub.f32 %v51_v1, %v77_v4  ;;  %v19502_v34 = vld [vmem:[%s23981_s1 + $0x60] sm:$0xff] }
   0x6   :  { %16434 = vmatprep.subr.bf16.mxu1 %v19432_v10  ;;  %16530 = vmatprep.subr.bf16.mxu0 %v19432_v10  ;;  %v19474_v24 = vsub.f32 %v42_v16, %v19454_v17  ;;  %v19490_v29 = vand.u32 4294901760, %v43_v18  ;;  %v19497_v31 = vpack.c.bf16 %v95_v21, %v92_v20  ;;  %v98_v32 = vand.u32 4294901760, %v58_v22  ;;  %v19507_v35 = vld [vmem:[%s23981_s1 + $0x68] sm:$0xff]  ;;  %v19517_v40 = vld [vmem:[%s23981_s1 + $0x70] sm:$0xff]  ;;  %v19522_v41 = vld [vmem:[%s23981_s1 + $0x78] sm:$0xff]  ;;  %s19335_s1 = smov 32  }
   0x7   :  { %16436 = vmatpush3.bf16.msra.mxu1 %v19432_v10  ;;  %16532 = vmatpush3.bf16.msra.mxu0 %v19432_v10  ;;  %v101_v33 = vand.u32 4294901760, %v59_v23  ;;  %v19509_v36 = vsub.f32 %v52_v2, %v80_v6  ;;  %v104_v37 = vand.u32 4294901760, %v19479_v25  ;;  %v107_v38 = vand.u32 4294901760, %v19484_v26  ;;  %v44_v59 = vld [vmem:[%s23982_s0 + $0x10] sm:$0xff] }
   0x8   :  { %16438 = vmatprep.subr.bf16.mxu1 %v19435_v13  ;;  %16534 = vmatprep.subr.bf16.mxu0 %v19435_v13  ;;  %24335 = vst [vmem:[#allocation4_spill] sm:$0xff] %v19474_v24  ;;  %v156_v30 = vand.u32 4294901760, %v19474_v24  ;;  %v237_v42 = vand.u32 4294901760, %v19486_v27  ;;  %v244_v43 = vand.u32 4294901760, %v19488_v28  ;;  %v19527_v44 = vsub.f32 %v43_v18, %v19490_v29 }
   0x9   :  { %v19529_v45 = vsub.f32 %v53_v5, %v83_v9  ;;  %v110_v46 = vand.u32 4294901760, %v19502_v34  ;;  %v23999_v47 = vand.u32 4294901760, %v19507_v35  ;;  %v19535_v49 = vsub.f32 %v54_v7, %v86_v11  ;;  %v45_v7 = vld [vmem:[%s23982_s0 + $0x18] sm:$0xff] }
   0xa   :  { %v157_v39 = vsub.f32 %v19474_v24, %v156_v30  ;;  %16333 = vmatprep.mubr.f32.mxu0 %v156_v30  ;;  %24336 = vst [vmem:[#allocation5_spill] sm:$0xff] %v19527_v44  ;;  %v19539_v50 = vpack.c.bf16 %v101_v33, %v98_v32  ;;  %v251_v51 = vand.u32 4294901760, %v19509_v36  ;;  %v19546_v52 = vpack.c.bf16 %v107_v38, %v104_v37 }
   0xb   :  { %16440 = vmatpush3.bf16.msra.mxu1 %v19435_v13  ;;  %16536 = vmatpush3.bf16.msra.mxu0 %v19435_v13  ;;  %v23997_v53 = vand.u32 4294901760, %v19517_v40  ;;  %v23996_v54 = vand.u32 4294901760, %v19522_v41  ;;  %v238_v55 = vsub.f32 %v19486_v27, %v237_v42  ;;  %v245_v56 = vsub.f32 %v19488_v28, %v244_v43 }
   0xc   :  { %16442 = vmatprep.subr.bf16.mxu1 %v19463_v19  ;;  %16538 = vmatprep.subr.bf16.mxu0 %v19463_v19  ;;  %v158_v48 = vand.u32 4294901760, %v157_v39  ;;  %24337 = vst [vmem:[#allocation6_spill] sm:$0xff] %v19539_v50  ;;  %24338 = vst [vmem:[#allocation7_spill] sm:$0xff] %v19546_v52  ;;  %v23998_v57 = vand.u32 4294901760, %v19527_v44  ;;  %v258_v58 = vand.u32 4294901760, %v19529_v45  ;;  %v19563_v60 = vpack.c.bf16 %v23999_v47, %v110_v46 }
   0xd   :  { %v265_v61 = vand.u32 4294901760, %v19535_v49  ;;  %v19569_v62 = vsub.f32 %v19430_v8, %v89_v12  ;;  %v19572_v63 = vsub.f32 %v19440_v14, %v92_v20  ;;  %v252_v0 = vsub.f32 %v19509_v36, %v251_v51  ;;  %v46_v14 = vld [vmem:[%s23982_s0 + $0x20] sm:$0xff] }
   0xe   :  { %16201 = vmatprep.mubr.f32.mxu1 %v158_v48  ;;  %24339 = vst [vmem:[#allocation8_spill] sm:$0xff] %v19563_v60  ;;  %v19578_v1 = vsub.f32 %v19445_v15, %v95_v21  ;;  %v19580_v2 = vsub.f32 %v58_v22, %v98_v32  ;;  %v19586_v3 = vpack.c.bf16 %v23996_v54, %v23997_v53  ;;  %v19592_v6 = vand.u32 4294901760, %v44_v59 }
   0xf   :  { %16444 = vmatpush3.bf16.msra.mxu1 %v19463_v19  ;;  %16540 = vmatpush3.bf16.msra.mxu0 %v19463_v19  ;;  %v19588_v4 = vpack.c.bf16 %v244_v43, %v237_v42  ;;  %v19590_v5 = vsub.f32 %v59_v23, %v101_v33  ;;  %v239_v8 = vand.u32 4294901760, %v238_v55  ;;  %v246_v9 = vand.u32 4294901760, %v245_v56  ;;  %v47_v43 = vld [vmem:[%s23982_s0 + $0x28] sm:$0xff] }
  0x10   :  { %16446 = vmatprep.subr.bf16.mxu1 %v19497_v31  ;;  %16542 = vmatprep.subr.bf16.mxu0 %v19497_v31  ;;  %24340 = vst [vmem:[#allocation9_spill] sm:$0xff] %v19586_v3  ;;  %v19600_v11 = vsub.f32 %v19527_v44, %v23998_v57  ;;  %v259_v12 = vsub.f32 %v19529_v45, %v258_v58  ;;  %v272_v18 = vand.u32 4294901760, %v19569_v62  ;;  %v279_v20 = vand.u32 4294901760, %v19572_v63 }
  0x11   :  { %v19608_v15 = vpack.c.bf16 %v258_v58, %v251_v51  ;;  %v19613_v16 = vsub.f32 %v19535_v49, %v265_v61  ;;  %v253_v21 = vand.u32 4294901760, %v252_v0  ;;  %v286_v22 = vand.u32 4294901760, %v19578_v1 }
  0x12   :  { %v293_v23 = vand.u32 4294901760, %v19580_v2  ;;  %v19621_v30 = vand.u32 4294901760, %v45_v7  ;;  %v300_v32 = vand.u32 4294901760, %v19590_v5  ;;  %v19625_v33 = vsub.f32 %v44_v59, %v19592_v6 }
  0x13   :  { %16448 = vmatpush3.bf16.msra.mxu1 %v19497_v31  ;;  %16544 = vmatpush3.bf16.msra.mxu0 %v19497_v31  ;;  %v19630_v39 = vsub.f32 %v19479_v25, %v104_v37  ;;  %v19632_v42 = vand.u32 4294901760, %v46_v14  ;;  %v19637_v48 = vpack.c.bf16 %v246_v9, %v239_v8  ;;  %v260_v55 = vand.u32 4294901760, %v259_v12  ;;  %v48_v25 = vld [vmem:[%s23982_s0 + $0x30] sm:$0xff] }
  0x14   :  { %16450 = vmatprep.subr.bf16.mxu1 %v19539_v50  ;;  %16546 = vmatprep.subr.bf16.mxu0 %v19539_v50  ;;  %24341 = vst [vmem:[#allocation10_spill] sm:$0xff] %v19625_v33  ;;  %v19643_v56 = vsub.f32 %v19484_v26, %v107_v38  ;;  %v267_v37 = vand.u32 4294901760, %v19613_v16  ;;  %v273_v58 = vsub.f32 %v19569_v62, %v272_v18  ;;  %v19663_v9 = vand.u32 4294901760, %v47_v43 }
  0x15   :  { %v280_v59 = vsub.f32 %v19572_v63, %v279_v20  ;;  %v19654_v0 = vsub.f32 %v45_v7, %v19621_v30  ;;  %v287_v26 = vsub.f32 %v19578_v1, %v286_v22  ;;  %v294_v38 = vsub.f32 %v19580_v2, %v293_v23 }
  0x16   :  { %v19661_v8 = vsub.f32 %v46_v14, %v19632_v42  ;;  %v301_v12 = vsub.f32 %v19590_v5, %v300_v32  ;;  %v19668_v54 = vand.u32 4294901760, %v48_v25  ;;  %v19670_v53 = vpack.c.bf16 %v260_v55, %v253_v21 }
  0x17   :  { %16452 = vmatpush3.bf16.msra.mxu1 %v19539_v50  ;;  %16548 = vmatpush3.bf16.msra.mxu0 %v19539_v50  ;;  %24342 = vst [vmem:[#allocation11_spill] sm:$0xff] %v19654_v0  ;;  %v19675_v47 = vsub.f32 %v47_v43, %v19663_v9  ;;  %v274_v14 = vand.u32 4294901760, %v273_v58  ;;  %v19681_v16 = vpack.c.bf16 %v272_v18, %v265_v61  ;;  %v49_v43 = vld [vmem:[%s23982_s0 + $0x38] sm:$0xff]  ;;  %v281_v58 = vand.u32 4294901760, %v280_v59 }
  0x18   :  { %16454 = vmatprep.subr.bf16.mxu1 %v19546_v52  ;;  %16550 = vmatprep.subr.bf16.mxu0 %v19546_v52  ;;  %v19686_v21 = vsub.f32 %v19502_v34, %v110_v46  ;;  %v19689_v55 = vsub.f32 %v48_v25, %v19668_v54  ;;  %v288_v51 = vand.u32 4294901760, %v287_v26  ;;  %v24344_v18 = vand.u32 4294901760, %v19507_v35 }
  0x19   :  { %24343 = vst [vmem:[#allocation12_spill] sm:$0xff] %v19675_v47  ;;  %v295_v46 = vand.u32 4294901760, %v294_v38  ;;  %v302_v25 = vand.u32 4294901760, %v301_v12  ;;  %v24345_v57 = vand.u32 4294901760, %v19625_v33  ;;  %v24347_v59 = vand.u32 4294901760, %v19643_v56 }
  0x1a   :  { %v19700_v34 = vsub.f32 %v19507_v35, %v24344_v18  ;;  %v24348_v61 = vand.u32 4294901760, %v19654_v0  ;;  %v19719_v12 = vand.u32 4294901760, %v49_v43  ;;  %v24350_v38 = vand.u32 4294901760, %v19661_v8 }
  0x1b   :  { %16456 = vmatpush3.bf16.msra.mxu1 %v19546_v52  ;;  %16552 = vmatpush3.bf16.msra.mxu0 %v19546_v52  ;;  %v177_v7 = vsub.f32 %v19625_v33, %v24345_v57  ;;  %v19713_v26 = vsub.f32 %v19643_v56, %v24347_v59  ;;  %v19723_v57 = vpack.c.bf16 %v274_v14, %v267_v37  ;;  %v24353_v37 = vand.u32 4294901760, %v19527_v44 }
  0x1c   :  { %16458 = vmatprep.subr.bf16.mxu1 %v19563_v60  ;;  %16554 = vmatprep.subr.bf16.mxu0 %v19563_v60  ;;  %v187_v35 = vsub.f32 %v19654_v0, %v24348_v61  ;;  %24349 = vst [vmem:[#allocation13_spill] sm:$0xff] %v19719_v12  ;;  %v19731_v61 = vpack.c.bf16 %v300_v32, %v293_v23  ;;  %v24358_v18 = vand.u32 4294901760, %v19517_v40 }
  0x1d   :  { %v19736_v24 = vsub.f32 %v19661_v8, %v24350_v38  ;;  %v19747_v14 = vpack.c.bf16 %v288_v51, %v281_v58  ;;  %v19749_v59 = vpack.c.bf16 %v302_v25, %v295_v46  ;;  %v178_v23 = vand.u32 4294901760, %v177_v7  ;;  %v19755_v38 = vld [vmem:[%s23983_s3 + $0x18] sm:$0xff]  ;;  %v19769_v25 = vld [vmem:[%s23983_s3] sm:$0xff] }
  0x1e   :  { %v188_v51 = vand.u32 4294901760, %v187_v35  ;;  %v24354_v58 = vand.u32 4294901760, %v19675_v47  ;;  %v24356_v35 = vand.u32 4294901760, %v19686_v21  ;;  %v19791_v32 = vsub.f32 %v19517_v40, %v24358_v18 }
  0x1f   :  { %16460 = vmatpush3.bf16.msra.mxu1 %v19563_v60  ;;  %16556 = vmatpush3.bf16.msra.mxu0 %v19563_v60  ;;  %v24346_v60 = vand.u32 4294901760, %v19630_v39  ;;  %v24360_v40 = vand.u32 4294901760, %v19700_v34 }
  0x20   :  { %16462 = vmatprep.subr.bf16.mxu1 %v19586_v3  ;;  %16558 = vmatprep.subr.bf16.mxu0 %v19586_v3  ;;  %v207_v7 = vsub.f32 %v19675_v47, %v24354_v58 }
  0x21   :  { %v19708_v52 = vsub.f32 %v19630_v39, %v24346_v60  ;;  %v19725_v60 = vpack.c.bf16 %v286_v22, %v279_v20  ;;  %v19740_v20 = vsub.f32 %v49_v43, %v19719_v12  ;;  %v19745_v22 = vld [vmem:[%s23983_s3 + $0x8] sm:$0xff]  ;;  %v24352_v43 = vand.u32 4294901760, %v19600_v11  ;;  %v19774_v11 = vld [vmem:[%s23983_s3 + $0x10] sm:$0xff] }
  0x22   :  { %24351 = vst [vmem:[#allocation14_spill] sm:$0xff] %v19745_v22  ;;  %24355 = vst [vmem:[#allocation15_spill] sm:$0xff] %v19774_v11  ;;  %v19810_v18 = vsub.f32 %v19700_v34, %v24360_v40  ;;  %v24364_v12 = vand.u32 4294901760, %v19745_v22 }
  0x23   :  { %16464 = vmatpush3.bf16.msra.mxu1 %v19586_v3  ;;  %16560 = vmatpush3.bf16.msra.mxu0 %v19586_v3  ;;  %v19821_v3 = vld [vmem:[%s23983_s3 + $0x20] sm:$0xff]  ;;  %v24363_v50 = vand.u32 4294901760, %v19740_v20 }
  0x24   :  { %16466 = vmatprep.subr.bf16.mxu1 %v19637_v48  ;;  %16562 = vmatprep.subr.bf16.mxu0 %v19588_v4 }
  0x25   :  { %v227_v40 = vsub.f32 %v19740_v20, %v24363_v50  ;;  %v24366_v50 = vand.u32 4294901760, %v19654_v0  ;;  %v19905_v0 = vld [vmem:[%s23983_s3 + $0x78] sm:$0xff] }
  0x26   :  { %16202 = vmatmul.mubr.f32.vlgmr.msra.gmra.mrb[0].mxu1 %v24352_v43  ;;  %16334 = vmatmul.mubr.f32.vlgmr.msra.gmra.mrb[0].mxu0 %v24353_v37  ;;  %v19781_v37 = vsub.f32 %v19686_v21, %v24356_v35  ;;  %v24357_v43 = vand.u32 4294901760, %v19689_v55  ;;  %v198_v35 = vand.u32 4294901760, %v19736_v24  ;;  %v24362_v24 = vand.u32 4294901760, %v19625_v33 }
  0x27   :  { %16468 = vmatpush3.bf16.msra.mxu1 %v19637_v48  ;;  %16564 = vmatpush3.bf16.msra.mxu0 %v19588_v4  ;;  %v19797_v4 = vld [vmem:[%s23983_s3 + $0x28] sm:$0xff]  ;;  %v19802_v48 = vld [vmem:[%s23983_s3 + $0x38] sm:$0xff]  ;;  %v24371_v33 = vand.u32 4294901760, %v19774_v11 }
  0x28   :  { %v19786_v58 = vsub.f32 %v19689_v55, %v24357_v43  ;;  %24359 = vst [vmem:[#allocation16_spill] sm:$0xff] %v19797_v4  ;;  %16470 = vmatprep.subr.bf16.mxu1 %v19670_v53  ;;  %16566 = vmatprep.subr.bf16.mxu0 %v19608_v15  ;;  %v24361_v43 = vand.u32 4294901760, %v19522_v41 }
  0x29   :  { %16204 = vmatprep.mubr.f32.mxu1 %v178_v23  ;;  %16336 = vmatprep.mubr.f32.mxu0 %v24362_v24  ;;  %v19838_v23 = vld [vmem:[%s23983_s3 + $0x30] sm:$0xff]  ;;  %v19843_v24 = vld [vmem:[%s23983_s3 + $0x48] sm:$0xff]  ;;  %v19875_v44 = vsub.f32 %v19774_v11, %v24371_v33  ;;  %v24377_v11 = vand.u32 4294901760, %v19661_v8 }
  0x2a   :  { %v19815_v46 = vsub.f32 %v19522_v41, %v24361_v43  ;;  %v19831_v41 = vsub.f32 %v19745_v22, %v24364_v12  ;;  %16205 = vmatmul.mubr.f32.gmra.mrb[2].mxu1 %v188_v51  ;;  %16337 = vmatmul.mubr.f32.gmra.mrb[2].mxu0 %v24366_v50  ;;  %v208_v12 = vand.u32 4294901760, %v207_v7  ;;  %v19857_v22 = vld [vmem:[%s23983_s3 + $0x58] sm:$0xff]  ;;  %v19862_v51 = vld [vmem:[%s23983_s3 + $0x40] sm:$0xff]  ;;  %v218_v7 = vand.u32 4294901760, %v19786_v58 }
  0x2b   :  { %16472 = vmatpush3.bf16.msra.mxu1 %v19670_v53  ;;  %16568 = vmatpush3.bf16.msra.mxu0 %v19608_v15  ;;  %24372 = vst [vmem:[#allocation20_spill] sm:$0xff] %v19875_v44  ;;  %v19881_v53 = vld [vmem:[%s23983_s3 + $0x50] sm:$0xff]  ;;  %v19886_v15 = vld [vmem:[%s23983_s3 + $0x68] sm:$0xff]  ;;  %v24373_v58 = vand.u32 4294901760, %v19797_v4  ;;  %v24387_v44 = vand.u32 4294901760, %v19862_v51 }
  0x2c   :  { %24365 = vst [vmem:[#allocation17_spill] sm:$0xff] %v19831_v41  ;;  %v24367_v41 = vand.u32 4294901760, %v19755_v38  ;;  %16474 = vmatprep.subr.bf16.mxu1 %v19723_v57  ;;  %16570 = vmatprep.subr.bf16.mxu0 %v19681_v16 }
  0x2d   :  { %v19893_v33 = vsub.f32 %v19797_v4, %v24373_v58  ;;  %16207 = vmatprep.mubr.f32.mxu1 %v198_v35  ;;  %16339 = vmatprep.mubr.f32.mxu0 %v24377_v11  ;;  %v228_v58 = vand.u32 4294901760, %v227_v40  ;;  %v24380_v35 = vand.u32 4294901760, %v19675_v47  ;;  %v24381_v11 = vand.u32 4294901760, %v19838_v23 }
  0x2e   :  { %v19850_v43 = vsub.f32 %v19755_v38, %v24367_v41  ;;  %v24369_v41 = vand.u32 4294901760, %v19769_v25  ;;  %16208 = vmatmul.mubr.f32.gmra.mrb[4].mxu1 %v208_v12  ;;  %v19938_v12 = vld [vmem:[%s23983_s3 + $0x70] sm:$0xff]  ;;  %v24393_v47 = vand.u32 4294901760, %v19905_v0 }
  0x2f   :  { %24374 = vst [vmem:[#allocation21_spill] sm:$0xff] %v19893_v33  ;;  %v24378_v33 = vand.u32 4294901760, %v19821_v3  ;;  %16340 = vmatmul.mubr.f32.gmra.mrb[4].mxu0 %v24380_v35  ;;  %v19926_v40 = vsub.f32 %v19838_v23, %v24381_v11  ;;  %16476 = vmatpush3.bf16.msra.mxu1 %v19723_v57  ;;  %v335_v35 = vand.u32 4294901760, %v19791_v32  ;;  %v342_v11 = vand.u32 4294901760, %v19815_v46 }
  0x30   :  { %24368 = vst [vmem:[#allocation18_spill] sm:$0xff] %v19850_v43  ;;  %v19870_v50 = vsub.f32 %v19769_v25, %v24369_v41  ;;  %v24375_v41 = vand.u32 4294901760, %v19802_v48  ;;  %16572 = vmatpush3.bf16.msra.mxu0 %v19681_v16  ;;  %16478 = vmatprep.subr.bf16.mxu1 %v19747_v14  ;;  %v19955_v57 = vsub.f32 %v19862_v51, %v24387_v44  ;;  %v24389_v16 = vand.u32 4294901760, %v19881_v53 }
  0x31   :  { %v19912_v4 = vsub.f32 %v19821_v3, %v24378_v33  ;;  %24382 = vst [vmem:[#allocation24_spill] sm:$0xff] %v19926_v40  ;;  %v24383_v33 = vand.u32 4294901760, %v19843_v24  ;;  %16574 = vmatprep.subr.bf16.mxu0 %v19725_v60  ;;  %16210 = vmatprep.mubr.f32.mxu1 %v218_v7  ;;  %v19973_v44 = vsub.f32 %v19905_v0, %v24393_v47  ;;  %v24396_v7 = vand.u32 4294901760, %v19708_v52 }
  0x32   :  { %24370 = vst [vmem:[#allocation19_spill] sm:$0xff] %v19870_v50  ;;  %v19898_v43 = vsub.f32 %v19802_v48, %v24375_v41  ;;  %v19919_v50 = vld [vmem:[%s23983_s3 + $0x60] sm:$0xff]  ;;  %24388 = vst [vmem:[#allocation27_spill] sm:$0xff] %v19955_v57  ;;  %v19960_v40 = vsub.f32 %v19881_v53, %v24389_v16  ;;  %16211 = vmatmul.mubr.f32.gmra.mrb[6].mxu1 %v228_v58  ;;  %v24395_v16 = vand.u32 4294901760, %v19740_v20  ;;  %v24397_v47 = vand.u32 4294901760, %v19713_v26 }
  0x33   :  { %24379 = vst [vmem:[#allocation23_spill] sm:$0xff] %v19912_v4  ;;  %v19931_v41 = vsub.f32 %v19843_v24, %v24383_v33  ;;  %v24385_v33 = vand.u32 4294901760, %v19857_v22  ;;  %v24031_v4 = vand.u32 4294901760, %v19919_v50  ;;  %24394 = vst [vmem:[#allocation29_spill] sm:$0xff] %v19973_v44  ;;  %16480 = vmatpush3.bf16.msra.mxu1 %v19747_v14  ;;  %v24398_v57 = vand.u32 4294901760, %v19630_v39  ;;  %16245 = vmatprep.mubr.f32.mxu1 %v19454_v17 }
  0x34   :  { %24376 = vst [vmem:[#allocation22_spill] sm:$0xff] %v19898_v43  ;;  %v24390_v43 = vand.u32 4294901760, %v19886_v15  ;;  %16576 = vmatpush3.bf16.msra.mxu0 %v19725_v60  ;;  %v24399_v58 = vand.u32 4294901760, %v19643_v56  ;;  %16482 = vmatprep.subr.bf16.mxu1 %v19749_v59  ;;  %v323_v60 = vand.u32 4294901760, %v19781_v37  ;;  %v330_v52 = vand.u32 4294901760, %v19810_v18 }
  0x35   :  { %24384 = vst [vmem:[#allocation25_spill] sm:$0xff] %v19931_v41  ;;  %v19947_v41 = vsub.f32 %v19857_v22, %v24385_v33  ;;  %16578 = vmatprep.subr.bf16.mxu0 %v19731_v61  ;;  %v336_v26 = vsub.f32 %v19791_v32, %v335_v35  ;;  %v343_v14 = vsub.f32 %v19815_v46, %v342_v11  ;;  %v24402_v37 = vand.u32 4294901760, %v19700_v34 }
  0x36   :  { %v19965_v33 = vsub.f32 %v19886_v15, %v24390_v43  ;;  %v19981_v43 = vsub.f32 %v19919_v50, %v24031_v4  ;;  %v16581_v44 = vpack.c.bf16 %v24399_v58, %v24398_v57  ;;  %v16489_v57 = vpack.c.bf16 %v330_v52, %v323_v60 }
  0x37   :  { %24386 = vst [vmem:[#allocation26_spill] sm:$0xff] %v19947_v41  ;;  %v24392_v41 = vand.u32 4294901760, %v19689_v55  ;;  %16484 = vmatpush3.bf16.msra.mxu1 %v19749_v59  ;;  %v344_v58 = vand.u32 4294901760, %v343_v14  ;;  %v16589_v4 = vpack.c.bf16 %v342_v11, %v335_v35  ;;  %v16497_v59 = vpack.c.bf16 %v19488_v28, %v19486_v27  ;;  %v24403_v28 = vld [vmem:[#allocation13_spill] sm:$0xff] }
  0x38   :  { %24391 = vst [vmem:[#allocation28_spill] sm:$0xff] %v19965_v33  ;;  %16580 = vmatpush3.bf16.msra.mxu0 %v19731_v61  ;;  %v16501_v61 = vpack.c.bf16 %v19529_v45, %v19509_v36  ;;  %v16505_v27 = vpack.c.bf16 %v19569_v62, %v19535_v49  ;;  %v24404_v36 = vld [vmem:[#allocation6_spill] sm:$0xff]  ;;  %v24405_v45 = vld [vmem:[#allocation4_spill] sm:$0xff]  ;;  %v24406_v49 = vld [vmem:[#allocation7_spill] sm:$0xff]  ;;  %v16521_v62 = vpack.c.bf16 %v19700_v34, %v19686_v21  ;;  %v24419_v35 = vand.u32 4294901760, %v19802_v48 }
  0x39   :  { %16342 = vmatprep.mubr.f32.mxu0 %v24392_v41  ;;  %v16485_v41 = vpack.c.bf16 %v24397_v47, %v24396_v7  ;;  %16582 = vmatprep.subr.bf16.mxu0 %v16581_v44  ;;  %v24401_v7 = vand.u32 4294901760, %v19686_v21  ;;  %v337_v47 = vand.u32 4294901760, %v336_v26  ;;  %v24414_v21 = vld [vmem:[#allocation15_spill] sm:$0xff]  ;;  %v24426_v48 = vand.u32 4294901760, %v19843_v24 }
  0x3a   :  { %16343 = vmatmul.mubr.f32.gmra.mrb[6].mxu0 %v24395_v16  ;;  %v24400_v16 = vand.u32 4294901760, %v19938_v12  ;;  %v24415_v34 = vand.u32 4294901760, %v24414_v21  ;;  %v24427_v52 = vand.u32 4294901760, %v19857_v22  ;;  %v24433_v22 = vand.u32 4294901760, %v19886_v15  ;;  %v1051_v21 = vld [vmem:[%s23983_s3 + $0xe0] sm:$0xff] }
  0x3b   :  { %16377 = vmatprep.mubr.f32.mxu0 %v19454_v17  ;;  %16486 = vmatprep.subr.bf16.mxu1 %v16485_v41  ;;  %v16585_v18 = vpack.c.bf16 %v24402_v37, %v24401_v7  ;;  %v24434_v24 = vand.u32 4294901760, %v19905_v0  ;;  %v20138_v0 = vld [vmem:[%s23983_s3 + $0x98] sm:$0xff]  ;;  %v1044_v7 = vld [vmem:[%s23983_s3 + $0xa8] sm:$0xff] }
  0x3c   :  { %v19996_v33 = vsub.f32 %v19938_v12, %v24400_v16  ;;  %16488 = vmatpush3.bf16.msra.mxu1 %v16485_v41  ;;  %16584 = vmatpush3.bf16.msra.mxu0 %v16581_v44  ;;  %v16493_v16 = vpack.c.bf16 %v344_v58, %v337_v47  ;;  %v24422_v44 = vld [vmem:[#allocation10_spill] sm:$0xff]  ;;  %v24424_v41 = vand.u32 4294901760, %v19838_v23  ;;  %v20095_v26 = vpack.c.bf16 %v24427_v52, %v24426_v48  ;;  %v1046_v37 = vld [vmem:[%s23983_s3 + $0xb8] sm:$0xff]  ;;  %v1043_v58 = vld [vmem:[%s23983_s3 + $0xa0] sm:$0xff] }
  0x3d   :  { %16490 = vmatprep.subr.bf16.mxu1 %v16489_v57  ;;  %16586 = vmatprep.subr.bf16.mxu0 %v16585_v18  ;;  %v20113_v14 = vpack.c.bf16 %v24434_v24, %v24433_v22  ;;  %v1111_v47 = vand.u32 4294901760, %v1046_v37  ;;  %v24449_v52 = vld [vmem:[#allocation20_spill] sm:$0xff] }
  0x40   :  { %16492 = vmatpush3.bf16.msra.mxu1 %v16489_v57  ;;  %16588 = vmatpush3.bf16.msra.mxu0 %v16585_v18  ;;  %v1107_v18 = vand.u32 4294901760, %v1044_v7 }
  0x41   :  { %16494 = vmatprep.subr.bf16.mxu1 %v16493_v16  ;;  %16590 = vmatprep.subr.bf16.mxu0 %v16589_v4 }
  0x44   :  { %16496 = vmatpush3.bf16.msra.mxu1 %v16493_v16  ;;  %16592 = vmatpush3.bf16.msra.mxu0 %v16589_v4  ;;  %v1045_v16 = vld [vmem:[%s23983_s3 + $0xb0] sm:$0xff] }
  0x45   :  { %16498 = vmatprep.subr.bf16.mxu1 %v16497_v59  ;;  %16594 = vmatprep.subr.bf16.mxu0 %v19432_v10 }
  0x47   :  { %16246 = vmatmul.mubr.f32.vlgmr.msra.gmra.mrb[0].mxu1 %v19490_v29  ;;  %16378 = vmatmul.mubr.f32.vlgmr.msra.gmra.mrb[0].mxu0 %v19490_v29 }
  0x48   :  { %16500 = vmatpush3.bf16.msra.mxu1 %v16497_v59  ;;  %16596 = vmatpush3.bf16.msra.mxu0 %v19432_v10  ;;  %v16509_v10 = vpack.c.bf16 %v19578_v1, %v19572_v63  ;;  %v16525_v63 = vpack.c.bf16 %v19815_v46, %v19791_v32  ;;  %v24409_v1 = vld [vmem:[#allocation14_spill] sm:$0xff]  ;;  %v24417_v46 = vld [vmem:[#allocation16_spill] sm:$0xff]  ;;  %v1109_v59 = vand.u32 4294901760, %v1043_v58 }
  0x49   :  { %16502 = vmatprep.subr.bf16.mxu1 %v16501_v61  ;;  %16598 = vmatprep.subr.bf16.mxu0 %v19435_v13  ;;  %v24418_v4 = vand.u32 4294901760, %v24417_v46  ;;  %24435 = vst [vmem:[#allocation14_spill] sm:$0xff] %v20113_v14  ;;  %v24446_v46 = vld [vmem:[#allocation17_spill] sm:$0xff] }
  0x4a   :  { %16248 = vmatprep.mubr.f32.mxu1 %v19592_v6  ;;  %16380 = vmatprep.mubr.f32.mxu0 %v19592_v6 }
  0x4b   :  { %16249 = vmatmul.mubr.f32.gmra.mrb[2].mxu1 %v19621_v30  ;;  %16381 = vmatmul.mubr.f32.gmra.mrb[2].mxu0 %v19621_v30  ;;  %v20077_v11 = vpack.c.bf16 %v24419_v35, %v24418_v4  ;;  %v24036_v4 = vand.u32 4294901760, %v24446_v46  ;;  %v24447_v35 = vld [vmem:[#allocation18_spill] sm:$0xff] }
  0x4c   :  { %16504 = vmatpush3.bf16.msra.mxu1 %v16501_v61  ;;  %16600 = vmatpush3.bf16.msra.mxu0 %v19435_v13  ;;  %v16513_v13 = vpack.c.bf16 %v19590_v5, %v19580_v2  ;;  %v24410_v2 = vand.u32 4294901760, %v24409_v1  ;;  %v24411_v5 = vand.u32 4294901760, %v19755_v38  ;;  %v24421_v38 = vld [vmem:[#allocation5_spill] sm:$0xff]  ;;  %v1113_v61 = vand.u32 4294901760, %v1045_v16 }
  0x4d   :  { %16506 = vmatprep.subr.bf16.mxu1 %v16505_v27  ;;  %16602 = vmatprep.subr.bf16.mxu0 %v19463_v19  ;;  %24420 = vst [vmem:[#allocation4_spill] sm:$0xff] %v20077_v11  ;;  %v1052_v1 = vld [vmem:[%s23983_s3 + $0xe8] sm:$0xff] }
  0x4e   :  { %16251 = vmatprep.mubr.f32.mxu1 %v19632_v42  ;;  %16383 = vmatprep.mubr.f32.mxu0 %v19632_v42 }
  0x4f   :  { %16252 = vmatmul.mubr.f32.gmra.mrb[4].mxu1 %v19663_v9  ;;  %16384 = vmatmul.mubr.f32.gmra.mrb[4].mxu0 %v19663_v9 }
  0x50   :  { %16508 = vmatpush3.bf16.msra.mxu1 %v16505_v27  ;;  %16604 = vmatpush3.bf16.msra.mxu0 %v19463_v19  ;;  %v16517_v19 = vpack.c.bf16 %v19643_v56, %v19630_v39  ;;  %v20063_v39 = vpack.c.bf16 %v24411_v5, %v24410_v2  ;;  %v24413_v56 = vand.u32 4294901760, %v19769_v25  ;;  %v24423_v25 = vand.u32 4294901760, %v19821_v3  ;;  %v1054_v2 = vld [vmem:[%s23983_s3 + $0xf8] sm:$0xff] }
  0x51   :  { %16510 = vmatprep.subr.bf16.mxu1 %v16509_v10  ;;  %16606 = vmatprep.subr.bf16.mxu0 %v19497_v31  ;;  %v24430_v3 = vand.u32 4294901760, %v19862_v51  ;;  %v20166_v27 = vpack.c.bf16 %v1111_v47, %v1107_v18  ;;  %v1123_v5 = vand.u32 4294901760, %v1052_v1 }
  0x52   :  { %16254 = vmatprep.mubr.f32.mxu1 %v19668_v54  ;;  %16386 = vmatprep.mubr.f32.mxu0 %v19668_v54  ;;  %24412 = vst [vmem:[#allocation13_spill] sm:$0xff] %v20063_v39  ;;  %v20071_v32 = vpack.c.bf16 %v24415_v34, %v24413_v56  ;;  %v20088_v60 = vpack.c.bf16 %v24424_v41, %v24423_v25  ;;  %v1127_v56 = vand.u32 4294901760, %v1054_v2  ;;  %v1053_v34 = vld [vmem:[%s23983_s3 + $0xf0] sm:$0xff]  ;;  %v24448_v41 = vld [vmem:[#allocation19_spill] sm:$0xff] }
  0x53   :  { %16255 = vmatmul.mubr.f32.gmra.mrb[6].mxu1 %v24403_v28  ;;  %16387 = vmatmul.mubr.f32.gmra.mrb[6].mxu0 %v24403_v28  ;;  %24442 = vst [vmem:[#allocation10_spill] sm:$0xff] %v20166_v27  ;;  %v1129_v25 = vand.u32 4294901760, %v1053_v34  ;;  %v24050_v48 = vand.u32 4294901760, %v24448_v41 }
  0x54   :  { %16512 = vmatpush3.bf16.msra.mxu1 %v16509_v10  ;;  %16608 = vmatpush3.bf16.msra.mxu0 %v19497_v31  ;;  %v24407_v31 = vld [vmem:[#allocation8_spill] sm:$0xff]  ;;  %24416 = vst [vmem:[#allocation6_spill] sm:$0xff] %v20071_v32  ;;  %24425 = vst [vmem:[#allocation7_spill] sm:$0xff] %v20088_v60  ;;  %v20168_v10 = vpack.c.bf16 %v1113_v61, %v1109_v59 }
  0x55   :  { %16514 = vmatprep.subr.bf16.mxu1 %v16513_v13  ;;  %16610 = vmatprep.subr.bf16.mxu0 %v24404_v36  ;;  %24428 = vst [vmem:[#allocation8_spill] sm:$0xff] %v20095_v26 }
  0x56   :  { %16289 = vmatprep.mubr.f32.mxu1 %v24405_v45  ;;  %16421 = vmatprep.mubr.f32.mxu0 %v19454_v17  ;;  %v24408_v17 = vld [vmem:[#allocation9_spill] sm:$0xff]  ;;  %v1047_v45 = vld [vmem:[%s23983_s3 + $0xc0] sm:$0xff] }
  0x58   :  { %16516 = vmatpush3.bf16.msra.mxu1 %v16513_v13  ;;  %16612 = vmatpush3.bf16.msra.mxu0 %v24404_v36  ;;  %v1048_v13 = vld [vmem:[%s23983_s3 + $0xc8] sm:$0xff] }
  0x59   :  { %16518 = vmatprep.subr.bf16.mxu1 %v16517_v19  ;;  %16614 = vmatprep.subr.bf16.mxu0 %v24406_v49  ;;  %v1115_v36 = vand.u32 4294901760, %v1048_v13 }
  0x5c   :  { %16520 = vmatpush3.bf16.msra.mxu1 %v16517_v19  ;;  %16616 = vmatpush3.bf16.msra.mxu0 %v24406_v49  ;;  %v1049_v49 = vld [vmem:[%s23983_s3 + $0xd0] sm:$0xff] }
  0x5d   :  { %16522 = vmatprep.subr.bf16.mxu1 %v16521_v62  ;;  %16618 = vmatprep.subr.bf16.mxu0 %v24407_v31 }
  0x60   :  { %16524 = vmatpush3.bf16.msra.mxu1 %v16521_v62  ;;  %16620 = vmatpush3.bf16.msra.mxu0 %v24407_v31  ;;  %v1117_v62 = vand.u32 4294901760, %v1047_v45  ;;  %v1121_v31 = vand.u32 4294901760, %v1049_v49 }
  0x61   :  { %16526 = vmatprep.subr.bf16.mxu1 %v16525_v63  ;;  %16622 = vmatprep.subr.bf16.mxu0 %v24408_v17 }
  0x64   :  { %16528 = vmatpush3.bf16.msra.mxu1 %v16525_v63  ;;  %16624 = vmatpush3.bf16.msra.mxu0 %v24408_v17  ;;  %v20186_v17 = vpack.c.bf16 %v1121_v31, %v1117_v62 }
  0x65   :  { %16626 = vmatprep.subr.bf16.mxu1 %v20063_v39 }
  0x66   :  { %24445 = vst [vmem:[#allocation30_spill] sm:$0xff] %v20186_v17 }
  0x67   :  { %16290 = vmatmul.mubr.f32.vlgmr.msra.gmra.mrb[0].mxu1 %v24421_v38  ;;  %16422 = vmatmul.mubr.f32.vlgmr.msra.gmra.mrb[0].mxu0 %v19490_v29  ;;  %v24429_v29 = vld [vmem:[#allocation11_spill] sm:$0xff]  ;;  %v24041_v38 = vand.u32 4294901760, %v24447_v35 }
  0x68   :  { %16292 = vmatprep.mubr.f32.mxu1 %v24422_v44  ;;  %16424 = vmatprep.mubr.f32.mxu0 %v19592_v6  ;;  %v24431_v6 = vand.u32 4294901760, %v19881_v53  ;;  %24443 = vst [vmem:[#allocation11_spill] sm:$0xff] %v20168_v10  ;;  %v1125_v44 = vand.u32 4294901760, %v1051_v21 }
  0x69   :  { %16628 = vmatpush1.bf16.msra.mxu1 %v20071_v32  ;;  %v1267_v22 = vsub.f32 %v24447_v35, %v24041_v38 }
  0x6a   :  { %16630 = vmatprep.subr.bf16.mxu1 %v20077_v11  ;;  %v20106_v23 = vpack.c.bf16 %v24431_v6, %v24430_v3  ;;  %v20206_v3 = vpack.c.bf16 %v1127_v56, %v1123_v5  ;;  %v1255_v6 = vsub.f32 %v24446_v46, %v24036_v4  ;;  %v20214_v24 = vpack.c.bf16 %v1129_v25, %v1125_v44 }
  0x6b   :  { %16293 = vmatmul.mubr.f32.gmra.mrb[2].mxu1 %v24429_v29  ;;  %16425 = vmatmul.mubr.f32.gmra.mrb[2].mxu0 %v19621_v30  ;;  %v24436_v30 = vld [vmem:[#allocation12_spill] sm:$0xff]  ;;  %v24053_v29 = vand.u32 4294901760, %v24449_v52  ;;  %v20238_v4 = vsub.f32 %v1044_v7, %v1107_v18 }
  0x6c   :  { %16295 = vmatprep.mubr.f32.mxu1 %v19661_v8  ;;  %16427 = vmatprep.mubr.f32.mxu0 %v19632_v42  ;;  %24432 = vst [vmem:[#allocation9_spill] sm:$0xff] %v20106_v23  ;;  %v24437_v42 = vand.u32 4294901760, %v19919_v50  ;;  %v24438_v8 = vand.u32 4294901760, %v19938_v12  ;;  %v1041_v50 = vld [vmem:[%s23983_s3 + $0x90] sm:$0xff]  ;;  %24450 = vst [vmem:[#allocation17_spill] sm:$0xff] %v20206_v3 }
  0x6d   :  { %16632 = vmatpush1.bf16.msra.mxu1 %v20088_v60  ;;  %v1105_v15 = vand.u32 4294901760, %v1041_v50  ;;  %24451 = vst [vmem:[#allocation18_spill] sm:$0xff] %v20214_v24 }
  0x6e   :  { %16634 = vmatprep.subr.bf16.mxu1 %v20095_v26  ;;  %v20124_v51 = vpack.c.bf16 %v24438_v8, %v24437_v42  ;;  %v1273_v42 = vsub.f32 %v24449_v52, %v24053_v29  ;;  %v1256_v8 = vand.u32 4294901760, %v1255_v6 }
  0x6f   :  { %16296 = vmatmul.mubr.f32.gmra.mrb[4].mxu1 %v24436_v30  ;;  %16428 = vmatmul.mubr.f32.gmra.mrb[4].mxu0 %v19663_v9  ;;  %v1261_v30 = vsub.f32 %v24448_v41, %v24050_v48 }
  0x70   :  { %16298 = vmatprep.mubr.f32.mxu1 %v19689_v55  ;;  %16430 = vmatprep.mubr.f32.mxu0 %v19668_v54  ;;  %24439 = vst [vmem:[#allocation15_spill] sm:$0xff] %v20124_v51  ;;  %v20133_v54 = vld [vmem:[%s23983_s3 + $0x88] sm:$0xff]  ;;  %v1103_v55 = vand.u32 4294901760, %v20138_v0 }
  0x71   :  { %16636 = vmatpush1.bf16.msra.mxu1 %v20106_v23  ;;  %v1099_v9 = vand.u32 4294901760, %v20133_v54  ;;  %v1262_v38 = vand.u32 4294901760, %v1261_v30  ;;  %v20242_v30 = vsub.f32 %v1043_v58, %v1109_v59  ;;  %v24461_v58 = vld [vmem:[#allocation25_spill] sm:$0xff] }
  0x72   :  { %16638 = vmatprep.subr.bf16.mxu1 %v20113_v14  ;;  %v24455_v14 = vld [vmem:[#allocation24_spill] sm:$0xff]  ;;  %v20232_v29 = vsub.f32 %v20138_v0, %v1103_v55  ;;  %v20252_v0 = vsub.f32 %v1049_v49, %v1121_v31  ;;  %v20276_v49 = vsub.f32 %v1054_v2, %v1127_v56  ;;  %v20280_v31 = vsub.f32 %v1053_v34, %v1129_v25  ;;  %v20303_v34 = vld [vmem:[%s23984_s4 + $0x18] sm:$0xff] }
  0x73   :  { %16299 = vmatmul.mubr.f32.gmra.mrb[6].mxu1 %v19740_v20  ;;  %16431 = vmatmul.mubr.f32.gmra.mrb[6].mxu0 %v24403_v28  ;;  %v1039_v20 = vld [vmem:[%s23983_s3 + $0x80] sm:$0xff]  ;;  %v20148_v12 = vpack.c.bf16 %v1103_v55, %v1099_v9  ;;  %v1050_v28 = vld [vmem:[%s23983_s3 + $0xd8] sm:$0xff]  ;;  %v20229_v23 = vsub.f32 %v20133_v54, %v1099_v9  ;;  %v20250_v54 = vsub.f32 %v1047_v45, %v1117_v62 }
  0x74   :  { %v1101_v53 = vand.u32 4294901760, %v1039_v20  ;;  %v1119_v19 = vand.u32 4294901760, %v1050_v28  ;;  %v20274_v45 = vsub.f32 %v1052_v1, %v1123_v5  ;;  %v20278_v62 = vsub.f32 %v1051_v21, %v1125_v44  ;;  %v24465_v5 = vld [vmem:[#allocation28_spill] sm:$0xff]  ;;  %v20298_v21 = vld [vmem:[%s23984_s4 + $0x8] sm:$0xff] }
  0x75   :  { %16640 = vmatpush1.bf16.msra.mxu1 %v20124_v51  ;;  %24440 = vst [vmem:[#allocation16_spill] sm:$0xff] %v20148_v12  ;;  %v20246_v51 = vsub.f32 %v1048_v13, %v1115_v36  ;;  %v24055_v56 = vand.u32 4294901760, %v24465_v5 }
  0x76   :  { %v20150_v57 = vpack.c.bf16 %v1105_v15, %v1101_v53  ;;  %16642 = vmatprep.subr.bf16.mxu1 %v20148_v12  ;;  %v20184_v63 = vpack.c.bf16 %v1119_v19, %v1115_v36  ;;  %v24454_v12 = vld [vmem:[#allocation23_spill] sm:$0xff]  ;;  %v20234_v6 = vsub.f32 %v1039_v20, %v1101_v53  ;;  %v20248_v48 = vsub.f32 %v1050_v28, %v1119_v19 }
  0x77   :  { %v24060_v53 = vmov 0.0   ;;  %v24463_v28 = vld [vmem:[#allocation27_spill] sm:$0xff]  ;;  %v24054_v19 = vand.u32 4294901760, %v19960_v40  ;;  %24464 = vst [vmem:[#allocation24_spill] sm:$0xff] %v20278_v62 }
  0x78   :  { %24441 = vst [vmem:[#allocation5_spill] sm:$0xff] %v20150_v57  ;;  %24444 = vst [vmem:[#allocation12_spill] sm:$0xff] %v20184_v63  ;;  %1163 = vmatprep.mubr.f32.mxu1 %v24060_v53  ;;  %2383 = vmatprep.mubr.f32.mxu0 %v24060_v53  ;;  %v24057_v36 = vand.u32 4294901760, %v24463_v28  ;;  %v20363_v53 = vld [vmem:[%s23984_s4 + $0x20] sm:$0xff] }
  0x79   :  { %16644 = vmatpush1.bf16.msra.mxu1 %v20150_v57  ;;  %v1274_v57 = vand.u32 4294901760, %v1273_v42  ;;  %v20244_v42 = vsub.f32 %v1045_v16, %v1113_v61  ;;  %v24059_v16 = vand.u32 4294901760, %v24461_v58  ;;  %v24462_v61 = vld [vmem:[#allocation26_spill] sm:$0xff]  ;;  %v1321_v2 = vsub.f32 %v19960_v40, %v24054_v19  ;;  %v20316_v19 = vld [vmem:[%s23984_s4] sm:$0xff] }
  0x7a   :  { %16646 = vmatprep.subr.bf16.mxu1 %v20166_v27  ;;  %v20240_v27 = vsub.f32 %v1046_v37, %v1111_v47  ;;  %v24459_v37 = vand.u32 4294901760, %v24454_v12  ;;  %v24460_v47 = vand.u32 4294901760, %v24455_v14  ;;  %v24058_v13 = vand.u32 4294901760, %v24462_v61 }
  0x7b   :  { %v20254_v55 = vpack.c.bf16 %v1274_v57, %v1262_v38  ;;  %v1309_v1 = vsub.f32 %v24463_v28, %v24057_v36  ;;  %v20342_v36 = vld [vmem:[%s23984_s4 + $0x38] sm:$0xff] }
  0x7c   :  { %v1285_v18 = vsub.f32 %v24454_v12, %v24459_v37  ;;  %v1297_v57 = vsub.f32 %v24455_v14, %v24460_v47  ;;  %v1322_v47 = vand.u32 4294901760, %v1321_v2 }
  0x7d   :  { %16648 = vmatpush1.bf16.msra.mxu1 %v20168_v10  ;;  %v24453_v10 = vld [vmem:[#allocation22_spill] sm:$0xff]  ;;  %24456 = vst [vmem:[#allocation23_spill] sm:$0xff] %v20254_v55 }
  0x7e   :  { %16650 = vmatprep.subr.bf16.mxu1 %v20184_v63  ;;  %v24452_v63 = vld [vmem:[#allocation21_spill] sm:$0xff]  ;;  %v1286_v38 = vand.u32 4294901760, %v1285_v18  ;;  %v1310_v18 = vand.u32 4294901760, %v1309_v1 }
  0x7f   :  { %v24457_v20 = vand.u32 4294901760, %v24452_v63 }
  0x80   :  { %v20331_v1 = vpack.c.bf16 %v1322_v47, %v1310_v18  ;;  %v24075_v18 = vand.u32 4294901760, %v20316_v19 }
  0x81   :  { %16652 = vmatpush1.bf16.msra.mxu1 %v20186_v17  ;;  %v1268_v17 = vand.u32 4294901760, %v1267_v22  ;;  %v20236_v22 = vsub.f32 %v1041_v50, %v1105_v15  ;;  %v1279_v50 = vsub.f32 %v24452_v63, %v24457_v20  ;;  %v24458_v15 = vand.u32 4294901760, %v24453_v10 }
  0x82   :  { %16654 = vmatprep.subr.bf16.mxu1 %v20206_v3  ;;  %v1315_v20 = vsub.f32 %v24462_v61, %v24058_v13  ;;  %24470 = vst [vmem:[#allocation28_spill] sm:$0xff] %v20331_v1  ;;  %v24476_v3 = vand.u32 4294901760, %v20342_v36 }
  0x83   :  { %v16657_v9 = vpack.c.bf16 %v1268_v17, %v1256_v8  ;;  %v1291_v7 = vsub.f32 %v24453_v10, %v24458_v15  ;;  %v1280_v59 = vand.u32 4294901760, %v1279_v50  ;;  %v1298_v8 = vand.u32 4294901760, %v1297_v57  ;;  %v24468_v15 = vld [vmem:[#allocation29_spill] sm:$0xff] }
  0x84   :  { %v1316_v37 = vand.u32 4294901760, %v1315_v20  ;;  %v1327_v57 = vsub.f32 %v24465_v5, %v24055_v56  ;;  %v24065_v56 = vand.u32 4294901760, %v19996_v33  ;;  %v24479_v11 = vand.u32 4294901760, %v20236_v22 }
  0x85   :  { %16656 = vmatpush1.bf16.msra.mxu1 %v20214_v24  ;;  %v1292_v17 = vand.u32 4294901760, %v1291_v7  ;;  %v20307_v25 = vpack.c.bf16 %v1298_v8, %v1286_v38  ;;  %v24056_v7 = vand.u32 4294901760, %v24468_v15  ;;  %v24062_v38 = vand.u32 4294901760, %v20303_v34 }
  0x86   :  { %16658 = vmatprep.subr.bf16.mxu1 %v16657_v9  ;;  %v1303_v9 = vsub.f32 %v24461_v58, %v24059_v16  ;;  %v24063_v8 = vand.u32 4294901760, %v19981_v43  ;;  %v1328_v2 = vand.u32 4294901760, %v1327_v57  ;;  %v1345_v47 = vsub.f32 %v19996_v33, %v24065_v56 }
  0x87   :  { %v20305_v44 = vpack.c.bf16 %v1292_v17, %v1280_v59  ;;  %24467 = vst [vmem:[#allocation26_spill] sm:$0xff] %v20307_v25  ;;  %v1339_v59 = vsub.f32 %v24468_v15, %v24056_v7  ;;  %v24064_v17 = vand.u32 4294901760, %v20298_v21  ;;  %v20337_v7 = vld [vmem:[%s23984_s4 + $0x28] sm:$0xff]  ;;  %v1369_v32 = vsub.f32 %v20236_v22, %v24479_v11 }
  0x88   :  { %v1304_v50 = vand.u32 4294901760, %v1303_v9  ;;  %v20327_v9 = vld [vmem:[%s23984_s4 + $0x10] sm:$0xff]  ;;  %v1346_v16 = vand.u32 4294901760, %v1345_v47  ;;  %v24083_v47 = vand.u32 4294901760, %v20234_v6  ;;  %v24488_v25 = vand.u32 4294901760, %v20244_v42 }
  0x89   :  { %24466 = vst [vmem:[#allocation25_spill] sm:$0xff] %v20305_v44  ;;  %v1340_v13 = vand.u32 4294901760, %v1339_v59  ;;  %v24074_v57 = vand.u32 4294901760, %v20327_v9  ;;  %v20373_v59 = vld [vmem:[%s23984_s4 + $0x30] sm:$0xff] }
  0x8a   :  { %v20329_v20 = vpack.c.bf16 %v1316_v37, %v1304_v50  ;;  %v20348_v50 = vpack.c.bf16 %v24062_v38, %v24064_v17  ;;  %v1333_v37 = vsub.f32 %v19981_v43, %v24063_v8  ;;  %v24076_v17 = vand.u32 4294901760, %v20337_v7 }
  0x8b   :  { %v20365_v38 = vpack.c.bf16 %v1340_v13, %v1328_v2  ;;  %v20379_v24 = vpack.c.bf16 %v24074_v57, %v24075_v18  ;;  %v24474_v13 = vand.u32 4294901760, %v20229_v23  ;;  %v24084_v60 = vand.u32 4294901760, %v20373_v59 }
  0x8c   :  { %24469 = vst [vmem:[#allocation27_spill] sm:$0xff] %v20329_v20  ;;  %24471 = vst [vmem:[#allocation29_spill] sm:$0xff] %v20348_v50  ;;  %16818 = vmatprep.subr.bf16.mxu0 %v20348_v50  ;;  %v1334_v8 = vand.u32 4294901760, %v1333_v37  ;;  %v24475_v37 = vand.u32 4294901760, %v20232_v29  ;;  %v20391_v26 = vpack.c.bf16 %v24476_v3, %v24076_v17  ;;  %v1357_v57 = vsub.f32 %v20234_v6, %v24083_v47 }
  0x8d   :  { %24472 = vst [vmem:[#allocation31_spill] sm:$0xff] %v20365_v38  ;;  %24473 = vst [vmem:[#allocation32_spill] sm:$0xff] %v20379_v24  ;;  %v1351_v2 = vsub.f32 %v20229_v23, %v24474_v13  ;;  %v20399_v13 = vld [vmem:[%s23984_s4 + $0x48] sm:$0xff]  ;;  %16820 = vmatpush1.bf16.msra.mxu0 %v20379_v24  ;;  %v1370_v38 = vand.u32 4294901760, %v1369_v32  ;;  %v1393_v44 = vsub.f32 %v20244_v42, %v24488_v25 }
  0x8e   :  { %v1363_v56 = vsub.f32 %v20232_v29, %v24475_v37  ;;  %24477 = vst [vmem:[#allocation33_spill] sm:$0xff] %v20391_v26  ;;  %v20404_v37 = vld [vmem:[%s23984_s4 + $0x58] sm:$0xff]  ;;  %v20406_v18 = vpack.c.bf16 %v1346_v16, %v1334_v8  ;;  %16822 = vmatprep.subr.bf16.mxu0 %v20391_v26  ;;  %v20437_v16 = vld [vmem:[%s23984_s4 + $0x50] sm:$0xff]  ;;  %v1358_v39 = vand.u32 4294901760, %v1357_v57  ;;  %v24487_v57 = vand.u32 4294901760, %v20242_v30 }
  0x8f   :  { %v1352_v3 = vand.u32 4294901760, %v1351_v2  ;;  %v24481_v2 = vand.u32 4294901760, %v20363_v53  ;;  %v24085_v11 = vand.u32 4294901760, %v20404_v37  ;;  %v24089_v1 = vand.u32 4294901760, %v20437_v16 }
  0x90   :  { %24478 = vst [vmem:[#allocation34_spill] sm:$0xff] %v20406_v18  ;;  %v1364_v17 = vand.u32 4294901760, %v1363_v56  ;;  %v20422_v56 = vld [vmem:[%s23984_s4 + $0x40] sm:$0xff]  ;;  %v24086_v18 = vand.u32 4294901760, %v20399_v13  ;;  %v20465_v20 = vpack.c.bf16 %v1370_v38, %v1358_v39  ;;  %v1381_v32 = vsub.f32 %v20242_v30, %v24487_v57 }
  0x91   :  { %v20430_v47 = vpack.c.bf16 %v24084_v60, %v24481_v2  ;;  %v20480_v39 = vld [vmem:[%s23984_s4 + $0x60] sm:$0xff] }
  0x92   :  { %v20424_v8 = vpack.c.bf16 %v1364_v17, %v1352_v3  ;;  %v24483_v17 = vand.u32 4294901760, %v20238_v4  ;;  %v20450_v60 = vpack.c.bf16 %v24085_v11, %v24086_v18  ;;  %24486 = vst [vmem:[#allocation38_spill] sm:$0xff] %v20465_v20  ;;  %v1382_v55 = vand.u32 4294901760, %v1381_v32 }
  0x93   :  { %24482 = vst [vmem:[#allocation36_spill] sm:$0xff] %v20430_v47  ;;  %16824 = vmatpush1.bf16.msra.mxu0 %v20430_v47  ;;  %v20495_v47 = vld [vmem:[%s23984_s4 + $0x70] sm:$0xff]  ;;  %v1394_v20 = vand.u32 4294901760, %v1393_v44  ;;  %v24101_v44 = vand.u32 4294901760, %v20252_v0 }
  0x94   :  { %24480 = vst [vmem:[#allocation35_spill] sm:$0xff] %v20424_v8  ;;  %v1375_v3 = vsub.f32 %v20238_v4, %v24483_v17  ;;  %v24484_v8 = vand.u32 4294901760, %v20240_v27  ;;  %24485 = vst [vmem:[#allocation37_spill] sm:$0xff] %v20450_v60  ;;  %v20458_v17 = vld [vmem:[%s23984_s4 + $0x68] sm:$0xff]  ;;  %16826 = vmatprep.subr.bf16.mxu0 %v20450_v60  ;;  %v24100_v60 = vand.u32 4294901760, %v20250_v54 }
  0x95   :  { %v24099_v57 = vand.u32 4294901760, %v20458_v17  ;;  %v20513_v26 = vpack.c.bf16 %v1394_v20, %v1382_v55  ;;  %v24497_v20 = vand.u32 4294901760, %v20480_v39 }
  0x96   :  { %v1387_v2 = vsub.f32 %v20240_v27, %v24484_v8  ;;  %v20463_v8 = vld [vmem:[%s23984_s4 + $0x78] sm:$0xff]  ;;  %v1376_v11 = vand.u32 4294901760, %v1375_v3  ;;  %v24490_v3 = vand.u32 4294901760, %v20422_v56 }
  0x97   :  { %v24098_v25 = vand.u32 4294901760, %v20463_v8  ;;  %24495 = vst [vmem:[#allocation42_spill] sm:$0xff] %v20513_v26  ;;  %v24500_v26 = vand.u32 4294901760, %v20303_v34 }
  0x98   :  { %v1388_v18 = vand.u32 4294901760, %v1387_v2  ;;  %v20488_v2 = vpack.c.bf16 %v24089_v1, %v24490_v3 }
  0x99   :  { %v20508_v1 = vpack.c.bf16 %v24098_v25, %v24099_v57  ;;  %v1417_v25 = vsub.f32 %v20252_v0, %v24101_v44  ;;  %v20541_v44 = vsub.f32 %v20303_v34, %v24500_v26  ;;  %v24114_v26 = vand.u32 4294901760, %v20280_v31 }
  0x9a   :  { %v20482_v38 = vpack.c.bf16 %v1388_v18, %v1376_v11  ;;  %24491 = vst [vmem:[#allocation40_spill] sm:$0xff] %v20488_v2  ;;  %v24492_v18 = vand.u32 4294901760, %v20246_v51  ;;  %16828 = vmatpush1.bf16.msra.mxu0 %v20488_v2  ;;  %v1405_v2 = vsub.f32 %v20250_v54, %v24100_v60 }
  0x9b   :  { %24494 = vst [vmem:[#allocation41_spill] sm:$0xff] %v20508_v1  ;;  %16830 = vmatprep.subr.bf16.mxu0 %v20508_v1  ;;  %v1418_v32 = vand.u32 4294901760, %v1417_v25 }
  0x9c   :  { %24489 = vst [vmem:[#allocation39_spill] sm:$0xff] %v20482_v38  ;;  %v1399_v11 = vsub.f32 %v20246_v51, %v24492_v18  ;;  %v24493_v38 = vand.u32 4294901760, %v20248_v48  ;;  %v1406_v57 = vand.u32 4294901760, %v1405_v2 }
  0x9e   :  { %v1411_v3 = vsub.f32 %v20248_v48, %v24493_v38  ;;  %v1400_v18 = vand.u32 4294901760, %v1399_v11  ;;  %v24102_v38 = vand.u32 4294901760, %v20495_v47  ;;  %v20554_v34 = vpack.c.bf16 %v1418_v32, %v1406_v57 }
  0x9f   :  { %v1441_v32 = vsub.f32 %v20280_v31, %v24114_v26  ;;  %v24507_v26 = vand.u32 4294901760, %v20337_v7 }
  0xa0   :  { %v1412_v24 = vand.u32 4294901760, %v1411_v3  ;;  %v20531_v11 = vpack.c.bf16 %v24102_v38, %v24497_v20  ;;  %v24499_v3 = vand.u32 4294901760, %v20298_v21  ;;  %v24109_v38 = vand.u32 4294901760, %v20278_v62  ;;  %24503 = vst [vmem:[#allocation45_spill] sm:$0xff] %v20554_v34 }
  0xa2   :  { %v20525_v55 = vpack.c.bf16 %v1412_v24, %v1400_v18  ;;  %24498 = vst [vmem:[#allocation44_spill] sm:$0xff] %v20531_v11  ;;  %v20536_v60 = vsub.f32 %v20298_v21, %v24499_v3  ;;  %v24501_v24 = vand.u32 4294901760, %v20274_v45  ;;  %16832 = vmatpush1.bf16.msra.mxu0 %v20531_v11  ;;  %v24108_v3 = vand.u32 4294901760, %v20541_v44 }
  0xa3   :  { %v1429_v57 = vsub.f32 %v20278_v62, %v24109_v38  ;;  %v1442_v62 = vand.u32 4294901760, %v1441_v32 }
  0xa4   :  { %24496 = vst [vmem:[#allocation43_spill] sm:$0xff] %v20525_v55  ;;  %v1423_v18 = vsub.f32 %v20274_v45, %v24501_v24  ;;  %v24502_v55 = vand.u32 4294901760, %v20276_v49  ;;  %v24107_v21 = vand.u32 4294901760, %v20536_v60  ;;  %v24504_v24 = vand.u32 4294901760, %v20316_v19 }
  0xa5   :  { %v2410_v11 = vsub.f32 %v20541_v44, %v24108_v3  ;;  %v1430_v50 = vand.u32 4294901760, %v1429_v57  ;;  %v24510_v3 = vand.u32 4294901760, %v20363_v53 }
  0xa6   :  { %v1435_v20 = vsub.f32 %v20276_v49, %v24502_v55  ;;  %v1424_v2 = vand.u32 4294901760, %v1423_v18  ;;  %v20559_v1 = vsub.f32 %v20316_v19, %v24504_v24  ;;  %v2398_v55 = vsub.f32 %v20536_v60, %v24107_v21 }
  0xa7   :  { %v24505_v19 = vmov 0.0   ;;  %v24506_v24 = vand.u32 4294901760, %v20327_v9  ;;  %v2411_v38 = vand.u32 4294901760, %v2410_v11  ;;  %v20601_v57 = vpack.c.bf16 %v1442_v62, %v1430_v50 }
  0xa8   :  { %v1436_v25 = vand.u32 4294901760, %v1435_v20  ;;  %2389 = vmatmul.mubr.f32.vlgmr.msra.gmra.mrb[8].mxu0 %v24505_v19  ;;  %v24115_v20 = vand.u32 4294901760, %v20559_v1  ;;  %v2399_v34 = vand.u32 4294901760, %v2398_v55  ;;  %v24512_v50 = vand.u32 4294901760, %v20373_v59 }
  0xa9   :  { %v20580_v21 = vsub.f32 %v20327_v9, %v24506_v24  ;;  %2539 = vmatprep.mubr.f32.mxu0 %v24505_v19  ;;  %v20592_v9 = vsub.f32 %v20337_v7, %v24507_v26  ;;  %v24508_v24 = vand.u32 4294901760, %v20342_v36 }
  0xaa   :  { %v20573_v18 = vpack.c.bf16 %v1436_v25, %v1424_v2  ;;  %v2404_v2 = vsub.f32 %v20559_v1, %v24115_v20  ;;  %v20599_v11 = vpack.c.bf16 %v2411_v38, %v2399_v34  ;;  %v20608_v20 = vsub.f32 %v20363_v53, %v24510_v3 }
  0xab   :  { %v20597_v55 = vsub.f32 %v20342_v36, %v24508_v24  ;;  %v24511_v7 = vand.u32 4294901760, %v20580_v21  ;;  %v24116_v36 = vand.u32 4294901760, %v20592_v9  ;;  %v20620_v34 = vsub.f32 %v20373_v59, %v24512_v50 }
  0xac   :  { %24509 = vst [vmem:[#allocation46_spill] sm:$0xff] %v20599_v11  ;;  %v2405_v25 = vand.u32 4294901760, %v2404_v2  ;;  %16834 = vmatprep.subr.bf16.mxu0 %v20599_v11  ;;  %v24121_v62 = vand.u32 4294901760, %v20608_v20  ;;  %v24513_v3 = vand.u32 4294901760, %v20399_v13  ;;  %v24514_v59 = vand.u32 4294901760, %v20404_v37 }
  0xad   :  { %v2416_v26 = vsub.f32 %v20580_v21, %v24511_v7  ;;  %v24118_v38 = vand.u32 4294901760, %v20597_v55  ;;  %v2422_v7 = vsub.f32 %v20592_v9, %v24116_v36 }
  0xae   :  { %v20627_v2 = vsub.f32 %v20399_v13, %v24513_v3  ;;  %v20638_v50 = vsub.f32 %v20404_v37, %v24514_v59  ;;  %v2428_v53 = vsub.f32 %v20608_v20, %v24121_v62  ;;  %v24125_v13 = vand.u32 4294901760, %v20620_v34 }
  0xaf   :  { %v2417_v24 = vand.u32 4294901760, %v2416_v26  ;;  %v2434_v32 = vsub.f32 %v20597_v55, %v24118_v38  ;;  %v2423_v63 = vand.u32 4294901760, %v2422_v7  ;;  %v24516_v62 = vand.u32 4294901760, %v20422_v56 }
  0xb0   :  { %v24123_v26 = vand.u32 4294901760, %v20627_v2  ;;  %v24124_v10 = vand.u32 4294901760, %v20638_v50  ;;  %v2429_v41 = vand.u32 4294901760, %v2428_v53  ;;  %v2440_v37 = vsub.f32 %v20620_v34, %v24125_v13 }
  0xb1   :  { %v20647_v36 = vpack.c.bf16 %v2417_v24, %v2405_v25  ;;  %v2435_v38 = vand.u32 4294901760, %v2434_v32  ;;  %v20659_v52 = vsub.f32 %v20422_v56, %v24516_v62  ;;  %v24518_v53 = vand.u32 4294901760, %v20437_v16 }
  0xb2   :  { %v2446_v59 = vsub.f32 %v20627_v2, %v24123_v26  ;;  %v2458_v32 = vsub.f32 %v20638_v50, %v24124_v10  ;;  %v2441_v3 = vand.u32 4294901760, %v2440_v37  ;;  %v24519_v62 = vand.u32 4294901760, %v20458_v17 }
  0xb3   :  { %24515 = vst [vmem:[#allocation47_spill] sm:$0xff] %v20647_v36  ;;  %16836 = vmatpush1.bf16.msra.mxu0 %v20647_v36  ;;  %v20662_v25 = vpack.c.bf16 %v2435_v38, %v2423_v63  ;;  %v20670_v24 = vsub.f32 %v20437_v16, %v24518_v53  ;;  %v24128_v56 = vand.u32 4294901760, %v20659_v52  ;;  %v24520_v16 = vand.u32 4294901760, %v20463_v8 }
  0xb4   :  { %v2447_v26 = vand.u32 4294901760, %v2446_v59  ;;  %v20678_v63 = vsub.f32 %v20458_v17, %v24519_v62  ;;  %v2459_v38 = vand.u32 4294901760, %v2458_v32  ;;  %v20689_v59 = vpack.c.bf16 %v2441_v3, %v2429_v41 }
  0xb5   :  { %24517 = vst [vmem:[#allocation48_spill] sm:$0xff] %v20662_v25  ;;  %16838 = vmatprep.subr.bf16.mxu0 %v20662_v25  ;;  %v24126_v10 = vand.u32 4294901760, %v20670_v24  ;;  %v20685_v53 = vsub.f32 %v20463_v8, %v24520_v16  ;;  %v2452_v17 = vsub.f32 %v20659_v52, %v24128_v56  ;;  %v24522_v32 = vand.u32 4294901760, %v20480_v39 }
  0xb6   :  { %24521 = vst [vmem:[#allocation49_spill] sm:$0xff] %v20689_v59  ;;  %v24127_v62 = vand.u32 4294901760, %v20678_v63  ;;  %v20700_v13 = vpack.c.bf16 %v2459_v38, %v2447_v26  ;;  %v24524_v3 = vand.u32 4294901760, %v20495_v47  ;;  %v24551_v25 = vand.u32 4294901760, %v20592_v9 }
  0xb7   :  { %v20698_v7 = vsub.f32 %v20480_v39, %v24522_v32  ;;  %v2464_v8 = vsub.f32 %v20670_v24, %v24126_v10  ;;  %v24129_v41 = vand.u32 4294901760, %v20685_v53  ;;  %16840 = vmatpush1.bf16.msra.mxu0 %v20689_v59  ;;  %v2453_v37 = vand.u32 4294901760, %v2452_v17 }
  0xb8   :  { %24523 = vst [vmem:[#allocation50_spill] sm:$0xff] %v20700_v13  ;;  %v20709_v16 = vsub.f32 %v20495_v47, %v24524_v3  ;;  %v2470_v39 = vsub.f32 %v20678_v63, %v24127_v62  ;;  %16842 = vmatprep.subr.bf16.mxu0 %v20700_v13  ;;  %v24538_v62 = vld [vmem:[#allocation32_spill] sm:$0xff]  ;;  %v24552_v36 = vand.u32 4294901760, %v20597_v55 }
  0xb9   :  { %v24132_v26 = vand.u32 4294901760, %v20698_v7  ;;  %v2465_v32 = vand.u32 4294901760, %v2464_v8  ;;  %v2482_v47 = vsub.f32 %v20685_v53, %v24129_v41  ;;  %v24537_v41 = vld [vmem:[#allocation29_spill] sm:$0xff] }
  0xba   :  { %v24135_v3 = vand.u32 4294901760, %v20709_v16  ;;  %v2471_v10 = vand.u32 4294901760, %v2470_v39 }
  0xbb   :  { %v2476_v17 = vsub.f32 %v20698_v7, %v24132_v26  ;;  %v20728_v56 = vpack.c.bf16 %v2465_v32, %v2453_v37  ;;  %v2483_v38 = vand.u32 4294901760, %v2482_v47  ;;  %v20744_v32 = vpack.c.bf16 %v20541_v44, %v20536_v60 }
  0xbc   :  { %v2488_v8 = vsub.f32 %v20709_v16, %v24135_v3  ;;  %v20789_v47 = vpack.c.bf16 %v20685_v53, %v20678_v63  ;;  %v20794_v37 = vpack.c.bf16 %v20709_v16, %v20698_v7  ;;  %v24539_v3 = vld [vmem:[#allocation33_spill] sm:$0xff] }
  0xbd   :  { %24525 = vst [vmem:[#allocation51_spill] sm:$0xff] %v20728_v56  ;;  %v2477_v13 = vand.u32 4294901760, %v2476_v17  ;;  %16844 = vmatpush1.bf16.msra.mxu0 %v20728_v56  ;;  %v20738_v26 = vpack.c.bf16 %v2483_v38, %v2471_v10  ;;  %24527 = vst [vmem:[#allocation53_spill] sm:$0xff] %v20744_v32  ;;  %v20758_v38 = vpack.c.bf16 %v20580_v21, %v20559_v1 }
  0xbe   :  { %v2489_v59 = vand.u32 4294901760, %v2488_v8  ;;  %v20765_v17 = vpack.c.bf16 %v20597_v55, %v20592_v9  ;;  %v20773_v10 = vpack.c.bf16 %v20620_v34, %v20608_v20  ;;  %v20779_v8 = vpack.c.bf16 %v20638_v50, %v20627_v2  ;;  %24535 = vst [vmem:[#allocation60_spill] sm:$0xff] %v20789_v47  ;;  %24536 = vst [vmem:[#allocation61_spill] sm:$0xff] %v20794_v37 }
  0xbf   :  { %24526 = vst [vmem:[#allocation52_spill] sm:$0xff] %v20738_v26  ;;  %16846 = vmatprep.subr.bf16.mxu0 %v20738_v26  ;;  %24529 = vst [vmem:[#allocation55_spill] sm:$0xff] %v20758_v38  ;;  %v24549_v26 = vand.u32 4294901760, %v20580_v21  ;;  %v24557_v21 = vand.u32 4294901760, %v20627_v2  ;;  %v24558_v9 = vand.u32 4294901760, %v20638_v50  ;;  %v24566_v2 = vand.u32 4294901760, %v20698_v7 }
  0xc0   :  { %v20751_v39 = vpack.c.bf16 %v2489_v59, %v2477_v13  ;;  %24530 = vst [vmem:[#allocation56_spill] sm:$0xff] %v20765_v17  ;;  %24532 = vst [vmem:[#allocation57_spill] sm:$0xff] %v20773_v10  ;;  %v20784_v59 = vpack.c.bf16 %v20670_v24, %v20659_v52  ;;  %v20825_v13 = vpack.c.bf16 %v24552_v36, %v24551_v25  ;;  %v24560_v36 = vand.u32 4294901760, %v20659_v52  ;;  %v15992_v52 = vld [vmem:[%s23985_s2] ss:$0 sm:$0xff] }
  0xc1   :  { %24533 = vst [vmem:[#allocation58_spill] sm:$0xff] %v20779_v8  ;;  %v20841_v55 = vpack.c.bf16 %v24558_v9, %v24557_v21  ;;  %v24567_v50 = vand.u32 4294901760, %v20709_v16 }
  0xc2   :  { %24528 = vst [vmem:[#allocation54_spill] sm:$0xff] %v20751_v39  ;;  %16848 = vmatpush1.bf16.msra.mxu0 %v20751_v39  ;;  %24534 = vst [vmem:[#allocation59_spill] sm:$0xff] %v20784_v59  ;;  %v24548_v39 = vand.u32 4294901760, %v20559_v1  ;;  %v24555_v1 = vand.u32 4294901760, %v20620_v34  ;;  %v24563_v34 = vand.u32 4294901760, %v20678_v63 }
  0xc3   :  { %16850 = vmatprep.subr.bf16.mxu0 %v20744_v32  ;;  %v24547_v32 = vld [vmem:[#allocation44_spill] sm:$0xff]  ;;  %24553 = vst [vmem:[#allocation64_spill] sm:$0xff] %v20825_v13  ;;  %24559 = vst [vmem:[#allocation66_spill] sm:$0xff] %v20841_v55 }
  0xc4   :  { %v20818_v56 = vpack.c.bf16 %v24549_v26, %v24548_v39  ;;  %v24564_v26 = vand.u32 4294901760, %v20685_v53 }
  0xc5   :  { %2541 = vmatmul.mubr.f32.vlgmr.msra.gmra.mrb[8].mxu0 %v24505_v19 }
  0xc6   :  { %16852 = vmatpush1.bf16.msra.mxu0 %v20758_v38  ;;  %2643 = vmatprep.mubr.f32.mxu0 %v24505_v19  ;;  %24550 = vst [vmem:[#allocation63_spill] sm:$0xff] %v20818_v56  ;;  %v20855_v39 = vpack.c.bf16 %v24564_v26, %v24563_v34 }
  0xc7   :  { %16854 = vmatprep.subr.bf16.mxu0 %v20765_v17  ;;  %v24543_v17 = vld [vmem:[#allocation41_spill] sm:$0xff] }
  0xc8   :  { %24565 = vst [vmem:[#allocation68_spill] sm:$0xff] %v20855_v39 }
  0xca   :  { %16856 = vmatpush1.bf16.msra.mxu0 %v20773_v10  ;;  %v24542_v10 = vld [vmem:[#allocation40_spill] sm:$0xff] }
  0xcb   :  { %16858 = vmatprep.subr.bf16.mxu0 %v20779_v8  ;;  %v24540_v8 = vld [vmem:[#allocation36_spill] sm:$0xff] }
  0xce   :  { %16860 = vmatpush1.bf16.msra.mxu0 %v20784_v59  ;;  %v24541_v59 = vld [vmem:[#allocation37_spill] sm:$0xff] }
  0xcf   :  { %16862 = vmatprep.subr.bf16.mxu0 %v20789_v47  ;;  %v24545_v47 = vand.u32 4294901760, %v20541_v44 }
  0xd2   :  { %16864 = vmatpush1.bf16.msra.mxu0 %v20794_v37  ;;  %v24544_v37 = vand.u32 4294901760, %v20536_v60  ;;  %v24554_v60 = vand.u32 4294901760, %v20608_v20  ;;  %v24561_v20 = vand.u32 4294901760, %v20670_v24 }
  0xd3   :  { %16866 = vmatprep.subr.bf16.mxu0 %v24537_v41 }
  0xd4   :  { %v20811_v38 = vpack.c.bf16 %v24545_v47, %v24544_v37  ;;  %v20833_v44 = vpack.c.bf16 %v24555_v1, %v24554_v60  ;;  %v20848_v25 = vpack.c.bf16 %v24561_v20, %v24560_v36  ;;  %v20862_v37 = vpack.c.bf16 %v24567_v50, %v24566_v2 }
  0xd5   :  { %2646 = vmatmul.mubr.f32.vlgmr.msra.gmra.mrb[8].mxu0 %v24505_v19 }
  0xd6   :  { %16868 = vmatpush1.bf16.msra.mxu0 %v24538_v62  ;;  %2732 = vmatprep.mubr.f32.mxu0 %v24505_v19  ;;  %24546 = vst [vmem:[#allocation62_spill] sm:$0xff] %v20811_v38  ;;  %24556 = vst [vmem:[#allocation65_spill] sm:$0xff] %v20833_v44 }
  0xd7   :  { %16870 = vmatprep.subr.bf16.mxu0 %v24539_v3  ;;  %24562 = vst [vmem:[#allocation67_spill] sm:$0xff] %v20848_v25  ;;  %24568 = vst [vmem:[#allocation69_spill] sm:$0xff] %v20862_v37 }
  0xda   :  { %16872 = vmatpush1.bf16.msra.mxu0 %v24540_v8 }
  0xdb   :  { %16874 = vmatprep.subr.bf16.mxu0 %v24541_v59 }
  0xde   :  { %16876 = vmatpush1.bf16.msra.mxu0 %v24542_v10 }
  0xdf   :  { %16878 = vmatprep.subr.bf16.mxu0 %v24543_v17 }
  0xe2   :  { %16880 = vmatpush1.bf16.msra.mxu0 %v24547_v32 }
  0xe3   :  { %16882 = vmatprep.subr.bf16.mxu0 %v20811_v38 }
  0xe5   :  { %2736 = vmatmul.mubr.f32.vlgmr.msra.gmra.mrb[8].mxu0 %v24505_v19 }
  0xe6   :  { %16884 = vmatpush1.bf16.msra.mxu0 %v20818_v56  ;;  %2854 = vmatprep.mubr.f32.mxu0 %v24505_v19 }
  0xe7   :  { %16886 = vmatprep.subr.bf16.mxu0 %v20825_v13 }
  0xea   :  { %16888 = vmatpush1.bf16.msra.mxu0 %v20833_v44 }
  0xeb   :  { %16890 = vmatprep.subr.bf16.mxu0 %v20841_v55 }
  0xee   :  { %16892 = vmatpush1.bf16.msra.mxu0 %v20848_v25 }
  0xef   :  { %16894 = vmatprep.subr.bf16.mxu0 %v20855_v39 }
  0xf2   :  { %16896 = vmatpush1.bf16.msra.mxu0 %v20862_v37 }
  0xf3   :  { %16898 = vmatprep.subr.bf16.mxu0 %v24537_v41 }
  0xf5   :  { %2856 = vmatmul.mubr.f32.vlgmr.msra.gmra.mrb[8].mxu0 %v24505_v19 }
  0xf6   :  { %16900 = vmatpush1.bf16.msra.mxu0 %v24538_v62  ;;  %2942 = vmatprep.mubr.f32.mxu0 %v24505_v19 }
  0xf7   :  { %16902 = vmatprep.subr.bf16.mxu0 %v24539_v3 }
  0xfa   :  { %16904 = vmatpush1.bf16.msra.mxu0 %v24540_v8 }
  0xfb   :  { %16906 = vmatprep.subr.bf16.mxu0 %v24541_v59 }
  0xfe   :  { %16908 = vmatpush1.bf16.msra.mxu0 %v24542_v10 }
  0xff   :  { %16910 = vmatprep.subr.bf16.mxu0 %v24543_v17 }
 0x102   :  { %16912 = vmatpush1.bf16.msra.mxu0 %v24547_v32 }
 0x103   :  { %17010 = vmatprep.subr.bf16.mxu0 %v24537_v41  ;;  %v24621_v41 = vld [vmem:[#allocation17_spill] sm:$0xff] }
 0x105   :  { %2944 = vmatmul.mubr.f32.vlgmr.msra.gmra.mrb[8].mxu0 %v24505_v19 }
 0x106   :  { %17012 = vmatpush1.bf16.msra.mxu0 %v24538_v62  ;;  %3806 = vmatprep.mubr.f32.mxu0 %v24505_v19  ;;  %v24620_v62 = vld [vmem:[#allocation30_spill] sm:$0xff] }
 0x107   :  { %17014 = vmatprep.subr.bf16.mxu0 %v24539_v3  ;;  %v24619_v3 = vld [vmem:[#allocation12_spill] sm:$0xff] }
 0x10a   :  { %17016 = vmatpush1.bf16.msra.mxu0 %v24540_v8  ;;  %v24618_v8 = vld [vmem:[#allocation11_spill] sm:$0xff] }
 0x10b   :  { %17018 = vmatprep.subr.bf16.mxu0 %v24541_v59  ;;  %v24617_v59 = vld [vmem:[#allocation10_spill] sm:$0xff] }
 0x10e   :  { %17020 = vmatpush1.bf16.msra.mxu0 %v24542_v10  ;;  %v24616_v10 = vld [vmem:[#allocation5_spill] sm:$0xff] }
 0x10f   :  { %17022 = vmatprep.subr.bf16.mxu0 %v24543_v17  ;;  %v24615_v17 = vld [vmem:[#allocation16_spill] sm:$0xff] }
 0x112   :  { %17024 = vmatpush1.bf16.msra.mxu0 %v24547_v32  ;;  %v24581_v32 = vld [vmem:[#allocation38_spill] sm:$0xff] }
 0x113   :  { %17026 = vmatprep.subr.bf16.mxu0 %v20599_v11  ;;  %v24614_v11 = vld [vmem:[#allocation15_spill] sm:$0xff] }
 0x13a   :  { %v16291_v24 = vpop.f32.mrb[0].mxu1  ;;  %v16423_v7 = vpop.f32.mrb[0].mxu0 }
 0x13b   :  { %v18545_v63 = vadd.f32 %v16291_v24, %v15992_v52  ;;  %v527_v53 = vpop.f32.mrb[1].mxu1  ;;  %v969_v16 = vpop.f32.mrb[1].mxu0 }
 0x13c   :  { %v18547_v47 = vadd.f32 %v15992_v52, %v527_v53 }
 0x13d   :  { %v18546_v60 = vadd.f32 %v18545_v63, %v16423_v7 }
 0x13e   :  { %v18548_v1 = vadd.f32 %v18547_v47, %v969_v16  ;;  %v16294_v21 = vpop.f32.mrb[2].mxu1  ;;  %v16426_v9 = vpop.f32.mrb[2].mxu0 }
 0x13f   :  { %v1016_v36 = vmax.f32 %v18546_v60, 0.0  ;;  %v18549_v20 = vadd.f32 %v16294_v21, %v15992_v52  ;;  %v541_v34 = vpop.f32.mrb[3].mxu1  ;;  %v981_v26 = vpop.f32.mrb[3].mxu0 }
 0x140   :  { %v1015_v2 = vmax.f32 %v18548_v1, 0.0  ;;  %v18551_v50 = vadd.f32 %v15992_v52, %v541_v34 }
 0x141   :  { %v20876_v37 = vand.u32 4294901760, %v1016_v36  ;;  %v18550_v24 = vadd.f32 %v18549_v20, %v16426_v9 }
 0x142   :  { %v20879_v53 = vand.u32 4294901760, %v1015_v2  ;;  %v18552_v7 = vadd.f32 %v18551_v50, %v981_v26  ;;  %v16297_v63 = vpop.f32.mrb[4].mxu1  ;;  %v16429_v16 = vpop.f32.mrb[4].mxu0 }
 0x143   :  { %v20883_v47 = vsub.f32 %v1016_v36, %v20876_v37  ;;  %v1018_v60 = vmax.f32 %v18550_v24, 0.0  ;;  %v18553_v21 = vadd.f32 %v16297_v63, %v15992_v52  ;;  %v555_v39 = vpop.f32.mrb[5].mxu1  ;;  %v993_v1 = vpop.f32.mrb[5].mxu0 }
 0x144   :  { %v20886_v34 = vsub.f32 %v1015_v2, %v20879_v53  ;;  %v1017_v9 = vmax.f32 %v18552_v7, 0.0  ;;  %v18555_v20 = vadd.f32 %v15992_v52, %v555_v39 }
 0x145   :  { %v20888_v25 = vand.u32 4294901760, %v1018_v60  ;;  %v18554_v55 = vadd.f32 %v18553_v21, %v16429_v16 }
 0x146   :  { %v24178_v50 = vand.u32 4294901760, %v20886_v34  ;;  %v20893_v36 = vand.u32 4294901760, %v1017_v9  ;;  %v18556_v24 = vadd.f32 %v18555_v20, %v993_v1  ;;  %v16300_v63 = vpop.f32.mrb[6].mxu1  ;;  %v16432_v44 = vpop.f32.mrb[6].mxu0 }
 0x147   :  { %v18557_v2 = vadd.f32 %v16300_v63, %v15992_v52  ;;  %v569_v13 = vpop.f32.mrb[7].mxu1  ;;  %v1005_v7 = vpop.f32.mrb[7].mxu0  ;;  %v20904_v1 = vsub.f32 %v1018_v60, %v20888_v25  ;;  %v1020_v20 = vmax.f32 %v18554_v55, 0.0  ;;  %v24569_v63 = vand.u32 4294901760, %v20883_v47 }
 0x148   :  { %v1167_v39 = vsub.f32 %v20886_v34, %v24178_v50  ;;  %v20900_v16 = vsub.f32 %v1017_v9, %v20893_v36  ;;  %v1019_v21 = vmax.f32 %v18556_v24, 0.0  ;;  %v18559_v26 = vadd.f32 %v15992_v52, %v569_v13 }
 0x149   :  { %v18558_v56 = vadd.f32 %v18557_v2, %v16432_v44  ;;  %v1178_v38 = vsub.f32 %v20883_v47, %v24569_v63  ;;  %v20915_v52 = vand.u32 4294901760, %v1020_v20  ;;  %v24571_v44 = vld [vmem:[#allocation23_spill] sm:$0xff] }
 0x14a   :  { %v1168_v50 = vand.u32 4294901760, %v1167_v39  ;;  %v20911_v9 = vand.u32 4294901760, %v1019_v21  ;;  %v18560_v24 = vadd.f32 %v18559_v26, %v1005_v7  ;;  %v24179_v13 = vand.u32 4294901760, %v20900_v16  ;;  %v24572_v39 = vld [vmem:[#allocation25_spill] sm:$0xff] }
 0x14b   :  { %24570 = vst [vmem:[#allocation70_spill] sm:$0xff] %v20915_v52  ;;  %v1179_v55 = vand.u32 4294901760, %v1178_v38  ;;  %v24180_v7 = vand.u32 4294901760, %v20904_v1  ;;  %v1022_v38 = vmax.f32 %v18558_v56, 0.0 }
 0x14c   :  { %1169 = vmatmul.mubr.f32.vlgmr.msra.gmra.mrb[8].mxu1 %v1168_v50  ;;  %v20920_v60 = vsub.f32 %v1019_v21, %v20911_v9  ;;  %v1021_v2 = vmax.f32 %v18560_v24, 0.0  ;;  %v1189_v26 = vsub.f32 %v20900_v16, %v24179_v13  ;;  %v20930_v50 = vsub.f32 %v1020_v20, %v20915_v52  ;;  %v24573_v21 = vld [vmem:[#allocation26_spill] sm:$0xff]  ;;  %v24575_v24 = vld [vmem:[#allocation27_spill] sm:$0xff]  ;;  %v24577_v20 = vld [vmem:[#allocation28_spill] sm:$0xff] }
 0x14d   :  { %16660 = vmatpush1.bf16.msra.mxu1 %v24571_v44  ;;  %1174 = vmatprep.mubr.f32.mxu1 %v24505_v19  ;;  %v20943_v56 = vand.u32 4294901760, %v1022_v38 }
 0x14e   :  { %16662 = vmatprep.subr.bf16.mxu1 %v24572_v39  ;;  %v20934_v63 = vand.u32 4294901760, %v1021_v2  ;;  %v1190_v44 = vand.u32 4294901760, %v1189_v26  ;;  %v1200_v39 = vsub.f32 %v20904_v1, %v24180_v7  ;;  %v24181_v13 = vand.u32 4294901760, %v20920_v60  ;;  %v24578_v26 = vld [vmem:[#allocation31_spill] sm:$0xff] }
 0x14f   :  { %24576 = vst [vmem:[#allocation25_spill] sm:$0xff] %v20943_v56  ;;  %v24183_v7 = vand.u32 4294901760, %v20930_v50 }
 0x150   :  { %1180 = vmatmul.mubr.f32.gmra.mrb[10].mxu1 %v1179_v55  ;;  %24574 = vst [vmem:[#allocation23_spill] sm:$0xff] %v20934_v63  ;;  %v20948_v55 = vsub.f32 %v1021_v2, %v20934_v63  ;;  %v20960_v2 = vsub.f32 %v1022_v38, %v20943_v56 }
 0x151   :  { %16664 = vmatpush1.bf16.msra.mxu1 %v24573_v21  ;;  %1185 = vmatprep.mubr.f32.mxu1 %v24505_v19  ;;  %v1201_v21 = vand.u32 4294901760, %v1200_v39 }
 0x152   :  { %16666 = vmatprep.subr.bf16.mxu1 %v24575_v24  ;;  %v1211_v24 = vsub.f32 %v20920_v60, %v24181_v13  ;;  %v24185_v13 = vand.u32 4294901760, %v20948_v55 }
 0x154   :  { %1191 = vmatmul.mubr.f32.gmra.mrb[12].mxu1 %v1190_v44  ;;  %v24579_v44 = vld [vmem:[#allocation34_spill] sm:$0xff]  ;;  %v1212_v39 = vand.u32 4294901760, %v1211_v24  ;;  %v1233_v38 = vsub.f32 %v20948_v55, %v24185_v13  ;;  %v24184_v24 = vand.u32 4294901760, %v20960_v2 }
 0x155   :  { %16668 = vmatpush1.bf16.msra.mxu1 %v24577_v20  ;;  %1196 = vmatprep.mubr.f32.mxu1 %v24505_v19  ;;  %v24580_v20 = vld [vmem:[#allocation35_spill] sm:$0xff]  ;;  %v24613_v13 = vld [vmem:[#allocation14_spill] sm:$0xff] }
 0x156   :  { %16670 = vmatprep.subr.bf16.mxu1 %v24578_v26  ;;  %v1222_v26 = vsub.f32 %v20930_v50, %v24183_v7  ;;  %v24584_v7 = vld [vmem:[#allocation43_spill] sm:$0xff] }
 0x158   :  { %1202 = vmatmul.mubr.f32.gmra.mrb[14].mxu1 %v1201_v21  ;;  %v24582_v21 = vld [vmem:[#allocation39_spill] sm:$0xff] }
 0x159   :  { %16672 = vmatpush1.bf16.msra.mxu1 %v24579_v44  ;;  %1207 = vmatprep.mubr.f32.mxu1 %v24505_v19  ;;  %v1223_v44 = vand.u32 4294901760, %v1222_v26  ;;  %v24585_v26 = vld [vmem:[#allocation45_spill] sm:$0xff] }
 0x15a   :  { %16674 = vmatprep.subr.bf16.mxu1 %v24580_v20  ;;  %v24583_v20 = vld [vmem:[#allocation42_spill] sm:$0xff] }
 0x15c   :  { %1213 = vmatmul.mubr.f32.gmra.mrb[16].mxu1 %v1212_v39  ;;  %v1234_v39 = vand.u32 4294901760, %v1233_v38  ;;  %v24588_v38 = vld [vmem:[#allocation19_spill] sm:$0xff] }
 0x15d   :  { %16676 = vmatpush1.bf16.msra.mxu1 %v24581_v32  ;;  %1218 = vmatprep.mubr.f32.mxu1 %v24505_v19  ;;  %v1244_v32 = vsub.f32 %v20960_v2, %v24184_v24  ;;  %v24611_v24 = vld [vmem:[#allocation8_spill] sm:$0xff] }
 0x15e   :  { %16678 = vmatprep.subr.bf16.mxu1 %v24582_v21 }
 0x15f   :  { %v1245_v21 = vand.u32 4294901760, %v1244_v32 }
 0x160   :  { %1224 = vmatmul.mubr.f32.gmra.mrb[18].mxu1 %v1223_v44  ;;  %v24587_v44 = vld [vmem:[#allocation20_spill] sm:$0xff] }
 0x161   :  { %16680 = vmatpush1.bf16.msra.mxu1 %v24583_v20  ;;  %1229 = vmatprep.mubr.f32.mxu1 %v24505_v19  ;;  %v24589_v20 = vpack.c.bf16 %v24587_v44, %v24588_v38 }
 0x162   :  { %16682 = vmatprep.subr.bf16.mxu1 %v24584_v7  ;;  %v24586_v7 = vpack.c.bf16 %v24447_v35, %v24446_v46 }
 0x164   :  { %1235 = vmatmul.mubr.f32.gmra.mrb[20].mxu1 %v1234_v39  ;;  %v24590_v39 = vld [vmem:[#allocation22_spill] sm:$0xff] }
 0x165   :  { %16684 = vmatpush1.bf16.msra.mxu1 %v24585_v26  ;;  %1240 = vmatprep.mubr.f32.mxu1 %v24505_v19  ;;  %v24594_v26 = vpack.c.bf16 %v24462_v61, %v24461_v58 }
 0x166   :  { %16686 = vmatprep.subr.bf16.mxu1 %v20573_v18  ;;  %v24591_v18 = vld [vmem:[#allocation21_spill] sm:$0xff] }
 0x167   :  { %v24592_v32 = vpack.c.bf16 %v24590_v39, %v24591_v18 }
 0x168   :  { %1246 = vmatmul.mubr.f32.gmra.mrb[22].mxu1 %v1245_v21  ;;  %v24595_v21 = vpack.c.bf16 %v19960_v40, %v24463_v28 }
 0x169   :  { %16688 = vmatpush1.bf16.msra.mxu1 %v20601_v57  ;;  %1476 = vmatprep.mubr.f32.mxu1 %v24505_v19  ;;  %v24593_v57 = vpack.c.bf16 %v24455_v14, %v24454_v12 }
 0x16a   :  { %16690 = vmatprep.subr.bf16.mxu1 %v24586_v7  ;;  %v24596_v7 = vpack.c.bf16 %v24468_v15, %v24465_v5 }
 0x16c   :  { %1478 = vmatmul.mubr.f32.vlgmr.msra.gmra.mrb[8].mxu1 %v20879_v53 }
 0x16d   :  { %16692 = vmatpush1.bf16.msra.mxu1 %v24589_v20  ;;  %1483 = vmatprep.mubr.f32.mxu1 %v24505_v19  ;;  %v24597_v20 = vpack.c.bf16 %v19996_v33, %v19981_v43 }
 0x16e   :  { %16694 = vmatprep.subr.bf16.mxu1 %v24592_v32  ;;  %v24598_v32 = vpack.c.bf16 %v20232_v29, %v20229_v23 }
 0x170   :  { %1485 = vmatmul.mubr.f32.gmra.mrb[10].mxu1 %v20876_v37 }
 0x171   :  { %16696 = vmatpush1.bf16.msra.mxu1 %v24593_v57  ;;  %1490 = vmatprep.mubr.f32.mxu1 %v24505_v19  ;;  %v24599_v57 = vpack.c.bf16 %v20236_v22, %v20234_v6 }
 0x172   :  { %16698 = vmatprep.subr.bf16.mxu1 %v24594_v26  ;;  %v24600_v26 = vpack.c.bf16 %v20240_v27, %v20238_v4 }
 0x174   :  { %1492 = vmatmul.mubr.f32.gmra.mrb[12].mxu1 %v20893_v36 }
 0x175   :  { %16700 = vmatpush1.bf16.msra.mxu1 %v24595_v21  ;;  %1497 = vmatprep.mubr.f32.mxu1 %v24505_v19  ;;  %v24601_v21 = vpack.c.bf16 %v20244_v42, %v20242_v30 }
 0x176   :  { %16702 = vmatprep.subr.bf16.mxu1 %v24596_v7  ;;  %v24602_v7 = vpack.c.bf16 %v20248_v48, %v20246_v51 }
 0x178   :  { %1499 = vmatmul.mubr.f32.gmra.mrb[14].mxu1 %v20888_v25 }
 0x179   :  { %16704 = vmatpush1.bf16.msra.mxu1 %v24597_v20  ;;  %1504 = vmatprep.mubr.f32.mxu1 %v24505_v19  ;;  %v24603_v20 = vpack.c.bf16 %v20252_v0, %v20250_v54 }
 0x17a   :  { %16706 = vmatprep.subr.bf16.mxu1 %v24598_v32  ;;  %v24604_v32 = vpack.c.bf16 %v20276_v49, %v20274_v45 }
 0x17c   :  { %1506 = vmatmul.mubr.f32.gmra.mrb[16].mxu1 %v20911_v9 }
 0x17d   :  { %16708 = vmatpush1.bf16.msra.mxu1 %v24599_v57  ;;  %1511 = vmatprep.mubr.f32.mxu1 %v24505_v19  ;;  %v24605_v57 = vld [vmem:[#allocation24_spill] sm:$0xff] }
 0x17e   :  { %16710 = vmatprep.subr.bf16.mxu1 %v24600_v26  ;;  %v24606_v26 = vpack.c.bf16 %v20280_v31, %v24605_v57 }
 0x180   :  { %1513 = vmatmul.mubr.f32.gmra.mrb[18].mxu1 %v20915_v52 }
 0x181   :  { %16712 = vmatpush1.bf16.msra.mxu1 %v24601_v21  ;;  %1518 = vmatprep.mubr.f32.mxu1 %v24505_v19  ;;  %v24607_v21 = vld [vmem:[#allocation13_spill] sm:$0xff] }
 0x182   :  { %16714 = vmatprep.subr.bf16.mxu1 %v24602_v7  ;;  %v24608_v7 = vld [vmem:[#allocation6_spill] sm:$0xff] }
 0x184   :  { %1520 = vmatmul.mubr.f32.gmra.mrb[20].mxu1 %v20934_v63  ;;  %v24623_v63 = vand.u32 4294901760, %v24447_v35  ;;  %v24629_v35 = vand.u32 4294901760, %v20886_v34 }
 0x185   :  { %16716 = vmatpush1.bf16.msra.mxu1 %v24603_v20  ;;  %1525 = vmatprep.mubr.f32.mxu1 %v24505_v19  ;;  %v24609_v20 = vld [vmem:[#allocation4_spill] sm:$0xff] }
 0x186   :  { %16718 = vmatprep.subr.bf16.mxu1 %v24604_v32  ;;  %v24610_v32 = vld [vmem:[#allocation7_spill] sm:$0xff] }
 0x188   :  { %1527 = vmatmul.mubr.f32.gmra.mrb[22].mxu1 %v20943_v56  ;;  %v24622_v56 = vand.u32 4294901760, %v24446_v46 }
 0x189   :  { %16720 = vmatpush1.bf16.msra.mxu1 %v24606_v26  ;;  %1661 = vmatprep.mubr.f32.mxu1 %v24505_v19  ;;  %v24612_v26 = vld [vmem:[#allocation9_spill] sm:$0xff] }
 0x18a   :  { %16722 = vmatprep.subr.bf16.mxu1 %v24607_v21  ;;  %v16753_v52 = vpack.c.bf16 %v24623_v63, %v24622_v56  ;;  %v24630_v63 = vand.u32 4294901760, %v24454_v12  ;;  %v24631_v56 = vand.u32 4294901760, %v24455_v14  ;;  %v24637_v14 = vand.u32 4294901760, %v24465_v5 }
 0x18c   :  { %1664 = vmatmul.mubr.f32.vlgmr.msra.gmra.mrb[8].mxu1 %v20886_v34  ;;  %v24641_v34 = vand.u32 4294901760, %v19996_v33  ;;  %v24647_v33 = vand.u32 4294901760, %v20238_v4 }
 0x18d   :  { %16724 = vmatpush1.bf16.msra.mxu1 %v24608_v7  ;;  %1669 = vmatprep.mubr.f32.mxu1 %v24505_v19 }
 0x18e   :  { %16726 = vmatprep.subr.bf16.mxu1 %v24609_v20 }
 0x190   :  { %1672 = vmatmul.mubr.f32.gmra.mrb[10].mxu1 %v20883_v47 }
 0x191   :  { %16728 = vmatpush1.bf16.msra.mxu1 %v24610_v32  ;;  %1677 = vmatprep.mubr.f32.mxu1 %v24505_v19 }
 0x192   :  { %16730 = vmatprep.subr.bf16.mxu1 %v24611_v24 }
 0x194   :  { %1680 = vmatmul.mubr.f32.gmra.mrb[12].mxu1 %v20900_v16 }
 0x195   :  { %16732 = vmatpush1.bf16.msra.mxu1 %v24612_v26  ;;  %1685 = vmatprep.mubr.f32.mxu1 %v24505_v19 }
 0x196   :  { %16734 = vmatprep.subr.bf16.mxu1 %v24613_v13 }
 0x198   :  { %1688 = vmatmul.mubr.f32.gmra.mrb[14].mxu1 %v20904_v1 }
 0x199   :  { %16736 = vmatpush1.bf16.msra.mxu1 %v24614_v11  ;;  %1693 = vmatprep.mubr.f32.mxu1 %v24505_v19 }
 0x19a   :  { %16738 = vmatprep.subr.bf16.mxu1 %v24615_v17 }
 0x19c   :  { %1696 = vmatmul.mubr.f32.gmra.mrb[16].mxu1 %v20920_v60 }
 0x19d   :  { %16740 = vmatpush1.bf16.msra.mxu1 %v24616_v10  ;;  %1701 = vmatprep.mubr.f32.mxu1 %v24505_v19  ;;  %v24627_v10 = vand.u32 4294901760, %v24591_v18  ;;  %v24646_v18 = vand.u32 4294901760, %v20236_v22  ;;  %v24652_v22 = vand.u32 4294901760, %v20246_v51 }
 0x19e   :  { %16742 = vmatprep.subr.bf16.mxu1 %v24617_v59  ;;  %v24626_v59 = vand.u32 4294901760, %v24587_v44  ;;  %v24634_v44 = vand.u32 4294901760, %v20883_v47  ;;  %v24640_v47 = vand.u32 4294901760, %v19981_v43 }
 0x1a0   :  { %1704 = vmatmul.mubr.f32.gmra.mrb[18].mxu1 %v20930_v50 }
 0x1a1   :  { %16744 = vmatpush1.bf16.msra.mxu1 %v24618_v8  ;;  %1709 = vmatprep.mubr.f32.mxu1 %v24505_v19  ;;  %v24624_v8 = vld [vmem:[#allocation18_spill] sm:$0xff] }
 0x1a2   :  { %16746 = vmatprep.subr.bf16.mxu1 %v24619_v3  ;;  %v24625_v3 = vand.u32 4294901760, %v24588_v38  ;;  %v16759_v38 = vpack.c.bf16 %v24631_v56, %v24630_v63  ;;  %v24653_v63 = vand.u32 4294901760, %v20248_v48  ;;  %v24656_v56 = vand.u32 4294901760, %v20252_v0 }
 0x1a3   :  { %v24659_v48 = vand.u32 4294901760, %v20948_v55  ;;  %v24662_v0 = vand.u32 4294901760, %v20960_v2 }
 0x1a4   :  { %1712 = vmatmul.mubr.f32.gmra.mrb[20].mxu1 %v20948_v55  ;;  %v16777_v4 = vpack.c.bf16 %v24653_v63, %v24652_v22  ;;  %v24666_v55 = vld [vmem:[#allocation11_spill] sm:$0xff] }
 0x1a5   :  { %16748 = vmatpush1.bf16.msra.mxu1 %v24620_v62  ;;  %1717 = vmatprep.mubr.f32.mxu1 %v24505_v19  ;;  %v16755_v62 = vpack.c.bf16 %v24626_v59, %v24625_v3  ;;  %v24632_v3 = vand.u32 4294901760, %v24461_v58  ;;  %v24633_v59 = vand.u32 4294901760, %v24462_v61  ;;  %v24639_v61 = vand.u32 4294901760, %v20900_v16 }
 0x1a6   :  { %16750 = vmatprep.subr.bf16.mxu1 %v24621_v41  ;;  %v24628_v41 = vand.u32 4294901760, %v24590_v39  ;;  %v24643_v39 = vand.u32 4294901760, %v20232_v29  ;;  %v24645_v16 = vand.u32 4294901760, %v20234_v6  ;;  %v24649_v29 = vand.u32 4294901760, %v20920_v60 }
 0x1a7   :  { %v24655_v60 = vand.u32 4294901760, %v20250_v54 }
 0x1a8   :  { %1720 = vmatmul.mubr.f32.gmra.mrb[22].mxu1 %v20960_v2  ;;  %v16757_v46 = vpack.c.bf16 %v24628_v41, %v24627_v10  ;;  %v24636_v41 = vand.u32 4294901760, %v19960_v40  ;;  %v24638_v10 = vand.u32 4294901760, %v24468_v15  ;;  %v24642_v40 = vand.u32 4294901760, %v20229_v23  ;;  %v24669_v2 = vld [vmem:[#allocation30_spill] sm:$0xff] }
 0x1a9   :  { %16752 = vmatpush1.bf16.msra.mxu1 %v24624_v8  ;;  %1822 = vmatprep.mubr.f32.mxu1 %v24505_v19  ;;  %v24644_v15 = vand.u32 4294901760, %v20904_v1  ;;  %v16771_v43 = vpack.c.bf16 %v24646_v18, %v24645_v16  ;;  %v24650_v1 = vand.u32 4294901760, %v20242_v30  ;;  %v16779_v30 = vpack.c.bf16 %v24656_v56, %v24655_v60 }
 0x1aa   :  { %16754 = vmatprep.subr.bf16.mxu1 %v16753_v52  ;;  %v16761_v52 = vpack.c.bf16 %v24633_v59, %v24632_v3  ;;  %v16765_v58 = vpack.c.bf16 %v24638_v10, %v24637_v14  ;;  %v16769_v5 = vpack.c.bf16 %v24643_v39, %v24642_v40  ;;  %v24661_v3 = vand.u32 4294901760, %v20280_v31  ;;  %v24665_v31 = vld [vmem:[#allocation70_spill] sm:$0xff] }
 0x1ab   :  { %v1057_v59 = vlaneseq }
 0x1ac   :  { %1826 = vmatmul.mubr.f32.vlgmr.msra.gmra.mrb[8].mxu1 %v24629_v35  ;;  %v24651_v35 = vand.u32 4294901760, %v20244_v42  ;;  %v24657_v42 = vand.u32 4294901760, %v20274_v45  ;;  %v24663_v45 = vld [vmem:[#allocation5_spill] sm:$0xff] }
 0x1ad   :  { %16756 = vmatpush1.bf16.msra.mxu1 %v16755_v62  ;;  %1831 = vmatprep.mubr.f32.mxu1 %v24505_v19  ;;  %v24635_v62 = vand.u32 4294901760, %v24463_v28  ;;  %v16767_v28 = vpack.c.bf16 %v24641_v34, %v24640_v47 }
 0x1ae   :  { %16758 = vmatprep.subr.bf16.mxu1 %v16757_v46  ;;  %v24648_v46 = vand.u32 4294901760, %v20240_v27  ;;  %v16775_v6 = vpack.c.bf16 %v24651_v35, %v24650_v1  ;;  %v24654_v27 = vand.u32 4294901760, %v20930_v50  ;;  %v24660_v50 = vand.u32 4294901760, %v24605_v57  ;;  %v24672_v57 = vld [vmem:[#allocation29_spill] sm:$0xff] }
 0x1af   :  { %v16763_v12 = vpack.c.bf16 %v24636_v41, %v24635_v62 }
 0x1b0   :  { %1835 = vmatmul.mubr.f32.gmra.mrb[10].mxu1 %v24634_v44  ;;  %v16773_v23 = vpack.c.bf16 %v24648_v46, %v24647_v33  ;;  %v16783_v54 = vpack.c.bf16 %v24661_v3, %v24660_v50 }
 0x1b1   :  { %16760 = vmatpush1.bf16.msra.mxu1 %v16759_v38  ;;  %1840 = vmatprep.mubr.f32.mxu1 %v24505_v19  ;;  %v24658_v38 = vand.u32 4294901760, %v20276_v49  ;;  %v24664_v49 = vld [vmem:[#allocation10_spill] sm:$0xff] }
 0x1b2   :  { %16762 = vmatprep.subr.bf16.mxu1 %v16761_v52  ;;  %v1058_v52 = vshrl.u32 %v1057_v59, 7 }
 0x1b3   :  { %v16781_v51 = vpack.c.bf16 %v24658_v38, %v24657_v42 }
 0x1b4   :  { %1844 = vmatmul.mubr.f32.gmra.mrb[12].mxu1 %v24639_v61  ;;  %v21226_v44 = vsub.s32 0, %v1058_v52  ;;  %v21231_v62 = vsub.s32 1, %v1058_v52 }
 0x1b5   :  { %16764 = vmatpush1.bf16.msra.mxu1 %v16763_v12  ;;  %1849 = vmatprep.mubr.f32.mxu1 %v24505_v19 }
 0x1b6   :  { %16766 = vmatprep.subr.bf16.mxu1 %v16765_v58  ;;  %24681 = vst [vmem:[#allocation26_spill] sm:$0xff] %v21226_v44  ;;  %24682 = vst [vmem:[#allocation27_spill] sm:$0xff] %v21231_v62 }
 0x1b8   :  { %1853 = vmatmul.mubr.f32.gmra.mrb[14].mxu1 %v24644_v15 }
 0x1b9   :  { %16768 = vmatpush1.bf16.msra.mxu1 %v16767_v28  ;;  %1858 = vmatprep.mubr.f32.mxu1 %v24505_v19 }
 0x1ba   :  { %16770 = vmatprep.subr.bf16.mxu1 %v16769_v5 }
 0x1bc   :  { %1862 = vmatmul.mubr.f32.gmra.mrb[16].mxu1 %v24649_v29 }
 0x1bd   :  { %16772 = vmatpush1.bf16.msra.mxu1 %v16771_v43  ;;  %1867 = vmatprep.mubr.f32.mxu1 %v24505_v19 }
 0x1be   :  { %16774 = vmatprep.subr.bf16.mxu1 %v16773_v23 }
 0x1c0   :  { %1871 = vmatmul.mubr.f32.gmra.mrb[18].mxu1 %v24654_v27 }
 0x1c1   :  { %16776 = vmatpush1.bf16.msra.mxu1 %v16775_v6  ;;  %1876 = vmatprep.mubr.f32.mxu1 %v24505_v19 }
 0x1c2   :  { %16778 = vmatprep.subr.bf16.mxu1 %v16777_v4 }
 0x1c4   :  { %1880 = vmatmul.mubr.f32.gmra.mrb[20].mxu1 %v24659_v48 }
 0x1c5   :  { %16780 = vmatpush1.bf16.msra.mxu1 %v16779_v30  ;;  %1885 = vmatprep.mubr.f32.mxu1 %v24505_v19 }
 0x1c6   :  { %16782 = vmatprep.subr.bf16.mxu1 %v16781_v51 }
 0x1c8   :  { %1889 = vmatmul.mubr.f32.gmra.mrb[22].mxu1 %v24662_v0 }
 0x1c9   :  { %16784 = vmatpush1.bf16.msra.mxu1 %v16783_v54  ;;  %2055 = vmatprep.mubr.f32.mxu1 %v24505_v19 }
 0x1ca   :  { %16786 = vmatprep.subr.bf16.mxu1 %v24607_v21  ;;  %v24673_v21 = vld [vmem:[#allocation32_spill] sm:$0xff] }
 0x1cc   :  { %2057 = vmatmul.mubr.f32.vlgmr.msra.gmra.mrb[8].mxu1 %v20879_v53 }
 0x1cd   :  { %16788 = vmatpush1.bf16.msra.mxu1 %v24608_v7  ;;  %2062 = vmatprep.mubr.f32.mxu1 %v24505_v19  ;;  %v24674_v7 = vld [vmem:[#allocation33_spill] sm:$0xff] }
 0x1ce   :  { %16790 = vmatprep.subr.bf16.mxu1 %v24609_v20  ;;  %v24675_v20 = vld [vmem:[#allocation36_spill] sm:$0xff] }
 0x1d0   :  { %2064 = vmatmul.mubr.f32.gmra.mrb[10].mxu1 %v20876_v37 }
 0x1d1   :  { %16792 = vmatpush1.bf16.msra.mxu1 %v24610_v32  ;;  %2069 = vmatprep.mubr.f32.mxu1 %v24505_v19  ;;  %v24676_v32 = vld [vmem:[#allocation37_spill] sm:$0xff] }
 0x1d2   :  { %16794 = vmatprep.subr.bf16.mxu1 %v24611_v24  ;;  %v24671_v24 = vld [vmem:[#allocation25_spill] sm:$0xff] }
 0x1d4   :  { %2071 = vmatmul.mubr.f32.gmra.mrb[12].mxu1 %v20893_v36 }
 0x1d5   :  { %16796 = vmatpush1.bf16.msra.mxu1 %v24612_v26  ;;  %2076 = vmatprep.mubr.f32.mxu1 %v24505_v19  ;;  %v24679_v26 = vld [vmem:[#allocation44_spill] sm:$0xff] }
 0x1d6   :  { %16798 = vmatprep.subr.bf16.mxu1 %v24613_v13  ;;  %v24667_v13 = vld [vmem:[#allocation12_spill] sm:$0xff] }
 0x1d8   :  { %2078 = vmatmul.mubr.f32.gmra.mrb[14].mxu1 %v20888_v25 }
 0x1d9   :  { %16800 = vmatpush1.bf16.msra.mxu1 %v24614_v11  ;;  %2083 = vmatprep.mubr.f32.mxu1 %v24505_v19  ;;  %v24668_v11 = vld [vmem:[#allocation23_spill] sm:$0xff] }
 0x1da   :  { %16802 = vmatprep.subr.bf16.mxu1 %v24615_v17  ;;  %v24670_v17 = vld [vmem:[#allocation17_spill] sm:$0xff] }
 0x1dc   :  { %2085 = vmatmul.mubr.f32.gmra.mrb[16].mxu1 %v20911_v9 }
 0x1dd   :  { %16804 = vmatpush1.bf16.msra.mxu1 %v24663_v45  ;;  %2090 = vmatprep.mubr.f32.mxu1 %v24505_v19 }
 0x1de   :  { %16806 = vmatprep.subr.bf16.mxu1 %v24664_v49 }
 0x1e0   :  { %2092 = vmatmul.mubr.f32.gmra.mrb[18].mxu1 %v24665_v31 }
 0x1e1   :  { %16808 = vmatpush1.bf16.msra.mxu1 %v24666_v55  ;;  %2097 = vmatprep.mubr.f32.mxu1 %v24505_v19 }
 0x1e2   :  { %16810 = vmatprep.subr.bf16.mxu1 %v24667_v13 }
 0x1e4   :  { %2099 = vmatmul.mubr.f32.gmra.mrb[20].mxu1 %v24668_v11 }
 0x1e5   :  { %16812 = vmatpush1.bf16.msra.mxu1 %v24669_v2  ;;  %2104 = vmatprep.mubr.f32.mxu1 %v24505_v19 }
 0x1e6   :  { %16814 = vmatprep.subr.bf16.mxu1 %v24670_v17 }
 0x1e8   :  { %2106 = vmatmul.mubr.f32.gmra.mrb[22].mxu1 %v24671_v24 }
 0x1e9   :  { %16816 = vmatpush1.bf16.msra.mxu1 %v24624_v8  ;;  %2208 = vmatprep.mubr.f32.mxu1 %v24505_v19  ;;  %v24677_v8 = vld [vmem:[#allocation40_spill] sm:$0xff] }
 0x1ea   :  { %16914 = vmatprep.subr.bf16.mxu1 %v24672_v57 }
 0x1ec   :  { %2210 = vmatmul.mubr.f32.vlgmr.msra.gmra.mrb[8].mxu1 %v20879_v53  ;;  %v24678_v53 = vld [vmem:[#allocation41_spill] sm:$0xff] }
 0x1ed   :  { %2215 = vmatprep.mubr.f32.mxu1 %v24505_v19  ;;  %16916 = vmatpush1.bf16.msra.mxu1 %v24673_v21 }
 0x1ee   :  { %16918 = vmatprep.subr.bf16.mxu1 %v24674_v7 }
 0x1f0   :  { %2217 = vmatmul.mubr.f32.gmra.mrb[10].mxu1 %v20876_v37  ;;  %v24680_v37 = vld [vmem:[#allocation46_spill] sm:$0xff] }
 0x1f1   :  { %2222 = vmatprep.mubr.f32.mxu1 %v24505_v19  ;;  %16920 = vmatpush1.bf16.msra.mxu1 %v24675_v20 }
 0x1f2   :  { %16922 = vmatprep.subr.bf16.mxu1 %v24676_v32 }
 0x1f4   :  { %2224 = vmatmul.mubr.f32.gmra.mrb[12].mxu1 %v20893_v36 }
 0x1f5   :  { %2229 = vmatprep.mubr.f32.mxu1 %v24505_v19  ;;  %16924 = vmatpush1.bf16.msra.mxu1 %v24677_v8 }
 0x1f6   :  { %16926 = vmatprep.subr.bf16.mxu1 %v24678_v53 }
 0x1f8   :  { %2231 = vmatmul.mubr.f32.gmra.mrb[14].mxu1 %v20888_v25  ;;  %v2945_v25 = vpop.f32.mrb[8].mxu0 }
 0x1f9   :  { %2236 = vmatprep.mubr.f32.mxu1 %v24505_v19  ;;  %16928 = vmatpush1.bf16.msra.mxu1 %v24679_v26  ;;  %v2947_v36 = vpop.f32.mrb[9].mxu0 }
 0x1fa   :  { %16930 = vmatprep.subr.bf16.mxu1 %v24680_v37 }
 0x1fc   :  { %2238 = vmatmul.mubr.f32.gmra.mrb[16].mxu1 %v20911_v9  ;;  %v1055_v9 = vld [vmem:[%s23986_s5] sm:$0x3]  ;;  %s19334_s5 = smov 64  }
 0x1fd   :  { %2243 = vmatprep.mubr.f32.mxu1 %v24505_v19  ;;  %v1060_v41 = vrot.slane %v1055_v9, %v21226_v44  ;;  %v1064_v12 = vrot.slane %v1055_v9, %v21231_v62 }
 0x200   :  { %2245 = vmatmul.mubr.f32.gmra.mrb[18].mxu1 %v24665_v31 }
 0x201   :  { %2250 = vmatprep.mubr.f32.mxu1 %v24505_v19 }
 0x204   :  { %2252 = vmatmul.mubr.f32.gmra.mrb[20].mxu1 %v24668_v11 }
 0x205   :  { %2257 = vmatprep.mubr.f32.mxu1 %v24505_v19 }
 0x208   :  { %2259 = vmatmul.mubr.f32.gmra.mrb[22].mxu1 %v24671_v24 }
 0x209   :  { %3095 = vmatprep.mubr.f32.mxu1 %v24505_v19 }
 0x2bf   :  { %v2211_v14 = vpop.f32.mrb[8].mxu1 }
 0x2c0   :  { %v18561_v10 = vadd.f32 %v2211_v14, %v1060_v41  ;;  %v2213_v58 = vpop.f32.mrb[9].mxu1 }
 0x2c1   :  { %v21235_v61 = vadd.f32 %v2213_v58, %v1064_v12 }
 0x2c2   :  { %v2950_v47 = vadd.f32 %v18561_v10, %v2945_v25 }
 0x2c3   :  { %v2218_v34 = vpop.f32.mrb[10].mxu1 }
 0x2c4   :  { %19045 = vtanh.f32 %v2950_v47  ;;  %v21237_v28 = vadd.f32 %v2218_v34, %v1060_v41  ;;  %v2220_v40 = vpop.f32.mrb[11].mxu1  ;;  %v15993_v45 = vmul.f32 -1.442695, %v2950_v47 }
 0x2c5   :  { %v21239_v39 = vadd.f32 %v2220_v40, %v1064_v12 }
 0x2c7   :  { %v2225_v5 = vpop.f32.mrb[12].mxu1 }
 0x2c8   :  { %v21241_v15 = vadd.f32 %v2225_v5, %v1060_v41  ;;  %v2227_v16 = vpop.f32.mrb[13].mxu1 }
 0x2c9   :  { %v21243_v18 = vadd.f32 %v2227_v16, %v1064_v12 }
 0x2cb   :  { %v2232_v43 = vpop.f32.mrb[14].mxu1 }
 0x2cc   :  { %v21245_v33 = vadd.f32 %v2232_v43, %v1060_v41  ;;  %v2234_v46 = vpop.f32.mrb[15].mxu1 }
 0x2cd   :  { %v21247_v23 = vadd.f32 %v2234_v46, %v1064_v12 }
 0x2ce   :  { %v19046_v29 = vpop.eup %19045 }
 0x2cf   :  { %v2239_v1 = vpop.f32.mrb[16].mxu1  ;;  %2968 = vrot.lane.b32.xlu0 %v19046_v29, %s19334_s5 }
 0x2d0   :  { %v21250_v35 = vadd.f32 %v2239_v1, %v1060_v41  ;;  %v2241_v6 = vpop.f32.mrb[17].mxu1 }
 0x2d1   :  { %v21252_v22 = vadd.f32 %v2241_v6, %v1064_v12 }
 0x2d3   :  { %v2246_v63 = vpop.f32.mrb[18].mxu1 }
 0x2d4   :  { %v21254_v4 = vadd.f32 %v2246_v63, %v1060_v41  ;;  %v2248_v27 = vpop.f32.mrb[19].mxu1 }
 0x2d5   :  { %v21256_v60 = vadd.f32 %v2248_v27, %v1064_v12 }
 0x2d7   :  { %v2253_v56 = vpop.f32.mrb[20].mxu1 }
 0x2d8   :  { %v21258_v30 = vadd.f32 %v2253_v56, %v1060_v41  ;;  %v2255_v42 = vpop.f32.mrb[21].mxu1 }
 0x2d9   :  { %v21260_v38 = vadd.f32 %v2255_v42, %v1064_v12 }
 0x2db   :  { %v2260_v51 = vpop.f32.mrb[22].mxu1 }
 0x2dc   :  { %v21262_v48 = vadd.f32 %v2260_v51, %v1060_v41  ;;  %v2262_v50 = vpop.f32.mrb[23].mxu1  ;;  %v24684_v51 = vld [vmem:[#allocation47_spill] sm:$0xff] }
 0x2dd   :  { %v18576_v3 = vadd.f32 %v2262_v50, %v1064_v12  ;;  %v24685_v50 = vld [vmem:[#allocation48_spill] sm:$0xff] }
 0x2df   :  { %v2951_v54 = vadd.f32 %v18576_v3, %v2947_v36  ;;  %v24686_v3 = vld [vmem:[#allocation49_spill] sm:$0xff] }
 0x2e1   :  { %19047 = vtanh.f32 %v2951_v54  ;;  %v15994_v55 = vmul.f32 -1.442695, %v2951_v54  ;;  %v24687_v54 = vld [vmem:[#allocation50_spill] sm:$0xff] }
 0x2e2   :  { %19049 = vpow2.f32 %v15993_v45  ;;  %v24689_v45 = vld [vmem:[#allocation52_spill] sm:$0xff] }
 0x2eb   :  { %v19048_v0 = vpop.eup %19047 }
 0x2ec   :  { %2979 = vrot.lane.b32.xlu0 %v19048_v0, %s19334_s5  ;;  %v19050_v49 = vpop.eup %19049  ;;  %v24688_v0 = vld [vmem:[#allocation51_spill] sm:$0xff] }
 0x2ed   :  { %v2958_v31 = vadd.f32 1.0, %v19050_v49  ;;  %v24690_v49 = vld [vmem:[#allocation54_spill] sm:$0xff] }
 0x2ef   :  { %19051 = vrcp.f32 %v2958_v31  ;;  %v24691_v31 = vld [vmem:[#allocation53_spill] sm:$0xff] }
 0x2f0   :  { %19053 = vpow2.f32 %v15994_v55  ;;  %v24692_v55 = vld [vmem:[#allocation55_spill] sm:$0xff] }
 0x2f9   :  { %v19052_v13 = vpop.eup %19051 }
 0x2fa   :  { %v19054_v17 = vpop.eup %19053  ;;  %v2966_v52 = vmul.f32 0.0, %v19052_v13 }
 0x2fb   :  { %v2959_v24 = vadd.f32 1.0, %v19054_v17  ;;  %v24696_v17 = vld [vmem:[#allocation59_spill] sm:$0xff] }
 0x2fd   :  { %19055 = vrcp.f32 %v2959_v24  ;;  %v24697_v24 = vld [vmem:[#allocation60_spill] sm:$0xff] }
 0x307   :  { %v19056_v25 = vpop.eup %19055 }
 0x308   :  { %v2977_v14 = vmul.f32 0.0, %v19056_v25 }
 0x341   :  { %v2969_v11 = vpop.permute.xlu0 %2968 }
 0x342   :  { %v2971_v2 = vmul.f32 %v19052_v13, %v2969_v11  ;;  %v24694_v11 = vld [vmem:[#allocation57_spill] sm:$0xff] }
 0x344   :  { %2973 = vrot.lane.b32.xlu1 %v2971_v2, %s19335_s1  ;;  %v24695_v2 = vld [vmem:[#allocation58_spill] sm:$0xff] }
 0x35e   :  { %v2980_v36 = vpop.permute.xlu0 %2979 }
 0x35f   :  { %v2982_v59 = vmul.f32 %v19056_v25, %v2980_v36  ;;  %v24699_v36 = vld [vmem:[#allocation62_spill] sm:$0xff] }
 0x361   :  { %2984 = vrot.lane.b32.xlu1 %v2982_v59, %s19335_s1  ;;  %v24700_v59 = vld [vmem:[#allocation63_spill] sm:$0xff] }
 0x3b6   :  { %v2974_v9 = vpop.permute.xlu1 %2973 }
 0x3b7   :  { %v21267_v41 = vadd.f32 %v2974_v9, %v2966_v52  ;;  %v24701_v52 = vld [vmem:[#allocation64_spill] sm:$0xff]  ;;  %v24702_v9 = vld [vmem:[#allocation65_spill] sm:$0xff] }
 0x3b9   :  { %19057 = vtanh.f32 %v21267_v41 }
 0x3c3   :  { %v19058_v12 = vpop.eup %19057 }
 0x3c4   :  { %2990 = vrot.lane.b32.xlu0 %v19058_v12, %s19334_s5  ;;  %v24703_v12 = vld [vmem:[#allocation66_spill] sm:$0xff] }
 0x3d3   :  { %v2985_v10 = vpop.permute.xlu1 %2984 }
 0x3d4   :  { %v21271_v58 = vadd.f32 %v2985_v10, %v2977_v14  ;;  %v24704_v14 = vld [vmem:[#allocation67_spill] sm:$0xff]  ;;  %v24705_v10 = vld [vmem:[#allocation68_spill] sm:$0xff] }
 0x3d6   :  { %19059 = vtanh.f32 %v21271_v58 }
 0x3e0   :  { %v19060_v47 = vpop.eup %19059 }
 0x3e1   :  { %2996 = vrot.lane.b32.xlu1 %v19060_v47, %s19334_s5  ;;  %v24706_v47 = vld [vmem:[#allocation69_spill] sm:$0xff] }
 0x436   :  { %v2991_v34 = vpop.permute.xlu0 %2990 }
 0x437   :  { %v2993_v40 = vmul.f32 %v19052_v13, %v2991_v34  ;;  %v24693_v13 = vld [vmem:[#allocation56_spill] sm:$0xff] }
 0x439   :  { %3001 = vrot.lane.b32.xlu0 %v2993_v40, %s19335_s1 }
 0x453   :  { %v2997_v5 = vpop.permute.xlu1 %2996 }
 0x454   :  { %v2999_v16 = vmul.f32 %v19056_v25, %v2997_v5  ;;  %v24698_v25 = vld [vmem:[#allocation61_spill] sm:$0xff] }
 0x456   :  { %3005 = vrot.lane.b32.xlu1 %v2999_v16, %s19334_s5 }
 0x4ab   :  { %v21277_v43 = vpop.permute.xlu0 %3001 }
 0x4c8   :  { %v21279_v46 = vpop.permute.xlu1 %3005 }
 0x4c9   :  { %24683 = vst [vmem:[#allocation28_spill] sm:$0xff] %v21279_v46  ;;  %v3009_v29 = vsel %vm3008_vm0, %v21277_v43, %v21279_v46 }
 0x4ca   :  { %v3013_v1 = vsel %vm2299_vm1, %v3009_v29, 0 }
 0x4cb   :  { %v3096_v6 = vand.u32 4294901760, %v3013_v1 }
 0x4cd   :  { %v3097_v63 = vsub.f32 %v3013_v1, %v3096_v6 }
 0x4cf   :  { %v3098_v27 = vand.u32 4294901760, %v3097_v63 }
 0x4d1   :  { %v3099_v56 = vsub.f32 %v3097_v63, %v3098_v27 }
 0x4d3   :  { %v3100_v42 = vand.u32 4294901760, %v3099_v56 }
 0x4d5   :  { %3101 = vmatmul.mubr.f32.vlgmr.msra.gmra.mrb[24].mxu1 %v3100_v42 }
 0x4d6   :  { %16932 = vmatpush1.bf16.msra.mxu1 %v24684_v51  ;;  %3251 = vmatprep.mubr.f32.mxu1 %v24505_v19 }
 0x4d7   :  { %16934 = vmatprep.subr.bf16.mxu1 %v24685_v50 }
 0x4da   :  { %16936 = vmatpush1.bf16.msra.mxu1 %v24686_v3 }
 0x4db   :  { %16938 = vmatprep.subr.bf16.mxu1 %v24687_v54 }
 0x4de   :  { %16940 = vmatpush1.bf16.msra.mxu1 %v24688_v0 }
 0x4df   :  { %16942 = vmatprep.subr.bf16.mxu1 %v24689_v45 }
 0x4e2   :  { %16944 = vmatpush1.bf16.msra.mxu1 %v24690_v49 }
 0x4e3   :  { %16946 = vmatprep.subr.bf16.mxu1 %v24691_v31 }
 0x4e5   :  { %3253 = vmatmul.mubr.f32.vlgmr.msra.gmra.mrb[24].mxu1 %v3096_v6 }
 0x4e6   :  { %16948 = vmatpush1.bf16.msra.mxu1 %v24692_v55  ;;  %3355 = vmatprep.mubr.f32.mxu1 %v24505_v19 }
 0x4e7   :  { %16950 = vmatprep.subr.bf16.mxu1 %v24693_v13 }
 0x4ea   :  { %16952 = vmatpush1.bf16.msra.mxu1 %v24694_v11 }
 0x4eb   :  { %16954 = vmatprep.subr.bf16.mxu1 %v24695_v2 }
 0x4ee   :  { %16956 = vmatpush1.bf16.msra.mxu1 %v24696_v17 }
 0x4ef   :  { %16958 = vmatprep.subr.bf16.mxu1 %v24697_v24 }
 0x4f2   :  { %16960 = vmatpush1.bf16.msra.mxu1 %v24698_v25 }
 0x4f3   :  { %16962 = vmatprep.subr.bf16.mxu1 %v24672_v57 }
 0x4f5   :  { %3358 = vmatmul.mubr.f32.vlgmr.msra.gmra.mrb[24].mxu1 %v3097_v63 }
 0x4f6   :  { %16964 = vmatpush1.bf16.msra.mxu1 %v24673_v21  ;;  %3444 = vmatprep.mubr.f32.mxu1 %v24505_v19 }
 0x4f7   :  { %16966 = vmatprep.subr.bf16.mxu1 %v24674_v7 }
 0x4fa   :  { %16968 = vmatpush1.bf16.msra.mxu1 %v24675_v20 }
 0x4fb   :  { %16970 = vmatprep.subr.bf16.mxu1 %v24676_v32 }
 0x4fe   :  { %16972 = vmatpush1.bf16.msra.mxu1 %v24677_v8 }
 0x4ff   :  { %16974 = vmatprep.subr.bf16.mxu1 %v24678_v53 }
 0x502   :  { %16976 = vmatpush1.bf16.msra.mxu1 %v24679_v26 }
 0x503   :  { %16978 = vmatprep.subr.bf16.mxu1 %v24699_v36 }
 0x505   :  { %3448 = vmatmul.mubr.f32.vlgmr.msra.gmra.mrb[24].mxu1 %v3098_v27 }
 0x506   :  { %16980 = vmatpush1.bf16.msra.mxu1 %v24700_v59  ;;  %3566 = vmatprep.mubr.f32.mxu1 %v24505_v19 }
 0x507   :  { %16982 = vmatprep.subr.bf16.mxu1 %v24701_v52 }
 0x50a   :  { %16984 = vmatpush1.bf16.msra.mxu1 %v24702_v9 }
 0x50b   :  { %16986 = vmatprep.subr.bf16.mxu1 %v24703_v12 }
 0x50e   :  { %16988 = vmatpush1.bf16.msra.mxu1 %v24704_v14 }
 0x50f   :  { %16990 = vmatprep.subr.bf16.mxu1 %v24705_v10 }
 0x512   :  { %16992 = vmatpush1.bf16.msra.mxu1 %v24706_v47 }
 0x513   :  { %16994 = vmatprep.subr.bf16.mxu1 %v24672_v57 }
 0x515   :  { %3568 = vmatmul.mubr.f32.vlgmr.msra.gmra.mrb[24].mxu1 %v3096_v6 }
 0x516   :  { %16996 = vmatpush1.bf16.msra.mxu1 %v24673_v21  ;;  %3654 = vmatprep.mubr.f32.mxu1 %v24505_v19 }
 0x517   :  { %16998 = vmatprep.subr.bf16.mxu1 %v24674_v7 }
 0x51a   :  { %17000 = vmatpush1.bf16.msra.mxu1 %v24675_v20 }
 0x51b   :  { %17002 = vmatprep.subr.bf16.mxu1 %v24676_v32 }
 0x51e   :  { %17004 = vmatpush1.bf16.msra.mxu1 %v24677_v8 }
 0x51f   :  { %17006 = vmatprep.subr.bf16.mxu1 %v24678_v53 }
 0x522   :  { %17008 = vmatpush1.bf16.msra.mxu1 %v24679_v26 }
 0x523   :  { %17106 = vmatprep.subr.bf16.mxu1 %v24672_v57 }
 0x525   :  { %3656 = vmatmul.mubr.f32.vlgmr.msra.gmra.mrb[24].mxu1 %v3096_v6 }
 0x526   :  { %17108 = vmatpush1.bf16.msra.mxu1 %v24673_v21  ;;  %4517 = vmatprep.mubr.f32.mxu1 %v24505_v19 }
 0x527   :  { %17110 = vmatprep.subr.bf16.mxu1 %v24674_v7 }
 0x52a   :  { %17112 = vmatpush1.bf16.msra.mxu1 %v24675_v20 }
 0x52b   :  { %17114 = vmatprep.subr.bf16.mxu1 %v24676_v32 }
 0x52e   :  { %17116 = vmatpush1.bf16.msra.mxu1 %v24677_v8 }
 0x52f   :  { %17118 = vmatprep.subr.bf16.mxu1 %v24678_v53 }
 0x532   :  { %17120 = vmatpush1.bf16.msra.mxu1 %v24679_v26 }
 0x533   :  { %17122 = vmatprep.subr.bf16.mxu1 %v24680_v37 }
 0x5f8   :  { %v3657_v34 = vpop.f32.mrb[24].mxu1 }
 0x5f9   :  { %v3662_v40 = vadd.f32 %v21237_v28, %v3657_v34  ;;  %v3659_v5 = vpop.f32.mrb[25].mxu1 }
 0x5fa   :  { %v3663_v16 = vadd.f32 %v21260_v38, %v3659_v5 }
 0x5fb   :  { %19061 = vtanh.f32 %v3662_v40  ;;  %v15995_v6 = vmul.f32 -1.442695, %v3662_v40 }
 0x5fc   :  { %19063 = vtanh.f32 %v3663_v16  ;;  %v15996_v63 = vmul.f32 -1.442695, %v3663_v16 }
 0x5fd   :  { %19065 = vpow2.f32 %v15995_v6 }
 0x5fe   :  { %19067 = vpow2.f32 %v15996_v63 }
 0x605   :  { %v19062_v29 = vpop.eup %19061 }
 0x606   :  { %v19064_v1 = vpop.eup %19063  ;;  %3680 = vrot.lane.b32.xlu0 %v19062_v29, %s19334_s5 }
 0x607   :  { %3691 = vrot.lane.b32.xlu1 %v19064_v1, %s19334_s5  ;;  %v19066_v27 = vpop.eup %19065 }
 0x608   :  { %v19068_v56 = vpop.eup %19067  ;;  %v3670_v42 = vadd.f32 1.0, %v19066_v27 }
 0x609   :  { %v3671_v62 = vadd.f32 1.0, %v19068_v56 }
 0x60a   :  { %19069 = vrcp.f32 %v3670_v42 }
 0x60b   :  { %19071 = vrcp.f32 %v3671_v62 }
 0x614   :  { %v19070_v28 = vpop.eup %19069 }
 0x615   :  { %v19072_v34 = vpop.eup %19071  ;;  %v3678_v40 = vmul.f32 %v19070_v28, %v21267_v41 }
 0x616   :  { %v3689_v29 = vmul.f32 %v19072_v34, %v21271_v58 }
 0x678   :  { %v3681_v38 = vpop.permute.xlu0 %3680 }
 0x679   :  { %v3683_v5 = vmul.f32 %v19070_v28, %v3681_v38  ;;  %v3692_v44 = vpop.permute.xlu1 %3691 }
 0x67a   :  { %v3694_v46 = vmul.f32 %v19072_v34, %v3692_v44 }
 0x67b   :  { %3685 = vrot.lane.b32.xlu0 %v3683_v5, %s19335_s1 }
 0x67c   :  { %3696 = vrot.lane.b32.xlu1 %v3694_v46, %s19335_s1 }
 0x6ed   :  { %v3686_v16 = vpop.permute.xlu0 %3685 }
 0x6ee   :  { %v21347_v1 = vadd.f32 %v3686_v16, %v3678_v40  ;;  %v3697_v6 = vpop.permute.xlu1 %3696 }
 0x6ef   :  { %v21349_v63 = vadd.f32 %v3697_v6, %v3689_v29 }
 0x6f0   :  { %19073 = vtanh.f32 %v21347_v1 }
 0x6f1   :  { %19075 = vtanh.f32 %v21349_v63 }
 0x6fa   :  { %v19074_v62 = vpop.eup %19073 }
 0x6fb   :  { %v19076_v44 = vpop.eup %19075  ;;  %3702 = vrot.lane.b32.xlu0 %v19074_v62, %s19334_s5 }
 0x6fc   :  { %3708 = vrot.lane.b32.xlu1 %v19076_v44, %s19334_s5 }
 0x76d   :  { %v3703_v46 = vpop.permute.xlu0 %3702 }
 0x76e   :  { %v3705_v41 = vmul.f32 %v19070_v28, %v3703_v46  ;;  %v3709_v27 = vpop.permute.xlu1 %3708 }
 0x76f   :  { %v3711_v56 = vmul.f32 %v19072_v34, %v3709_v27 }
 0x770   :  { %3713 = vrot.lane.b32.xlu0 %v3705_v41, %s19335_s1 }
 0x771   :  { %3717 = vrot.lane.b32.xlu1 %v3711_v56, %s19334_s5 }
 0x7e2   :  { %v21357_v58 = vpop.permute.xlu0 %3713 }
 0x7e3   :  { %v21359_v42 = vpop.permute.xlu1 %3717 }
 0x7e4   :  { %24707 = vst [vmem:[#allocation31_spill] sm:$0xff] %v21359_v42  ;;  %v3720_v38 = vsel %vm3008_vm0, %v21357_v58, %v21359_v42 }
 0x7e5   :  { %v3724_v5 = vsel %vm2299_vm1, %v3720_v38, 0 }
 0x7e6   :  { %v3807_v40 = vand.u32 4294901760, %v3724_v5 }
 0x7e8   :  { %v3808_v16 = vsub.f32 %v3724_v5, %v3807_v40 }
 0x7ea   :  { %v3809_v29 = vand.u32 4294901760, %v3808_v16 }
 0x7ec   :  { %v3810_v28 = vsub.f32 %v3808_v16, %v3809_v29 }
 0x7ee   :  { %v3811_v6 = vand.u32 4294901760, %v3810_v28 }
 0x7f0   :  { %3812 = vmatmul.mubr.f32.vlgmr.msra.gmra.mrb[10].mxu0 %v3811_v6 }
 0x7f1   :  { %17028 = vmatpush1.bf16.msra.mxu0 %v24684_v51  ;;  %3962 = vmatprep.mubr.f32.mxu0 %v24505_v19 }
 0x7f2   :  { %17030 = vmatprep.subr.bf16.mxu0 %v24685_v50 }
 0x7f5   :  { %17032 = vmatpush1.bf16.msra.mxu0 %v24686_v3 }
 0x7f6   :  { %17034 = vmatprep.subr.bf16.mxu0 %v24687_v54 }
 0x7f9   :  { %17036 = vmatpush1.bf16.msra.mxu0 %v24688_v0 }
 0x7fa   :  { %17038 = vmatprep.subr.bf16.mxu0 %v24689_v45 }
 0x7fd   :  { %17040 = vmatpush1.bf16.msra.mxu0 %v24690_v49 }
 0x7fe   :  { %17042 = vmatprep.subr.bf16.mxu0 %v24691_v31 }
 0x800   :  { %3964 = vmatmul.mubr.f32.vlgmr.msra.gmra.mrb[10].mxu0 %v3807_v40 }
 0x801   :  { %17044 = vmatpush1.bf16.msra.mxu0 %v24692_v55  ;;  %4066 = vmatprep.mubr.f32.mxu0 %v24505_v19 }
 0x802   :  { %17046 = vmatprep.subr.bf16.mxu0 %v24693_v13 }
 0x805   :  { %17048 = vmatpush1.bf16.msra.mxu0 %v24694_v11 }
 0x806   :  { %17050 = vmatprep.subr.bf16.mxu0 %v24695_v2 }
 0x809   :  { %17052 = vmatpush1.bf16.msra.mxu0 %v24696_v17 }
 0x80a   :  { %17054 = vmatprep.subr.bf16.mxu0 %v24697_v24 }
 0x80d   :  { %17056 = vmatpush1.bf16.msra.mxu0 %v24698_v25 }
 0x80e   :  { %17058 = vmatprep.subr.bf16.mxu0 %v24672_v57 }
 0x810   :  { %4069 = vmatmul.mubr.f32.vlgmr.msra.gmra.mrb[10].mxu0 %v3808_v16 }
 0x811   :  { %17060 = vmatpush1.bf16.msra.mxu0 %v24673_v21  ;;  %4155 = vmatprep.mubr.f32.mxu0 %v24505_v19 }
 0x812   :  { %17062 = vmatprep.subr.bf16.mxu0 %v24674_v7 }
 0x815   :  { %17064 = vmatpush1.bf16.msra.mxu0 %v24675_v20 }
 0x816   :  { %17066 = vmatprep.subr.bf16.mxu0 %v24676_v32 }
 0x819   :  { %17068 = vmatpush1.bf16.msra.mxu0 %v24677_v8 }
 0x81a   :  { %17070 = vmatprep.subr.bf16.mxu0 %v24678_v53 }
 0x81d   :  { %17072 = vmatpush1.bf16.msra.mxu0 %v24679_v26 }
 0x81e   :  { %17074 = vmatprep.subr.bf16.mxu0 %v24699_v36 }
 0x820   :  { %4159 = vmatmul.mubr.f32.vlgmr.msra.gmra.mrb[10].mxu0 %v3809_v29 }
 0x821   :  { %17076 = vmatpush1.bf16.msra.mxu0 %v24700_v59  ;;  %4277 = vmatprep.mubr.f32.mxu0 %v24505_v19 }
 0x822   :  { %17078 = vmatprep.subr.bf16.mxu0 %v24701_v52 }
 0x825   :  { %17080 = vmatpush1.bf16.msra.mxu0 %v24702_v9 }
 0x826   :  { %17082 = vmatprep.subr.bf16.mxu0 %v24703_v12 }
 0x829   :  { %17084 = vmatpush1.bf16.msra.mxu0 %v24704_v14 }
 0x82a   :  { %17086 = vmatprep.subr.bf16.mxu0 %v24705_v10 }
 0x82d   :  { %17088 = vmatpush1.bf16.msra.mxu0 %v24706_v47 }
 0x82e   :  { %17090 = vmatprep.subr.bf16.mxu0 %v24672_v57 }
 0x830   :  { %4279 = vmatmul.mubr.f32.vlgmr.msra.gmra.mrb[10].mxu0 %v3807_v40 }
 0x831   :  { %17092 = vmatpush1.bf16.msra.mxu0 %v24673_v21  ;;  %4365 = vmatprep.mubr.f32.mxu0 %v24505_v19 }
 0x832   :  { %17094 = vmatprep.subr.bf16.mxu0 %v24674_v7 }
 0x835   :  { %17096 = vmatpush1.bf16.msra.mxu0 %v24675_v20 }
 0x836   :  { %17098 = vmatprep.subr.bf16.mxu0 %v24676_v32 }
 0x839   :  { %17100 = vmatpush1.bf16.msra.mxu0 %v24677_v8 }
 0x83a   :  { %17102 = vmatprep.subr.bf16.mxu0 %v24678_v53 }
 0x83d   :  { %17104 = vmatpush1.bf16.msra.mxu0 %v24679_v26 }
 0x83e   :  { %17202 = vmatprep.subr.bf16.mxu0 %v24672_v57 }
 0x840   :  { %4367 = vmatmul.mubr.f32.vlgmr.msra.gmra.mrb[10].mxu0 %v3807_v40 }
 0x841   :  { %17204 = vmatpush1.bf16.msra.mxu0 %v24673_v21  ;;  %5228 = vmatprep.mubr.f32.mxu0 %v24505_v19 }
 0x842   :  { %17206 = vmatprep.subr.bf16.mxu0 %v24674_v7 }
 0x845   :  { %17208 = vmatpush1.bf16.msra.mxu0 %v24675_v20 }
 0x846   :  { %17210 = vmatprep.subr.bf16.mxu0 %v24676_v32 }
 0x849   :  { %17212 = vmatpush1.bf16.msra.mxu0 %v24677_v8 }
 0x84a   :  { %17214 = vmatprep.subr.bf16.mxu0 %v24678_v53 }
 0x84d   :  { %17216 = vmatpush1.bf16.msra.mxu0 %v24679_v26 }
 0x84e   :  { %17218 = vmatprep.subr.bf16.mxu0 %v24680_v37 }
 0x913   :  { %v4368_v34 = vpop.f32.mrb[10].mxu0 }
 0x914   :  { %v4373_v62 = vadd.f32 %v21241_v15, %v4368_v34  ;;  %v4370_v44 = vpop.f32.mrb[11].mxu0 }
 0x915   :  { %v4374_v46 = vadd.f32 %v21256_v60, %v4370_v44 }
 0x916   :  { %19077 = vtanh.f32 %v4373_v62  ;;  %v15997_v56 = vmul.f32 -1.442695, %v4373_v62 }
 0x917   :  { %19079 = vtanh.f32 %v4374_v46  ;;  %v15998_v38 = vmul.f32 -1.442695, %v4374_v46 }
 0x918   :  { %19081 = vpow2.f32 %v15997_v56 }
 0x919   :  { %19083 = vpow2.f32 %v15998_v38 }
 0x920   :  { %v19078_v41 = vpop.eup %19077 }
 0x921   :  { %v19080_v27 = vpop.eup %19079  ;;  %4391 = vrot.lane.b32.xlu0 %v19078_v41, %s19334_s5 }
 0x922   :  { %4402 = vrot.lane.b32.xlu1 %v19080_v27, %s19334_s5  ;;  %v19082_v5 = vpop.eup %19081 }
 0x923   :  { %v19084_v40 = vpop.eup %19083  ;;  %v4381_v16 = vadd.f32 1.0, %v19082_v5 }
 0x924   :  { %v4382_v29 = vadd.f32 1.0, %v19084_v40 }
 0x925   :  { %19085 = vrcp.f32 %v4381_v16 }
 0x926   :  { %19087 = vrcp.f32 %v4382_v29 }
 0x92f   :  { %v19086_v15 = vpop.eup %19085 }
 0x930   :  { %v19088_v28 = vpop.eup %19087  ;;  %v4389_v62 = vmul.f32 %v19086_v15, %v21347_v1 }
 0x931   :  { %v4400_v41 = vmul.f32 %v19088_v28, %v21349_v63 }
 0x993   :  { %v4392_v60 = vpop.permute.xlu0 %4391 }
 0x994   :  { %v4394_v6 = vmul.f32 %v19086_v15, %v4392_v60  ;;  %v4403_v34 = vpop.permute.xlu1 %4402 }
 0x995   :  { %v4405_v44 = vmul.f32 %v19088_v28, %v4403_v34 }
 0x996   :  { %4396 = vrot.lane.b32.xlu0 %v4394_v6, %s19335_s1 }
 0x997   :  { %4407 = vrot.lane.b32.xlu1 %v4405_v44, %s19335_s1 }
 0xa08   :  { %v4397_v46 = vpop.permute.xlu0 %4396 }
 0xa09   :  { %v21427_v27 = vadd.f32 %v4397_v46, %v4389_v62  ;;  %v4408_v56 = vpop.permute.xlu1 %4407 }
 0xa0a   :  { %v21429_v38 = vadd.f32 %v4408_v56, %v4400_v41 }
 0xa0b   :  { %19089 = vtanh.f32 %v21427_v27 }
 0xa0c   :  { %19091 = vtanh.f32 %v21429_v38 }
 0xa15   :  { %v19090_v5 = vpop.eup %19089 }
 0xa16   :  { %v19092_v40 = vpop.eup %19091  ;;  %4413 = vrot.lane.b32.xlu0 %v19090_v5, %s19334_s5 }
 0xa17   :  { %4419 = vrot.lane.b32.xlu1 %v19092_v40, %s19334_s5 }
 0xa88   :  { %v4414_v16 = vpop.permute.xlu0 %4413 }
 0xa89   :  { %v4416_v1 = vmul.f32 %v19086_v15, %v4414_v16  ;;  %v4420_v29 = vpop.permute.xlu1 %4419 }
 0xa8a   :  { %v4422_v60 = vmul.f32 %v19088_v28, %v4420_v29 }
 0xa8b   :  { %4424 = vrot.lane.b32.xlu0 %v4416_v1, %s19335_s1 }
 0xa8c   :  { %4428 = vrot.lane.b32.xlu1 %v4422_v60, %s19334_s5 }
 0xafd   :  { %v21437_v63 = vpop.permute.xlu0 %4424 }
 0xafe   :  { %v21439_v6 = vpop.permute.xlu1 %4428 }
 0xaff   :  { %24708 = vst [vmem:[#allocation34_spill] sm:$0xff] %v21439_v6  ;;  %v4431_v34 = vsel %vm3008_vm0, %v21437_v63, %v21439_v6 }
 0xb00   :  { %v4435_v44 = vsel %vm2299_vm1, %v4431_v34, 0 }
 0xb01   :  { %v4518_v62 = vand.u32 4294901760, %v4435_v44 }
 0xb03   :  { %v4519_v46 = vsub.f32 %v4435_v44, %v4518_v62 }
 0xb05   :  { %v4520_v41 = vand.u32 4294901760, %v4519_v46 }
 0xb07   :  { %v4521_v15 = vsub.f32 %v4519_v46, %v4520_v41 }
 0xb09   :  { %v4522_v56 = vand.u32 4294901760, %v4521_v15 }
 0xb0b   :  { %4523 = vmatmul.mubr.f32.vlgmr.msra.gmra.mrb[26].mxu1 %v4522_v56 }
 0xb0c   :  { %17124 = vmatpush1.bf16.msra.mxu1 %v24684_v51  ;;  %4673 = vmatprep.mubr.f32.mxu1 %v24505_v19 }
 0xb0d   :  { %17126 = vmatprep.subr.bf16.mxu1 %v24685_v50 }
 0xb10   :  { %17128 = vmatpush1.bf16.msra.mxu1 %v24686_v3 }
 0xb11   :  { %17130 = vmatprep.subr.bf16.mxu1 %v24687_v54 }
 0xb14   :  { %17132 = vmatpush1.bf16.msra.mxu1 %v24688_v0 }
 0xb15   :  { %17134 = vmatprep.subr.bf16.mxu1 %v24689_v45 }
 0xb18   :  { %17136 = vmatpush1.bf16.msra.mxu1 %v24690_v49 }
 0xb19   :  { %17138 = vmatprep.subr.bf16.mxu1 %v24691_v31 }
 0xb1b   :  { %4675 = vmatmul.mubr.f32.vlgmr.msra.gmra.mrb[26].mxu1 %v4518_v62 }
 0xb1c   :  { %17140 = vmatpush1.bf16.msra.mxu1 %v24692_v55  ;;  %4777 = vmatprep.mubr.f32.mxu1 %v24505_v19 }
 0xb1d   :  { %17142 = vmatprep.subr.bf16.mxu1 %v24693_v13 }
 0xb20   :  { %17144 = vmatpush1.bf16.msra.mxu1 %v24694_v11 }
 0xb21   :  { %17146 = vmatprep.subr.bf16.mxu1 %v24695_v2 }
 0xb24   :  { %17148 = vmatpush1.bf16.msra.mxu1 %v24696_v17 }
 0xb25   :  { %17150 = vmatprep.subr.bf16.mxu1 %v24697_v24 }
 0xb28   :  { %17152 = vmatpush1.bf16.msra.mxu1 %v24698_v25 }
 0xb29   :  { %17154 = vmatprep.subr.bf16.mxu1 %v24672_v57 }
 0xb2b   :  { %4780 = vmatmul.mubr.f32.vlgmr.msra.gmra.mrb[26].mxu1 %v4519_v46 }
 0xb2c   :  { %17156 = vmatpush1.bf16.msra.mxu1 %v24673_v21  ;;  %4866 = vmatprep.mubr.f32.mxu1 %v24505_v19 }
 0xb2d   :  { %17158 = vmatprep.subr.bf16.mxu1 %v24674_v7 }
 0xb30   :  { %17160 = vmatpush1.bf16.msra.mxu1 %v24675_v20 }
 0xb31   :  { %17162 = vmatprep.subr.bf16.mxu1 %v24676_v32 }
 0xb34   :  { %17164 = vmatpush1.bf16.msra.mxu1 %v24677_v8 }
 0xb35   :  { %17166 = vmatprep.subr.bf16.mxu1 %v24678_v53 }
 0xb38   :  { %17168 = vmatpush1.bf16.msra.mxu1 %v24679_v26 }
 0xb39   :  { %17170 = vmatprep.subr.bf16.mxu1 %v24699_v36 }
 0xb3b   :  { %4870 = vmatmul.mubr.f32.vlgmr.msra.gmra.mrb[26].mxu1 %v4520_v41 }
 0xb3c   :  { %17172 = vmatpush1.bf16.msra.mxu1 %v24700_v59  ;;  %4988 = vmatprep.mubr.f32.mxu1 %v24505_v19 }
 0xb3d   :  { %17174 = vmatprep.subr.bf16.mxu1 %v24701_v52 }
 0xb40   :  { %17176 = vmatpush1.bf16.msra.mxu1 %v24702_v9 }
 0xb41   :  { %17178 = vmatprep.subr.bf16.mxu1 %v24703_v12 }
 0xb44   :  { %17180 = vmatpush1.bf16.msra.mxu1 %v24704_v14 }
 0xb45   :  { %17182 = vmatprep.subr.bf16.mxu1 %v24705_v10 }
 0xb48   :  { %17184 = vmatpush1.bf16.msra.mxu1 %v24706_v47 }
 0xb49   :  { %17186 = vmatprep.subr.bf16.mxu1 %v24672_v57 }
 0xb4b   :  { %4990 = vmatmul.mubr.f32.vlgmr.msra.gmra.mrb[26].mxu1 %v4518_v62 }
 0xb4c   :  { %17188 = vmatpush1.bf16.msra.mxu1 %v24673_v21  ;;  %5076 = vmatprep.mubr.f32.mxu1 %v24505_v19 }
 0xb4d   :  { %17190 = vmatprep.subr.bf16.mxu1 %v24674_v7 }
 0xb50   :  { %17192 = vmatpush1.bf16.msra.mxu1 %v24675_v20 }
 0xb51   :  { %17194 = vmatprep.subr.bf16.mxu1 %v24676_v32 }
 0xb54   :  { %17196 = vmatpush1.bf16.msra.mxu1 %v24677_v8 }
 0xb55   :  { %17198 = vmatprep.subr.bf16.mxu1 %v24678_v53 }
 0xb58   :  { %17200 = vmatpush1.bf16.msra.mxu1 %v24679_v26 }
 0xb59   :  { %17298 = vmatprep.subr.bf16.mxu1 %v24672_v57 }
 0xb5b   :  { %5078 = vmatmul.mubr.f32.vlgmr.msra.gmra.mrb[26].mxu1 %v4518_v62 }
 0xb5c   :  { %17300 = vmatpush1.bf16.msra.mxu1 %v24673_v21  ;;  %5939 = vmatprep.mubr.f32.mxu1 %v24505_v19 }
 0xb5d   :  { %17302 = vmatprep.subr.bf16.mxu1 %v24674_v7 }
 0xb60   :  { %17304 = vmatpush1.bf16.msra.mxu1 %v24675_v20 }
 0xb61   :  { %17306 = vmatprep.subr.bf16.mxu1 %v24676_v32 }
 0xb64   :  { %17308 = vmatpush1.bf16.msra.mxu1 %v24677_v8 }
 0xb65   :  { %17310 = vmatprep.subr.bf16.mxu1 %v24678_v53 }
 0xb68   :  { %17312 = vmatpush1.bf16.msra.mxu1 %v24679_v26 }
 0xb69   :  { %17314 = vmatprep.subr.bf16.mxu1 %v24680_v37 }
 0xc2e   :  { %v5079_v28 = vpop.f32.mrb[26].mxu1 }
 0xc2f   :  { %v5084_v5 = vadd.f32 %v21245_v33, %v5079_v28  ;;  %v5081_v40 = vpop.f32.mrb[27].mxu1 }
 0xc30   :  { %v5085_v16 = vadd.f32 %v21252_v22, %v5081_v40 }
 0xc31   :  { %19093 = vtanh.f32 %v5084_v5  ;;  %v15999_v60 = vmul.f32 -1.442695, %v5084_v5 }
 0xc32   :  { %19095 = vtanh.f32 %v5085_v16  ;;  %v16000_v34 = vmul.f32 -1.442695, %v5085_v16 }
 0xc33   :  { %19097 = vpow2.f32 %v15999_v60 }
 0xc34   :  { %19099 = vpow2.f32 %v16000_v34 }
 0xc3b   :  { %v19094_v1 = vpop.eup %19093 }
 0xc3c   :  { %v19096_v29 = vpop.eup %19095  ;;  %5102 = vrot.lane.b32.xlu0 %v19094_v1, %s19334_s5 }
 0xc3d   :  { %5113 = vrot.lane.b32.xlu1 %v19096_v29, %s19334_s5  ;;  %v19098_v44 = vpop.eup %19097 }
 0xc3e   :  { %v19100_v62 = vpop.eup %19099  ;;  %v5092_v46 = vadd.f32 1.0, %v19098_v44 }
 0xc3f   :  { %v5093_v41 = vadd.f32 1.0, %v19100_v62 }
 0xc40   :  { %19101 = vrcp.f32 %v5092_v46 }
 0xc41   :  { %19103 = vrcp.f32 %v5093_v41 }
 0xc4a   :  { %v19102_v33 = vpop.eup %19101 }
 0xc4b   :  { %v19104_v15 = vpop.eup %19103  ;;  %v5100_v5 = vmul.f32 %v19102_v33, %v21427_v27 }
 0xc4c   :  { %v5111_v1 = vmul.f32 %v19104_v15, %v21429_v38 }
 0xcae   :  { %v5103_v22 = vpop.permute.xlu0 %5102 }
 0xcaf   :  { %v5105_v56 = vmul.f32 %v19102_v33, %v5103_v22  ;;  %v5114_v28 = vpop.permute.xlu1 %5113 }
 0xcb0   :  { %v5116_v40 = vmul.f32 %v19104_v15, %v5114_v28 }
 0xcb1   :  { %5107 = vrot.lane.b32.xlu0 %v5105_v56, %s19335_s1 }
 0xcb2   :  { %5118 = vrot.lane.b32.xlu1 %v5116_v40, %s19335_s1 }
 0xd23   :  { %v5108_v16 = vpop.permute.xlu0 %5107 }
 0xd24   :  { %v21507_v29 = vadd.f32 %v5108_v16, %v5100_v5  ;;  %v5119_v60 = vpop.permute.xlu1 %5118 }
 0xd25   :  { %v21509_v34 = vadd.f32 %v5119_v60, %v5111_v1 }
 0xd26   :  { %19105 = vtanh.f32 %v21507_v29 }
 0xd27   :  { %19107 = vtanh.f32 %v21509_v34 }
 0xd30   :  { %v19106_v44 = vpop.eup %19105 }
 0xd31   :  { %v19108_v62 = vpop.eup %19107  ;;  %5124 = vrot.lane.b32.xlu0 %v19106_v44, %s19334_s5 }
 0xd32   :  { %5130 = vrot.lane.b32.xlu1 %v19108_v62, %s19334_s5 }
 0xda3   :  { %v5125_v46 = vpop.permute.xlu0 %5124 }
 0xda4   :  { %v5127_v27 = vmul.f32 %v19102_v33, %v5125_v46  ;;  %v5131_v41 = vpop.permute.xlu1 %5130 }
 0xda5   :  { %v5133_v22 = vmul.f32 %v19104_v15, %v5131_v41 }
 0xda6   :  { %5135 = vrot.lane.b32.xlu0 %v5127_v27, %s19335_s1 }
 0xda7   :  { %5139 = vrot.lane.b32.xlu1 %v5133_v22, %s19334_s5 }
 0xe18   :  { %v21517_v38 = vpop.permute.xlu0 %5135 }
 0xe19   :  { %v21519_v56 = vpop.permute.xlu1 %5139 }
 0xe1a   :  { %v5142_v28 = vsel %vm3008_vm0, %v21517_v38, %v21519_v56 }
 0xe1b   :  { %v5146_v40 = vsel %vm2299_vm1, %v5142_v28, 0 }
 0xe1c   :  { %v5229_v5 = vand.u32 4294901760, %v5146_v40 }
 0xe1e   :  { %v5230_v16 = vsub.f32 %v5146_v40, %v5229_v5 }
 0xe20   :  { %v5231_v1 = vand.u32 4294901760, %v5230_v16 }
 0xe22   :  { %v5232_v33 = vsub.f32 %v5230_v16, %v5231_v1 }
 0xe24   :  { %v5233_v60 = vand.u32 4294901760, %v5232_v33 }
 0xe26   :  { %5234 = vmatmul.mubr.f32.vlgmr.msra.gmra.mrb[12].mxu0 %v5233_v60 }
 0xe27   :  { %17220 = vmatpush1.bf16.msra.mxu0 %v24684_v51  ;;  %5384 = vmatprep.mubr.f32.mxu0 %v24505_v19 }
 0xe28   :  { %17222 = vmatprep.subr.bf16.mxu0 %v24685_v50 }
 0xe2b   :  { %17224 = vmatpush1.bf16.msra.mxu0 %v24686_v3 }
 0xe2c   :  { %17226 = vmatprep.subr.bf16.mxu0 %v24687_v54 }
 0xe2f   :  { %17228 = vmatpush1.bf16.msra.mxu0 %v24688_v0 }
 0xe30   :  { %17230 = vmatprep.subr.bf16.mxu0 %v24689_v45 }
 0xe33   :  { %17232 = vmatpush1.bf16.msra.mxu0 %v24690_v49 }
 0xe34   :  { %17234 = vmatprep.subr.bf16.mxu0 %v24691_v31 }
 0xe36   :  { %5386 = vmatmul.mubr.f32.vlgmr.msra.gmra.mrb[12].mxu0 %v5229_v5 }
 0xe37   :  { %17236 = vmatpush1.bf16.msra.mxu0 %v24692_v55  ;;  %5488 = vmatprep.mubr.f32.mxu0 %v24505_v19 }
 0xe38   :  { %17238 = vmatprep.subr.bf16.mxu0 %v24693_v13 }
 0xe3b   :  { %17240 = vmatpush1.bf16.msra.mxu0 %v24694_v11 }
 0xe3c   :  { %17242 = vmatprep.subr.bf16.mxu0 %v24695_v2 }
 0xe3f   :  { %17244 = vmatpush1.bf16.msra.mxu0 %v24696_v17 }
 0xe40   :  { %17246 = vmatprep.subr.bf16.mxu0 %v24697_v24 }
 0xe43   :  { %17248 = vmatpush1.bf16.msra.mxu0 %v24698_v25 }
 0xe44   :  { %17250 = vmatprep.subr.bf16.mxu0 %v24672_v57 }
 0xe46   :  { %5491 = vmatmul.mubr.f32.vlgmr.msra.gmra.mrb[12].mxu0 %v5230_v16 }
 0xe47   :  { %17252 = vmatpush1.bf16.msra.mxu0 %v24673_v21  ;;  %5577 = vmatprep.mubr.f32.mxu0 %v24505_v19 }
 0xe48   :  { %17254 = vmatprep.subr.bf16.mxu0 %v24674_v7 }
 0xe4b   :  { %17256 = vmatpush1.bf16.msra.mxu0 %v24675_v20 }
 0xe4c   :  { %17258 = vmatprep.subr.bf16.mxu0 %v24676_v32 }
 0xe4f   :  { %17260 = vmatpush1.bf16.msra.mxu0 %v24677_v8 }
 0xe50   :  { %17262 = vmatprep.subr.bf16.mxu0 %v24678_v53 }
 0xe53   :  { %17264 = vmatpush1.bf16.msra.mxu0 %v24679_v26 }
 0xe54   :  { %17266 = vmatprep.subr.bf16.mxu0 %v24699_v36 }
 0xe56   :  { %5581 = vmatmul.mubr.f32.vlgmr.msra.gmra.mrb[12].mxu0 %v5231_v1 }
 0xe57   :  { %17268 = vmatpush1.bf16.msra.mxu0 %v24700_v59  ;;  %5699 = vmatprep.mubr.f32.mxu0 %v24505_v19 }
 0xe58   :  { %17270 = vmatprep.subr.bf16.mxu0 %v24701_v52 }
 0xe5b   :  { %17272 = vmatpush1.bf16.msra.mxu0 %v24702_v9 }
 0xe5c   :  { %17274 = vmatprep.subr.bf16.mxu0 %v24703_v12 }
 0xe5f   :  { %17276 = vmatpush1.bf16.msra.mxu0 %v24704_v14 }
 0xe60   :  { %17278 = vmatprep.subr.bf16.mxu0 %v24705_v10 }
 0xe63   :  { %17280 = vmatpush1.bf16.msra.mxu0 %v24706_v47 }
 0xe64   :  { %17282 = vmatprep.subr.bf16.mxu0 %v24672_v57 }
 0xe66   :  { %5701 = vmatmul.mubr.f32.vlgmr.msra.gmra.mrb[12].mxu0 %v5229_v5 }
 0xe67   :  { %17284 = vmatpush1.bf16.msra.mxu0 %v24673_v21  ;;  %5787 = vmatprep.mubr.f32.mxu0 %v24505_v19 }
 0xe68   :  { %17286 = vmatprep.subr.bf16.mxu0 %v24674_v7 }
 0xe6b   :  { %17288 = vmatpush1.bf16.msra.mxu0 %v24675_v20 }
 0xe6c   :  { %17290 = vmatprep.subr.bf16.mxu0 %v24676_v32 }
 0xe6f   :  { %17292 = vmatpush1.bf16.msra.mxu0 %v24677_v8 }
 0xe70   :  { %17294 = vmatprep.subr.bf16.mxu0 %v24678_v53 }
 0xe73   :  { %17296 = vmatpush1.bf16.msra.mxu0 %v24679_v26 }
 0xe74   :  { %17394 = vmatprep.subr.bf16.mxu0 %v24672_v57 }
 0xe76   :  { %5789 = vmatmul.mubr.f32.vlgmr.msra.gmra.mrb[12].mxu0 %v5229_v5 }
 0xe77   :  { %17396 = vmatpush1.bf16.msra.mxu0 %v24673_v21  ;;  %6650 = vmatprep.mubr.f32.mxu0 %v24505_v19 }
 0xe78   :  { %17398 = vmatprep.subr.bf16.mxu0 %v24674_v7 }
 0xe7b   :  { %17400 = vmatpush1.bf16.msra.mxu0 %v24675_v20 }
 0xe7c   :  { %17402 = vmatprep.subr.bf16.mxu0 %v24676_v32 }
 0xe7f   :  { %17404 = vmatpush1.bf16.msra.mxu0 %v24677_v8 }
 0xe80   :  { %17406 = vmatprep.subr.bf16.mxu0 %v24678_v53 }
 0xe83   :  { %17408 = vmatpush1.bf16.msra.mxu0 %v24679_v26 }
 0xe84   :  { %17410 = vmatprep.subr.bf16.mxu0 %v24680_v37 }
 0xf49   :  { %v5790_v15 = vpop.f32.mrb[12].mxu0 }
 0xf4a   :  { %v5795_v44 = vadd.f32 %v21250_v35, %v5790_v15  ;;  %v5792_v62 = vpop.f32.mrb[13].mxu0 }
 0xf4b   :  { %v5796_v46 = vadd.f32 %v21247_v23, %v5792_v62 }
 0xf4c   :  { %19109 = vtanh.f32 %v5795_v44  ;;  %v16001_v22 = vmul.f32 -1.442695, %v5795_v44 }
 0xf4d   :  { %19111 = vtanh.f32 %v5796_v46  ;;  %v16002_v28 = vmul.f32 -1.442695, %v5796_v46 }
 0xf4e   :  { %19113 = vpow2.f32 %v16001_v22 }
 0xf4f   :  { %19115 = vpow2.f32 %v16002_v28 }
 0xf56   :  { %v19110_v27 = vpop.eup %19109 }
 0xf57   :  { %v19112_v41 = vpop.eup %19111  ;;  %5813 = vrot.lane.b32.xlu0 %v19110_v27, %s19334_s5 }
 0xf58   :  { %5824 = vrot.lane.b32.xlu1 %v19112_v41, %s19334_s5  ;;  %v19114_v40 = vpop.eup %19113 }
 0xf59   :  { %v19116_v5 = vpop.eup %19115  ;;  %v5803_v16 = vadd.f32 1.0, %v19114_v40 }
 0xf5a   :  { %v5804_v1 = vadd.f32 1.0, %v19116_v5 }
 0xf5b   :  { %19117 = vrcp.f32 %v5803_v16 }
 0xf5c   :  { %19119 = vrcp.f32 %v5804_v1 }
 0xf65   :  { %v19118_v35 = vpop.eup %19117 }
 0xf66   :  { %v19120_v33 = vpop.eup %19119  ;;  %v5811_v44 = vmul.f32 %v19118_v35, %v21507_v29 }
 0xf67   :  { %v5822_v27 = vmul.f32 %v19120_v33, %v21509_v34 }
 0xfc9   :  { %v5814_v23 = vpop.permute.xlu0 %5813 }
 0xfca   :  { %v5816_v60 = vmul.f32 %v19118_v35, %v5814_v23  ;;  %v5825_v15 = vpop.permute.xlu1 %5824 }
 0xfcb   :  { %v5827_v62 = vmul.f32 %v19120_v33, %v5825_v15 }
 0xfcc   :  { %5818 = vrot.lane.b32.xlu0 %v5816_v60, %s19335_s1 }
 0xfcd   :  { %5829 = vrot.lane.b32.xlu1 %v5827_v62, %s19335_s1 }
0x103e   :  { %v5819_v46 = vpop.permute.xlu0 %5818 }
0x103f   :  { %v21587_v41 = vadd.f32 %v5819_v46, %v5811_v44  ;;  %v5830_v22 = vpop.permute.xlu1 %5829 }
0x1040   :  { %v21589_v28 = vadd.f32 %v5830_v22, %v5822_v27 }
0x1041   :  { %19121 = vtanh.f32 %v21587_v41 }
0x1042   :  { %19123 = vtanh.f32 %v21589_v28 }
0x104b   :  { %v19122_v40 = vpop.eup %19121 }
0x104c   :  { %v19124_v5 = vpop.eup %19123  ;;  %5835 = vrot.lane.b32.xlu0 %v19122_v40, %s19334_s5 }
0x104d   :  { %5841 = vrot.lane.b32.xlu1 %v19124_v5, %s19334_s5 }
0x10be   :  { %v5836_v16 = vpop.permute.xlu0 %5835 }
0x10bf   :  { %v5838_v29 = vmul.f32 %v19118_v35, %v5836_v16  ;;  %v5842_v1 = vpop.permute.xlu1 %5841 }
0x10c0   :  { %v5844_v23 = vmul.f32 %v19120_v33, %v5842_v1 }
0x10c1   :  { %5846 = vrot.lane.b32.xlu0 %v5838_v29, %s19335_s1 }
0x10c2   :  { %5850 = vrot.lane.b32.xlu1 %v5844_v23, %s19334_s5 }
0x1133   :  { %v21597_v34 = vpop.permute.xlu0 %5846 }
0x1134   :  { %v21599_v60 = vpop.permute.xlu1 %5850 }
0x1135   :  { %v5853_v15 = vsel %vm3008_vm0, %v21597_v34, %v21599_v60 }
0x1136   :  { %v5857_v62 = vsel %vm2299_vm1, %v5853_v15, 0 }
0x1137   :  { %v5940_v44 = vand.u32 4294901760, %v5857_v62 }
0x1139   :  { %v5941_v46 = vsub.f32 %v5857_v62, %v5940_v44 }
0x113b   :  { %v5942_v27 = vand.u32 4294901760, %v5941_v46 }
0x113d   :  { %v5943_v35 = vsub.f32 %v5941_v46, %v5942_v27 }
0x113f   :  { %v5944_v22 = vand.u32 4294901760, %v5943_v35 }
0x1141   :  { %5945 = vmatmul.mubr.f32.vlgmr.msra.gmra.mrb[28].mxu1 %v5944_v22 }
0x1142   :  { %17316 = vmatpush1.bf16.msra.mxu1 %v24684_v51  ;;  %6095 = vmatprep.mubr.f32.mxu1 %v24505_v19 }
0x1143   :  { %17318 = vmatprep.subr.bf16.mxu1 %v24685_v50 }
0x1146   :  { %17320 = vmatpush1.bf16.msra.mxu1 %v24686_v3 }
0x1147   :  { %17322 = vmatprep.subr.bf16.mxu1 %v24687_v54 }
0x114a   :  { %17324 = vmatpush1.bf16.msra.mxu1 %v24688_v0 }
0x114b   :  { %17326 = vmatprep.subr.bf16.mxu1 %v24689_v45 }
0x114e   :  { %17328 = vmatpush1.bf16.msra.mxu1 %v24690_v49 }
0x114f   :  { %17330 = vmatprep.subr.bf16.mxu1 %v24691_v31 }
0x1151   :  { %6097 = vmatmul.mubr.f32.vlgmr.msra.gmra.mrb[28].mxu1 %v5940_v44 }
0x1152   :  { %17332 = vmatpush1.bf16.msra.mxu1 %v24692_v55  ;;  %6199 = vmatprep.mubr.f32.mxu1 %v24505_v19 }
0x1153   :  { %17334 = vmatprep.subr.bf16.mxu1 %v24693_v13 }
0x1156   :  { %17336 = vmatpush1.bf16.msra.mxu1 %v24694_v11 }
0x1157   :  { %17338 = vmatprep.subr.bf16.mxu1 %v24695_v2 }
0x115a   :  { %17340 = vmatpush1.bf16.msra.mxu1 %v24696_v17 }
0x115b   :  { %17342 = vmatprep.subr.bf16.mxu1 %v24697_v24 }
0x115e   :  { %17344 = vmatpush1.bf16.msra.mxu1 %v24698_v25 }
0x115f   :  { %17346 = vmatprep.subr.bf16.mxu1 %v24672_v57 }
0x1161   :  { %6202 = vmatmul.mubr.f32.vlgmr.msra.gmra.mrb[28].mxu1 %v5941_v46 }
0x1162   :  { %17348 = vmatpush1.bf16.msra.mxu1 %v24673_v21  ;;  %6288 = vmatprep.mubr.f32.mxu1 %v24505_v19 }
0x1163   :  { %17350 = vmatprep.subr.bf16.mxu1 %v24674_v7 }
0x1166   :  { %17352 = vmatpush1.bf16.msra.mxu1 %v24675_v20 }
0x1167   :  { %17354 = vmatprep.subr.bf16.mxu1 %v24676_v32 }
0x116a   :  { %17356 = vmatpush1.bf16.msra.mxu1 %v24677_v8 }
0x116b   :  { %17358 = vmatprep.subr.bf16.mxu1 %v24678_v53 }
0x116e   :  { %17360 = vmatpush1.bf16.msra.mxu1 %v24679_v26 }
0x116f   :  { %17362 = vmatprep.subr.bf16.mxu1 %v24699_v36 }
0x1171   :  { %6292 = vmatmul.mubr.f32.vlgmr.msra.gmra.mrb[28].mxu1 %v5942_v27 }
0x1172   :  { %17364 = vmatpush1.bf16.msra.mxu1 %v24700_v59  ;;  %6410 = vmatprep.mubr.f32.mxu1 %v24505_v19 }
0x1173   :  { %17366 = vmatprep.subr.bf16.mxu1 %v24701_v52 }
0x1176   :  { %17368 = vmatpush1.bf16.msra.mxu1 %v24702_v9 }
0x1177   :  { %17370 = vmatprep.subr.bf16.mxu1 %v24703_v12 }
0x117a   :  { %17372 = vmatpush1.bf16.msra.mxu1 %v24704_v14 }
0x117b   :  { %17374 = vmatprep.subr.bf16.mxu1 %v24705_v10 }
0x117e   :  { %17376 = vmatpush1.bf16.msra.mxu1 %v24706_v47 }
0x117f   :  { %17378 = vmatprep.subr.bf16.mxu1 %v24672_v57 }
0x1181   :  { %6412 = vmatmul.mubr.f32.vlgmr.msra.gmra.mrb[28].mxu1 %v5940_v44 }
0x1182   :  { %17380 = vmatpush1.bf16.msra.mxu1 %v24673_v21  ;;  %6498 = vmatprep.mubr.f32.mxu1 %v24505_v19 }
0x1183   :  { %17382 = vmatprep.subr.bf16.mxu1 %v24674_v7 }
0x1186   :  { %17384 = vmatpush1.bf16.msra.mxu1 %v24675_v20 }
0x1187   :  { %17386 = vmatprep.subr.bf16.mxu1 %v24676_v32 }
0x118a   :  { %17388 = vmatpush1.bf16.msra.mxu1 %v24677_v8 }
0x118b   :  { %17390 = vmatprep.subr.bf16.mxu1 %v24678_v53 }
0x118e   :  { %17392 = vmatpush1.bf16.msra.mxu1 %v24679_v26 }
0x118f   :  { %17490 = vmatprep.subr.bf16.mxu1 %v24672_v57 }
0x1191   :  { %6500 = vmatmul.mubr.f32.vlgmr.msra.gmra.mrb[28].mxu1 %v5940_v44 }
0x1192   :  { %17492 = vmatpush1.bf16.msra.mxu1 %v24673_v21  ;;  %7361 = vmatprep.mubr.f32.mxu1 %v24505_v19 }
0x1193   :  { %17494 = vmatprep.subr.bf16.mxu1 %v24674_v7 }
0x1196   :  { %17496 = vmatpush1.bf16.msra.mxu1 %v24675_v20 }
0x1197   :  { %17498 = vmatprep.subr.bf16.mxu1 %v24676_v32 }
0x119a   :  { %17500 = vmatpush1.bf16.msra.mxu1 %v24677_v8 }
0x119b   :  { %17502 = vmatprep.subr.bf16.mxu1 %v24678_v53 }
0x119e   :  { %17504 = vmatpush1.bf16.msra.mxu1 %v24679_v26 }
0x119f   :  { %17506 = vmatprep.subr.bf16.mxu1 %v24680_v37 }
0x1264   :  { %v6501_v33 = vpop.f32.mrb[28].mxu1 }
0x1265   :  { %v6506_v40 = vadd.f32 %v21254_v4, %v6501_v33  ;;  %v6503_v5 = vpop.f32.mrb[29].mxu1 }
0x1266   :  { %v6507_v16 = vadd.f32 %v21243_v18, %v6503_v5 }
0x1267   :  { %19125 = vtanh.f32 %v6506_v40  ;;  %v16003_v23 = vmul.f32 -1.442695, %v6506_v40 }
0x1268   :  { %19127 = vtanh.f32 %v6507_v16  ;;  %v16004_v15 = vmul.f32 -1.442695, %v6507_v16 }
0x1269   :  { %19129 = vpow2.f32 %v16003_v23 }
0x126a   :  { %19131 = vpow2.f32 %v16004_v15 }
0x1271   :  { %v19126_v29 = vpop.eup %19125 }
0x1272   :  { %v19128_v1 = vpop.eup %19127  ;;  %6524 = vrot.lane.b32.xlu0 %v19126_v29, %s19334_s5 }
0x1273   :  { %6535 = vrot.lane.b32.xlu1 %v19128_v1, %s19334_s5  ;;  %v19130_v62 = vpop.eup %19129 }
0x1274   :  { %v19132_v37 = vpop.eup %19131  ;;  %v6514_v44 = vadd.f32 1.0, %v19130_v62 }
0x1275   :  { %v6515_v46 = vadd.f32 1.0, %v19132_v37 }
0x1276   :  { %19133 = vrcp.f32 %v6514_v44 }
0x1277   :  { %19135 = vrcp.f32 %v6515_v46 }
0x1280   :  { %v19134_v4 = vpop.eup %19133 }
0x1281   :  { %v19136_v27 = vpop.eup %19135  ;;  %v6522_v40 = vmul.f32 %v19134_v4, %v21587_v41 }
0x1282   :  { %v6533_v16 = vmul.f32 %v19136_v27, %v21589_v28 }
0x12e4   :  { %v6525_v18 = vpop.permute.xlu0 %6524 }
0x12e5   :  { %v6527_v35 = vmul.f32 %v19134_v4, %v6525_v18  ;;  %v6536_v22 = vpop.permute.xlu1 %6535 }
0x12e6   :  { %v6538_v33 = vmul.f32 %v19136_v27, %v6536_v22 }
0x12e7   :  { %6529 = vrot.lane.b32.xlu0 %v6527_v35, %s19335_s1 }
0x12e8   :  { %6540 = vrot.lane.b32.xlu1 %v6538_v33, %s19335_s1 }
0x1359   :  { %v6530_v5 = vpop.permute.xlu0 %6529 }
0x135a   :  { %v21667_v29 = vadd.f32 %v6530_v5, %v6522_v40  ;;  %v6541_v1 = vpop.permute.xlu1 %6540 }
0x135b   :  { %v21669_v23 = vadd.f32 %v6541_v1, %v6533_v16 }
0x135c   :  { %19137 = vtanh.f32 %v21667_v29 }
0x135d   :  { %19139 = vtanh.f32 %v21669_v23 }
0x1366   :  { %v19138_v15 = vpop.eup %19137 }
0x1367   :  { %v19140_v62 = vpop.eup %19139  ;;  %6546 = vrot.lane.b32.xlu0 %v19138_v15, %s19334_s5 }
0x1368   :  { %6552 = vrot.lane.b32.xlu1 %v19140_v62, %s19334_s5 }
0x13d9   :  { %v6547_v37 = vpop.permute.xlu0 %6546 }
0x13da   :  { %v6549_v41 = vmul.f32 %v19134_v4, %v6547_v37  ;;  %v6553_v44 = vpop.permute.xlu1 %6552 }
0x13db   :  { %v6555_v46 = vmul.f32 %v19136_v27, %v6553_v44 }
0x13dc   :  { %6557 = vrot.lane.b32.xlu0 %v6549_v41, %s19335_s1 }
0x13dd   :  { %6561 = vrot.lane.b32.xlu1 %v6555_v46, %s19334_s5 }
0x144e   :  { %v21677_v28 = vpop.permute.xlu0 %6557 }
0x144f   :  { %24709 = vst [vmem:[#allocation35_spill] sm:$0xff] %v21677_v28  ;;  %v21679_v18 = vpop.permute.xlu1 %6561 }
0x1450   :  { %v6564_v35 = vsel %vm3008_vm0, %v21677_v28, %v21679_v18 }
0x1451   :  { %v6568_v22 = vsel %vm2299_vm1, %v6564_v35, 0 }
0x1452   :  { %v6651_v33 = vand.u32 4294901760, %v6568_v22 }
0x1454   :  { %v6652_v40 = vsub.f32 %v6568_v22, %v6651_v33 }
0x1456   :  { %v6653_v5 = vand.u32 4294901760, %v6652_v40 }
0x1458   :  { %v6654_v4 = vsub.f32 %v6652_v40, %v6653_v5 }
0x145a   :  { %v6655_v16 = vand.u32 4294901760, %v6654_v4 }
0x145c   :  { %6656 = vmatmul.mubr.f32.vlgmr.msra.gmra.mrb[14].mxu0 %v6655_v16 }
0x145d   :  { %17412 = vmatpush1.bf16.msra.mxu0 %v24684_v51  ;;  %6806 = vmatprep.mubr.f32.mxu0 %v24505_v19 }
0x145e   :  { %17414 = vmatprep.subr.bf16.mxu0 %v24685_v50 }
0x1461   :  { %17416 = vmatpush1.bf16.msra.mxu0 %v24686_v3 }
0x1462   :  { %17418 = vmatprep.subr.bf16.mxu0 %v24687_v54 }
0x1465   :  { %17420 = vmatpush1.bf16.msra.mxu0 %v24688_v0 }
0x1466   :  { %17422 = vmatprep.subr.bf16.mxu0 %v24689_v45 }
0x1469   :  { %17424 = vmatpush1.bf16.msra.mxu0 %v24690_v49 }
0x146a   :  { %17426 = vmatprep.subr.bf16.mxu0 %v24691_v31 }
0x146c   :  { %6808 = vmatmul.mubr.f32.vlgmr.msra.gmra.mrb[14].mxu0 %v6651_v33 }
0x146d   :  { %17428 = vmatpush1.bf16.msra.mxu0 %v24692_v55  ;;  %6910 = vmatprep.mubr.f32.mxu0 %v24505_v19 }
0x146e   :  { %17430 = vmatprep.subr.bf16.mxu0 %v24693_v13 }
0x1471   :  { %17432 = vmatpush1.bf16.msra.mxu0 %v24694_v11 }
0x1472   :  { %17434 = vmatprep.subr.bf16.mxu0 %v24695_v2 }
0x1475   :  { %17436 = vmatpush1.bf16.msra.mxu0 %v24696_v17 }
0x1476   :  { %17438 = vmatprep.subr.bf16.mxu0 %v24697_v24 }
0x1479   :  { %17440 = vmatpush1.bf16.msra.mxu0 %v24698_v25 }
0x147a   :  { %17442 = vmatprep.subr.bf16.mxu0 %v24672_v57 }
0x147c   :  { %6913 = vmatmul.mubr.f32.vlgmr.msra.gmra.mrb[14].mxu0 %v6652_v40 }
0x147d   :  { %17444 = vmatpush1.bf16.msra.mxu0 %v24673_v21  ;;  %6999 = vmatprep.mubr.f32.mxu0 %v24505_v19 }
0x147e   :  { %17446 = vmatprep.subr.bf16.mxu0 %v24674_v7 }
0x1481   :  { %17448 = vmatpush1.bf16.msra.mxu0 %v24675_v20 }
0x1482   :  { %17450 = vmatprep.subr.bf16.mxu0 %v24676_v32 }
0x1485   :  { %17452 = vmatpush1.bf16.msra.mxu0 %v24677_v8 }
0x1486   :  { %17454 = vmatprep.subr.bf16.mxu0 %v24678_v53 }
0x1489   :  { %17456 = vmatpush1.bf16.msra.mxu0 %v24679_v26 }
0x148a   :  { %17458 = vmatprep.subr.bf16.mxu0 %v24699_v36 }
0x148c   :  { %7003 = vmatmul.mubr.f32.vlgmr.msra.gmra.mrb[14].mxu0 %v6653_v5 }
0x148d   :  { %17460 = vmatpush1.bf16.msra.mxu0 %v24700_v59  ;;  %7121 = vmatprep.mubr.f32.mxu0 %v24505_v19 }
0x148e   :  { %17462 = vmatprep.subr.bf16.mxu0 %v24701_v52 }
0x1491   :  { %17464 = vmatpush1.bf16.msra.mxu0 %v24702_v9 }
0x1492   :  { %17466 = vmatprep.subr.bf16.mxu0 %v24703_v12 }
0x1495   :  { %17468 = vmatpush1.bf16.msra.mxu0 %v24704_v14 }
0x1496   :  { %17470 = vmatprep.subr.bf16.mxu0 %v24705_v10 }
0x1499   :  { %17472 = vmatpush1.bf16.msra.mxu0 %v24706_v47 }
0x149a   :  { %17474 = vmatprep.subr.bf16.mxu0 %v24672_v57 }
0x149c   :  { %7123 = vmatmul.mubr.f32.vlgmr.msra.gmra.mrb[14].mxu0 %v6651_v33 }
0x149d   :  { %17476 = vmatpush1.bf16.msra.mxu0 %v24673_v21  ;;  %7209 = vmatprep.mubr.f32.mxu0 %v24505_v19 }
0x149e   :  { %17478 = vmatprep.subr.bf16.mxu0 %v24674_v7 }
0x14a1   :  { %17480 = vmatpush1.bf16.msra.mxu0 %v24675_v20 }
0x14a2   :  { %17482 = vmatprep.subr.bf16.mxu0 %v24676_v32 }
0x14a5   :  { %17484 = vmatpush1.bf16.msra.mxu0 %v24677_v8 }
0x14a6   :  { %17486 = vmatprep.subr.bf16.mxu0 %v24678_v53 }
0x14a9   :  { %17488 = vmatpush1.bf16.msra.mxu0 %v24679_v26 }
0x14ac   :  { %7211 = vmatmul.mubr.f32.vlgmr.msra.gmra.mrb[14].mxu0 %v6651_v33 }
0x14ad   :  { %8126 = vmatprep.mubr.f32.mxu0 %v24505_v19 }
0x157f   :  { %v7212_v27 = vpop.f32.mrb[14].mxu0 }
0x1580   :  { %v7217_v1 = vadd.f32 %v21258_v30, %v7212_v27  ;;  %v7214_v15 = vpop.f32.mrb[15].mxu0 }
0x1581   :  { %v7218_v62 = vadd.f32 %v21239_v39, %v7214_v15 }
0x1582   :  { %19141 = vtanh.f32 %v7217_v1  ;;  %v16005_v44 = vmul.f32 -1.442695, %v7217_v1 }
0x1583   :  { %19143 = vtanh.f32 %v7218_v62  ;;  %v16006_v46 = vmul.f32 -1.442695, %v7218_v62 }
0x1584   :  { %19145 = vpow2.f32 %v16005_v44 }
0x1585   :  { %19147 = vpow2.f32 %v16006_v46 }
0x158c   :  { %v19142_v37 = vpop.eup %19141 }
0x158d   :  { %v19144_v41 = vpop.eup %19143  ;;  %7235 = vrot.lane.b32.xlu0 %v19142_v37, %s19334_s5 }
0x158e   :  { %7246 = vrot.lane.b32.xlu1 %v19144_v41, %s19334_s5  ;;  %v19146_v35 = vpop.eup %19145 }
0x158f   :  { %v19148_v22 = vpop.eup %19147  ;;  %v7225_v33 = vadd.f32 1.0, %v19146_v35 }
0x1590   :  { %v7226_v40 = vadd.f32 1.0, %v19148_v22 }
0x1591   :  { %19149 = vrcp.f32 %v7225_v33 }
0x1592   :  { %19151 = vrcp.f32 %v7226_v40 }
0x159b   :  { %v19150_v30 = vpop.eup %19149 }
0x159c   :  { %v19152_v5 = vpop.eup %19151  ;;  %v7233_v1 = vmul.f32 %v19150_v30, %v21667_v29 }
0x159d   :  { %v7244_v62 = vmul.f32 %v19152_v5, %v21669_v23 }
0x15ff   :  { %v7236_v39 = vpop.permute.xlu0 %7235 }
0x1600   :  { %v7238_v4 = vmul.f32 %v19150_v30, %v7236_v39  ;;  %v7247_v16 = vpop.permute.xlu1 %7246 }
0x1601   :  { %v7249_v27 = vmul.f32 %v19152_v5, %v7247_v16 }
0x1602   :  { %7240 = vrot.lane.b32.xlu0 %v7238_v4, %s19335_s1 }
0x1603   :  { %7251 = vrot.lane.b32.xlu1 %v7249_v27, %s19335_s1 }
0x1674   :  { %v7241_v15 = vpop.permute.xlu0 %7240 }
0x1675   :  { %v21738_v37 = vadd.f32 %v7241_v15, %v7233_v1  ;;  %v7252_v41 = vpop.permute.xlu1 %7251 }
0x1676   :  { %v21740_v44 = vadd.f32 %v7252_v41, %v7244_v62 }
0x1677   :  { %19153 = vtanh.f32 %v21738_v37 }
0x1678   :  { %19155 = vtanh.f32 %v21740_v44 }
0x1681   :  { %v19154_v46 = vpop.eup %19153 }
0x1682   :  { %v19156_v35 = vpop.eup %19155  ;;  %7257 = vrot.lane.b32.xlu0 %v19154_v46, %s19334_s5 }
0x1683   :  { %7263 = vrot.lane.b32.xlu1 %v19156_v35, %s19334_s5 }
0x16f4   :  { %v7258_v22 = vpop.permute.xlu0 %7257 }
0x16f5   :  { %v7260_v29 = vmul.f32 %v19150_v30, %v7258_v22  ;;  %v7264_v33 = vpop.permute.xlu1 %7263 }
0x16f6   :  { %v7266_v40 = vmul.f32 %v19152_v5, %v7264_v33  ;;  %v8001_v33 = vld [vmem:[%s23987_s6 + $0x38] sm:$0xff] }
0x16f7   :  { %7268 = vrot.lane.b32.xlu0 %v7260_v29, %s19335_s1  ;;  %v7999_v29 = vld [vmem:[%s23987_s6 + $0x28] sm:$0xff] }
0x16f8   :  { %7272 = vrot.lane.b32.xlu1 %v7266_v40, %s19334_s5  ;;  %v8054_v40 = vand.u32 4294901760, %v7999_v29 }
0x1769   :  { %v21748_v23 = vpop.permute.xlu0 %7268 }
0x176a   :  { %24710 = vst [vmem:[#allocation38_spill] sm:$0xff] %v21748_v23  ;;  %v21750_v39 = vpop.permute.xlu1 %7272 }
0x176b   :  { %v7275_v4 = vsel %vm3008_vm0, %v21748_v23, %v21750_v39 }
0x176c   :  { %v7279_v16 = vsel %vm2299_vm1, %v7275_v4, 0  ;;  %v8058_v4 = vand.u32 4294901760, %v8001_v33 }
0x176d   :  { %v7362_v27 = vand.u32 4294901760, %v7279_v16 }
0x176f   :  { %v7363_v1 = vsub.f32 %v7279_v16, %v7362_v27  ;;  %v7998_v16 = vld [vmem:[%s23987_s6 + $0x20] sm:$0xff] }
0x1771   :  { %v7364_v15 = vand.u32 4294901760, %v7363_v1 }
0x1773   :  { %v7365_v30 = vsub.f32 %v7363_v1, %v7364_v15 }
0x1775   :  { %v7366_v62 = vand.u32 4294901760, %v7365_v30  ;;  %v21863_v30 = vpack.c.bf16 %v8058_v4, %v8054_v40 }
0x1777   :  { %7367 = vmatmul.mubr.f32.vlgmr.msra.gmra.mrb[30].mxu1 %v7366_v62  ;;  %24717 = vst [vmem:[#allocation22_spill] sm:$0xff] %v21863_v30 }
0x1778   :  { %17508 = vmatpush1.bf16.msra.mxu1 %v24684_v51  ;;  %7517 = vmatprep.mubr.f32.mxu1 %v24505_v19 }
0x1779   :  { %17510 = vmatprep.subr.bf16.mxu1 %v24685_v50 }
0x177c   :  { %17512 = vmatpush1.bf16.msra.mxu1 %v24686_v3 }
0x177d   :  { %17514 = vmatprep.subr.bf16.mxu1 %v24687_v54 }
0x1780   :  { %17516 = vmatpush1.bf16.msra.mxu1 %v24688_v0 }
0x1781   :  { %17518 = vmatprep.subr.bf16.mxu1 %v24689_v45 }
0x1784   :  { %17520 = vmatpush1.bf16.msra.mxu1 %v24690_v49 }
0x1785   :  { %17522 = vmatprep.subr.bf16.mxu1 %v24691_v31 }
0x1787   :  { %7519 = vmatmul.mubr.f32.vlgmr.msra.gmra.mrb[30].mxu1 %v7362_v27 }
0x1788   :  { %17524 = vmatpush1.bf16.msra.mxu1 %v24692_v55  ;;  %7621 = vmatprep.mubr.f32.mxu1 %v24505_v19 }
0x1789   :  { %17526 = vmatprep.subr.bf16.mxu1 %v24693_v13 }
0x178c   :  { %17528 = vmatpush1.bf16.msra.mxu1 %v24694_v11 }
0x178d   :  { %17530 = vmatprep.subr.bf16.mxu1 %v24695_v2 }
0x1790   :  { %17532 = vmatpush1.bf16.msra.mxu1 %v24696_v17 }
0x1791   :  { %17534 = vmatprep.subr.bf16.mxu1 %v24697_v24 }
0x1794   :  { %17536 = vmatpush1.bf16.msra.mxu1 %v24698_v25  ;;  %v7995_v25 = vld [vmem:[%s23987_s6 + $0x8] sm:$0xff] }
0x1795   :  { %17538 = vmatprep.subr.bf16.mxu1 %v24672_v57 }
0x1797   :  { %7624 = vmatmul.mubr.f32.vlgmr.msra.gmra.mrb[30].mxu1 %v7363_v1  ;;  %v8056_v1 = vand.u32 4294901760, %v7998_v16 }
0x1798   :  { %17540 = vmatpush1.bf16.msra.mxu1 %v24673_v21  ;;  %7710 = vmatprep.mubr.f32.mxu1 %v24505_v19 }
0x1799   :  { %17542 = vmatprep.subr.bf16.mxu1 %v24674_v7 }
0x179c   :  { %17544 = vmatpush1.bf16.msra.mxu1 %v24675_v20 }
0x179d   :  { %17546 = vmatprep.subr.bf16.mxu1 %v24676_v32 }
0x17a0   :  { %17548 = vmatpush1.bf16.msra.mxu1 %v24677_v8 }
0x17a1   :  { %17550 = vmatprep.subr.bf16.mxu1 %v24678_v53 }
0x17a4   :  { %17552 = vmatpush1.bf16.msra.mxu1 %v24679_v26 }
0x17a5   :  { %17554 = vmatprep.subr.bf16.mxu1 %v24699_v36  ;;  %v7997_v36 = vld [vmem:[%s23987_s6 + $0x18] sm:$0xff] }
0x17a7   :  { %7714 = vmatmul.mubr.f32.vlgmr.msra.gmra.mrb[30].mxu1 %v7364_v15 }
0x17a8   :  { %17556 = vmatpush1.bf16.msra.mxu1 %v24700_v59  ;;  %7832 = vmatprep.mubr.f32.mxu1 %v24505_v19  ;;  %v7994_v59 = vld [vmem:[%s23987_s6] sm:$0xff] }
0x17a9   :  { %17558 = vmatprep.subr.bf16.mxu1 %v24701_v52  ;;  %v8046_v52 = vand.u32 4294901760, %v7995_v25 }
0x17ab   :  { %v21837_v5 = vsub.f32 %v7995_v25, %v8046_v52  ;;  %v21903_v25 = vsub.f32 %v7998_v16, %v8056_v1 }
0x17ac   :  { %17560 = vmatpush1.bf16.msra.mxu1 %v24702_v9  ;;  %v8050_v9 = vand.u32 4294901760, %v7997_v36 }
0x17ad   :  { %17562 = vmatprep.subr.bf16.mxu1 %v24703_v12  ;;  %v7996_v12 = vld [vmem:[%s23987_s6 + $0x10] sm:$0xff]  ;;  %24714 = vst [vmem:[#allocation45_spill] sm:$0xff] %v21837_v5 }
0x17b0   :  { %17564 = vmatpush1.bf16.msra.mxu1 %v24704_v14  ;;  %v8048_v14 = vand.u32 4294901760, %v7994_v59 }
0x17b1   :  { %17566 = vmatprep.subr.bf16.mxu1 %v24705_v10  ;;  %v8052_v10 = vand.u32 4294901760, %v7996_v12 }
0x17b2   :  { %v21841_v41 = vsub.f32 %v7994_v59, %v8048_v14 }
0x17b3   :  { %v21845_v46 = vsub.f32 %v7996_v12, %v8052_v10 }
0x17b4   :  { %17568 = vmatpush1.bf16.msra.mxu1 %v24706_v47  ;;  %v21835_v47 = vpack.c.bf16 %v8050_v9, %v8046_v52 }
0x17b5   :  { %17570 = vmatprep.subr.bf16.mxu1 %v24672_v57 }
0x17b6   :  { %24713 = vst [vmem:[#allocation43_spill] sm:$0xff] %v21835_v47  ;;  %17586 = vmatprep.subr.bf16.mxu0 %v21835_v47 }
0x17b7   :  { %7834 = vmatmul.mubr.f32.vlgmr.msra.gmra.mrb[30].mxu1 %v7362_v27 }
0x17b8   :  { %17572 = vmatpush1.bf16.msra.mxu1 %v24673_v21  ;;  %7920 = vmatprep.mubr.f32.mxu1 %v24505_v19 }
0x17b9   :  { %17574 = vmatprep.subr.bf16.mxu1 %v24674_v7 }
0x17bc   :  { %17576 = vmatpush1.bf16.msra.mxu1 %v24675_v20 }
0x17bd   :  { %17578 = vmatprep.subr.bf16.mxu1 %v24676_v32 }
0x17c0   :  { %17580 = vmatpush1.bf16.msra.mxu1 %v24677_v8 }
0x17c1   :  { %17582 = vmatprep.subr.bf16.mxu1 %v24678_v53 }
0x17c4   :  { %17584 = vmatpush1.bf16.msra.mxu1 %v24679_v26 }
0x17c7   :  { %7922 = vmatmul.mubr.f32.vlgmr.msra.gmra.mrb[30].mxu1 %v7362_v27  ;;  %v8000_v27 = vld [vmem:[%s23987_s6 + $0x30] sm:$0xff] }
0x17c8   :  { %9150 = vmatprep.mubr.f32.mxu1 %v24505_v19  ;;  %v8060_v15 = vand.u32 4294901760, %v8000_v27 }
0x17ca   :  { %v21865_v62 = vpack.c.bf16 %v8060_v15, %v8056_v1 }
0x17cc   :  { %24718 = vst [vmem:[#allocation21_spill] sm:$0xff] %v21865_v62 }
0x189a   :  { %v7923_v57 = vpop.f32.mrb[30].mxu1 }
0x189b   :  { %v7928_v21 = vadd.f32 %v21262_v48, %v7923_v57  ;;  %v7925_v51 = vpop.f32.mrb[31].mxu1  ;;  %v8003_v57 = vld [vmem:[%s23987_s6 + $0x48] sm:$0xff] }
0x189c   :  { %v7929_v50 = vadd.f32 %v21235_v61, %v7925_v51  ;;  %v8062_v51 = vand.u32 4294901760, %v8003_v57 }
0x189d   :  { %19157 = vtanh.f32 %v7928_v21  ;;  %v16007_v32 = vmul.f32 -1.442695, %v7928_v21  ;;  %v8005_v21 = vld [vmem:[%s23987_s6 + $0x58] sm:$0xff] }
0x189e   :  { %19159 = vtanh.f32 %v7929_v50  ;;  %v16008_v8 = vmul.f32 -1.442695, %v7929_v50  ;;  %v8066_v50 = vand.u32 4294901760, %v8005_v21  ;;  %v21907_v59 = vsub.f32 %v8003_v57, %v8062_v51 }
0x189f   :  { %19161 = vpow2.f32 %v16007_v32 }
0x18a0   :  { %19163 = vpow2.f32 %v16008_v8  ;;  %v21909_v52 = vsub.f32 %v8005_v21, %v8066_v50 }
0x18a7   :  { %v19158_v7 = vpop.eup %19157 }
0x18a8   :  { %v19160_v20 = vpop.eup %19159  ;;  %7946 = vrot.lane.b32.xlu1 %v19158_v7, %s19334_s5  ;;  %v8002_v7 = vld [vmem:[%s23987_s6 + $0x40] sm:$0xff] }
0x18a9   :  { %7957 = vrot.lane.b32.xlu0 %v19160_v20, %s19334_s5  ;;  %v19162_v53 = vpop.eup %19161  ;;  %v8004_v20 = vld [vmem:[%s23987_s6 + $0x50] sm:$0xff]  ;;  %v8064_v32 = vand.u32 4294901760, %v8002_v7 }
0x18aa   :  { %v19164_v26 = vpop.eup %19163  ;;  %v7936_v3 = vadd.f32 1.0, %v19162_v53  ;;  %v8068_v8 = vand.u32 4294901760, %v8004_v20  ;;  %v21881_v53 = vpack.c.bf16 %v8066_v50, %v8062_v51  ;;  %v24211_v51 = vand.u32 4294901760, %v21841_v41 }
0x18ab   :  { %v7937_v54 = vadd.f32 1.0, %v19164_v26  ;;  %v21883_v26 = vsub.f32 %v7999_v29, %v8054_v40 }
0x18ac   :  { %19165 = vrcp.f32 %v7936_v3  ;;  %24719 = vst [vmem:[#allocation24_spill] sm:$0xff] %v21881_v53  ;;  %v21885_v3 = vsub.f32 %v8001_v33, %v8058_v4  ;;  %v21913_v12 = vsub.f32 %v8004_v20, %v8068_v8  ;;  %v24213_v4 = vand.u32 4294901760, %v21837_v5 }
0x18ad   :  { %19167 = vrcp.f32 %v7937_v54  ;;  %24720 = vst [vmem:[#allocation13_spill] sm:$0xff] %v21883_v26  ;;  %v21887_v54 = vpack.c.bf16 %v8068_v8, %v8064_v32 }
0x18ae   :  { %24721 = vst [vmem:[#allocation6_spill] sm:$0xff] %v21885_v3  ;;  %v8218_v57 = vsub.f32 %v21837_v5, %v24213_v4  ;;  %v22033_v4 = vld [vmem:[%s23988_s7 + $0x30] sm:$0xff] }
0x18af   :  { %24722 = vst [vmem:[#allocation4_spill] sm:$0xff] %v21887_v54 }
0x18b0   :  { %v8219_v50 = vand.u32 4294901760, %v8218_v57  ;;  %v21972_v57 = vld [vmem:[%s23988_s7 + $0x18] sm:$0xff] }
0x18b6   :  { %v21805_v48 = vpop.eup %19165 }
0x18b7   :  { %v21807_v0 = vpop.eup %19167  ;;  %v7944_v55 = vmul.f32 %v21805_v48, %v21738_v37  ;;  %v21839_v37 = vsub.f32 %v7997_v36, %v8050_v9  ;;  %v21905_v36 = vsub.f32 %v8000_v27, %v8060_v15  ;;  %v21911_v9 = vsub.f32 %v8002_v7, %v8064_v32 }
0x18b8   :  { %v7955_v11 = vmul.f32 %v21807_v0, %v21740_v44  ;;  %v21843_v44 = vpack.c.bf16 %v8052_v10, %v8048_v14  ;;  %v8224_v7 = vsub.f32 %v21841_v41, %v24211_v51 }
0x18b9   :  { %24715 = vst [vmem:[#allocation20_spill] sm:$0xff] %v21839_v37  ;;  %v24212_v16 = vand.u32 4294901760, %v21839_v37 }
0x18ba   :  { %24716 = vst [vmem:[#allocation19_spill] sm:$0xff] %v21843_v44  ;;  %17588 = vmatpush1.bf16.msra.mxu0 %v21843_v44  ;;  %v8225_v8 = vand.u32 4294901760, %v8224_v7  ;;  %v24216_v7 = vand.u32 4294901760, %v21972_v57 }
0x18bb   :  { %17590 = vmatprep.subr.bf16.mxu0 %v21863_v30  ;;  %v8230_v21 = vsub.f32 %v21839_v37, %v24212_v16  ;;  %v22028_v16 = vld [vmem:[%s23988_s7 + $0x20] sm:$0xff] }
0x18be   :  { %17592 = vmatpush1.bf16.msra.mxu0 %v21865_v62 }
0x18bf   :  { %17594 = vmatprep.subr.bf16.mxu0 %v21881_v53 }
0x18c2   :  { %17596 = vmatpush1.bf16.msra.mxu0 %v21887_v54 }
0x191a   :  { %v7947_v61 = vpop.permute.xlu1 %7946 }
0x191b   :  { %v7949_v45 = vmul.f32 %v21805_v48, %v7947_v61  ;;  %v7958_v49 = vpop.permute.xlu0 %7957  ;;  %v8007_v61 = vld [vmem:[%s23987_s6 + $0x68] sm:$0xff] }
0x191c   :  { %v7960_v31 = vmul.f32 %v21807_v0, %v7958_v49  ;;  %v8070_v49 = vand.u32 4294901760, %v8007_v61 }
0x191d   :  { %7951 = vrot.lane.b32.xlu1 %v7949_v45, %s19335_s1  ;;  %v8009_v45 = vld [vmem:[%s23987_s6 + $0x78] sm:$0xff] }
0x191e   :  { %7962 = vrot.lane.b32.xlu0 %v7960_v31, %s19335_s1  ;;  %v8074_v31 = vand.u32 4294901760, %v8009_v45  ;;  %v21917_v10 = vsub.f32 %v8007_v61, %v8070_v49 }
0x1920   :  { %v21915_v14 = vpack.c.bf16 %v8074_v31, %v8070_v49  ;;  %v24208_v49 = vand.u32 4294901760, %v21885_v3  ;;  %v24243_v30 = vand.u32 4294901760, %v21917_v10 }
0x1922   :  { %24723 = vst [vmem:[#allocation7_spill] sm:$0xff] %v21915_v14  ;;  %17598 = vmatprep.subr.bf16.mxu0 %v21915_v14 }
0x198f   :  { %v7952_v13 = vpop.permute.xlu1 %7951 }
0x1990   :  { %v21817_v2 = vadd.f32 %v7952_v13, %v7944_v55  ;;  %v7963_v17 = vpop.permute.xlu0 %7962  ;;  %v8006_v55 = vld [vmem:[%s23987_s6 + $0x60] sm:$0xff]  ;;  %v8008_v13 = vld [vmem:[%s23987_s6 + $0x70] sm:$0xff] }
0x1991   :  { %v21819_v24 = vadd.f32 %v7963_v17, %v7955_v11  ;;  %v8072_v11 = vand.u32 4294901760, %v8006_v55  ;;  %v8076_v17 = vand.u32 4294901760, %v8008_v13 }
0x1992   :  { %24711 = vst [vmem:[#allocation39_spill] sm:$0xff] %v21817_v2  ;;  %19169 = vtanh.f32 %v21817_v2 }
0x1993   :  { %24712 = vst [vmem:[#allocation42_spill] sm:$0xff] %v21819_v24  ;;  %19171 = vtanh.f32 %v21819_v24  ;;  %v21923_v29 = vsub.f32 %v8006_v55, %v8072_v11  ;;  %v21925_v33 = vsub.f32 %v8008_v13, %v8076_v17  ;;  %v8254_v13 = vsub.f32 %v21885_v3, %v24208_v49  ;;  %v22080_v24 = vld [vmem:[%s23988_s7 + $0x40] sm:$0xff] }
0x1994   :  { %v24219_v49 = vand.u32 4294901760, %v21907_v59 }
0x199c   :  { %v19170_v35 = vpop.eup %19169 }
0x199d   :  { %v19172_v22 = vpop.eup %19171  ;;  %7968 = vrot.lane.b32.xlu1 %v19170_v35, %s19334_s5  ;;  %v21919_v35 = vsub.f32 %v8009_v45, %v8074_v31  ;;  %v24209_v45 = vand.u32 4294901760, %v21883_v26 }
0x199e   :  { %7974 = vrot.lane.b32.xlu0 %v19172_v22, %s19334_s5  ;;  %v21921_v22 = vpack.c.bf16 %v8076_v17, %v8072_v11  ;;  %v24207_v11 = vand.u32 4294901760, %v21903_v25  ;;  %v24206_v17 = vand.u32 4294901760, %v21905_v36 }
0x199f   :  { %v8242_v55 = vsub.f32 %v21883_v26, %v24209_v45  ;;  %v24221_v45 = vand.u32 4294901760, %v21909_v52  ;;  %v24246_v44 = vand.u32 4294901760, %v21919_v35 }
0x19a0   :  { %24724 = vst [vmem:[#allocation8_spill] sm:$0xff] %v21921_v22  ;;  %17600 = vmatpush1.bf16.msra.mxu0 %v21921_v22  ;;  %v22085_v22 = vld [vmem:[%s23988_s7 + $0x50] sm:$0xff] }
0x1a0f   :  { %v7969_v40 = vpop.permute.xlu1 %7968 }
0x1a10   :  { %v7971_v27 = vmul.f32 %v21805_v48, %v7969_v40  ;;  %v7975_v1 = vpop.permute.xlu0 %7974  ;;  %v24210_v48 = vand.u32 4294901760, %v21845_v46  ;;  %v8243_v40 = vand.u32 4294901760, %v8242_v55 }
0x1a11   :  { %v21933_v15 = vmul.f32 %v21807_v0, %v7975_v1  ;;  %v8231_v0 = vand.u32 4294901760, %v8230_v21  ;;  %v21967_v1 = vld [vmem:[%s23988_s7 + $0x8] sm:$0xff]  ;;  %v8248_v21 = vsub.f32 %v21903_v25, %v24207_v11 }
0x1a12   :  { %7979 = vrot.lane.b32.xlu1 %v7971_v27, %s19335_s1  ;;  %v8236_v20 = vsub.f32 %v21845_v46, %v24210_v48  ;;  %v8255_v27 = vand.u32 4294901760, %v8254_v13  ;;  %v24739_v23 = vand.u32 4294901760, %v21967_v1 }
0x1a13   :  { %24725 = vst [vmem:[#allocation9_spill] sm:$0xff] %v21933_v15  ;;  %7983 = vrot.lane.b32.xlu0 %v21933_v15, %s19334_s5  ;;  %v17601_v32 = vpack.c.bf16 %v8231_v0, %v8219_v50  ;;  %v8260_v50 = vsub.f32 %v21905_v36, %v24206_v17  ;;  %v24217_v0 = vand.u32 4294901760, %v21967_v1  ;;  %v8249_v13 = vand.u32 4294901760, %v8248_v21  ;;  %v22018_v21 = vld [vmem:[%s23988_s7 + $0x38] sm:$0xff] }
0x1a14   :  { %v8237_v61 = vand.u32 4294901760, %v8236_v20  ;;  %v21985_v20 = vld [vmem:[%s23988_s7] sm:$0xff]  ;;  %v24222_v51 = vand.u32 4294901760, %v22018_v21  ;;  %v22157_v42 = vsub.f32 %v21967_v1, %v24739_v23 }
0x1a15   :  { %17602 = vmatprep.subr.bf16.mxu0 %v17601_v32  ;;  %v21990_v32 = vld [vmem:[%s23988_s7 + $0x10] sm:$0xff]  ;;  %v8261_v17 = vand.u32 4294901760, %v8260_v50  ;;  %v22000_v11 = vpack.c.bf16 %v24216_v7, %v24217_v0  ;;  %v22061_v7 = vld [vmem:[%s23988_s7 + $0x48] sm:$0xff]  ;;  %v22066_v0 = vld [vmem:[%s23988_s7 + $0x58] sm:$0xff]  ;;  %v24741_v23 = vand.u32 4294901760, %v21985_v20 }
0x1a16   :  { %v21954_v31 = vpack.c.bf16 %v8237_v61, %v8225_v8  ;;  %v21992_v8 = vpack.c.bf16 %v8255_v27, %v8243_v40  ;;  %v24215_v61 = vand.u32 4294901760, %v21985_v20  ;;  %v24214_v55 = vand.u32 4294901760, %v21990_v32  ;;  %v22013_v27 = vld [vmem:[%s23988_s7 + $0x28] sm:$0xff] }
0x1a17   :  { %v22020_v50 = vpack.c.bf16 %v8261_v17, %v8249_v13  ;;  %17682 = vmatprep.subr.bf16.mxu1 %v22000_v11  ;;  %v24223_v48 = vand.u32 4294901760, %v22013_v27  ;;  %v8266_v17 = vsub.f32 %v21907_v59, %v24219_v49  ;;  %v8278_v13 = vsub.f32 %v21909_v52, %v24221_v45 }
0x1a18   :  { %24726 = vst [vmem:[#allocation14_spill] sm:$0xff] %v21954_v31  ;;  %24727 = vst [vmem:[#allocation15_spill] sm:$0xff] %v21992_v8  ;;  %v22008_v40 = vpack.c.bf16 %v24214_v55, %v24215_v61  ;;  %v24225_v55 = vand.u32 4294901760, %v22028_v16  ;;  %v24224_v61 = vand.u32 4294901760, %v22033_v4  ;;  %v24732_v54 = vand.u32 4294901760, %v22061_v7 }
0x1a19   :  { %24728 = vst [vmem:[#allocation16_spill] sm:$0xff] %v22020_v50  ;;  %v22050_v2 = vpack.c.bf16 %v24222_v51, %v24223_v48  ;;  %v8267_v49 = vand.u32 4294901760, %v8266_v17  ;;  %v8279_v15 = vand.u32 4294901760, %v8278_v13  ;;  %v24729_v51 = vand.u32 4294901760, %v21911_v9 }
0x1a1a   :  { %17684 = vmatpush1.bf16.msra.mxu1 %v22008_v40  ;;  %v22056_v45 = vpack.c.bf16 %v24224_v61, %v24225_v55  ;;  %v24730_v13 = vand.u32 4294901760, %v21913_v12  ;;  %v24241_v61 = vand.u32 4294901760, %v22085_v22  ;;  %v24733_v53 = vand.u32 4294901760, %v22066_v0 }
0x1a1b   :  { %v8272_v17 = vsub.f32 %v21911_v9, %v24729_v51  ;;  %17686 = vmatprep.subr.bf16.mxu1 %v22050_v2  ;;  %v22087_v51 = vpack.c.bf16 %v8279_v15, %v8267_v49  ;;  %v22129_v49 = vld [vmem:[%s23988_s7 + $0x60] sm:$0xff]  ;;  %v22175_v1 = vsub.f32 %v21985_v20, %v24741_v23  ;;  %v24747_v23 = vand.u32 4294901760, %v22028_v16 }
0x1a1c   :  { %v8284_v48 = vsub.f32 %v21913_v12, %v24730_v13  ;;  %v24242_v13 = vand.u32 4294901760, %v22080_v24  ;;  %v22096_v62 = vpack.c.bf16 %v24733_v53, %v24732_v54  ;;  %v22116_v53 = vld [vmem:[%s23988_s7 + $0x78] sm:$0xff] }
0x1a1d   :  { %24731 = vst [vmem:[#allocation18_spill] sm:$0xff] %v22087_v51  ;;  %v8273_v14 = vand.u32 4294901760, %v8272_v17  ;;  %v22111_v17 = vld [vmem:[%s23988_s7 + $0x68] sm:$0xff]  ;;  %v24738_v8 = vand.u32 4294901760, %v22116_v53 }
0x1a1e   :  { %17688 = vmatpush1.bf16.msra.mxu1 %v22056_v45  ;;  %v8285_v55 = vand.u32 4294901760, %v8284_v48  ;;  %v22104_v15 = vpack.c.bf16 %v24241_v61, %v24242_v13  ;;  %v8290_v61 = vsub.f32 %v21917_v10, %v24243_v30  ;;  %v24735_v30 = vand.u32 4294901760, %v21923_v29 }
0x1a1f   :  { %17690 = vmatprep.subr.bf16.mxu1 %v22096_v62  ;;  %v24736_v13 = vand.u32 4294901760, %v21925_v33  ;;  %v24737_v50 = vand.u32 4294901760, %v22111_v17 }
0x1a20   :  { %v22118_v54 = vpack.c.bf16 %v8285_v55, %v8273_v14  ;;  %v22134_v14 = vld [vmem:[%s23988_s7 + $0x70] sm:$0xff]  ;;  %v8302_v55 = vsub.f32 %v21919_v35, %v24246_v44  ;;  %v8296_v48 = vsub.f32 %v21923_v29, %v24735_v30  ;;  %v8291_v51 = vand.u32 4294901760, %v8290_v61 }
0x1a21   :  { %v8308_v47 = vsub.f32 %v21925_v33, %v24736_v13  ;;  %v22151_v31 = vpack.c.bf16 %v24738_v8, %v24737_v50  ;;  %v24251_v44 = vand.u32 4294901760, %v22134_v14  ;;  %v24740_v13 = vand.u32 4294901760, %v21972_v57 }
0x1a22   :  { %24734 = vst [vmem:[#allocation5_spill] sm:$0xff] %v22118_v54  ;;  %17692 = vmatpush1.bf16.msra.mxu1 %v22104_v15  ;;  %v24252_v54 = vand.u32 4294901760, %v22129_v49  ;;  %v8303_v30 = vand.u32 4294901760, %v8302_v55  ;;  %v8297_v28 = vand.u32 4294901760, %v8296_v48  ;;  %v24253_v50 = vand.u32 4294901760, %v22157_v42 }
0x1a23   :  { %v8309_v6 = vand.u32 4294901760, %v8308_v47  ;;  %v22162_v61 = vsub.f32 %v21972_v57, %v24740_v13  ;;  %17694 = vmatprep.subr.bf16.mxu1 %v22151_v31  ;;  %v24742_v47 = vand.u32 4294901760, %v21990_v32 }
0x1a24   :  { %v22169_v8 = vpack.c.bf16 %v24251_v44, %v24252_v54  ;;  %v22182_v48 = vpack.c.bf16 %v8303_v30, %v8291_v51  ;;  %v24745_v44 = vand.u32 4294901760, %v22013_v27  ;;  %v9165_v20 = vsub.f32 %v22157_v42, %v24253_v50 }
0x1a25   :  { %v22180_v57 = vsub.f32 %v21990_v32, %v24742_v47  ;;  %v22184_v55 = vpack.c.bf16 %v8309_v6, %v8297_v28  ;;  %v24254_v13 = vand.u32 4294901760, %v22162_v61  ;;  %v24255_v32 = vand.u32 4294901760, %v22175_v1 }
0x1a26   :  { %24743 = vst [vmem:[#allocation10_spill] sm:$0xff] %v22182_v48  ;;  %v22190_v54 = vsub.f32 %v22013_v27, %v24745_v44  ;;  %17696 = vmatpush1.bf16.msra.mxu1 %v22169_v8  ;;  %v24746_v6 = vand.u32 4294901760, %v22018_v21  ;;  %v22212_v47 = vsub.f32 %v22028_v16, %v24747_v23  ;;  %v9166_v50 = vand.u32 4294901760, %v9165_v20 }
0x1a27   :  { %24744 = vst [vmem:[#allocation70_spill] sm:$0xff] %v22184_v55  ;;  %v24258_v51 = vand.u32 4294901760, %v22180_v57  ;;  %v9177_v44 = vsub.f32 %v22162_v61, %v24254_v13  ;;  %v24748_v20 = vand.u32 4294901760, %v22033_v4 }
0x1a28   :  { %v22201_v28 = vsub.f32 %v22018_v21, %v24746_v6  ;;  %v24261_v30 = vand.u32 4294901760, %v22190_v54  ;;  %v9171_v21 = vsub.f32 %v22175_v1, %v24255_v32  ;;  %v24264_v16 = vand.u32 4294901760, %v22212_v47 }
0x1a29   :  { %v9183_v6 = vsub.f32 %v22180_v57, %v24258_v51  ;;  %v9178_v55 = vand.u32 4294901760, %v9177_v44  ;;  %9156 = vmatmul.mubr.f32.vlgmr.msra.gmra.mrb[32].mxu1 %v24505_v19  ;;  %v22229_v23 = vsub.f32 %v22033_v4, %v24748_v20  ;;  %v24750_v20 = vand.u32 4294901760, %v22061_v7 }
0x1a2a   :  { %v24262_v13 = vand.u32 4294901760, %v22201_v28  ;;  %v9189_v27 = vsub.f32 %v22190_v54, %v24261_v30  ;;  %v9172_v32 = vand.u32 4294901760, %v9171_v21  ;;  %9306 = vmatprep.mubr.f32.mxu1 %v24505_v19  ;;  %v9195_v48 = vsub.f32 %v22212_v47, %v24264_v16 }
0x1a2b   :  { %v9184_v5 = vand.u32 4294901760, %v9183_v6  ;;  %v22237_v37 = vpack.c.bf16 %v9178_v55, %v9166_v50  ;;  %v24263_v4 = vand.u32 4294901760, %v22229_v23  ;;  %v22248_v51 = vsub.f32 %v22061_v7, %v24750_v20 }
0x1a2c   :  { %v9201_v44 = vsub.f32 %v22201_v28, %v24262_v13  ;;  %v9190_v30 = vand.u32 4294901760, %v9189_v27  ;;  %v24751_v13 = vand.u32 4294901760, %v22066_v0  ;;  %v9196_v55 = vand.u32 4294901760, %v9195_v48 }
0x1a2d   :  { %v22243_v21 = vpack.c.bf16 %v9184_v5, %v9172_v32  ;;  %17698 = vmatprep.subr.bf16.mxu1 %v22237_v37  ;;  %v9207_v27 = vsub.f32 %v22229_v23, %v24263_v4  ;;  %v24752_v5 = vand.u32 4294901760, %v22080_v24  ;;  %v24753_v7 = vand.u32 4294901760, %v22085_v22 }
0x1a2e   :  { %v9202_v6 = vand.u32 4294901760, %v9201_v44  ;;  %v22253_v50 = vsub.f32 %v22066_v0, %v24751_v13  ;;  %v24265_v48 = vand.u32 4294901760, %v22248_v51  ;;  %v24755_v20 = vand.u32 4294901760, %v22111_v17 }
0x1a2f   :  { %24749 = vst [vmem:[#allocation11_spill] sm:$0xff] %v22243_v21  ;;  %v22262_v32 = vsub.f32 %v22080_v24, %v24752_v5  ;;  %v22267_v44 = vsub.f32 %v22085_v22, %v24753_v7  ;;  %17700 = vmatpush1.bf16.msra.mxu1 %v22243_v21  ;;  %v9208_v24 = vand.u32 4294901760, %v9207_v27  ;;  %v24756_v27 = vand.u32 4294901760, %v22116_v53 }
0x1a30   :  { %v22270_v0 = vpack.c.bf16 %v9202_v6, %v9190_v30  ;;  %v24268_v13 = vand.u32 4294901760, %v22253_v50  ;;  %v22277_v4 = vsub.f32 %v22111_v17, %v24755_v20  ;;  %v9213_v30 = vsub.f32 %v22248_v51, %v24265_v48 }
0x1a31   :  { %v24271_v22 = vand.u32 4294901760, %v22262_v32  ;;  %v24272_v7 = vand.u32 4294901760, %v22267_v44  ;;  %v22294_v20 = vsub.f32 %v22116_v53, %v24756_v27  ;;  %v22296_v5 = vpack.c.bf16 %v9208_v24, %v9196_v55 }
0x1a32   :  { %24754 = vst [vmem:[#allocation12_spill] sm:$0xff] %v22270_v0  ;;  %17702 = vmatprep.subr.bf16.mxu1 %v22270_v0  ;;  %v9225_v6 = vsub.f32 %v22253_v50, %v24268_v13  ;;  %v24757_v0 = vand.u32 4294901760, %v22129_v49  ;;  %v9214_v17 = vand.u32 4294901760, %v9213_v30  ;;  %v24758_v55 = vand.u32 4294901760, %v22277_v4 }
0x1a33   :  { %v9219_v16 = vsub.f32 %v22262_v32, %v24271_v22  ;;  %v9231_v48 = vsub.f32 %v22267_v44, %v24272_v7  ;;  %17704 = vmatpush1.bf16.msra.mxu1 %v22296_v5  ;;  %v24278_v7 = vand.u32 4294901760, %v22294_v20  ;;  %v22345_v53 = vpack.c.bf16 %v22162_v61, %v22157_v42 }
0x1a34   :  { %v22307_v13 = vsub.f32 %v22129_v49, %v24757_v0  ;;  %v9226_v21 = vand.u32 4294901760, %v9225_v6  ;;  %v9237_v24 = vsub.f32 %v22277_v4, %v24758_v55  ;;  %v24759_v49 = vand.u32 4294901760, %v22134_v14 }
0x1a35   :  { %v9220_v27 = vand.u32 4294901760, %v9219_v16  ;;  %v9232_v22 = vand.u32 4294901760, %v9231_v48  ;;  %v9249_v55 = vsub.f32 %v22294_v20, %v24278_v7  ;;  %v24770_v7 = vand.u32 4294901760, %v22175_v1 }
0x1a36   :  { %v24277_v26 = vand.u32 4294901760, %v22307_v13  ;;  %v22317_v3 = vpack.c.bf16 %v9226_v21, %v9214_v17  ;;  %v22322_v0 = vsub.f32 %v22134_v14, %v24759_v49  ;;  %v9238_v6 = vand.u32 4294901760, %v9237_v24 }
0x1a37   :  { %v22324_v30 = vpack.c.bf16 %v9232_v22, %v9220_v27  ;;  %v9250_v48 = vand.u32 4294901760, %v9249_v55  ;;  %v22352_v55 = vpack.c.bf16 %v22180_v57, %v22175_v1  ;;  %v24768_v49 = vand.u32 4294901760, %v22162_v61 }
0x1a38   :  { %v9243_v16 = vsub.f32 %v22307_v13, %v24277_v26  ;;  %17706 = vmatprep.subr.bf16.mxu1 %v22317_v3  ;;  %v9254_v21 = vand.u32 4294901760, %v22322_v0  ;;  %v24777_v61 = vand.u32 4294901760, %v22229_v23 }
0x1a39   :  { %17708 = vmatpush1.bf16.msra.mxu1 %v22324_v30  ;;  %v22338_v24 = vpack.c.bf16 %v9250_v48, %v9238_v6  ;;  %24760 = vst [vmem:[#allocation23_spill] sm:$0xff] %v22352_v55  ;;  %v22357_v6 = vpack.c.bf16 %v22201_v28, %v22190_v54  ;;  %v22365_v48 = vpack.c.bf16 %v22229_v23, %v22212_v47  ;;  %v24785_v23 = vand.u32 4294901760, %v22277_v4 }
0x1a3a   :  { %v9244_v22 = vand.u32 4294901760, %v9243_v16  ;;  %v9255_v17 = vsub.f32 %v22322_v0, %v9254_v21  ;;  %v22383_v16 = vpack.c.bf16 %v22294_v20, %v22277_v4  ;;  %v7987_v4 = vsel %vm3008_vm0, %v21357_v58, %v21750_v39 }
0x1a3b   :  { %17710 = vmatprep.subr.bf16.mxu1 %v22338_v24  ;;  %24761 = vst [vmem:[#allocation30_spill] sm:$0xff] %v22357_v6  ;;  %24762 = vst [vmem:[#allocation17_spill] sm:$0xff] %v22365_v48 }
0x1a3c   :  { %v9256_v27 = vand.u32 4294901760, %v9255_v17  ;;  %v22373_v17 = vpack.c.bf16 %v22253_v50, %v22248_v51  ;;  %24765 = vst [vmem:[#allocation32_spill] sm:$0xff] %v22383_v16 }
0x1a3e   :  { %v22347_v26 = vpack.c.bf16 %v9256_v27, %v9244_v22  ;;  %24763 = vst [vmem:[#allocation25_spill] sm:$0xff] %v22373_v17  ;;  %v22378_v27 = vpack.c.bf16 %v22267_v44, %v22262_v32  ;;  %v22388_v22 = vpack.c.bf16 %v22322_v0, %v22307_v13  ;;  %v24767_v0 = vand.u32 4294901760, %v22157_v42 }
0x1a3f   :  { %v24776_v42 = vand.u32 4294901760, %v22212_v47  ;;  %v24783_v47 = vand.u32 4294901760, %v22267_v44  ;;  %v7988_v44 = vsel %vm3008_vm0, %v21437_v63, %v21679_v18 }
0x1a40   :  { %17712 = vmatpush1.bf16.msra.mxu1 %v22347_v26  ;;  %24764 = vst [vmem:[#allocation29_spill] sm:$0xff] %v22378_v27  ;;  %24766 = vst [vmem:[#allocation33_spill] sm:$0xff] %v22388_v22  ;;  %v22405_v14 = vpack.c.bf16 %v24768_v49, %v24767_v0  ;;  %v7990_v0 = vsel %vm3008_vm0, %v21597_v34, %v21519_v56 }
0x1a41   :  { %17714 = vmatprep.subr.bf16.mxu1 %v22345_v53  ;;  %v22427_v1 = vpack.c.bf16 %v24777_v61, %v24776_v42  ;;  %v8035_v56 = vsel %vm2299_vm1, %v7990_v0, 0 }
0x1a42   :  { %24769 = vst [vmem:[#allocation36_spill] sm:$0xff] %v22405_v14 }
0x1a43   :  { %9308 = vmatmul.mubr.f32.vlgmr.msra.gmra.mrb[32].mxu1 %v24505_v19  ;;  %24778 = vst [vmem:[#allocation41_spill] sm:$0xff] %v22427_v1 }
0x1a44   :  { %17716 = vmatpush1.bf16.msra.mxu1 %v22352_v55  ;;  %9410 = vmatprep.mubr.f32.mxu1 %v24505_v19 }
0x1a45   :  { %17718 = vmatprep.subr.bf16.mxu1 %v22357_v6  ;;  %v24830_v6 = vand.u32 4294901760, %v21905_v36 }
0x1a48   :  { %17720 = vmatpush1.bf16.msra.mxu1 %v22365_v48 }
0x1a49   :  { %17722 = vmatprep.subr.bf16.mxu1 %v22373_v17  ;;  %v24774_v17 = vand.u32 4294901760, %v22201_v28 }
0x1a4c   :  { %17724 = vmatpush1.bf16.msra.mxu1 %v22378_v27  ;;  %v24773_v27 = vand.u32 4294901760, %v22190_v54  ;;  %v24779_v54 = vand.u32 4294901760, %v22248_v51  ;;  %v24788_v51 = vand.u32 4294901760, %v22307_v13 }
0x1a4d   :  { %17726 = vmatprep.subr.bf16.mxu1 %v22383_v16 }
0x1a4e   :  { %v22419_v48 = vpack.c.bf16 %v24774_v17, %v24773_v27  ;;  %v7989_v27 = vsel %vm3008_vm0, %v21517_v38, %v21599_v60 }
0x1a4f   :  { %v8032_v61 = vsel %vm2299_vm1, %v7989_v27, 0  ;;  %v24792_v27 = vld [vmem:[#allocation31_spill] sm:$0xff] }
0x1a50   :  { %17728 = vmatpush1.bf16.msra.mxu1 %v22388_v22  ;;  %v24771_v22 = vand.u32 4294901760, %v22180_v57  ;;  %24775 = vst [vmem:[#allocation40_spill] sm:$0xff] %v22419_v48  ;;  %v24780_v57 = vand.u32 4294901760, %v22253_v50  ;;  %v22454_v50 = vpack.c.bf16 %v9254_v21, %v24788_v51  ;;  %v8029_v21 = vsel %vm2299_vm1, %v7988_v44, 0 }
0x1a51   :  { %17730 = vmatprep.subr.bf16.mxu1 %v22000_v11  ;;  %v22492_v42 = vand.u32 4294901760, %v8029_v21  ;;  %v22508_v34 = vand.u32 4294901760, %v8032_v61 }
0x1a52   :  { %v22412_v16 = vpack.c.bf16 %v24771_v22, %v24770_v7  ;;  %v22435_v28 = vpack.c.bf16 %v24780_v57, %v24779_v54  ;;  %v24782_v7 = vand.u32 4294901760, %v22262_v32  ;;  %v24786_v22 = vand.u32 4294901760, %v22294_v20  ;;  %24789 = vst [vmem:[#allocation48_spill] sm:$0xff] %v22454_v50 }
0x1a53   :  { %9413 = vmatmul.mubr.f32.vlgmr.msra.gmra.mrb[32].mxu1 %v24505_v19  ;;  %v8026_v32 = vsel %vm2299_vm1, %v7987_v4, 0  ;;  %v22511_v54 = vsub.f32 %v8029_v21, %v22492_v42  ;;  %v22522_v4 = vand.u32 4294901760, %v8035_v56 }
0x1a54   :  { %17732 = vmatpush1.bf16.msra.mxu1 %v22008_v40  ;;  %9499 = vmatprep.mubr.f32.mxu1 %v24505_v19  ;;  %24772 = vst [vmem:[#allocation37_spill] sm:$0xff] %v22412_v16  ;;  %24781 = vst [vmem:[#allocation44_spill] sm:$0xff] %v22435_v28  ;;  %v22442_v49 = vpack.c.bf16 %v24783_v47, %v24782_v7  ;;  %v22449_v17 = vpack.c.bf16 %v24786_v22, %v24785_v23  ;;  %v22474_v13 = vand.u32 4294901760, %v8026_v32  ;;  %v24790_v47 = vld [vmem:[#allocation34_spill] sm:$0xff]  ;;  %v24791_v23 = vld [vmem:[#allocation35_spill] sm:$0xff] }
0x1a55   :  { %17734 = vmatprep.subr.bf16.mxu1 %v22050_v2  ;;  %v7991_v22 = vsel %vm3008_vm0, %v24791_v23, %v24790_v47  ;;  %v22538_v0 = vsub.f32 %v8035_v56, %v22522_v4 }
0x1a56   :  { %24784 = vst [vmem:[#allocation46_spill] sm:$0xff] %v22442_v49  ;;  %24787 = vst [vmem:[#allocation47_spill] sm:$0xff] %v22449_v17  ;;  %v22495_v38 = vsub.f32 %v8026_v32, %v22474_v13  ;;  %v22526_v32 = vsub.f32 %v8032_v61, %v22508_v34  ;;  %v24794_v61 = vld [vmem:[#allocation14_spill] sm:$0xff] }
0x1a58   :  { %17736 = vmatpush1.bf16.msra.mxu1 %v22056_v45  ;;  %v24290_v7 = vand.u32 4294901760, %v22495_v38 }
0x1a59   :  { %17738 = vmatprep.subr.bf16.mxu1 %v22096_v62 }
0x1a5a   :  { %v8141_v21 = vsub.f32 %v22495_v38, %v24290_v7 }
0x1a5c   :  { %17740 = vmatpush1.bf16.msra.mxu1 %v22104_v15  ;;  %v8142_v23 = vand.u32 4294901760, %v8141_v21  ;;  %v24797_v21 = vld [vmem:[#allocation16_spill] sm:$0xff] }
0x1a5d   :  { %17742 = vmatprep.subr.bf16.mxu1 %v22151_v31 }
0x1a60   :  { %17744 = vmatpush1.bf16.msra.mxu1 %v22169_v8 }
0x1a61   :  { %17746 = vmatprep.subr.bf16.mxu1 %v22405_v14  ;;  %v24829_v14 = vand.u32 4294901760, %v21903_v25 }
0x1a63   :  { %9503 = vmatmul.mubr.f32.vlgmr.msra.gmra.mrb[32].mxu1 %v24505_v19  ;;  %v17655_v55 = vpack.c.bf16 %v24830_v6, %v24829_v14  ;;  %v24837_v14 = vand.u32 4294901760, %v21919_v35  ;;  %v24839_v6 = vand.u32 4294901760, %v21923_v29 }
0x1a64   :  { %17748 = vmatpush1.bf16.msra.mxu1 %v22412_v16  ;;  %9621 = vmatprep.mubr.f32.mxu1 %v24505_v19 }
0x1a65   :  { %17750 = vmatprep.subr.bf16.mxu1 %v22419_v48 }
0x1a68   :  { %17752 = vmatpush1.bf16.msra.mxu1 %v22427_v1  ;;  %v24823_v1 = vld [vmem:[#allocation8_spill] sm:$0xff] }
0x1a69   :  { %17754 = vmatprep.subr.bf16.mxu1 %v22435_v28 }
0x1a6c   :  { %17756 = vmatpush1.bf16.msra.mxu1 %v22442_v49 }
0x1a6d   :  { %17758 = vmatprep.subr.bf16.mxu1 %v22449_v17 }
0x1a70   :  { %17760 = vmatpush1.bf16.msra.mxu1 %v22454_v50  ;;  %v24803_v50 = vld [vmem:[#allocation45_spill] sm:$0xff] }
0x1a71   :  { %17762 = vmatprep.subr.bf16.mxu1 %v22000_v11 }
0x1a73   :  { %9623 = vmatmul.mubr.f32.vlgmr.msra.gmra.mrb[32].mxu1 %v24505_v19 }
0x1a74   :  { %17764 = vmatpush1.bf16.msra.mxu1 %v22008_v40  ;;  %9709 = vmatprep.mubr.f32.mxu1 %v24505_v19 }
0x1a75   :  { %17766 = vmatprep.subr.bf16.mxu1 %v22050_v2 }
0x1a78   :  { %17768 = vmatpush1.bf16.msra.mxu1 %v22056_v45 }
0x1a79   :  { %17770 = vmatprep.subr.bf16.mxu1 %v22096_v62 }
0x1a7c   :  { %17772 = vmatpush1.bf16.msra.mxu1 %v22104_v15 }
0x1a7d   :  { %17774 = vmatprep.subr.bf16.mxu1 %v22151_v31 }
0x1a80   :  { %17776 = vmatpush1.bf16.msra.mxu1 %v22169_v8 }
0x1a81   :  { %17778 = vmatprep.subr.bf16.mxu1 %v22000_v11 }
0x1a83   :  { %9711 = vmatmul.mubr.f32.vlgmr.msra.gmra.mrb[32].mxu1 %v24505_v19 }
0x1a84   :  { %v7980_v20 = vpop.permute.xlu1 %7979  ;;  %17780 = vmatpush1.bf16.msra.mxu1 %v22008_v40  ;;  %9861 = vmatprep.mubr.f32.mxu1 %v24505_v19 }
0x1a85   :  { %v15944_v58 = vsel %vm3008_vm0, %v7980_v20, 0.0  ;;  %v7984_v39 = vpop.permute.xlu0 %7983  ;;  %17782 = vmatprep.subr.bf16.mxu1 %v22050_v2 }
0x1a86   :  { %15968 = vst [vmem:[%s23989_s13] sm:$0xff] %v15944_v58  ;;  %v7986_v63 = vsel %vm3008_vm0, %v21277_v43, %v7984_v39  ;;  %v24289_v58 = vand.u32 4294901760, %v22511_v54  ;;  %v8038_v39 = vsel %vm2299_vm1, %v7991_v22, 0 }
0x1a87   :  { %v8023_v18 = vsel %vm2299_vm1, %v7986_v63, 0  ;;  %v24793_v63 = vld [vmem:[#allocation38_spill] sm:$0xff]  ;;  %v22542_v47 = vand.u32 4294901760, %v8038_v39 }
0x1a88   :  { %v22497_v60 = vand.u32 4294901760, %v8023_v18  ;;  %17784 = vmatpush1.bf16.msra.mxu1 %v22056_v45  ;;  %v8152_v22 = vsub.f32 %v22511_v54, %v24289_v58 }
0x1a89   :  { %17786 = vmatprep.subr.bf16.mxu1 %v22096_v62 }
0x1a8a   :  { %v22502_v43 = vsub.f32 %v8023_v18, %v22497_v60  ;;  %v7992_v18 = vsel %vm3008_vm0, %v24793_v63, %v24792_v27  ;;  %v24796_v27 = vld [vmem:[#allocation28_spill] sm:$0xff]  ;;  %v8153_v7 = vand.u32 4294901760, %v8152_v22 }
0x1a8b   :  { %v8041_v56 = vsel %vm2299_vm1, %v7992_v18, 0  ;;  %v7993_v63 = vsel %vm3008_vm0, %v7980_v20, %v24796_v27  ;;  %v24798_v20 = vld [vmem:[#allocation18_spill] sm:$0xff]  ;;  %v24799_v27 = vld [vmem:[#allocation5_spill] sm:$0xff] }
0x1a8c   :  { %v24292_v57 = vand.u32 4294901760, %v22502_v43  ;;  %17788 = vmatpush1.bf16.msra.mxu1 %v22104_v15  ;;  %v22560_v58 = vand.u32 4294901760, %v8041_v56  ;;  %v24828_v16 = vand.u32 4294901760, %v22502_v43 }
0x1a8d   :  { %17790 = vmatprep.subr.bf16.mxu1 %v22151_v31 }
0x1a8e   :  { %v8130_v51 = vsub.f32 %v22502_v43, %v24292_v57  ;;  %v22574_v22 = vsub.f32 %v8041_v56, %v22560_v58  ;;  %v24800_v57 = vld [vmem:[#allocation10_spill] sm:$0xff] }
0x1a90   :  { %v8131_v44 = vand.u32 4294901760, %v8130_v51  ;;  %v24795_v51 = vld [vmem:[#allocation15_spill] sm:$0xff]  ;;  %17792 = vmatpush1.bf16.msra.mxu1 %v22169_v8 }
0x1a91   :  { %17794 = vmatprep.subr.bf16.mxu1 %v22237_v37 }
0x1a92   :  { %8132 = vmatmul.mubr.f32.vlgmr.msra.gmra.mrb[16].mxu0 %v8131_v44  ;;  %v24291_v44 = vand.u32 4294901760, %v22526_v32 }
0x1a93   :  { %17604 = vmatpush1.bf16.msra.mxu0 %v24794_v61  ;;  %8137 = vmatprep.mubr.f32.mxu0 %v24505_v19  ;;  %v24293_v61 = vand.u32 4294901760, %v22538_v0 }
0x1a94   :  { %17606 = vmatprep.subr.bf16.mxu0 %v24795_v51  ;;  %v22558_v51 = vsub.f32 %v8038_v39, %v22542_v47  ;;  %v8163_v18 = vsub.f32 %v22526_v32, %v24291_v44 }
0x1a95   :  { %v8174_v39 = vsub.f32 %v22538_v0, %v24293_v61 }
0x1a96   :  { %8143 = vmatmul.mubr.f32.gmra.mrb[18].mxu0 %v8142_v23  ;;  %v8044_v23 = vsel %vm2299_vm1, %v7993_v63, 0  ;;  %v8164_v44 = vand.u32 4294901760, %v8163_v18  ;;  %v24802_v18 = vld [vmem:[#allocation20_spill] sm:$0xff] }
0x1a97   :  { %8148 = vmatprep.mubr.f32.mxu0 %v24505_v19  ;;  %17608 = vmatpush1.bf16.msra.mxu0 %v24797_v21  ;;  %v22576_v21 = vand.u32 4294901760, %v8044_v23  ;;  %v8175_v61 = vand.u32 4294901760, %v8174_v39  ;;  %v24804_v17 = vpack.c.bf16 %v24802_v18, %v24803_v50  ;;  %v24822_v49 = vand.u32 4294901760, %v24802_v18 }
0x1a98   :  { %17610 = vmatprep.subr.bf16.mxu0 %v24798_v20  ;;  %v24300_v20 = vand.u32 4294901760, %v22558_v51 }
0x1a99   :  { %v22583_v63 = vsub.f32 %v8044_v23, %v22576_v21 }
0x1a9a   :  { %8154 = vmatmul.mubr.f32.gmra.mrb[20].mxu0 %v8153_v7  ;;  %v24801_v7 = vld [vmem:[#allocation70_spill] sm:$0xff]  ;;  %v8185_v56 = vsub.f32 %v22558_v51, %v24300_v20  ;;  %v24821_v20 = vand.u32 4294901760, %v24803_v50 }
0x1a9b   :  { %8159 = vmatprep.mubr.f32.mxu0 %v24505_v19  ;;  %17612 = vmatpush1.bf16.msra.mxu0 %v24799_v27  ;;  %v24299_v27 = vand.u32 4294901760, %v22574_v22  ;;  %v24298_v23 = vand.u32 4294901760, %v22583_v63 }
0x1a9c   :  { %17614 = vmatprep.subr.bf16.mxu0 %v24800_v57  ;;  %v8186_v57 = vand.u32 4294901760, %v8185_v56  ;;  %v24806_v56 = vld [vmem:[#allocation6_spill] sm:$0xff]  ;;  %v17649_v28 = vpack.c.bf16 %v24822_v49, %v24821_v20  ;;  %v24824_v49 = vand.u32 4294901760, %v21841_v41 }
0x1a9d   :  { %v24827_v18 = vand.u32 4294901760, %v24806_v56 }
0x1a9e   :  { %8165 = vmatmul.mubr.f32.gmra.mrb[22].mxu0 %v8164_v44  ;;  %v8196_v44 = vsub.f32 %v22574_v22, %v24299_v27  ;;  %v24820_v27 = vld [vmem:[#allocation7_spill] sm:$0xff] }
0x1a9f   :  { %8170 = vmatprep.mubr.f32.mxu0 %v24505_v19  ;;  %17616 = vmatpush1.bf16.msra.mxu0 %v24801_v7  ;;  %v8207_v7 = vsub.f32 %v22583_v63, %v24298_v23  ;;  %v24819_v23 = vld [vmem:[#allocation4_spill] sm:$0xff] }
0x1aa0   :  { %17618 = vmatprep.subr.bf16.mxu0 %v24804_v17  ;;  %v8197_v39 = vand.u32 4294901760, %v8196_v44 }
0x1aa1   :  { %v8208_v17 = vand.u32 4294901760, %v8207_v7  ;;  %v24810_v7 = vpack.c.bf16 %v21909_v52, %v21907_v59 }
0x1aa2   :  { %8176 = vmatmul.mubr.f32.gmra.mrb[24].mxu0 %v8175_v61  ;;  %v24805_v61 = vpack.c.bf16 %v21845_v46, %v21841_v41  ;;  %v24831_v41 = vand.u32 4294901760, %v21907_v59 }
0x1aa3   :  { %8181 = vmatprep.mubr.f32.mxu0 %v24505_v19 }
0x1aa6   :  { %8187 = vmatmul.mubr.f32.gmra.mrb[26].mxu0 %v8186_v57  ;;  %v24807_v57 = vld [vmem:[#allocation13_spill] sm:$0xff] }
0x1aa7   :  { %8192 = vmatprep.mubr.f32.mxu0 %v24505_v19  ;;  %v24808_v44 = vpack.c.bf16 %v24806_v56, %v24807_v57  ;;  %v24826_v20 = vand.u32 4294901760, %v24807_v57  ;;  %v24833_v56 = vand.u32 4294901760, %v22495_v38 }
0x1aa9   :  { %v17653_v48 = vpack.c.bf16 %v24827_v18, %v24826_v20 }
0x1aaa   :  { %8198 = vmatmul.mubr.f32.gmra.mrb[28].mxu0 %v8197_v39  ;;  %v24809_v39 = vpack.c.bf16 %v21905_v36, %v21903_v25  ;;  %v24836_v36 = vand.u32 4294901760, %v21917_v10 }
0x1aab   :  { %8203 = vmatprep.mubr.f32.mxu0 %v24505_v19 }
0x1aac   :  { %v17661_v59 = vpack.c.bf16 %v24837_v14, %v24836_v36 }
0x1aae   :  { %8209 = vmatmul.mubr.f32.gmra.mrb[30].mxu0 %v8208_v17  ;;  %v24811_v17 = vpack.c.bf16 %v21913_v12, %v21911_v9 }
0x1aaf   :  { %8359 = vmatprep.mubr.f32.mxu0 %v24505_v19 }
0x1ab2   :  { %8361 = vmatmul.mubr.f32.vlgmr.msra.gmra.mrb[16].mxu0 %v22497_v60 }
0x1ab3   :  { %17620 = vmatpush1.bf16.msra.mxu0 %v24805_v61  ;;  %8366 = vmatprep.mubr.f32.mxu0 %v24505_v19  ;;  %v24812_v61 = vpack.c.bf16 %v21919_v35, %v21917_v10  ;;  %v24842_v10 = vand.u32 4294901760, %v22538_v0  ;;  %v24843_v35 = vand.u32 4294901760, %v22558_v51 }
0x1ab4   :  { %17622 = vmatprep.subr.bf16.mxu0 %v24808_v44  ;;  %v24813_v44 = vpack.c.bf16 %v21925_v33, %v21923_v29  ;;  %v24844_v29 = vand.u32 4294901760, %v22574_v22 }
0x1ab6   :  { %8368 = vmatmul.mubr.f32.gmra.mrb[18].mxu0 %v22474_v13 }
0x1ab7   :  { %8373 = vmatprep.mubr.f32.mxu0 %v24505_v19  ;;  %17624 = vmatpush1.bf16.msra.mxu0 %v24809_v39  ;;  %v24814_v39 = vld [vmem:[#allocation43_spill] sm:$0xff] }
0x1ab8   :  { %17626 = vmatprep.subr.bf16.mxu0 %v24810_v7  ;;  %v24815_v7 = vld [vmem:[#allocation19_spill] sm:$0xff] }
0x1aba   :  { %8375 = vmatmul.mubr.f32.gmra.mrb[20].mxu0 %v22492_v42 }
0x1abb   :  { %8380 = vmatprep.mubr.f32.mxu0 %v24505_v19  ;;  %17628 = vmatpush1.bf16.msra.mxu0 %v24811_v17  ;;  %v24816_v17 = vld [vmem:[#allocation22_spill] sm:$0xff] }
0x1abc   :  { %17630 = vmatprep.subr.bf16.mxu0 %v24812_v61  ;;  %v24817_v61 = vld [vmem:[#allocation21_spill] sm:$0xff] }
0x1abe   :  { %8382 = vmatmul.mubr.f32.gmra.mrb[22].mxu0 %v22508_v34 }
0x1abf   :  { %8387 = vmatprep.mubr.f32.mxu0 %v24505_v19  ;;  %17632 = vmatpush1.bf16.msra.mxu0 %v24813_v44  ;;  %v24818_v44 = vld [vmem:[#allocation24_spill] sm:$0xff] }
0x1ac0   :  { %17634 = vmatprep.subr.bf16.mxu0 %v24814_v39 }
0x1ac2   :  { %8389 = vmatmul.mubr.f32.gmra.mrb[24].mxu0 %v22522_v4 }
0x1ac3   :  { %8394 = vmatprep.mubr.f32.mxu0 %v24505_v19 }
0x1ac6   :  { %8396 = vmatmul.mubr.f32.gmra.mrb[26].mxu0 %v22542_v47 }
0x1ac7   :  { %8401 = vmatprep.mubr.f32.mxu0 %v24505_v19 }
0x1aca   :  { %8403 = vmatmul.mubr.f32.gmra.mrb[28].mxu0 %v22560_v58 }
0x1acb   :  { %8408 = vmatprep.mubr.f32.mxu0 %v24505_v19 }
0x1ace   :  { %8410 = vmatmul.mubr.f32.gmra.mrb[30].mxu0 %v22576_v21 }
0x1acf   :  { %8512 = vmatprep.mubr.f32.mxu0 %v24505_v19 }
0x1ad2   :  { %8515 = vmatmul.mubr.f32.vlgmr.msra.gmra.mrb[16].mxu0 %v22502_v43  ;;  %v24835_v43 = vand.u32 4294901760, %v21913_v12  ;;  %v24841_v12 = vand.u32 4294901760, %v22526_v32 }
0x1ad3   :  { %17636 = vmatpush1.bf16.msra.mxu0 %v24815_v7  ;;  %8520 = vmatprep.mubr.f32.mxu0 %v24505_v19 }
0x1ad4   :  { %17638 = vmatprep.subr.bf16.mxu0 %v24816_v17 }
0x1ad6   :  { %8523 = vmatmul.mubr.f32.gmra.mrb[18].mxu0 %v22495_v38 }
0x1ad7   :  { %8528 = vmatprep.mubr.f32.mxu0 %v24505_v19  ;;  %17640 = vmatpush1.bf16.msra.mxu0 %v24817_v61 }
0x1ad8   :  { %17642 = vmatprep.subr.bf16.mxu0 %v24818_v44 }
0x1ada   :  { %8531 = vmatmul.mubr.f32.gmra.mrb[20].mxu0 %v22511_v54 }
0x1adb   :  { %8536 = vmatprep.mubr.f32.mxu0 %v24505_v19  ;;  %17644 = vmatpush1.bf16.msra.mxu0 %v24819_v23 }
0x1adc   :  { %17646 = vmatprep.subr.bf16.mxu0 %v24820_v27 }
0x1ade   :  { %8539 = vmatmul.mubr.f32.gmra.mrb[22].mxu0 %v22526_v32 }
0x1adf   :  { %8544 = vmatprep.mubr.f32.mxu0 %v24505_v19  ;;  %17648 = vmatpush1.bf16.msra.mxu0 %v24823_v1 }
0x1ae0   :  { %17650 = vmatprep.subr.bf16.mxu0 %v17649_v28  ;;  %v24825_v28 = vand.u32 4294901760, %v21845_v46  ;;  %v24832_v46 = vand.u32 4294901760, %v21909_v52  ;;  %v24838_v52 = vand.u32 4294901760, %v22511_v54 }
0x1ae2   :  { %8547 = vmatmul.mubr.f32.gmra.mrb[24].mxu0 %v22538_v0  ;;  %v17651_v50 = vpack.c.bf16 %v24825_v28, %v24824_v49  ;;  %v17657_v57 = vpack.c.bf16 %v24832_v46, %v24831_v41 }
0x1ae3   :  { %8552 = vmatprep.mubr.f32.mxu0 %v24505_v19 }
0x1ae6   :  { %8555 = vmatmul.mubr.f32.gmra.mrb[26].mxu0 %v22558_v51 }
0x1ae7   :  { %8560 = vmatprep.mubr.f32.mxu0 %v24505_v19 }
0x1aea   :  { %8563 = vmatmul.mubr.f32.gmra.mrb[28].mxu0 %v22574_v22 }
0x1aeb   :  { %8568 = vmatprep.mubr.f32.mxu0 %v24505_v19 }
0x1aee   :  { %8571 = vmatmul.mubr.f32.gmra.mrb[30].mxu0 %v22583_v63 }
0x1aef   :  { %8657 = vmatprep.mubr.f32.mxu0 %v24505_v19 }
0x1af2   :  { %8661 = vmatmul.mubr.f32.vlgmr.msra.gmra.mrb[16].mxu0 %v24828_v16  ;;  %v24834_v16 = vand.u32 4294901760, %v21911_v9 }
0x1af3   :  { %17652 = vmatpush1.bf16.msra.mxu0 %v17651_v50  ;;  %8666 = vmatprep.mubr.f32.mxu0 %v24505_v19 }
0x1af4   :  { %17654 = vmatprep.subr.bf16.mxu0 %v17653_v48  ;;  %v17659_v25 = vpack.c.bf16 %v24835_v43, %v24834_v16 }
0x1af6   :  { %8670 = vmatmul.mubr.f32.gmra.mrb[18].mxu0 %v24833_v56 }
0x1af7   :  { %8675 = vmatprep.mubr.f32.mxu0 %v24505_v19  ;;  %17656 = vmatpush1.bf16.msra.mxu0 %v17655_v55  ;;  %v24840_v55 = vand.u32 4294901760, %v21925_v33  ;;  %v24845_v33 = vand.u32 4294901760, %v22583_v63 }
0x1af8   :  { %17658 = vmatprep.subr.bf16.mxu0 %v17657_v57 }
0x1af9   :  { %v17663_v9 = vpack.c.bf16 %v24840_v55, %v24839_v6 }
0x1afa   :  { %8679 = vmatmul.mubr.f32.gmra.mrb[20].mxu0 %v24838_v52 }
0x1afb   :  { %8684 = vmatprep.mubr.f32.mxu0 %v24505_v19  ;;  %17660 = vmatpush1.bf16.msra.mxu0 %v17659_v25 }
0x1afc   :  { %17662 = vmatprep.subr.bf16.mxu0 %v17661_v59 }
0x1afe   :  { %8688 = vmatmul.mubr.f32.gmra.mrb[22].mxu0 %v24841_v12 }
0x1aff   :  { %8693 = vmatprep.mubr.f32.mxu0 %v24505_v19  ;;  %17664 = vmatpush1.bf16.msra.mxu0 %v17663_v9 }
0x1b00   :  { %17666 = vmatprep.subr.bf16.mxu0 %v24814_v39 }
0x1b02   :  { %8697 = vmatmul.mubr.f32.gmra.mrb[24].mxu0 %v24842_v10 }
0x1b03   :  { %8702 = vmatprep.mubr.f32.mxu0 %v24505_v19 }
0x1b06   :  { %8706 = vmatmul.mubr.f32.gmra.mrb[26].mxu0 %v24843_v35 }
0x1b07   :  { %8711 = vmatprep.mubr.f32.mxu0 %v24505_v19 }
0x1b0a   :  { %8715 = vmatmul.mubr.f32.gmra.mrb[28].mxu0 %v24844_v29 }
0x1b0b   :  { %8720 = vmatprep.mubr.f32.mxu0 %v24505_v19 }
0x1b0e   :  { %8724 = vmatmul.mubr.f32.gmra.mrb[30].mxu0 %v24845_v33 }
0x1b0f   :  { %8842 = vmatprep.mubr.f32.mxu0 %v24505_v19 }
0x1b12   :  { %8844 = vmatmul.mubr.f32.vlgmr.msra.gmra.mrb[16].mxu0 %v22497_v60 }
0x1b13   :  { %17668 = vmatpush1.bf16.msra.mxu0 %v24815_v7  ;;  %8849 = vmatprep.mubr.f32.mxu0 %v24505_v19 }
0x1b14   :  { %17670 = vmatprep.subr.bf16.mxu0 %v24816_v17 }
0x1b16   :  { %8851 = vmatmul.mubr.f32.gmra.mrb[18].mxu0 %v22474_v13 }
0x1b17   :  { %8856 = vmatprep.mubr.f32.mxu0 %v24505_v19  ;;  %17672 = vmatpush1.bf16.msra.mxu0 %v24817_v61 }
0x1b18   :  { %17674 = vmatprep.subr.bf16.mxu0 %v24818_v44 }
0x1b1a   :  { %8858 = vmatmul.mubr.f32.gmra.mrb[20].mxu0 %v22492_v42 }
0x1b1b   :  { %8863 = vmatprep.mubr.f32.mxu0 %v24505_v19  ;;  %17676 = vmatpush1.bf16.msra.mxu0 %v24819_v23 }
0x1b1c   :  { %17678 = vmatprep.subr.bf16.mxu0 %v24820_v27 }
0x1b1e   :  { %8865 = vmatmul.mubr.f32.gmra.mrb[22].mxu0 %v22508_v34 }
0x1b1f   :  { %8870 = vmatprep.mubr.f32.mxu0 %v24505_v19  ;;  %17680 = vmatpush1.bf16.msra.mxu0 %v24823_v1 }
0x1b20   :  { %17874 = vmatprep.subr.bf16.mxu0 %v22000_v11 }
0x1b22   :  { %8872 = vmatmul.mubr.f32.gmra.mrb[24].mxu0 %v22522_v4 }
0x1b23   :  { %8877 = vmatprep.mubr.f32.mxu0 %v24505_v19 }
0x1b26   :  { %8879 = vmatmul.mubr.f32.gmra.mrb[26].mxu0 %v22542_v47 }
0x1b27   :  { %8884 = vmatprep.mubr.f32.mxu0 %v24505_v19 }
0x1b2a   :  { %8886 = vmatmul.mubr.f32.gmra.mrb[28].mxu0 %v22560_v58 }
0x1b2b   :  { %8891 = vmatprep.mubr.f32.mxu0 %v24505_v19 }
0x1b2e   :  { %8893 = vmatmul.mubr.f32.gmra.mrb[30].mxu0 %v22576_v21 }
0x1b2f   :  { %8979 = vmatprep.mubr.f32.mxu0 %v24505_v19 }
0x1b32   :  { %8981 = vmatmul.mubr.f32.vlgmr.msra.gmra.mrb[16].mxu0 %v22497_v60  ;;  %v24847_v60 = vld [vmem:[#allocation27_spill] sm:$0xff] }
0x1b33   :  { %8986 = vmatprep.mubr.f32.mxu0 %v24505_v19  ;;  %17876 = vmatpush1.bf16.msra.mxu0 %v22008_v40 }
0x1b34   :  { %17878 = vmatprep.subr.bf16.mxu0 %v22050_v2 }
0x1b36   :  { %8988 = vmatmul.mubr.f32.gmra.mrb[18].mxu0 %v22474_v13  ;;  %v8010_v13 = vld [vmem:[%s23990_s8] sm:$0x3] }
0x1b37   :  { %8993 = vmatprep.mubr.f32.mxu0 %v24505_v19  ;;  %17880 = vmatpush1.bf16.msra.mxu0 %v22056_v45 }
0x1b38   :  { %17882 = vmatprep.subr.bf16.mxu0 %v22096_v62 }
0x1b3a   :  { %8995 = vmatmul.mubr.f32.gmra.mrb[20].mxu0 %v22492_v42  ;;  %v24846_v42 = vld [vmem:[#allocation26_spill] sm:$0xff] }
0x1b3b   :  { %9000 = vmatprep.mubr.f32.mxu0 %v24505_v19  ;;  %17884 = vmatpush1.bf16.msra.mxu0 %v22104_v15  ;;  %v8015_v38 = vrot.slane %v8010_v13, %v24846_v42 }
0x1b3c   :  { %17886 = vmatprep.subr.bf16.mxu0 %v22151_v31 }
0x1b3e   :  { %9002 = vmatmul.mubr.f32.gmra.mrb[22].mxu0 %v22508_v34  ;;  %v8019_v34 = vrot.slane %v8010_v13, %v24847_v60 }
0x1b3f   :  { %9007 = vmatprep.mubr.f32.mxu0 %v24505_v19  ;;  %17888 = vmatpush1.bf16.msra.mxu0 %v22169_v8 }
0x1b40   :  { %17890 = vmatprep.subr.bf16.mxu0 %v22237_v37 }
0x1b42   :  { %9009 = vmatmul.mubr.f32.gmra.mrb[24].mxu0 %v22522_v4 }
0x1b43   :  { %9014 = vmatprep.mubr.f32.mxu0 %v24505_v19 }
0x1b46   :  { %9016 = vmatmul.mubr.f32.gmra.mrb[26].mxu0 %v22542_v47 }
0x1b47   :  { %9021 = vmatprep.mubr.f32.mxu0 %v24505_v19 }
0x1b4a   :  { %9023 = vmatmul.mubr.f32.gmra.mrb[28].mxu0 %v22560_v58 }
0x1b4b   :  { %9028 = vmatprep.mubr.f32.mxu0 %v24505_v19 }
0x1b4e   :  { %9030 = vmatmul.mubr.f32.gmra.mrb[30].mxu0 %v22576_v21 }
0x1b4f   :  { %10572 = vmatprep.mubr.f32.mxu0 %v24505_v19 }
0x1b56   :  { %v9712_v48 = vpop.f32.mrb[32].mxu1 }
0x1b57   :  { %v9714_v1 = vpop.f32.mrb[33].mxu1 }
0x1c05   :  { %v8982_v54 = vpop.f32.mrb[16].mxu0 }
0x1c06   :  { %v18577_v4 = vadd.f32 %v8982_v54, %v8015_v38  ;;  %v8984_v32 = vpop.f32.mrb[17].mxu0 }
0x1c07   :  { %v22774_v58 = vadd.f32 %v8984_v32, %v8019_v34 }
0x1c08   :  { %v9717_v0 = vadd.f32 %v18577_v4, %v9712_v48 }
0x1c09   :  { %v8989_v47 = vpop.f32.mrb[18].mxu0 }
0x1c0a   :  { %19173 = vtanh.f32 %v9717_v0  ;;  %v22776_v51 = vadd.f32 %v8989_v47, %v8015_v38  ;;  %v8991_v22 = vpop.f32.mrb[19].mxu0  ;;  %v16009_v12 = vmul.f32 -1.442695, %v9717_v0 }
0x1c0b   :  { %v22778_v21 = vadd.f32 %v8991_v22, %v8019_v34 }
0x1c0d   :  { %v8996_v63 = vpop.f32.mrb[20].mxu0 }
0x1c0e   :  { %v22780_v27 = vadd.f32 %v8996_v63, %v8015_v38  ;;  %v8998_v23 = vpop.f32.mrb[21].mxu0 }
0x1c0f   :  { %v22782_v39 = vadd.f32 %v8998_v23, %v8019_v34 }
0x1c11   :  { %v9003_v7 = vpop.f32.mrb[22].mxu0 }
0x1c12   :  { %v22784_v17 = vadd.f32 %v9003_v7, %v8015_v38  ;;  %v9005_v61 = vpop.f32.mrb[23].mxu0 }
0x1c13   :  { %v22786_v44 = vadd.f32 %v9005_v61, %v8019_v34 }
0x1c14   :  { %v19174_v49 = vpop.eup %19173 }
0x1c15   :  { %v9010_v28 = vpop.f32.mrb[24].mxu0  ;;  %9735 = vrot.lane.b32.xlu0 %v19174_v49, %s19334_s5 }
0x1c16   :  { %v22789_v50 = vadd.f32 %v9010_v28, %v8015_v38  ;;  %v9012_v20 = vpop.f32.mrb[25].mxu0 }
0x1c17   :  { %v22791_v18 = vadd.f32 %v9012_v20, %v8019_v34 }
0x1c19   :  { %v9017_v41 = vpop.f32.mrb[26].mxu0 }
0x1c1a   :  { %v22793_v46 = vadd.f32 %v9017_v41, %v8015_v38  ;;  %v9019_v57 = vpop.f32.mrb[27].mxu0 }
0x1c1b   :  { %v22795_v56 = vadd.f32 %v9019_v57, %v8019_v34 }
0x1c1d   :  { %v9024_v16 = vpop.f32.mrb[28].mxu0 }
0x1c1e   :  { %v22797_v43 = vadd.f32 %v9024_v16, %v8015_v38  ;;  %v9026_v25 = vpop.f32.mrb[29].mxu0 }
0x1c1f   :  { %v22799_v36 = vadd.f32 %v9026_v25, %v8019_v34 }
0x1c21   :  { %v9031_v14 = vpop.f32.mrb[30].mxu0 }
0x1c22   :  { %v22801_v59 = vadd.f32 %v9031_v14, %v8015_v38  ;;  %v9033_v52 = vpop.f32.mrb[31].mxu0 }
0x1c23   :  { %v18592_v6 = vadd.f32 %v9033_v52, %v8019_v34 }
0x1c25   :  { %v9718_v55 = vadd.f32 %v18592_v6, %v9714_v1 }
0x1c27   :  { %19175 = vtanh.f32 %v9718_v55  ;;  %v16010_v29 = vmul.f32 -1.442695, %v9718_v55 }
0x1c28   :  { %19177 = vpow2.f32 %v16009_v12 }
0x1c31   :  { %v19176_v9 = vpop.eup %19175 }
0x1c32   :  { %9746 = vrot.lane.b32.xlu1 %v19176_v9, %s19334_s5  ;;  %v19178_v10 = vpop.eup %19177 }
0x1c33   :  { %v9725_v35 = vadd.f32 1.0, %v19178_v10  ;;  %v24849_v10 = vld [vmem:[#allocation11_spill] sm:$0xff] }
0x1c35   :  { %19179 = vrcp.f32 %v9725_v35  ;;  %v24850_v35 = vld [vmem:[#allocation12_spill] sm:$0xff] }
0x1c36   :  { %19181 = vpow2.f32 %v16010_v29  ;;  %v24851_v29 = vld [vmem:[#allocation23_spill] sm:$0xff] }
0x1c3f   :  { %v19180_v33 = vpop.eup %19179 }
0x1c40   :  { %v19182_v38 = vpop.eup %19181  ;;  %v9733_v32 = vmul.f32 0.0, %v19180_v33 }
0x1c41   :  { %v9726_v54 = vadd.f32 1.0, %v19182_v38  ;;  %v24855_v38 = vld [vmem:[#allocation29_spill] sm:$0xff] }
0x1c43   :  { %19183 = vrcp.f32 %v9726_v54  ;;  %v24856_v54 = vld [vmem:[#allocation32_spill] sm:$0xff] }
0x1c4d   :  { %v19184_v1 = vpop.eup %19183 }
0x1c4e   :  { %v9744_v63 = vmul.f32 0.0, %v19184_v1 }
0x1c87   :  { %v9736_v48 = vpop.permute.xlu0 %9735 }
0x1c88   :  { %v9738_v13 = vmul.f32 %v19180_v33, %v9736_v48  ;;  %v24853_v48 = vld [vmem:[#allocation17_spill] sm:$0xff] }
0x1c8a   :  { %9740 = vrot.lane.b32.xlu0 %v9738_v13, %s19335_s1  ;;  %v24854_v13 = vld [vmem:[#allocation25_spill] sm:$0xff] }
0x1ca4   :  { %v9747_v34 = vpop.permute.xlu1 %9746 }
0x1ca5   :  { %v9749_v4 = vmul.f32 %v19184_v1, %v9747_v34  ;;  %v24858_v34 = vld [vmem:[#allocation36_spill] sm:$0xff] }
0x1ca7   :  { %9751 = vrot.lane.b32.xlu1 %v9749_v4, %s19335_s1  ;;  %v24859_v4 = vld [vmem:[#allocation37_spill] sm:$0xff] }
0x1cfc   :  { %v9741_v0 = vpop.permute.xlu0 %9740 }
0x1cfd   :  { %v22806_v47 = vadd.f32 %v9741_v0, %v9733_v32  ;;  %v24860_v32 = vld [vmem:[#allocation40_spill] sm:$0xff]  ;;  %v24861_v0 = vld [vmem:[#allocation41_spill] sm:$0xff] }
0x1cff   :  { %19185 = vtanh.f32 %v22806_v47 }
0x1d09   :  { %v19186_v22 = vpop.eup %19185 }
0x1d0a   :  { %9757 = vrot.lane.b32.xlu0 %v19186_v22, %s19334_s5  ;;  %v24862_v22 = vld [vmem:[#allocation44_spill] sm:$0xff] }
0x1d19   :  { %v9752_v23 = vpop.permute.xlu1 %9751 }
0x1d1a   :  { %v22810_v7 = vadd.f32 %v9752_v23, %v9744_v63  ;;  %v24863_v63 = vld [vmem:[#allocation46_spill] sm:$0xff]  ;;  %v24864_v23 = vld [vmem:[#allocation47_spill] sm:$0xff] }
0x1d1c   :  { %19187 = vtanh.f32 %v22810_v7 }
0x1d26   :  { %v19188_v61 = vpop.eup %19187 }
0x1d27   :  { %9763 = vrot.lane.b32.xlu1 %v19188_v61, %s19334_s5  ;;  %v24865_v61 = vld [vmem:[#allocation48_spill] sm:$0xff] }
0x1d7c   :  { %v9758_v49 = vpop.permute.xlu0 %9757 }
0x1d7d   :  { %v9760_v28 = vmul.f32 %v19180_v33, %v9758_v49  ;;  %v24852_v33 = vld [vmem:[#allocation30_spill] sm:$0xff] }
0x1d7f   :  { %9768 = vrot.lane.b32.xlu0 %v9760_v28, %s19335_s1 }
0x1d99   :  { %v9764_v20 = vpop.permute.xlu1 %9763 }
0x1d9a   :  { %v9766_v41 = vmul.f32 %v19184_v1, %v9764_v20  ;;  %v24857_v1 = vld [vmem:[#allocation33_spill] sm:$0xff] }
0x1d9c   :  { %9772 = vrot.lane.b32.xlu1 %v9766_v41, %s19334_s5 }
0x1df1   :  { %v22816_v57 = vpop.permute.xlu0 %9768 }
0x1e0e   :  { %v22818_v16 = vpop.permute.xlu1 %9772 }
0x1e0f   :  { %24848 = vst [vmem:[#allocation49_spill] sm:$0xff] %v22818_v16  ;;  %v9775_v25 = vsel %vm3008_vm0, %v22816_v57, %v22818_v16 }
0x1e10   :  { %v9779_v14 = vsel %vm2299_vm1, %v9775_v25, 0 }
0x1e11   :  { %v9862_v52 = vand.u32 4294901760, %v9779_v14 }
0x1e13   :  { %v9863_v6 = vsub.f32 %v9779_v14, %v9862_v52 }
0x1e15   :  { %v9864_v55 = vand.u32 4294901760, %v9863_v6 }
0x1e17   :  { %v9865_v9 = vsub.f32 %v9863_v6, %v9864_v55 }
0x1e19   :  { %v9866_v12 = vand.u32 4294901760, %v9865_v9 }
0x1e1b   :  { %9867 = vmatmul.mubr.f32.vlgmr.msra.gmra.mrb[34].mxu1 %v9866_v12 }
0x1e1c   :  { %17796 = vmatpush1.bf16.msra.mxu1 %v24849_v10  ;;  %10017 = vmatprep.mubr.f32.mxu1 %v24505_v19 }
0x1e1d   :  { %17798 = vmatprep.subr.bf16.mxu1 %v24850_v35 }
0x1e20   :  { %17800 = vmatpush1.bf16.msra.mxu1 %v22296_v5 }
0x1e21   :  { %17802 = vmatprep.subr.bf16.mxu1 %v22317_v3 }
0x1e24   :  { %17804 = vmatpush1.bf16.msra.mxu1 %v22324_v30 }
0x1e25   :  { %17806 = vmatprep.subr.bf16.mxu1 %v22338_v24 }
0x1e28   :  { %17808 = vmatpush1.bf16.msra.mxu1 %v22347_v26 }
0x1e29   :  { %17810 = vmatprep.subr.bf16.mxu1 %v22345_v53 }
0x1e2b   :  { %10019 = vmatmul.mubr.f32.vlgmr.msra.gmra.mrb[34].mxu1 %v9862_v52 }
0x1e2c   :  { %17812 = vmatpush1.bf16.msra.mxu1 %v24851_v29  ;;  %10121 = vmatprep.mubr.f32.mxu1 %v24505_v19 }
0x1e2d   :  { %17814 = vmatprep.subr.bf16.mxu1 %v24852_v33 }
0x1e30   :  { %17816 = vmatpush1.bf16.msra.mxu1 %v24853_v48 }
0x1e31   :  { %17818 = vmatprep.subr.bf16.mxu1 %v24854_v13 }
0x1e34   :  { %17820 = vmatpush1.bf16.msra.mxu1 %v24855_v38 }
0x1e35   :  { %17822 = vmatprep.subr.bf16.mxu1 %v24856_v54 }
0x1e38   :  { %17824 = vmatpush1.bf16.msra.mxu1 %v24857_v1 }
0x1e39   :  { %17826 = vmatprep.subr.bf16.mxu1 %v22000_v11 }
0x1e3b   :  { %10124 = vmatmul.mubr.f32.vlgmr.msra.gmra.mrb[34].mxu1 %v9863_v6 }
0x1e3c   :  { %17828 = vmatpush1.bf16.msra.mxu1 %v22008_v40  ;;  %10210 = vmatprep.mubr.f32.mxu1 %v24505_v19 }
0x1e3d   :  { %17830 = vmatprep.subr.bf16.mxu1 %v22050_v2 }
0x1e40   :  { %17832 = vmatpush1.bf16.msra.mxu1 %v22056_v45 }
0x1e41   :  { %17834 = vmatprep.subr.bf16.mxu1 %v22096_v62 }
0x1e44   :  { %17836 = vmatpush1.bf16.msra.mxu1 %v22104_v15 }
0x1e45   :  { %17838 = vmatprep.subr.bf16.mxu1 %v22151_v31 }
0x1e48   :  { %17840 = vmatpush1.bf16.msra.mxu1 %v22169_v8 }
0x1e49   :  { %17842 = vmatprep.subr.bf16.mxu1 %v24858_v34 }
0x1e4b   :  { %10214 = vmatmul.mubr.f32.vlgmr.msra.gmra.mrb[34].mxu1 %v9864_v55 }
0x1e4c   :  { %17844 = vmatpush1.bf16.msra.mxu1 %v24859_v4  ;;  %10332 = vmatprep.mubr.f32.mxu1 %v24505_v19 }
0x1e4d   :  { %17846 = vmatprep.subr.bf16.mxu1 %v24860_v32 }
0x1e50   :  { %17848 = vmatpush1.bf16.msra.mxu1 %v24861_v0 }
0x1e51   :  { %17850 = vmatprep.subr.bf16.mxu1 %v24862_v22 }
0x1e54   :  { %17852 = vmatpush1.bf16.msra.mxu1 %v24863_v63 }
0x1e55   :  { %17854 = vmatprep.subr.bf16.mxu1 %v24864_v23 }
0x1e58   :  { %17856 = vmatpush1.bf16.msra.mxu1 %v24865_v61 }
0x1e59   :  { %17858 = vmatprep.subr.bf16.mxu1 %v22000_v11 }
0x1e5b   :  { %10334 = vmatmul.mubr.f32.vlgmr.msra.gmra.mrb[34].mxu1 %v9862_v52 }
0x1e5c   :  { %17860 = vmatpush1.bf16.msra.mxu1 %v22008_v40  ;;  %10420 = vmatprep.mubr.f32.mxu1 %v24505_v19 }
0x1e5d   :  { %17862 = vmatprep.subr.bf16.mxu1 %v22050_v2 }
0x1e60   :  { %17864 = vmatpush1.bf16.msra.mxu1 %v22056_v45 }
0x1e61   :  { %17866 = vmatprep.subr.bf16.mxu1 %v22096_v62 }
0x1e64   :  { %17868 = vmatpush1.bf16.msra.mxu1 %v22104_v15 }
0x1e65   :  { %17870 = vmatprep.subr.bf16.mxu1 %v22151_v31 }
0x1e68   :  { %17872 = vmatpush1.bf16.msra.mxu1 %v22169_v8 }
0x1e69   :  { %17970 = vmatprep.subr.bf16.mxu1 %v22000_v11 }
0x1e6b   :  { %10422 = vmatmul.mubr.f32.vlgmr.msra.gmra.mrb[34].mxu1 %v9862_v52 }
0x1e6c   :  { %17972 = vmatpush1.bf16.msra.mxu1 %v22008_v40  ;;  %11283 = vmatprep.mubr.f32.mxu1 %v24505_v19 }
0x1e6d   :  { %17974 = vmatprep.subr.bf16.mxu1 %v22050_v2 }
0x1e70   :  { %17976 = vmatpush1.bf16.msra.mxu1 %v22056_v45 }
0x1e71   :  { %17978 = vmatprep.subr.bf16.mxu1 %v22096_v62 }
0x1e74   :  { %17980 = vmatpush1.bf16.msra.mxu1 %v22104_v15 }
0x1e75   :  { %17982 = vmatprep.subr.bf16.mxu1 %v22151_v31 }
0x1e78   :  { %17984 = vmatpush1.bf16.msra.mxu1 %v22169_v8 }
0x1e79   :  { %17986 = vmatprep.subr.bf16.mxu1 %v22237_v37 }
0x1f3e   :  { %v10423_v49 = vpop.f32.mrb[34].mxu1 }
0x1f3f   :  { %v10428_v28 = vadd.f32 %v22776_v51, %v10423_v49  ;;  %v10425_v20 = vpop.f32.mrb[35].mxu1 }
0x1f40   :  { %v10429_v41 = vadd.f32 %v22799_v36, %v10425_v20 }
0x1f41   :  { %19189 = vtanh.f32 %v10428_v28  ;;  %v16011_v52 = vmul.f32 -1.442695, %v10428_v28 }
0x1f42   :  { %19191 = vtanh.f32 %v10429_v41  ;;  %v16012_v6 = vmul.f32 -1.442695, %v10429_v41 }
0x1f43   :  { %19193 = vpow2.f32 %v16011_v52 }
0x1f44   :  { %19195 = vpow2.f32 %v16012_v6 }
0x1f4b   :  { %v19190_v25 = vpop.eup %19189 }
0x1f4c   :  { %v19192_v14 = vpop.eup %19191  ;;  %10446 = vrot.lane.b32.xlu0 %v19190_v25, %s19334_s5 }
0x1f4d   :  { %10457 = vrot.lane.b32.xlu1 %v19192_v14, %s19334_s5  ;;  %v19194_v55 = vpop.eup %19193 }
0x1f4e   :  { %v19196_v9 = vpop.eup %19195  ;;  %v10436_v12 = vadd.f32 1.0, %v19194_v55 }
0x1f4f   :  { %v10437_v60 = vadd.f32 1.0, %v19196_v9 }
0x1f50   :  { %19197 = vrcp.f32 %v10436_v12 }
0x1f51   :  { %19199 = vrcp.f32 %v10437_v60 }
0x1f5a   :  { %v19198_v51 = vpop.eup %19197 }
0x1f5b   :  { %v19200_v49 = vpop.eup %19199  ;;  %v10444_v28 = vmul.f32 %v19198_v51, %v22806_v47 }
0x1f5c   :  { %v10455_v25 = vmul.f32 %v19200_v49, %v22810_v7 }
0x1fbe   :  { %v10447_v36 = vpop.permute.xlu0 %10446 }
0x1fbf   :  { %v10449_v20 = vmul.f32 %v19198_v51, %v10447_v36  ;;  %v10458_v42 = vpop.permute.xlu1 %10457 }
0x1fc0   :  { %v10460_v16 = vmul.f32 %v19200_v49, %v10458_v42 }
0x1fc1   :  { %10451 = vrot.lane.b32.xlu0 %v10449_v20, %s19335_s1 }
0x1fc2   :  { %10462 = vrot.lane.b32.xlu1 %v10460_v16, %s19335_s1 }
0x2033   :  { %v10452_v41 = vpop.permute.xlu0 %10451 }
0x2034   :  { %v22886_v14 = vadd.f32 %v10452_v41, %v10444_v28  ;;  %v10463_v52 = vpop.permute.xlu1 %10462 }
0x2035   :  { %v22888_v6 = vadd.f32 %v10463_v52, %v10455_v25 }
0x2036   :  { %19201 = vtanh.f32 %v22886_v14 }
0x2037   :  { %19203 = vtanh.f32 %v22888_v6 }
0x2040   :  { %v19202_v60 = vpop.eup %19201 }
0x2041   :  { %v19204_v42 = vpop.eup %19203  ;;  %10468 = vrot.lane.b32.xlu0 %v19202_v60, %s19334_s5 }
0x2042   :  { %10474 = vrot.lane.b32.xlu1 %v19204_v42, %s19334_s5 }
0x20b3   :  { %v10469_v16 = vpop.permute.xlu0 %10468 }
0x20b4   :  { %v10471_v47 = vmul.f32 %v19198_v51, %v10469_v16  ;;  %v10475_v55 = vpop.permute.xlu1 %10474 }
0x20b5   :  { %v10477_v9 = vmul.f32 %v19200_v49, %v10475_v55 }
0x20b6   :  { %10479 = vrot.lane.b32.xlu0 %v10471_v47, %s19335_s1 }
0x20b7   :  { %10483 = vrot.lane.b32.xlu1 %v10477_v9, %s19334_s5 }
0x2128   :  { %v22896_v7 = vpop.permute.xlu0 %10479 }
0x2129   :  { %v22898_v12 = vpop.permute.xlu1 %10483 }
0x212a   :  { %v10486_v36 = vsel %vm3008_vm0, %v22896_v7, %v22898_v12 }
0x212b   :  { %v10490_v20 = vsel %vm2299_vm1, %v10486_v36, 0 }
0x212c   :  { %v10573_v28 = vand.u32 4294901760, %v10490_v20 }
0x212e   :  { %v10574_v41 = vsub.f32 %v10490_v20, %v10573_v28 }
0x2130   :  { %v10575_v25 = vand.u32 4294901760, %v10574_v41 }
0x2132   :  { %v10576_v51 = vsub.f32 %v10574_v41, %v10575_v25 }
0x2134   :  { %v10577_v52 = vand.u32 4294901760, %v10576_v51 }
0x2136   :  { %10578 = vmatmul.mubr.f32.vlgmr.msra.gmra.mrb[32].mxu0 %v10577_v52 }
0x2137   :  { %17892 = vmatpush1.bf16.msra.mxu0 %v24849_v10  ;;  %10728 = vmatprep.mubr.f32.mxu0 %v24505_v19 }
0x2138   :  { %17894 = vmatprep.subr.bf16.mxu0 %v24850_v35 }
0x213b   :  { %17896 = vmatpush1.bf16.msra.mxu0 %v22296_v5 }
0x213c   :  { %17898 = vmatprep.subr.bf16.mxu0 %v22317_v3 }
0x213f   :  { %17900 = vmatpush1.bf16.msra.mxu0 %v22324_v30 }
0x2140   :  { %17902 = vmatprep.subr.bf16.mxu0 %v22338_v24 }
0x2143   :  { %17904 = vmatpush1.bf16.msra.mxu0 %v22347_v26 }
0x2144   :  { %17906 = vmatprep.subr.bf16.mxu0 %v22345_v53 }
0x2146   :  { %10730 = vmatmul.mubr.f32.vlgmr.msra.gmra.mrb[32].mxu0 %v10573_v28 }
0x2147   :  { %17908 = vmatpush1.bf16.msra.mxu0 %v24851_v29  ;;  %10832 = vmatprep.mubr.f32.mxu0 %v24505_v19 }
0x2148   :  { %17910 = vmatprep.subr.bf16.mxu0 %v24852_v33 }
0x214b   :  { %17912 = vmatpush1.bf16.msra.mxu0 %v24853_v48 }
0x214c   :  { %17914 = vmatprep.subr.bf16.mxu0 %v24854_v13 }
0x214f   :  { %17916 = vmatpush1.bf16.msra.mxu0 %v24855_v38 }
0x2150   :  { %17918 = vmatprep.subr.bf16.mxu0 %v24856_v54 }
0x2153   :  { %17920 = vmatpush1.bf16.msra.mxu0 %v24857_v1 }
0x2154   :  { %17922 = vmatprep.subr.bf16.mxu0 %v22000_v11 }
0x2156   :  { %10835 = vmatmul.mubr.f32.vlgmr.msra.gmra.mrb[32].mxu0 %v10574_v41 }
0x2157   :  { %17924 = vmatpush1.bf16.msra.mxu0 %v22008_v40  ;;  %10921 = vmatprep.mubr.f32.mxu0 %v24505_v19 }
0x2158   :  { %17926 = vmatprep.subr.bf16.mxu0 %v22050_v2 }
0x215b   :  { %17928 = vmatpush1.bf16.msra.mxu0 %v22056_v45 }
0x215c   :  { %17930 = vmatprep.subr.bf16.mxu0 %v22096_v62 }
0x215f   :  { %17932 = vmatpush1.bf16.msra.mxu0 %v22104_v15 }
0x2160   :  { %17934 = vmatprep.subr.bf16.mxu0 %v22151_v31 }
0x2163   :  { %17936 = vmatpush1.bf16.msra.mxu0 %v22169_v8 }
0x2164   :  { %17938 = vmatprep.subr.bf16.mxu0 %v24858_v34 }
0x2166   :  { %10925 = vmatmul.mubr.f32.vlgmr.msra.gmra.mrb[32].mxu0 %v10575_v25 }
0x2167   :  { %17940 = vmatpush1.bf16.msra.mxu0 %v24859_v4  ;;  %11043 = vmatprep.mubr.f32.mxu0 %v24505_v19 }
0x2168   :  { %17942 = vmatprep.subr.bf16.mxu0 %v24860_v32 }
0x216b   :  { %17944 = vmatpush1.bf16.msra.mxu0 %v24861_v0 }
0x216c   :  { %17946 = vmatprep.subr.bf16.mxu0 %v24862_v22 }
0x216f   :  { %17948 = vmatpush1.bf16.msra.mxu0 %v24863_v63 }
0x2170   :  { %17950 = vmatprep.subr.bf16.mxu0 %v24864_v23 }
0x2173   :  { %17952 = vmatpush1.bf16.msra.mxu0 %v24865_v61 }
0x2174   :  { %17954 = vmatprep.subr.bf16.mxu0 %v22000_v11 }
0x2176   :  { %11045 = vmatmul.mubr.f32.vlgmr.msra.gmra.mrb[32].mxu0 %v10573_v28 }
0x2177   :  { %17956 = vmatpush1.bf16.msra.mxu0 %v22008_v40  ;;  %11131 = vmatprep.mubr.f32.mxu0 %v24505_v19 }
0x2178   :  { %17958 = vmatprep.subr.bf16.mxu0 %v22050_v2 }
0x217b   :  { %17960 = vmatpush1.bf16.msra.mxu0 %v22056_v45 }
0x217c   :  { %17962 = vmatprep.subr.bf16.mxu0 %v22096_v62 }
0x217f   :  { %17964 = vmatpush1.bf16.msra.mxu0 %v22104_v15 }
0x2180   :  { %17966 = vmatprep.subr.bf16.mxu0 %v22151_v31 }
0x2183   :  { %17968 = vmatpush1.bf16.msra.mxu0 %v22169_v8 }
0x2184   :  { %18066 = vmatprep.subr.bf16.mxu0 %v22000_v11 }
0x2186   :  { %11133 = vmatmul.mubr.f32.vlgmr.msra.gmra.mrb[32].mxu0 %v10573_v28 }
0x2187   :  { %18068 = vmatpush1.bf16.msra.mxu0 %v22008_v40  ;;  %11994 = vmatprep.mubr.f32.mxu0 %v24505_v19 }
0x2188   :  { %18070 = vmatprep.subr.bf16.mxu0 %v22050_v2 }
0x218b   :  { %18072 = vmatpush1.bf16.msra.mxu0 %v22056_v45 }
0x218c   :  { %18074 = vmatprep.subr.bf16.mxu0 %v22096_v62 }
0x218f   :  { %18076 = vmatpush1.bf16.msra.mxu0 %v22104_v15 }
0x2190   :  { %18078 = vmatprep.subr.bf16.mxu0 %v22151_v31 }
0x2193   :  { %18080 = vmatpush1.bf16.msra.mxu0 %v22169_v8 }
0x2194   :  { %18082 = vmatprep.subr.bf16.mxu0 %v22237_v37 }
0x2259   :  { %v11134_v49 = vpop.f32.mrb[32].mxu0 }
0x225a   :  { %v11139_v60 = vadd.f32 %v22780_v27, %v11134_v49  ;;  %v11136_v42 = vpop.f32.mrb[33].mxu0 }
0x225b   :  { %v11140_v16 = vadd.f32 %v22795_v56, %v11136_v42 }
0x225c   :  { %19205 = vtanh.f32 %v11139_v60  ;;  %v16013_v9 = vmul.f32 -1.442695, %v11139_v60 }
0x225d   :  { %19207 = vtanh.f32 %v11140_v16  ;;  %v16014_v36 = vmul.f32 -1.442695, %v11140_v16 }
0x225e   :  { %19209 = vpow2.f32 %v16013_v9 }
0x225f   :  { %19211 = vpow2.f32 %v16014_v36 }
0x2266   :  { %v19206_v47 = vpop.eup %19205 }
0x2267   :  { %v19208_v55 = vpop.eup %19207  ;;  %11157 = vrot.lane.b32.xlu0 %v19206_v47, %s19334_s5 }
0x2268   :  { %11168 = vrot.lane.b32.xlu1 %v19208_v55, %s19334_s5  ;;  %v19210_v20 = vpop.eup %19209 }
0x2269   :  { %v19212_v28 = vpop.eup %19211  ;;  %v11147_v41 = vadd.f32 1.0, %v19210_v20 }
0x226a   :  { %v11148_v25 = vadd.f32 1.0, %v19212_v28 }
0x226b   :  { %19213 = vrcp.f32 %v11147_v41 }
0x226c   :  { %19215 = vrcp.f32 %v11148_v25 }
0x2275   :  { %v19214_v27 = vpop.eup %19213 }
0x2276   :  { %v19216_v51 = vpop.eup %19215  ;;  %v11155_v60 = vmul.f32 %v19214_v27, %v22886_v14 }
0x2277   :  { %v11166_v47 = vmul.f32 %v19216_v51, %v22888_v6 }
0x22d9   :  { %v11158_v56 = vpop.permute.xlu0 %11157 }
0x22da   :  { %v11160_v52 = vmul.f32 %v19214_v27, %v11158_v56  ;;  %v11169_v49 = vpop.permute.xlu1 %11168 }
0x22db   :  { %v11171_v42 = vmul.f32 %v19216_v51, %v11169_v49 }
0x22dc   :  { %11162 = vrot.lane.b32.xlu0 %v11160_v52, %s19335_s1 }
0x22dd   :  { %11173 = vrot.lane.b32.xlu1 %v11171_v42, %s19335_s1 }
0x234e   :  { %v11163_v16 = vpop.permute.xlu0 %11162 }
0x234f   :  { %v22966_v55 = vadd.f32 %v11163_v16, %v11155_v60  ;;  %v11174_v9 = vpop.permute.xlu1 %11173 }
0x2350   :  { %v22968_v36 = vadd.f32 %v11174_v9, %v11166_v47 }
0x2351   :  { %19217 = vtanh.f32 %v22966_v55 }
0x2352   :  { %19219 = vtanh.f32 %v22968_v36 }
0x235b   :  { %v19218_v20 = vpop.eup %19217 }
0x235c   :  { %v19220_v28 = vpop.eup %19219  ;;  %11179 = vrot.lane.b32.xlu0 %v19218_v20, %s19334_s5 }
0x235d   :  { %11185 = vrot.lane.b32.xlu1 %v19220_v28, %s19334_s5 }
0x23ce   :  { %v11180_v41 = vpop.permute.xlu0 %11179 }
0x23cf   :  { %v11182_v14 = vmul.f32 %v19214_v27, %v11180_v41  ;;  %v11186_v25 = vpop.permute.xlu1 %11185 }
0x23d0   :  { %v11188_v56 = vmul.f32 %v19216_v51, %v11186_v25 }
0x23d1   :  { %11190 = vrot.lane.b32.xlu0 %v11182_v14, %s19335_s1 }
0x23d2   :  { %11194 = vrot.lane.b32.xlu1 %v11188_v56, %s19334_s5 }
0x2443   :  { %v22976_v6 = vpop.permute.xlu0 %11190 }
0x2444   :  { %v22978_v52 = vpop.permute.xlu1 %11194 }
0x2445   :  { %v11197_v49 = vsel %vm3008_vm0, %v22976_v6, %v22978_v52 }
0x2446   :  { %v11201_v42 = vsel %vm2299_vm1, %v11197_v49, 0 }
0x2447   :  { %v11284_v60 = vand.u32 4294901760, %v11201_v42 }
0x2449   :  { %v11285_v16 = vsub.f32 %v11201_v42, %v11284_v60 }
0x244b   :  { %v11286_v47 = vand.u32 4294901760, %v11285_v16 }
0x244d   :  { %v11287_v27 = vsub.f32 %v11285_v16, %v11286_v47 }
0x244f   :  { %v11288_v9 = vand.u32 4294901760, %v11287_v27 }
0x2451   :  { %11289 = vmatmul.mubr.f32.vlgmr.msra.gmra.mrb[36].mxu1 %v11288_v9 }
0x2452   :  { %17988 = vmatpush1.bf16.msra.mxu1 %v24849_v10  ;;  %11439 = vmatprep.mubr.f32.mxu1 %v24505_v19 }
0x2453   :  { %17990 = vmatprep.subr.bf16.mxu1 %v24850_v35 }
0x2456   :  { %17992 = vmatpush1.bf16.msra.mxu1 %v22296_v5 }
0x2457   :  { %17994 = vmatprep.subr.bf16.mxu1 %v22317_v3 }
0x245a   :  { %17996 = vmatpush1.bf16.msra.mxu1 %v22324_v30 }
0x245b   :  { %17998 = vmatprep.subr.bf16.mxu1 %v22338_v24 }
0x245e   :  { %18000 = vmatpush1.bf16.msra.mxu1 %v22347_v26 }
0x245f   :  { %18002 = vmatprep.subr.bf16.mxu1 %v22345_v53 }
0x2461   :  { %11441 = vmatmul.mubr.f32.vlgmr.msra.gmra.mrb[36].mxu1 %v11284_v60 }
0x2462   :  { %18004 = vmatpush1.bf16.msra.mxu1 %v24851_v29  ;;  %11543 = vmatprep.mubr.f32.mxu1 %v24505_v19 }
0x2463   :  { %18006 = vmatprep.subr.bf16.mxu1 %v24852_v33 }
0x2466   :  { %18008 = vmatpush1.bf16.msra.mxu1 %v24853_v48 }
0x2467   :  { %18010 = vmatprep.subr.bf16.mxu1 %v24854_v13 }
0x246a   :  { %18012 = vmatpush1.bf16.msra.mxu1 %v24855_v38 }
0x246b   :  { %18014 = vmatprep.subr.bf16.mxu1 %v24856_v54 }
0x246e   :  { %18016 = vmatpush1.bf16.msra.mxu1 %v24857_v1 }
0x246f   :  { %18018 = vmatprep.subr.bf16.mxu1 %v22000_v11 }
0x2471   :  { %11546 = vmatmul.mubr.f32.vlgmr.msra.gmra.mrb[36].mxu1 %v11285_v16 }
0x2472   :  { %18020 = vmatpush1.bf16.msra.mxu1 %v22008_v40  ;;  %11632 = vmatprep.mubr.f32.mxu1 %v24505_v19 }
0x2473   :  { %18022 = vmatprep.subr.bf16.mxu1 %v22050_v2 }
0x2476   :  { %18024 = vmatpush1.bf16.msra.mxu1 %v22056_v45 }
0x2477   :  { %18026 = vmatprep.subr.bf16.mxu1 %v22096_v62 }
0x247a   :  { %18028 = vmatpush1.bf16.msra.mxu1 %v22104_v15 }
0x247b   :  { %18030 = vmatprep.subr.bf16.mxu1 %v22151_v31 }
0x247e   :  { %18032 = vmatpush1.bf16.msra.mxu1 %v22169_v8 }
0x247f   :  { %18034 = vmatprep.subr.bf16.mxu1 %v24858_v34 }
0x2481   :  { %11636 = vmatmul.mubr.f32.vlgmr.msra.gmra.mrb[36].mxu1 %v11286_v47 }
0x2482   :  { %18036 = vmatpush1.bf16.msra.mxu1 %v24859_v4  ;;  %11754 = vmatprep.mubr.f32.mxu1 %v24505_v19 }
0x2483   :  { %18038 = vmatprep.subr.bf16.mxu1 %v24860_v32 }
0x2486   :  { %18040 = vmatpush1.bf16.msra.mxu1 %v24861_v0 }
0x2487   :  { %18042 = vmatprep.subr.bf16.mxu1 %v24862_v22 }
0x248a   :  { %18044 = vmatpush1.bf16.msra.mxu1 %v24863_v63 }
0x248b   :  { %18046 = vmatprep.subr.bf16.mxu1 %v24864_v23 }
0x248e   :  { %18048 = vmatpush1.bf16.msra.mxu1 %v24865_v61 }
0x248f   :  { %18050 = vmatprep.subr.bf16.mxu1 %v22000_v11 }
0x2491   :  { %11756 = vmatmul.mubr.f32.vlgmr.msra.gmra.mrb[36].mxu1 %v11284_v60 }
0x2492   :  { %18052 = vmatpush1.bf16.msra.mxu1 %v22008_v40  ;;  %11842 = vmatprep.mubr.f32.mxu1 %v24505_v19 }
0x2493   :  { %18054 = vmatprep.subr.bf16.mxu1 %v22050_v2 }
0x2496   :  { %18056 = vmatpush1.bf16.msra.mxu1 %v22056_v45 }
0x2497   :  { %18058 = vmatprep.subr.bf16.mxu1 %v22096_v62 }
0x249a   :  { %18060 = vmatpush1.bf16.msra.mxu1 %v22104_v15 }
0x249b   :  { %18062 = vmatprep.subr.bf16.mxu1 %v22151_v31 }
0x249e   :  { %18064 = vmatpush1.bf16.msra.mxu1 %v22169_v8 }
0x249f   :  { %18162 = vmatprep.subr.bf16.mxu1 %v22000_v11 }
0x24a1   :  { %11844 = vmatmul.mubr.f32.vlgmr.msra.gmra.mrb[36].mxu1 %v11284_v60 }
0x24a2   :  { %18164 = vmatpush1.bf16.msra.mxu1 %v22008_v40  ;;  %12705 = vmatprep.mubr.f32.mxu1 %v24505_v19 }
0x24a3   :  { %18166 = vmatprep.subr.bf16.mxu1 %v22050_v2 }
0x24a6   :  { %18168 = vmatpush1.bf16.msra.mxu1 %v22056_v45 }
0x24a7   :  { %18170 = vmatprep.subr.bf16.mxu1 %v22096_v62 }
0x24aa   :  { %18172 = vmatpush1.bf16.msra.mxu1 %v22104_v15 }
0x24ab   :  { %18174 = vmatprep.subr.bf16.mxu1 %v22151_v31 }
0x24ae   :  { %18176 = vmatpush1.bf16.msra.mxu1 %v22169_v8 }
0x24af   :  { %18178 = vmatprep.subr.bf16.mxu1 %v22237_v37 }
0x2574   :  { %v11845_v51 = vpop.f32.mrb[36].mxu1 }
0x2575   :  { %v11850_v20 = vadd.f32 %v22784_v17, %v11845_v51  ;;  %v11847_v28 = vpop.f32.mrb[37].mxu1 }
0x2576   :  { %v11851_v41 = vadd.f32 %v22791_v18, %v11847_v28 }
0x2577   :  { %19221 = vtanh.f32 %v11850_v20  ;;  %v16015_v56 = vmul.f32 -1.442695, %v11850_v20 }
0x2578   :  { %19223 = vtanh.f32 %v11851_v41  ;;  %v16016_v49 = vmul.f32 -1.442695, %v11851_v41 }
0x2579   :  { %19225 = vpow2.f32 %v16015_v56 }
0x257a   :  { %19227 = vpow2.f32 %v16016_v49 }
0x2581   :  { %v19222_v14 = vpop.eup %19221 }
0x2582   :  { %v19224_v25 = vpop.eup %19223  ;;  %11868 = vrot.lane.b32.xlu0 %v19222_v14, %s19334_s5 }
0x2583   :  { %11879 = vrot.lane.b32.xlu1 %v19224_v25, %s19334_s5  ;;  %v19226_v42 = vpop.eup %19225 }
0x2584   :  { %v19228_v60 = vpop.eup %19227  ;;  %v11858_v16 = vadd.f32 1.0, %v19226_v42 }
0x2585   :  { %v11859_v47 = vadd.f32 1.0, %v19228_v60 }
0x2586   :  { %19229 = vrcp.f32 %v11858_v16 }
0x2587   :  { %19231 = vrcp.f32 %v11859_v47 }
0x2590   :  { %v19230_v17 = vpop.eup %19229 }
0x2591   :  { %v19232_v27 = vpop.eup %19231  ;;  %v11866_v20 = vmul.f32 %v19230_v17, %v22966_v55 }
0x2592   :  { %v11877_v14 = vmul.f32 %v19232_v27, %v22968_v36 }
0x25f4   :  { %v11869_v18 = vpop.permute.xlu0 %11868 }
0x25f5   :  { %v11871_v9 = vmul.f32 %v19230_v17, %v11869_v18  ;;  %v11880_v51 = vpop.permute.xlu1 %11879 }
0x25f6   :  { %v11882_v28 = vmul.f32 %v19232_v27, %v11880_v51 }
0x25f7   :  { %11873 = vrot.lane.b32.xlu0 %v11871_v9, %s19335_s1 }
0x25f8   :  { %11884 = vrot.lane.b32.xlu1 %v11882_v28, %s19335_s1 }
0x2669   :  { %v11874_v41 = vpop.permute.xlu0 %11873 }
0x266a   :  { %v23046_v25 = vadd.f32 %v11874_v41, %v11866_v20  ;;  %v11885_v56 = vpop.permute.xlu1 %11884 }
0x266b   :  { %v23048_v49 = vadd.f32 %v11885_v56, %v11877_v14 }
0x266c   :  { %19233 = vtanh.f32 %v23046_v25 }
0x266d   :  { %19235 = vtanh.f32 %v23048_v49 }
0x2676   :  { %v19234_v42 = vpop.eup %19233 }
0x2677   :  { %v19236_v60 = vpop.eup %19235  ;;  %11890 = vrot.lane.b32.xlu0 %v19234_v42, %s19334_s5 }
0x2678   :  { %11896 = vrot.lane.b32.xlu1 %v19236_v60, %s19334_s5 }
0x26e9   :  { %v11891_v16 = vpop.permute.xlu0 %11890 }
0x26ea   :  { %v11893_v55 = vmul.f32 %v19230_v17, %v11891_v16  ;;  %v11897_v47 = vpop.permute.xlu1 %11896 }
0x26eb   :  { %v11899_v18 = vmul.f32 %v19232_v27, %v11897_v47 }
0x26ec   :  { %11901 = vrot.lane.b32.xlu0 %v11893_v55, %s19335_s1 }
0x26ed   :  { %11905 = vrot.lane.b32.xlu1 %v11899_v18, %s19334_s5 }
0x275e   :  { %v23056_v36 = vpop.permute.xlu0 %11901 }
0x275f   :  { %v23058_v9 = vpop.permute.xlu1 %11905 }
0x2760   :  { %v11908_v51 = vsel %vm3008_vm0, %v23056_v36, %v23058_v9 }
0x2761   :  { %v11912_v28 = vsel %vm2299_vm1, %v11908_v51, 0 }
0x2762   :  { %v11995_v20 = vand.u32 4294901760, %v11912_v28 }
0x2764   :  { %v11996_v41 = vsub.f32 %v11912_v28, %v11995_v20 }
0x2766   :  { %v11997_v14 = vand.u32 4294901760, %v11996_v41 }
0x2768   :  { %v11998_v17 = vsub.f32 %v11996_v41, %v11997_v14 }
0x276a   :  { %v11999_v56 = vand.u32 4294901760, %v11998_v17 }
0x276c   :  { %12000 = vmatmul.mubr.f32.vlgmr.msra.gmra.mrb[34].mxu0 %v11999_v56 }
0x276d   :  { %18084 = vmatpush1.bf16.msra.mxu0 %v24849_v10  ;;  %12150 = vmatprep.mubr.f32.mxu0 %v24505_v19 }
0x276e   :  { %18086 = vmatprep.subr.bf16.mxu0 %v24850_v35 }
0x2771   :  { %18088 = vmatpush1.bf16.msra.mxu0 %v22296_v5 }
0x2772   :  { %18090 = vmatprep.subr.bf16.mxu0 %v22317_v3 }
0x2775   :  { %18092 = vmatpush1.bf16.msra.mxu0 %v22324_v30 }
0x2776   :  { %18094 = vmatprep.subr.bf16.mxu0 %v22338_v24 }
0x2779   :  { %18096 = vmatpush1.bf16.msra.mxu0 %v22347_v26 }
0x277a   :  { %18098 = vmatprep.subr.bf16.mxu0 %v22345_v53 }
0x277c   :  { %12152 = vmatmul.mubr.f32.vlgmr.msra.gmra.mrb[34].mxu0 %v11995_v20 }
0x277d   :  { %18100 = vmatpush1.bf16.msra.mxu0 %v24851_v29  ;;  %12254 = vmatprep.mubr.f32.mxu0 %v24505_v19 }
0x277e   :  { %18102 = vmatprep.subr.bf16.mxu0 %v24852_v33 }
0x2781   :  { %18104 = vmatpush1.bf16.msra.mxu0 %v24853_v48 }
0x2782   :  { %18106 = vmatprep.subr.bf16.mxu0 %v24854_v13 }
0x2785   :  { %18108 = vmatpush1.bf16.msra.mxu0 %v24855_v38 }
0x2786   :  { %18110 = vmatprep.subr.bf16.mxu0 %v24856_v54 }
0x2789   :  { %18112 = vmatpush1.bf16.msra.mxu0 %v24857_v1 }
0x278a   :  { %18114 = vmatprep.subr.bf16.mxu0 %v22000_v11 }
0x278c   :  { %12257 = vmatmul.mubr.f32.vlgmr.msra.gmra.mrb[34].mxu0 %v11996_v41 }
0x278d   :  { %18116 = vmatpush1.bf16.msra.mxu0 %v22008_v40  ;;  %12343 = vmatprep.mubr.f32.mxu0 %v24505_v19 }
0x278e   :  { %18118 = vmatprep.subr.bf16.mxu0 %v22050_v2 }
0x2791   :  { %18120 = vmatpush1.bf16.msra.mxu0 %v22056_v45 }
0x2792   :  { %18122 = vmatprep.subr.bf16.mxu0 %v22096_v62 }
0x2795   :  { %18124 = vmatpush1.bf16.msra.mxu0 %v22104_v15 }
0x2796   :  { %18126 = vmatprep.subr.bf16.mxu0 %v22151_v31 }
0x2799   :  { %18128 = vmatpush1.bf16.msra.mxu0 %v22169_v8 }
0x279a   :  { %18130 = vmatprep.subr.bf16.mxu0 %v24858_v34 }
0x279c   :  { %12347 = vmatmul.mubr.f32.vlgmr.msra.gmra.mrb[34].mxu0 %v11997_v14 }
0x279d   :  { %18132 = vmatpush1.bf16.msra.mxu0 %v24859_v4  ;;  %12465 = vmatprep.mubr.f32.mxu0 %v24505_v19 }
0x279e   :  { %18134 = vmatprep.subr.bf16.mxu0 %v24860_v32 }
0x27a1   :  { %18136 = vmatpush1.bf16.msra.mxu0 %v24861_v0 }
0x27a2   :  { %18138 = vmatprep.subr.bf16.mxu0 %v24862_v22 }
0x27a5   :  { %18140 = vmatpush1.bf16.msra.mxu0 %v24863_v63 }
0x27a6   :  { %18142 = vmatprep.subr.bf16.mxu0 %v24864_v23 }
0x27a9   :  { %18144 = vmatpush1.bf16.msra.mxu0 %v24865_v61 }
0x27aa   :  { %18146 = vmatprep.subr.bf16.mxu0 %v22000_v11 }
0x27ac   :  { %12467 = vmatmul.mubr.f32.vlgmr.msra.gmra.mrb[34].mxu0 %v11995_v20 }
0x27ad   :  { %18148 = vmatpush1.bf16.msra.mxu0 %v22008_v40  ;;  %12553 = vmatprep.mubr.f32.mxu0 %v24505_v19 }
0x27ae   :  { %18150 = vmatprep.subr.bf16.mxu0 %v22050_v2 }
0x27b1   :  { %18152 = vmatpush1.bf16.msra.mxu0 %v22056_v45 }
0x27b2   :  { %18154 = vmatprep.subr.bf16.mxu0 %v22096_v62 }
0x27b5   :  { %18156 = vmatpush1.bf16.msra.mxu0 %v22104_v15 }
0x27b6   :  { %18158 = vmatprep.subr.bf16.mxu0 %v22151_v31 }
0x27b9   :  { %18160 = vmatpush1.bf16.msra.mxu0 %v22169_v8 }
0x27ba   :  { %18258 = vmatprep.subr.bf16.mxu0 %v22000_v11 }
0x27bc   :  { %12555 = vmatmul.mubr.f32.vlgmr.msra.gmra.mrb[34].mxu0 %v11995_v20 }
0x27bd   :  { %18260 = vmatpush1.bf16.msra.mxu0 %v22008_v40  ;;  %13416 = vmatprep.mubr.f32.mxu0 %v24505_v19 }
0x27be   :  { %18262 = vmatprep.subr.bf16.mxu0 %v22050_v2 }
0x27c1   :  { %18264 = vmatpush1.bf16.msra.mxu0 %v22056_v45 }
0x27c2   :  { %18266 = vmatprep.subr.bf16.mxu0 %v22096_v62 }
0x27c5   :  { %18268 = vmatpush1.bf16.msra.mxu0 %v22104_v15 }
0x27c6   :  { %18270 = vmatprep.subr.bf16.mxu0 %v22151_v31 }
0x27c9   :  { %18272 = vmatpush1.bf16.msra.mxu0 %v22169_v8 }
0x27ca   :  { %18274 = vmatprep.subr.bf16.mxu0 %v22237_v37 }
0x288f   :  { %v12556_v27 = vpop.f32.mrb[34].mxu0 }
0x2890   :  { %v12561_v42 = vadd.f32 %v22789_v50, %v12556_v27  ;;  %v12558_v60 = vpop.f32.mrb[35].mxu0 }
0x2891   :  { %v12562_v16 = vadd.f32 %v22786_v44, %v12558_v60 }
0x2892   :  { %19237 = vtanh.f32 %v12561_v42  ;;  %v16017_v18 = vmul.f32 -1.442695, %v12561_v42 }
0x2893   :  { %19239 = vtanh.f32 %v12562_v16  ;;  %v16018_v51 = vmul.f32 -1.442695, %v12562_v16 }
0x2894   :  { %19241 = vpow2.f32 %v16017_v18 }
0x2895   :  { %19243 = vpow2.f32 %v16018_v51 }
0x289c   :  { %v19238_v55 = vpop.eup %19237 }
0x289d   :  { %v19240_v47 = vpop.eup %19239  ;;  %12579 = vrot.lane.b32.xlu0 %v19238_v55, %s19334_s5 }
0x289e   :  { %12590 = vrot.lane.b32.xlu1 %v19240_v47, %s19334_s5  ;;  %v19242_v28 = vpop.eup %19241 }
0x289f   :  { %v19244_v20 = vpop.eup %19243  ;;  %v12569_v41 = vadd.f32 1.0, %v19242_v28 }
0x28a0   :  { %v12570_v14 = vadd.f32 1.0, %v19244_v20 }
0x28a1   :  { %19245 = vrcp.f32 %v12569_v41 }
0x28a2   :  { %19247 = vrcp.f32 %v12570_v14 }
0x28ab   :  { %v19246_v50 = vpop.eup %19245 }
0x28ac   :  { %v19248_v17 = vpop.eup %19247  ;;  %v12577_v42 = vmul.f32 %v19246_v50, %v23046_v25 }
0x28ad   :  { %v12588_v55 = vmul.f32 %v19248_v17, %v23048_v49 }
0x290f   :  { %v12580_v44 = vpop.permute.xlu0 %12579 }
0x2910   :  { %v12582_v56 = vmul.f32 %v19246_v50, %v12580_v44  ;;  %v12591_v27 = vpop.permute.xlu1 %12590 }
0x2911   :  { %v12593_v60 = vmul.f32 %v19248_v17, %v12591_v27 }
0x2912   :  { %12584 = vrot.lane.b32.xlu0 %v12582_v56, %s19335_s1 }
0x2913   :  { %12595 = vrot.lane.b32.xlu1 %v12593_v60, %s19335_s1 }
0x2984   :  { %v12585_v16 = vpop.permute.xlu0 %12584 }
0x2985   :  { %v23126_v47 = vadd.f32 %v12585_v16, %v12577_v42  ;;  %v12596_v18 = vpop.permute.xlu1 %12595 }
0x2986   :  { %v23128_v51 = vadd.f32 %v12596_v18, %v12588_v55 }
0x2987   :  { %19249 = vtanh.f32 %v23126_v47 }
0x2988   :  { %19251 = vtanh.f32 %v23128_v51 }
0x2991   :  { %v19250_v28 = vpop.eup %19249 }
0x2992   :  { %v19252_v20 = vpop.eup %19251  ;;  %12601 = vrot.lane.b32.xlu0 %v19250_v28, %s19334_s5 }
0x2993   :  { %12607 = vrot.lane.b32.xlu1 %v19252_v20, %s19334_s5 }
0x2a04   :  { %v12602_v41 = vpop.permute.xlu0 %12601 }
0x2a05   :  { %v12604_v25 = vmul.f32 %v19246_v50, %v12602_v41  ;;  %v12608_v14 = vpop.permute.xlu1 %12607 }
0x2a06   :  { %v12610_v44 = vmul.f32 %v19248_v17, %v12608_v14 }
0x2a07   :  { %12612 = vrot.lane.b32.xlu0 %v12604_v25, %s19335_s1 }
0x2a08   :  { %12616 = vrot.lane.b32.xlu1 %v12610_v44, %s19334_s5 }
0x2a79   :  { %v23136_v49 = vpop.permute.xlu0 %12612 }
0x2a7a   :  { %v23138_v56 = vpop.permute.xlu1 %12616 }
0x2a7b   :  { %v12619_v27 = vsel %vm3008_vm0, %v23136_v49, %v23138_v56 }
0x2a7c   :  { %v12623_v60 = vsel %vm2299_vm1, %v12619_v27, 0 }
0x2a7d   :  { %v12706_v42 = vand.u32 4294901760, %v12623_v60 }
0x2a7f   :  { %v12707_v16 = vsub.f32 %v12623_v60, %v12706_v42 }
0x2a81   :  { %v12708_v55 = vand.u32 4294901760, %v12707_v16 }
0x2a83   :  { %v12709_v50 = vsub.f32 %v12707_v16, %v12708_v55 }
0x2a85   :  { %v12710_v18 = vand.u32 4294901760, %v12709_v50 }
0x2a87   :  { %12711 = vmatmul.mubr.f32.vlgmr.msra.gmra.mrb[38].mxu1 %v12710_v18 }
0x2a88   :  { %18180 = vmatpush1.bf16.msra.mxu1 %v24849_v10  ;;  %12861 = vmatprep.mubr.f32.mxu1 %v24505_v19 }
0x2a89   :  { %18182 = vmatprep.subr.bf16.mxu1 %v24850_v35 }
0x2a8c   :  { %18184 = vmatpush1.bf16.msra.mxu1 %v22296_v5 }
0x2a8d   :  { %18186 = vmatprep.subr.bf16.mxu1 %v22317_v3 }
0x2a90   :  { %18188 = vmatpush1.bf16.msra.mxu1 %v22324_v30 }
0x2a91   :  { %18190 = vmatprep.subr.bf16.mxu1 %v22338_v24 }
0x2a94   :  { %18192 = vmatpush1.bf16.msra.mxu1 %v22347_v26 }
0x2a95   :  { %18194 = vmatprep.subr.bf16.mxu1 %v22345_v53 }
0x2a97   :  { %12863 = vmatmul.mubr.f32.vlgmr.msra.gmra.mrb[38].mxu1 %v12706_v42 }
0x2a98   :  { %18196 = vmatpush1.bf16.msra.mxu1 %v24851_v29  ;;  %12965 = vmatprep.mubr.f32.mxu1 %v24505_v19 }
0x2a99   :  { %18198 = vmatprep.subr.bf16.mxu1 %v24852_v33 }
0x2a9c   :  { %18200 = vmatpush1.bf16.msra.mxu1 %v24853_v48 }
0x2a9d   :  { %18202 = vmatprep.subr.bf16.mxu1 %v24854_v13 }
0x2aa0   :  { %18204 = vmatpush1.bf16.msra.mxu1 %v24855_v38 }
0x2aa1   :  { %18206 = vmatprep.subr.bf16.mxu1 %v24856_v54 }
0x2aa4   :  { %18208 = vmatpush1.bf16.msra.mxu1 %v24857_v1 }
0x2aa5   :  { %18210 = vmatprep.subr.bf16.mxu1 %v22000_v11 }
0x2aa7   :  { %12968 = vmatmul.mubr.f32.vlgmr.msra.gmra.mrb[38].mxu1 %v12707_v16 }
0x2aa8   :  { %18212 = vmatpush1.bf16.msra.mxu1 %v22008_v40  ;;  %13054 = vmatprep.mubr.f32.mxu1 %v24505_v19 }
0x2aa9   :  { %18214 = vmatprep.subr.bf16.mxu1 %v22050_v2 }
0x2aac   :  { %18216 = vmatpush1.bf16.msra.mxu1 %v22056_v45 }
0x2aad   :  { %18218 = vmatprep.subr.bf16.mxu1 %v22096_v62 }
0x2ab0   :  { %18220 = vmatpush1.bf16.msra.mxu1 %v22104_v15 }
0x2ab1   :  { %18222 = vmatprep.subr.bf16.mxu1 %v22151_v31 }
0x2ab4   :  { %18224 = vmatpush1.bf16.msra.mxu1 %v22169_v8 }
0x2ab5   :  { %18226 = vmatprep.subr.bf16.mxu1 %v24858_v34 }
0x2ab7   :  { %13058 = vmatmul.mubr.f32.vlgmr.msra.gmra.mrb[38].mxu1 %v12708_v55 }
0x2ab8   :  { %18228 = vmatpush1.bf16.msra.mxu1 %v24859_v4  ;;  %13176 = vmatprep.mubr.f32.mxu1 %v24505_v19 }
0x2ab9   :  { %18230 = vmatprep.subr.bf16.mxu1 %v24860_v32 }
0x2abc   :  { %18232 = vmatpush1.bf16.msra.mxu1 %v24861_v0 }
0x2abd   :  { %18234 = vmatprep.subr.bf16.mxu1 %v24862_v22 }
0x2ac0   :  { %18236 = vmatpush1.bf16.msra.mxu1 %v24863_v63 }
0x2ac1   :  { %18238 = vmatprep.subr.bf16.mxu1 %v24864_v23 }
0x2ac4   :  { %18240 = vmatpush1.bf16.msra.mxu1 %v24865_v61 }
0x2ac5   :  { %18242 = vmatprep.subr.bf16.mxu1 %v22000_v11 }
0x2ac7   :  { %13178 = vmatmul.mubr.f32.vlgmr.msra.gmra.mrb[38].mxu1 %v12706_v42 }
0x2ac8   :  { %18244 = vmatpush1.bf16.msra.mxu1 %v22008_v40  ;;  %13264 = vmatprep.mubr.f32.mxu1 %v24505_v19 }
0x2ac9   :  { %18246 = vmatprep.subr.bf16.mxu1 %v22050_v2 }
0x2acc   :  { %18248 = vmatpush1.bf16.msra.mxu1 %v22056_v45 }
0x2acd   :  { %18250 = vmatprep.subr.bf16.mxu1 %v22096_v62 }
0x2ad0   :  { %18252 = vmatpush1.bf16.msra.mxu1 %v22104_v15 }
0x2ad1   :  { %18254 = vmatprep.subr.bf16.mxu1 %v22151_v31 }
0x2ad4   :  { %18256 = vmatpush1.bf16.msra.mxu1 %v22169_v8 }
0x2ad5   :  { %18354 = vmatprep.subr.bf16.mxu1 %v22000_v11 }
0x2ad7   :  { %13266 = vmatmul.mubr.f32.vlgmr.msra.gmra.mrb[38].mxu1 %v12706_v42 }
0x2ad8   :  { %18356 = vmatpush1.bf16.msra.mxu1 %v22008_v40  ;;  %14127 = vmatprep.mubr.f32.mxu1 %v24505_v19 }
0x2ad9   :  { %18358 = vmatprep.subr.bf16.mxu1 %v22050_v2 }
0x2adc   :  { %18360 = vmatpush1.bf16.msra.mxu1 %v22056_v45 }
0x2add   :  { %18362 = vmatprep.subr.bf16.mxu1 %v22096_v62 }
0x2ae0   :  { %18364 = vmatpush1.bf16.msra.mxu1 %v22104_v15 }
0x2ae1   :  { %18366 = vmatprep.subr.bf16.mxu1 %v22151_v31 }
0x2ae4   :  { %18368 = vmatpush1.bf16.msra.mxu1 %v22169_v8 }
0x2ae5   :  { %18370 = vmatprep.subr.bf16.mxu1 %v22237_v37 }
0x2baa   :  { %v13267_v17 = vpop.f32.mrb[38].mxu1 }
0x2bab   :  { %v13272_v28 = vadd.f32 %v22793_v46, %v13267_v17  ;;  %v13269_v20 = vpop.f32.mrb[39].mxu1 }
0x2bac   :  { %v13273_v41 = vadd.f32 %v22782_v39, %v13269_v20 }
0x2bad   :  { %19253 = vtanh.f32 %v13272_v28  ;;  %v16019_v44 = vmul.f32 -1.442695, %v13272_v28 }
0x2bae   :  { %19255 = vtanh.f32 %v13273_v41  ;;  %v16020_v27 = vmul.f32 -1.442695, %v13273_v41 }
0x2baf   :  { %19257 = vpow2.f32 %v16019_v44 }
0x2bb0   :  { %19259 = vpow2.f32 %v16020_v27 }
0x2bb7   :  { %v19254_v25 = vpop.eup %19253 }
0x2bb8   :  { %v19256_v14 = vpop.eup %19255  ;;  %13290 = vrot.lane.b32.xlu0 %v19254_v25, %s19334_s5 }
0x2bb9   :  { %13301 = vrot.lane.b32.xlu1 %v19256_v14, %s19334_s5  ;;  %v19258_v60 = vpop.eup %19257 }
0x2bba   :  { %v19260_v37 = vpop.eup %19259  ;;  %v13280_v42 = vadd.f32 1.0, %v19258_v60 }
0x2bbb   :  { %v13281_v16 = vadd.f32 1.0, %v19260_v37 }
0x2bbc   :  { %19261 = vrcp.f32 %v13280_v42 }
0x2bbd   :  { %19263 = vrcp.f32 %v13281_v16 }
0x2bc6   :  { %v19262_v46 = vpop.eup %19261 }
0x2bc7   :  { %v19264_v55 = vpop.eup %19263  ;;  %v13288_v28 = vmul.f32 %v19262_v46, %v23126_v47 }
0x2bc8   :  { %v13299_v41 = vmul.f32 %v19264_v55, %v23128_v51 }
0x2c2a   :  { %v13291_v39 = vpop.permute.xlu0 %13290 }
0x2c2b   :  { %v13293_v50 = vmul.f32 %v19262_v46, %v13291_v39  ;;  %v13302_v18 = vpop.permute.xlu1 %13301 }
0x2c2c   :  { %v13304_v17 = vmul.f32 %v19264_v55, %v13302_v18 }
0x2c2d   :  { %13295 = vrot.lane.b32.xlu0 %v13293_v50, %s19335_s1 }
0x2c2e   :  { %13306 = vrot.lane.b32.xlu1 %v13304_v17, %s19335_s1 }
0x2c9f   :  { %v13296_v20 = vpop.permute.xlu0 %13295 }
0x2ca0   :  { %v23206_v25 = vadd.f32 %v13296_v20, %v13288_v28  ;;  %v13307_v14 = vpop.permute.xlu1 %13306 }
0x2ca1   :  { %v23208_v44 = vadd.f32 %v13307_v14, %v13299_v41 }
0x2ca2   :  { %19265 = vtanh.f32 %v23206_v25 }
0x2ca3   :  { %19267 = vtanh.f32 %v23208_v44 }
0x2cac   :  { %v19266_v27 = vpop.eup %19265 }
0x2cad   :  { %v19268_v60 = vpop.eup %19267  ;;  %13312 = vrot.lane.b32.xlu0 %v19266_v27, %s19334_s5 }
0x2cae   :  { %13318 = vrot.lane.b32.xlu1 %v19268_v60, %s19334_s5 }
0x2d1f   :  { %v13313_v37 = vpop.permute.xlu0 %13312 }
0x2d20   :  { %v13315_v47 = vmul.f32 %v19262_v46, %v13313_v37  ;;  %v13319_v42 = vpop.permute.xlu1 %13318 }
0x2d21   :  { %v13321_v16 = vmul.f32 %v19264_v55, %v13319_v42 }
0x2d22   :  { %13323 = vrot.lane.b32.xlu0 %v13315_v47, %s19335_s1 }
0x2d23   :  { %13327 = vrot.lane.b32.xlu1 %v13321_v16, %s19334_s5 }
0x2d94   :  { %v23216_v51 = vpop.permute.xlu0 %13323 }
0x2d95   :  { %v23218_v39 = vpop.permute.xlu1 %13327 }
0x2d96   :  { %v13330_v50 = vsel %vm3008_vm0, %v23216_v51, %v23218_v39 }
0x2d97   :  { %v13334_v18 = vsel %vm2299_vm1, %v13330_v50, 0 }
0x2d98   :  { %v13417_v17 = vand.u32 4294901760, %v13334_v18 }
0x2d9a   :  { %v13418_v28 = vsub.f32 %v13334_v18, %v13417_v17 }
0x2d9c   :  { %v13419_v20 = vand.u32 4294901760, %v13418_v28 }
0x2d9e   :  { %v13420_v46 = vsub.f32 %v13418_v28, %v13419_v20 }
0x2da0   :  { %v13421_v41 = vand.u32 4294901760, %v13420_v46 }
0x2da2   :  { %13422 = vmatmul.mubr.f32.vlgmr.msra.gmra.mrb[36].mxu0 %v13421_v41 }
0x2da3   :  { %18276 = vmatpush1.bf16.msra.mxu0 %v24849_v10  ;;  %13572 = vmatprep.mubr.f32.mxu0 %v24505_v19 }
0x2da4   :  { %18278 = vmatprep.subr.bf16.mxu0 %v24850_v35 }
0x2da7   :  { %18280 = vmatpush1.bf16.msra.mxu0 %v22296_v5 }
0x2da8   :  { %18282 = vmatprep.subr.bf16.mxu0 %v22317_v3 }
0x2dab   :  { %18284 = vmatpush1.bf16.msra.mxu0 %v22324_v30 }
0x2dac   :  { %18286 = vmatprep.subr.bf16.mxu0 %v22338_v24 }
0x2daf   :  { %18288 = vmatpush1.bf16.msra.mxu0 %v22347_v26 }
0x2db0   :  { %18290 = vmatprep.subr.bf16.mxu0 %v22345_v53 }
0x2db2   :  { %13574 = vmatmul.mubr.f32.vlgmr.msra.gmra.mrb[36].mxu0 %v13417_v17 }
0x2db3   :  { %18292 = vmatpush1.bf16.msra.mxu0 %v24851_v29  ;;  %13676 = vmatprep.mubr.f32.mxu0 %v24505_v19 }
0x2db4   :  { %18294 = vmatprep.subr.bf16.mxu0 %v24852_v33 }
0x2db7   :  { %18296 = vmatpush1.bf16.msra.mxu0 %v24853_v48 }
0x2db8   :  { %18298 = vmatprep.subr.bf16.mxu0 %v24854_v13 }
0x2dbb   :  { %18300 = vmatpush1.bf16.msra.mxu0 %v24855_v38 }
0x2dbc   :  { %18302 = vmatprep.subr.bf16.mxu0 %v24856_v54 }
0x2dbf   :  { %18304 = vmatpush1.bf16.msra.mxu0 %v24857_v1 }
0x2dc0   :  { %18306 = vmatprep.subr.bf16.mxu0 %v22000_v11 }
0x2dc2   :  { %13679 = vmatmul.mubr.f32.vlgmr.msra.gmra.mrb[36].mxu0 %v13418_v28 }
0x2dc3   :  { %18308 = vmatpush1.bf16.msra.mxu0 %v22008_v40  ;;  %13765 = vmatprep.mubr.f32.mxu0 %v24505_v19 }
0x2dc4   :  { %18310 = vmatprep.subr.bf16.mxu0 %v22050_v2 }
0x2dc7   :  { %18312 = vmatpush1.bf16.msra.mxu0 %v22056_v45 }
0x2dc8   :  { %18314 = vmatprep.subr.bf16.mxu0 %v22096_v62 }
0x2dcb   :  { %18316 = vmatpush1.bf16.msra.mxu0 %v22104_v15 }
0x2dcc   :  { %18318 = vmatprep.subr.bf16.mxu0 %v22151_v31 }
0x2dcf   :  { %18320 = vmatpush1.bf16.msra.mxu0 %v22169_v8 }
0x2dd0   :  { %18322 = vmatprep.subr.bf16.mxu0 %v24858_v34 }
0x2dd2   :  { %13769 = vmatmul.mubr.f32.vlgmr.msra.gmra.mrb[36].mxu0 %v13419_v20 }
0x2dd3   :  { %18324 = vmatpush1.bf16.msra.mxu0 %v24859_v4  ;;  %13887 = vmatprep.mubr.f32.mxu0 %v24505_v19 }
0x2dd4   :  { %18326 = vmatprep.subr.bf16.mxu0 %v24860_v32 }
0x2dd7   :  { %18328 = vmatpush1.bf16.msra.mxu0 %v24861_v0 }
0x2dd8   :  { %18330 = vmatprep.subr.bf16.mxu0 %v24862_v22 }
0x2ddb   :  { %18332 = vmatpush1.bf16.msra.mxu0 %v24863_v63 }
0x2ddc   :  { %18334 = vmatprep.subr.bf16.mxu0 %v24864_v23 }
0x2ddf   :  { %18336 = vmatpush1.bf16.msra.mxu0 %v24865_v61 }
0x2de0   :  { %18338 = vmatprep.subr.bf16.mxu0 %v22000_v11 }
0x2de2   :  { %13889 = vmatmul.mubr.f32.vlgmr.msra.gmra.mrb[36].mxu0 %v13417_v17 }
0x2de3   :  { %18340 = vmatpush1.bf16.msra.mxu0 %v22008_v40  ;;  %13975 = vmatprep.mubr.f32.mxu0 %v24505_v19 }
0x2de4   :  { %18342 = vmatprep.subr.bf16.mxu0 %v22050_v2 }
0x2de7   :  { %18344 = vmatpush1.bf16.msra.mxu0 %v22056_v45 }
0x2de8   :  { %18346 = vmatprep.subr.bf16.mxu0 %v22096_v62 }
0x2deb   :  { %18348 = vmatpush1.bf16.msra.mxu0 %v22104_v15 }
0x2dec   :  { %18350 = vmatprep.subr.bf16.mxu0 %v22151_v31 }
0x2def   :  { %18352 = vmatpush1.bf16.msra.mxu0 %v22169_v8 }
0x2df2   :  { %13977 = vmatmul.mubr.f32.vlgmr.msra.gmra.mrb[36].mxu0 %v13417_v17 }
0x2df3   :  { %14892 = vmatprep.mubr.f32.mxu0 %v24505_v19 }
0x2ec5   :  { %v13978_v55 = vpop.f32.mrb[36].mxu0 }
0x2ec6   :  { %v13983_v14 = vadd.f32 %v22797_v43, %v13978_v55  ;;  %v13980_v27 = vpop.f32.mrb[37].mxu0 }
0x2ec7   :  { %v13984_v60 = vadd.f32 %v22778_v21, %v13980_v27 }
0x2ec8   :  { %19269 = vtanh.f32 %v13983_v14  ;;  %v16021_v42 = vmul.f32 -1.442695, %v13983_v14 }
0x2ec9   :  { %19271 = vtanh.f32 %v13984_v60  ;;  %v16022_v16 = vmul.f32 -1.442695, %v13984_v60 }
0x2eca   :  { %19273 = vpow2.f32 %v16021_v42 }
0x2ecb   :  { %19275 = vpow2.f32 %v16022_v16 }
0x2ed2   :  { %v19270_v37 = vpop.eup %19269 }
0x2ed3   :  { %v19272_v47 = vpop.eup %19271  ;;  %14001 = vrot.lane.b32.xlu0 %v19270_v37, %s19334_s5 }
0x2ed4   :  { %14012 = vrot.lane.b32.xlu1 %v19272_v47, %s19334_s5  ;;  %v19274_v50 = vpop.eup %19273 }
0x2ed5   :  { %v19276_v18 = vpop.eup %19275  ;;  %v13991_v17 = vadd.f32 1.0, %v19274_v50 }
0x2ed6   :  { %v13992_v28 = vadd.f32 1.0, %v19276_v18 }
0x2ed7   :  { %19277 = vrcp.f32 %v13991_v17 }
0x2ed8   :  { %19279 = vrcp.f32 %v13992_v28 }
0x2ee1   :  { %v19278_v43 = vpop.eup %19277 }
0x2ee2   :  { %v19280_v20 = vpop.eup %19279  ;;  %v13999_v14 = vmul.f32 %v19278_v43, %v23206_v25 }
0x2ee3   :  { %v14010_v60 = vmul.f32 %v19280_v20, %v23208_v44 }
0x2f45   :  { %v14002_v21 = vpop.permute.xlu0 %14001 }
0x2f46   :  { %v14004_v46 = vmul.f32 %v19278_v43, %v14002_v21  ;;  %v14013_v41 = vpop.permute.xlu1 %14012 }
0x2f47   :  { %v14015_v55 = vmul.f32 %v19280_v20, %v14013_v41 }
0x2f48   :  { %14006 = vrot.lane.b32.xlu0 %v14004_v46, %s19335_s1 }
0x2f49   :  { %14017 = vrot.lane.b32.xlu1 %v14015_v55, %s19335_s1 }
0x2fba   :  { %v14007_v27 = vpop.permute.xlu0 %14006 }
0x2fbb   :  { %v23277_v37 = vadd.f32 %v14007_v27, %v13999_v14  ;;  %v14018_v47 = vpop.permute.xlu1 %14017 }
0x2fbc   :  { %v23279_v42 = vadd.f32 %v14018_v47, %v14010_v60 }
0x2fbd   :  { %19281 = vtanh.f32 %v23277_v37 }
0x2fbe   :  { %19283 = vtanh.f32 %v23279_v42 }
0x2fc7   :  { %v19282_v16 = vpop.eup %19281 }
0x2fc8   :  { %v19284_v50 = vpop.eup %19283  ;;  %14023 = vrot.lane.b32.xlu0 %v19282_v16, %s19334_s5 }
0x2fc9   :  { %14029 = vrot.lane.b32.xlu1 %v19284_v50, %s19334_s5 }
0x303a   :  { %v14024_v18 = vpop.permute.xlu0 %14023 }
0x303b   :  { %v14026_v25 = vmul.f32 %v19278_v43, %v14024_v18  ;;  %v14030_v17 = vpop.permute.xlu1 %14029 }
0x303c   :  { %v14032_v28 = vmul.f32 %v19280_v20, %v14030_v17  ;;  %v14767_v17 = vld [vmem:[%s23991_s9 + $0x38] sm:$0xff] }
0x303d   :  { %14034 = vrot.lane.b32.xlu0 %v14026_v25, %s19335_s1  ;;  %v14765_v25 = vld [vmem:[%s23991_s9 + $0x28] sm:$0xff] }
0x303e   :  { %14038 = vrot.lane.b32.xlu1 %v14032_v28, %s19334_s5  ;;  %v14820_v28 = vand.u32 4294901760, %v14765_v25 }
0x30af   :  { %v23287_v44 = vpop.permute.xlu0 %14034 }
0x30b0   :  { %v23289_v21 = vpop.permute.xlu1 %14038 }
0x30b1   :  { %v14041_v46 = vsel %vm3008_vm0, %v23287_v44, %v23289_v21 }
0x30b2   :  { %v14045_v41 = vsel %vm2299_vm1, %v14041_v46, 0  ;;  %v14824_v46 = vand.u32 4294901760, %v14767_v17 }
0x30b3   :  { %v14128_v55 = vand.u32 4294901760, %v14045_v41 }
0x30b5   :  { %v14129_v14 = vsub.f32 %v14045_v41, %v14128_v55  ;;  %v14764_v41 = vld [vmem:[%s23991_s9 + $0x20] sm:$0xff] }
0x30b7   :  { %v14130_v27 = vand.u32 4294901760, %v14129_v14 }
0x30b9   :  { %v14131_v43 = vsub.f32 %v14129_v14, %v14130_v27 }
0x30bb   :  { %v14132_v60 = vand.u32 4294901760, %v14131_v43  ;;  %v23401_v43 = vpack.c.bf16 %v14824_v46, %v14820_v28 }
0x30bd   :  { %14133 = vmatmul.mubr.f32.vlgmr.msra.gmra.mrb[40].mxu1 %v14132_v60 }
0x30be   :  { %18372 = vmatpush1.bf16.msra.mxu1 %v24849_v10  ;;  %14283 = vmatprep.mubr.f32.mxu1 %v24505_v19 }
0x30bf   :  { %18374 = vmatprep.subr.bf16.mxu1 %v24850_v35 }
0x30c2   :  { %18376 = vmatpush1.bf16.msra.mxu1 %v22296_v5 }
0x30c3   :  { %18378 = vmatprep.subr.bf16.mxu1 %v22317_v3 }
0x30c6   :  { %18380 = vmatpush1.bf16.msra.mxu1 %v22324_v30 }
0x30c7   :  { %18382 = vmatprep.subr.bf16.mxu1 %v22338_v24 }
0x30ca   :  { %18384 = vmatpush1.bf16.msra.mxu1 %v22347_v26 }
0x30cb   :  { %18386 = vmatprep.subr.bf16.mxu1 %v22345_v53 }
0x30cd   :  { %14285 = vmatmul.mubr.f32.vlgmr.msra.gmra.mrb[40].mxu1 %v14128_v55 }
0x30ce   :  { %18388 = vmatpush1.bf16.msra.mxu1 %v24851_v29  ;;  %14387 = vmatprep.mubr.f32.mxu1 %v24505_v19 }
0x30cf   :  { %18390 = vmatprep.subr.bf16.mxu1 %v24852_v33 }
0x30d2   :  { %18392 = vmatpush1.bf16.msra.mxu1 %v24853_v48 }
0x30d3   :  { %18394 = vmatprep.subr.bf16.mxu1 %v24854_v13 }
0x30d6   :  { %18396 = vmatpush1.bf16.msra.mxu1 %v24855_v38 }
0x30d7   :  { %18398 = vmatprep.subr.bf16.mxu1 %v24856_v54 }
0x30da   :  { %18400 = vmatpush1.bf16.msra.mxu1 %v24857_v1 }
0x30db   :  { %18402 = vmatprep.subr.bf16.mxu1 %v22000_v11 }
0x30dd   :  { %14390 = vmatmul.mubr.f32.vlgmr.msra.gmra.mrb[40].mxu1 %v14129_v14  ;;  %v14822_v14 = vand.u32 4294901760, %v14764_v41 }
0x30de   :  { %18404 = vmatpush1.bf16.msra.mxu1 %v22008_v40  ;;  %14476 = vmatprep.mubr.f32.mxu1 %v24505_v19 }
0x30df   :  { %18406 = vmatprep.subr.bf16.mxu1 %v22050_v2 }
0x30e2   :  { %18408 = vmatpush1.bf16.msra.mxu1 %v22056_v45 }
0x30e3   :  { %18410 = vmatprep.subr.bf16.mxu1 %v22096_v62 }
0x30e6   :  { %18412 = vmatpush1.bf16.msra.mxu1 %v22104_v15 }
0x30e7   :  { %18414 = vmatprep.subr.bf16.mxu1 %v22151_v31 }
0x30ea   :  { %18416 = vmatpush1.bf16.msra.mxu1 %v22169_v8 }
0x30eb   :  { %18418 = vmatprep.subr.bf16.mxu1 %v24858_v34 }
0x30ed   :  { %14480 = vmatmul.mubr.f32.vlgmr.msra.gmra.mrb[40].mxu1 %v14130_v27 }
0x30ee   :  { %18420 = vmatpush1.bf16.msra.mxu1 %v24859_v4  ;;  %14598 = vmatprep.mubr.f32.mxu1 %v24505_v19  ;;  %v14761_v4 = vld [vmem:[%s23991_s9 + $0x8] sm:$0xff] }
0x30ef   :  { %18422 = vmatprep.subr.bf16.mxu1 %v24860_v32  ;;  %v14763_v32 = vld [vmem:[%s23991_s9 + $0x18] sm:$0xff] }
0x30f2   :  { %18424 = vmatpush1.bf16.msra.mxu1 %v24861_v0  ;;  %v14760_v0 = vld [vmem:[%s23991_s9] sm:$0xff] }
0x30f3   :  { %18426 = vmatprep.subr.bf16.mxu1 %v24862_v22  ;;  %v14812_v22 = vand.u32 4294901760, %v14761_v4 }
0x30f5   :  { %v23377_v47 = vsub.f32 %v14761_v4, %v14812_v22 }
0x30f6   :  { %18428 = vmatpush1.bf16.msra.mxu1 %v24863_v63  ;;  %v14816_v63 = vand.u32 4294901760, %v14763_v32 }
0x30f7   :  { %18430 = vmatprep.subr.bf16.mxu1 %v24864_v23  ;;  %v14762_v23 = vld [vmem:[%s23991_s9 + $0x10] sm:$0xff] }
0x30f8   :  { %v14818_v20 = vand.u32 4294901760, %v14762_v23 }
0x30fa   :  { %18432 = vmatpush1.bf16.msra.mxu1 %v24865_v61  ;;  %v14814_v61 = vand.u32 4294901760, %v14760_v0  ;;  %v23385_v18 = vsub.f32 %v14762_v23, %v14818_v20 }
0x30fb   :  { %18434 = vmatprep.subr.bf16.mxu1 %v22000_v11 }
0x30fc   :  { %v23381_v16 = vsub.f32 %v14760_v0, %v14814_v61  ;;  %v23383_v50 = vpack.c.bf16 %v14818_v20, %v14814_v61 }
0x30fd   :  { %14600 = vmatmul.mubr.f32.vlgmr.msra.gmra.mrb[40].mxu1 %v14128_v55 }
0x30fe   :  { %18436 = vmatpush1.bf16.msra.mxu1 %v22008_v40  ;;  %14686 = vmatprep.mubr.f32.mxu1 %v24505_v19 }
0x30ff   :  { %18438 = vmatprep.subr.bf16.mxu1 %v22050_v2 }
0x3102   :  { %18440 = vmatpush1.bf16.msra.mxu1 %v22056_v45 }
0x3103   :  { %18442 = vmatprep.subr.bf16.mxu1 %v22096_v62 }
0x3106   :  { %18444 = vmatpush1.bf16.msra.mxu1 %v22104_v15 }
0x3107   :  { %18446 = vmatprep.subr.bf16.mxu1 %v22151_v31 }
0x310a   :  { %18448 = vmatpush1.bf16.msra.mxu1 %v22169_v8 }
0x310d   :  { %14688 = vmatmul.mubr.f32.vlgmr.msra.gmra.mrb[40].mxu1 %v14128_v55  ;;  %v14766_v55 = vld [vmem:[%s23991_s9 + $0x30] sm:$0xff] }
0x310e   :  { %v14826_v27 = vand.u32 4294901760, %v14766_v55 }
0x3110   :  { %v23403_v60 = vpack.c.bf16 %v14826_v27, %v14822_v14 }
0x31e0   :  { %v14689_v26 = vpop.f32.mrb[40].mxu1 }
0x31e1   :  { %v14694_v3 = vadd.f32 %v22801_v59, %v14689_v26  ;;  %v14691_v11 = vpop.f32.mrb[41].mxu1  ;;  %v14769_v26 = vld [vmem:[%s23991_s9 + $0x48] sm:$0xff] }
0x31e2   :  { %v14695_v40 = vadd.f32 %v22774_v58, %v14691_v11  ;;  %v14828_v11 = vand.u32 4294901760, %v14769_v26 }
0x31e3   :  { %19285 = vtanh.f32 %v14694_v3  ;;  %v16023_v62 = vmul.f32 -1.442695, %v14694_v3  ;;  %v14771_v3 = vld [vmem:[%s23991_s9 + $0x58] sm:$0xff] }
0x31e4   :  { %19287 = vtanh.f32 %v14695_v40  ;;  %v16024_v45 = vmul.f32 -1.442695, %v14695_v40  ;;  %v14832_v40 = vand.u32 4294901760, %v14771_v3  ;;  %v23445_v4 = vsub.f32 %v14769_v26, %v14828_v11 }
0x31e5   :  { %19289 = vpow2.f32 %v16023_v62  ;;  %v24331_v26 = vand.u32 4294901760, %v23381_v16 }
0x31e6   :  { %19291 = vpow2.f32 %v16024_v45 }
0x31ed   :  { %v19286_v2 = vpop.eup %19285 }
0x31ee   :  { %v19288_v5 = vpop.eup %19287  ;;  %14712 = vrot.lane.b32.xlu1 %v19286_v2, %s19334_s5  ;;  %v14768_v2 = vld [vmem:[%s23991_s9 + $0x40] sm:$0xff] }
0x31ef   :  { %14723 = vrot.lane.b32.xlu0 %v19288_v5, %s19334_s5  ;;  %v19290_v31 = vpop.eup %19289  ;;  %v14770_v5 = vld [vmem:[%s23991_s9 + $0x50] sm:$0xff]  ;;  %v14830_v62 = vand.u32 4294901760, %v14768_v2 }
0x31f0   :  { %v19292_v15 = vpop.eup %19291  ;;  %v14702_v8 = vadd.f32 1.0, %v19290_v31  ;;  %v14834_v45 = vand.u32 4294901760, %v14770_v5  ;;  %v23419_v31 = vpack.c.bf16 %v14832_v40, %v14828_v11  ;;  %v14990_v11 = vsub.f32 %v23381_v16, %v24331_v26 }
0x31f1   :  { %v14703_v53 = vadd.f32 1.0, %v19292_v15  ;;  %v23421_v15 = vsub.f32 %v14765_v25, %v14820_v28  ;;  %v23449_v0 = vsub.f32 %v14768_v2, %v14830_v62  ;;  %v24866_v2 = vld [vmem:[#allocation42_spill] sm:$0xff]  ;;  %v14755_v26 = vsel %vm3008_vm0, %v23056_v36, %v23138_v56 }
0x31f2   :  { %19293 = vrcp.f32 %v14702_v8  ;;  %v23423_v8 = vsub.f32 %v14767_v17, %v14824_v46  ;;  %v14798_v56 = vsel %vm2299_vm1, %v14755_v26, 0 }
0x31f3   :  { %19295 = vrcp.f32 %v14703_v53  ;;  %v23425_v53 = vpack.c.bf16 %v14834_v45, %v14830_v62 }
0x31fc   :  { %v23343_v30 = vpop.eup %19293 }
0x31fd   :  { %v23345_v58 = vpop.eup %19295  ;;  %v14710_v29 = vmul.f32 %v23343_v30, %v23277_v37  ;;  %v23375_v37 = vpack.c.bf16 %v14816_v63, %v14812_v22  ;;  %v23451_v22 = vsub.f32 %v14770_v5, %v14834_v45  ;;  %v24867_v45 = vld [vmem:[#allocation9_spill] sm:$0xff] }
0x31fe   :  { %v14721_v48 = vmul.f32 %v23345_v58, %v23279_v42  ;;  %v23379_v42 = vsub.f32 %v14763_v32, %v14816_v63  ;;  %v23447_v32 = vsub.f32 %v14771_v3, %v14832_v40  ;;  %v24330_v3 = vand.u32 4294901760, %v23385_v18 }
0x31ff   :  { %18450 = vmatprep.subr.bf16.mxu0 %v23375_v37 }
0x3200   :  { %18452 = vmatpush1.bf16.msra.mxu0 %v23383_v50  ;;  %v15002_v40 = vsub.f32 %v23385_v18, %v24330_v3 }
0x3201   :  { %18454 = vmatprep.subr.bf16.mxu0 %v23401_v43 }
0x3204   :  { %18456 = vmatpush1.bf16.msra.mxu0 %v23403_v60 }
0x3205   :  { %18458 = vmatprep.subr.bf16.mxu0 %v23419_v31 }
0x3208   :  { %18460 = vmatpush1.bf16.msra.mxu0 %v23425_v53 }
0x3260   :  { %v14713_v24 = vpop.permute.xlu1 %14712 }
0x3261   :  { %v14715_v59 = vmul.f32 %v23343_v30, %v14713_v24  ;;  %v14724_v10 = vpop.permute.xlu0 %14723  ;;  %v14773_v24 = vld [vmem:[%s23991_s9 + $0x68] sm:$0xff] }
0x3262   :  { %v14726_v35 = vmul.f32 %v23345_v58, %v14724_v10  ;;  %v14836_v10 = vand.u32 4294901760, %v14773_v24 }
0x3263   :  { %14717 = vrot.lane.b32.xlu1 %v14715_v59, %s19335_s1  ;;  %v14775_v59 = vld [vmem:[%s23991_s9 + $0x78] sm:$0xff] }
0x3264   :  { %14728 = vrot.lane.b32.xlu0 %v14726_v35, %s19335_s1  ;;  %v14840_v35 = vand.u32 4294901760, %v14775_v59  ;;  %v23457_v61 = vsub.f32 %v14773_v24, %v14836_v10  ;;  %v14991_v24 = vand.u32 4294901760, %v14990_v11 }
0x3266   :  { %v23453_v63 = vpack.c.bf16 %v14840_v35, %v14836_v10  ;;  %v23459_v20 = vsub.f32 %v14775_v59, %v14840_v35  ;;  %v15003_v59 = vand.u32 4294901760, %v15002_v40  ;;  %v24329_v10 = vand.u32 4294901760, %v23421_v15 }
0x3267   :  { %v24328_v35 = vand.u32 4294901760, %v23423_v8 }
0x3268   :  { %18462 = vmatprep.subr.bf16.mxu0 %v23453_v63 }
0x32d5   :  { %v14718_v33 = vpop.permute.xlu1 %14717 }
0x32d6   :  { %v23355_v13 = vadd.f32 %v14718_v33, %v14710_v29  ;;  %v14729_v38 = vpop.permute.xlu0 %14728  ;;  %v14772_v29 = vld [vmem:[%s23991_s9 + $0x60] sm:$0xff]  ;;  %v14774_v33 = vld [vmem:[%s23991_s9 + $0x70] sm:$0xff]  ;;  %s19336_s9 = smov 96  }
0x32d7   :  { %v23357_v54 = vadd.f32 %v14729_v38, %v14721_v48  ;;  %v14838_v48 = vand.u32 4294901760, %v14772_v29  ;;  %v14842_v38 = vand.u32 4294901760, %v14774_v33 }
0x32d8   :  { %19297 = vtanh.f32 %v23355_v13 }
0x32d9   :  { %19299 = vtanh.f32 %v23357_v54  ;;  %v23455_v23 = vpack.c.bf16 %v14842_v38, %v14838_v48  ;;  %v23462_v17 = vsub.f32 %v14772_v29, %v14838_v48  ;;  %v23464_v28 = vsub.f32 %v14774_v33, %v14842_v38 }
0x32da   :  { %v23492_v33 = vpack.c.bf16 %v15003_v59, %v14991_v24  ;;  %v15008_v48 = vsub.f32 %v23421_v15, %v24329_v10  ;;  %v15020_v38 = vsub.f32 %v23423_v8, %v24328_v35 }
0x32db   :  { %18464 = vmatpush1.bf16.msra.mxu0 %v23455_v23 }
0x32e2   :  { %v19298_v1 = vpop.eup %19297 }
0x32e3   :  { %v19300_v34 = vpop.eup %19299  ;;  %14734 = vrot.lane.b32.xlu1 %v19298_v1, %s19334_s5  ;;  %v23441_v1 = vsub.f32 %v14764_v41, %v14822_v14  ;;  %v24333_v14 = vand.u32 4294901760, %v23377_v47 }
0x32e4   :  { %14740 = vrot.lane.b32.xlu0 %v19300_v34, %s19334_s5  ;;  %v23443_v34 = vsub.f32 %v14766_v55, %v14826_v27  ;;  %v24332_v27 = vand.u32 4294901760, %v23379_v42 }
0x3355   :  { %v14735_v25 = vpop.permute.xlu1 %14734 }
0x3356   :  { %v14737_v46 = vmul.f32 %v23343_v30, %v14735_v25  ;;  %v14741_v41 = vpop.permute.xlu0 %14740  ;;  %v14984_v30 = vsub.f32 %v23377_v47, %v24333_v14  ;;  %v24327_v25 = vand.u32 4294901760, %v23441_v1 }
0x3357   :  { %v14743_v55 = vmul.f32 %v23345_v58, %v14741_v41  ;;  %v14996_v58 = vsub.f32 %v23379_v42, %v24332_v27  ;;  %v24868_v41 = vld [vmem:[#allocation39_spill] sm:$0xff] }
0x3358   :  { %14745 = vrot.lane.b32.xlu1 %v14737_v46, %s19335_s1  ;;  %v14985_v5 = vand.u32 4294901760, %v14984_v30  ;;  %v24322_v46 = vand.u32 4294901760, %v23443_v34  ;;  %v15009_v30 = vand.u32 4294901760, %v15008_v48  ;;  %v15014_v11 = vsub.f32 %v23441_v1, %v24327_v25 }
0x3359   :  { %14749 = vrot.lane.b32.xlu0 %v14743_v55, %s19334_s5  ;;  %v14997_v62 = vand.u32 4294901760, %v14996_v58  ;;  %v15021_v58 = vand.u32 4294901760, %v15020_v38  ;;  %v24320_v48 = vand.u32 4294901760, %v23451_v22 }
0x335a   :  { %v15026_v40 = vsub.f32 %v23443_v34, %v24322_v46 }
0x335b   :  { %v18465_v29 = vpack.c.bf16 %v14997_v62, %v14985_v5  ;;  %v24321_v62 = vand.u32 4294901760, %v23445_v4 }
0x335c   :  { %15954 = vrot.lane.b32.xlu1 %v24866_v2, %s19336_s9  ;;  %v23510_v2 = vpack.c.bf16 %v15021_v58, %v15009_v30  ;;  %v15027_v5 = vand.u32 4294901760, %v15026_v40  ;;  %v15050_v30 = vsub.f32 %v23451_v22, %v24320_v48 }
0x335d   :  { %15938 = vrot.lane.b32.xlu0 %v24867_v45, %s19335_s1  ;;  %18466 = vmatprep.subr.bf16.mxu0 %v18465_v29  ;;  %v24318_v45 = vand.u32 4294901760, %v23447_v32  ;;  %v15032_v59 = vsub.f32 %v23445_v4, %v24321_v62 }
0x335e   :  { %v15051_v40 = vand.u32 4294901760, %v15050_v30 }
0x335f   :  { %v15044_v29 = vsub.f32 %v23447_v32, %v24318_v45  ;;  %v15033_v38 = vand.u32 4294901760, %v15032_v59  ;;  %v24325_v45 = vand.u32 4294901760, %v23462_v17  ;;  %v24326_v59 = vand.u32 4294901760, %v23464_v28 }
0x3360   :  { %15940 = vrot.lane.b32.xlu1 %v14743_v55, %s19335_s1  ;;  %v15015_v55 = vand.u32 4294901760, %v15014_v11 }
0x3361   :  { %15952 = vrot.lane.b32.xlu0 %v24868_v41, %s19336_s9 }
0x3362   :  { %v23516_v24 = vpack.c.bf16 %v15027_v5, %v15015_v55  ;;  %v24323_v55 = vand.u32 4294901760, %v23457_v61  ;;  %v24324_v5 = vand.u32 4294901760, %v23459_v20 }
0x3364   :  { %15958 = vrot.lane.b32.xlu1 %v23357_v54, %s19336_s9  ;;  %v24319_v54 = vand.u32 4294901760, %v23449_v0 }
0x3365   :  { %15956 = vrot.lane.b32.xlu0 %v23355_v13, %s19336_s9  ;;  %v15045_v13 = vand.u32 4294901760, %v15044_v29 }
0x3366   :  { %v15038_v41 = vsub.f32 %v23449_v0, %v24319_v54  ;;  %v15056_v54 = vsub.f32 %v23457_v61, %v24323_v55  ;;  %v18481_v55 = vpack.c.bf16 %v23379_v42, %v23377_v47 }
0x3367   :  { %v23532_v58 = vpack.c.bf16 %v15045_v13, %v15033_v38  ;;  %v15068_v38 = vsub.f32 %v23459_v20, %v24324_v5  ;;  %v15062_v13 = vsub.f32 %v23462_v17, %v24325_v45  ;;  %v18483_v5 = vpack.c.bf16 %v23385_v18, %v23381_v16 }
0x3368   :  { %v15039_v11 = vand.u32 4294901760, %v15038_v41  ;;  %v15074_v41 = vsub.f32 %v23464_v28, %v24326_v59  ;;  %v15057_v30 = vand.u32 4294901760, %v15056_v54  ;;  %v18485_v45 = vpack.c.bf16 %v23423_v8, %v23421_v15 }
0x3369   :  { %v15069_v48 = vand.u32 4294901760, %v15068_v38  ;;  %v18487_v59 = vpack.c.bf16 %v23443_v34, %v23441_v1  ;;  %v18489_v54 = vpack.c.bf16 %v23447_v32, %v23445_v4  ;;  %v18493_v38 = vpack.c.bf16 %v23459_v20, %v23457_v61 }
0x336a   :  { %v23538_v29 = vpack.c.bf16 %v15051_v40, %v15039_v11  ;;  %v15063_v11 = vand.u32 4294901760, %v15062_v13  ;;  %v15075_v40 = vand.u32 4294901760, %v15074_v41  ;;  %v14753_v41 = vsel %vm3008_vm0, %v22896_v7, %v23289_v21 }
0x336b   :  { %v23552_v62 = vpack.c.bf16 %v15069_v48, %v15057_v30  ;;  %v18491_v48 = vpack.c.bf16 %v23451_v22, %v23449_v0  ;;  %v14792_v30 = vsel %vm2299_vm1, %v14753_v41, 0 }
0x336c   :  { %v23554_v46 = vpack.c.bf16 %v15075_v40, %v15063_v11  ;;  %v14754_v11 = vsel %vm3008_vm0, %v22976_v6, %v23218_v39  ;;  %v23579_v40 = vand.u32 4294901760, %v14792_v30  ;;  %v14756_v39 = vsel %vm3008_vm0, %v23136_v49, %v23058_v9 }
0x336d   :  { %v14795_v35 = vsel %vm2299_vm1, %v14754_v11, 0  ;;  %v14801_v49 = vsel %vm2299_vm1, %v14756_v39, 0 }
0x336e   :  { %v23595_v21 = vand.u32 4294901760, %v14795_v35  ;;  %v23598_v41 = vsub.f32 %v14792_v30, %v23579_v40 }
0x3370   :  { %v23618_v26 = vsub.f32 %v14795_v35, %v23595_v21 }
0x33ca   :  { %v14746_v25 = vpop.permute.xlu1 %14745 }
0x33cb   :  { %v15946_v10 = vsel %vm3008_vm0, %v14746_v25, 0.0  ;;  %v14750_v3 = vpop.permute.xlu0 %14749 }
0x33cc   :  { %15970 = vst [vmem:[%s23989_s13 + $0x10] sm:$0xff] %v15946_v10  ;;  %v14752_v7 = vsel %vm3008_vm0, %v22816_v57, %v14750_v3  ;;  %v23615_v3 = vand.u32 4294901760, %v14798_v56 }
0x33cd   :  { %v14789_v6 = vsel %vm2299_vm1, %v14752_v7, 0 }
0x33ce   :  { %v23600_v11 = vand.u32 4294901760, %v14789_v6  ;;  %v15955_v36 = vpop.permute.xlu1 %15954 }
0x33cf   :  { %v15965_v10 = vsel %vm3008_vm0, %v15955_v36, 0.0  ;;  %v15939_v27 = vpop.permute.xlu0 %15938 }
0x33d0   :  { %v23605_v57 = vsub.f32 %v14789_v6, %v23600_v11  ;;  %15973 = vst [vmem:[%s23992_s14 + $0x8] sm:$0xff] %v15965_v10  ;;  %v15945_v9 = vsel %vm3008_vm0, %v15939_v27, 0.0  ;;  %v14906_v6 = vand.u32 4294901760, %v23598_v41  ;;  %v14757_v27 = vsel %vm3008_vm0, %v23216_v51, %v22978_v52 }
0x33d1   :  { %15969 = vst [vmem:[%s23989_s13 + $0x8] sm:$0xff] %v15945_v9  ;;  %v23633_v9 = vand.u32 4294901760, %v14801_v49  ;;  %v14804_v14 = vsel %vm2299_vm1, %v14757_v27, 0 }
0x33d2   :  { %v24334_v30 = vand.u32 4294901760, %v23605_v57  ;;  %v15941_v7 = vpop.permute.xlu1 %15940  ;;  %v23662_v27 = vand.u32 4294901760, %v14804_v14 }
0x33d3   :  { %v15947_v36 = vsel %vm3008_vm0, %v15941_v7, 0.0  ;;  %v15953_v10 = vpop.permute.xlu0 %15952  ;;  %v23639_v7 = vsub.f32 %v14798_v56, %v23615_v3 }
0x33d4   :  { %15971 = vst [vmem:[%s23989_s13 + $0x18] sm:$0xff] %v15947_v36  ;;  %v15964_v39 = vsel %vm3008_vm0, %v15953_v10, 0.0  ;;  %v14896_v35 = vsub.f32 %v23605_v57, %v24334_v30  ;;  %v14907_v36 = vsub.f32 %v23598_v41, %v14906_v6  ;;  %v14917_v10 = vand.u32 4294901760, %v23618_v26 }
0x33d5   :  { %15972 = vst [vmem:[%s23992_s14] sm:$0xff] %v15964_v39  ;;  %v14758_v39 = vsel %vm3008_vm0, %v23287_v44, %v22898_v12 }
0x33d6   :  { %v15959_v52 = vpop.permute.xlu1 %15958  ;;  %v14897_v51 = vand.u32 4294901760, %v14896_v35  ;;  %v23655_v35 = vsub.f32 %v14801_v49, %v23633_v9  ;;  %v14908_v12 = vand.u32 4294901760, %v14907_v36  ;;  %v14918_v44 = vsub.f32 %v23618_v26, %v14917_v10 }
0x33d7   :  { %v15967_v30 = vsel %vm3008_vm0, %v15959_v52, 0.0  ;;  %v15957_v13 = vpop.permute.xlu0 %15956  ;;  %v14807_v49 = vsel %vm2299_vm1, %v14758_v39, 0 }
0x33d8   :  { %15975 = vst [vmem:[%s23992_s14 + $0x18] sm:$0xff] %v15967_v30  ;;  %v15966_v56 = vsel %vm3008_vm0, %v15957_v13, 0.0  ;;  %14898 = vmatmul.mubr.f32.vlgmr.msra.gmra.mrb[38].mxu0 %v14897_v51  ;;  %v14928_v13 = vand.u32 4294901760, %v23639_v7  ;;  %v24869_v30 = vld [vmem:[#allocation49_spill] sm:$0xff]  ;;  %v23678_v51 = vand.u32 4294901760, %v14807_v49  ;;  %v14919_v36 = vand.u32 4294901760, %v14918_v44 }
0x33d9   :  { %15974 = vst [vmem:[%s23992_s14 + $0x10] sm:$0xff] %v15966_v56  ;;  %18468 = vmatpush1.bf16.msra.mxu0 %v23492_v33  ;;  %14903 = vmatprep.mubr.f32.mxu0 %v24505_v19  ;;  %v14759_v52 = vsel %vm3008_vm0, %v14746_v25, %v24869_v30  ;;  %v14939_v33 = vand.u32 4294901760, %v23655_v35 }
0x33da   :  { %18470 = vmatprep.subr.bf16.mxu0 %v23510_v2  ;;  %v23676_v2 = vsub.f32 %v14804_v14, %v23662_v27  ;;  %v14929_v39 = vsub.f32 %v23639_v7, %v14928_v13  ;;  %v14810_v25 = vsel %vm2299_vm1, %v14759_v52, 0  ;;  %v23691_v14 = vsub.f32 %v14807_v49, %v23678_v51 }
0x33db   :  { %v23693_v56 = vand.u32 4294901760, %v14810_v25 }
0x33dc   :  { %14909 = vmatmul.mubr.f32.gmra.mrb[40].mxu0 %v14908_v12  ;;  %v14930_v12 = vand.u32 4294901760, %v14929_v39  ;;  %v14950_v44 = vand.u32 4294901760, %v23676_v2  ;;  %v14961_v49 = vand.u32 4294901760, %v23691_v14 }
0x33dd   :  { %14914 = vmatprep.mubr.f32.mxu0 %v24505_v19  ;;  %18472 = vmatpush1.bf16.msra.mxu0 %v23516_v24  ;;  %v14940_v24 = vsub.f32 %v23655_v35, %v14939_v33 }
0x33de   :  { %18474 = vmatprep.subr.bf16.mxu0 %v23532_v58  ;;  %v23700_v58 = vsub.f32 %v14810_v25, %v23693_v56  ;;  %v24876_v25 = vand.u32 4294901760, %v23423_v8  ;;  %v24882_v8 = vand.u32 4294901760, %v23449_v0 }
0x33df   :  { %v14941_v30 = vand.u32 4294901760, %v14940_v24 }
0x33e0   :  { %14920 = vmatmul.mubr.f32.gmra.mrb[42].mxu0 %v14919_v36  ;;  %v14972_v52 = vand.u32 4294901760, %v23700_v58 }
0x33e1   :  { %14925 = vmatprep.mubr.f32.mxu0 %v24505_v19  ;;  %18476 = vmatpush1.bf16.msra.mxu0 %v23538_v29  ;;  %v14951_v29 = vsub.f32 %v23676_v2, %v14950_v44 }
0x33e2   :  { %18478 = vmatprep.subr.bf16.mxu0 %v23552_v62  ;;  %v14973_v39 = vsub.f32 %v23700_v58, %v14972_v52 }
0x33e3   :  { %v14952_v62 = vand.u32 4294901760, %v14951_v29  ;;  %v24879_v29 = vand.u32 4294901760, %v23443_v34  ;;  %v24884_v34 = vand.u32 4294901760, %v23457_v61 }
0x33e4   :  { %14931 = vmatmul.mubr.f32.gmra.mrb[44].mxu0 %v14930_v12  ;;  %v24877_v12 = vand.u32 4294901760, %v23605_v57 }
0x33e5   :  { %14936 = vmatprep.mubr.f32.mxu0 %v24505_v19  ;;  %18480 = vmatpush1.bf16.msra.mxu0 %v23554_v46  ;;  %v14962_v46 = vsub.f32 %v23691_v14, %v14961_v49 }
0x33e6   :  { %18482 = vmatprep.subr.bf16.mxu0 %v18481_v55  ;;  %v14974_v55 = vand.u32 4294901760, %v14973_v39 }
0x33e7   :  { %v14963_v36 = vand.u32 4294901760, %v14962_v46  ;;  %v24885_v46 = vand.u32 4294901760, %v23459_v20 }
0x33e8   :  { %14942 = vmatmul.mubr.f32.gmra.mrb[46].mxu0 %v14941_v30  ;;  %v24878_v30 = vand.u32 4294901760, %v23441_v1 }
0x33e9   :  { %14947 = vmatprep.mubr.f32.mxu0 %v24505_v19 }
0x33ec   :  { %14953 = vmatmul.mubr.f32.gmra.mrb[48].mxu0 %v14952_v62  ;;  %v18519_v62 = vpack.c.bf16 %v24879_v29, %v24878_v30 }
0x33ed   :  { %14958 = vmatprep.mubr.f32.mxu0 %v24505_v19 }
0x33f0   :  { %14964 = vmatmul.mubr.f32.gmra.mrb[50].mxu0 %v14963_v36 }
0x33f1   :  { %14969 = vmatprep.mubr.f32.mxu0 %v24505_v19 }
0x33f4   :  { %14975 = vmatmul.mubr.f32.gmra.mrb[52].mxu0 %v14974_v55 }
0x33f5   :  { %15125 = vmatprep.mubr.f32.mxu0 %v24505_v19 }
0x33f8   :  { %15127 = vmatmul.mubr.f32.vlgmr.msra.gmra.mrb[38].mxu0 %v23600_v11 }
0x33f9   :  { %18484 = vmatpush1.bf16.msra.mxu0 %v18483_v5  ;;  %15132 = vmatprep.mubr.f32.mxu0 %v24505_v19  ;;  %v24871_v5 = vand.u32 4294901760, %v23377_v47  ;;  %v24873_v47 = vand.u32 4294901760, %v23381_v16  ;;  %v24880_v16 = vand.u32 4294901760, %v23445_v4  ;;  %v18525_v4 = vpack.c.bf16 %v24885_v46, %v24884_v34 }
0x33fa   :  { %18486 = vmatprep.subr.bf16.mxu0 %v18485_v45  ;;  %v24870_v45 = vpack.c.bf16 %v23464_v28, %v23462_v17 }
0x33fc   :  { %15134 = vmatmul.mubr.f32.gmra.mrb[40].mxu0 %v23579_v40 }
0x33fd   :  { %15139 = vmatprep.mubr.f32.mxu0 %v24505_v19  ;;  %18488 = vmatpush1.bf16.msra.mxu0 %v18487_v59  ;;  %v24872_v59 = vand.u32 4294901760, %v23379_v42  ;;  %v24874_v42 = vand.u32 4294901760, %v23385_v18  ;;  %v24881_v18 = vand.u32 4294901760, %v23447_v32  ;;  %v24886_v32 = vand.u32 4294901760, %v23462_v17 }
0x33fe   :  { %18490 = vmatprep.subr.bf16.mxu0 %v18489_v54 }
0x33ff   :  { %v18513_v54 = vpack.c.bf16 %v24872_v59, %v24871_v5 }
0x3400   :  { %15141 = vmatmul.mubr.f32.gmra.mrb[42].mxu0 %v23595_v21 }
0x3401   :  { %15146 = vmatprep.mubr.f32.mxu0 %v24505_v19  ;;  %18492 = vmatpush1.bf16.msra.mxu0 %v18491_v48  ;;  %v18515_v48 = vpack.c.bf16 %v24874_v42, %v24873_v47 }
0x3402   :  { %18494 = vmatprep.subr.bf16.mxu0 %v18493_v38  ;;  %v24875_v38 = vand.u32 4294901760, %v23421_v15  ;;  %v18521_v15 = vpack.c.bf16 %v24881_v18, %v24880_v16 }
0x3404   :  { %15148 = vmatmul.mubr.f32.gmra.mrb[44].mxu0 %v23615_v3  ;;  %v18517_v24 = vpack.c.bf16 %v24876_v25, %v24875_v38 }
0x3405   :  { %15153 = vmatprep.mubr.f32.mxu0 %v24505_v19  ;;  %18496 = vmatpush1.bf16.msra.mxu0 %v24870_v45 }
0x3406   :  { %18498 = vmatprep.subr.bf16.mxu0 %v23375_v37 }
0x3408   :  { %15155 = vmatmul.mubr.f32.gmra.mrb[46].mxu0 %v23633_v9 }
0x3409   :  { %15160 = vmatprep.mubr.f32.mxu0 %v24505_v19 }
0x340c   :  { %15162 = vmatmul.mubr.f32.gmra.mrb[48].mxu0 %v23662_v27 }
0x340d   :  { %15167 = vmatprep.mubr.f32.mxu0 %v24505_v19 }
0x3410   :  { %15169 = vmatmul.mubr.f32.gmra.mrb[50].mxu0 %v23678_v51 }
0x3411   :  { %15174 = vmatprep.mubr.f32.mxu0 %v24505_v19 }
0x3414   :  { %15176 = vmatmul.mubr.f32.gmra.mrb[52].mxu0 %v23693_v56 }
0x3415   :  { %15278 = vmatprep.mubr.f32.mxu0 %v24505_v19 }
0x3418   :  { %15281 = vmatmul.mubr.f32.vlgmr.msra.gmra.mrb[38].mxu0 %v23605_v57  ;;  %v24883_v57 = vand.u32 4294901760, %v23451_v22 }
0x3419   :  { %18500 = vmatpush1.bf16.msra.mxu0 %v23383_v50  ;;  %15286 = vmatprep.mubr.f32.mxu0 %v24505_v19 }
0x341a   :  { %18502 = vmatprep.subr.bf16.mxu0 %v23401_v43  ;;  %v18523_v1 = vpack.c.bf16 %v24883_v57, %v24882_v8 }
0x341c   :  { %15289 = vmatmul.mubr.f32.gmra.mrb[40].mxu0 %v23598_v41  ;;  %v24887_v41 = vand.u32 4294901760, %v23464_v28 }
0x341d   :  { %15294 = vmatprep.mubr.f32.mxu0 %v24505_v19  ;;  %18504 = vmatpush1.bf16.msra.mxu0 %v23403_v60 }
0x341e   :  { %18506 = vmatprep.subr.bf16.mxu0 %v23419_v31  ;;  %v18527_v0 = vpack.c.bf16 %v24887_v41, %v24886_v32 }
0x3420   :  { %15297 = vmatmul.mubr.f32.gmra.mrb[42].mxu0 %v23618_v26 }
0x3421   :  { %15302 = vmatprep.mubr.f32.mxu0 %v24505_v19  ;;  %18508 = vmatpush1.bf16.msra.mxu0 %v23425_v53 }
0x3422   :  { %18510 = vmatprep.subr.bf16.mxu0 %v23453_v63 }
0x3424   :  { %15305 = vmatmul.mubr.f32.gmra.mrb[44].mxu0 %v23639_v7 }
0x3425   :  { %15310 = vmatprep.mubr.f32.mxu0 %v24505_v19  ;;  %18512 = vmatpush1.bf16.msra.mxu0 %v23455_v23 }
0x3426   :  { %18514 = vmatprep.subr.bf16.mxu0 %v18513_v54 }
0x3428   :  { %15313 = vmatmul.mubr.f32.gmra.mrb[46].mxu0 %v23655_v35 }
0x3429   :  { %15318 = vmatprep.mubr.f32.mxu0 %v24505_v19 }
0x342c   :  { %15321 = vmatmul.mubr.f32.gmra.mrb[48].mxu0 %v23676_v2 }
0x342d   :  { %15326 = vmatprep.mubr.f32.mxu0 %v24505_v19 }
0x3430   :  { %15329 = vmatmul.mubr.f32.gmra.mrb[50].mxu0 %v23691_v14 }
0x3431   :  { %15334 = vmatprep.mubr.f32.mxu0 %v24505_v19 }
0x3434   :  { %15337 = vmatmul.mubr.f32.gmra.mrb[52].mxu0 %v23700_v58 }
0x3435   :  { %15423 = vmatprep.mubr.f32.mxu0 %v24505_v19 }
0x3438   :  { %15427 = vmatmul.mubr.f32.vlgmr.msra.gmra.mrb[38].mxu0 %v24877_v12 }
0x3439   :  { %18516 = vmatpush1.bf16.msra.mxu0 %v18515_v48  ;;  %15432 = vmatprep.mubr.f32.mxu0 %v24505_v19 }
0x343a   :  { %18518 = vmatprep.subr.bf16.mxu0 %v18517_v24 }
0x343c   :  { %15436 = vmatmul.mubr.f32.gmra.mrb[40].mxu0 %v14906_v6 }
0x343d   :  { %15441 = vmatprep.mubr.f32.mxu0 %v24505_v19  ;;  %18520 = vmatpush1.bf16.msra.mxu0 %v18519_v62 }
0x343e   :  { %18522 = vmatprep.subr.bf16.mxu0 %v18521_v15 }
0x3440   :  { %15445 = vmatmul.mubr.f32.gmra.mrb[42].mxu0 %v14917_v10 }
0x3441   :  { %15450 = vmatprep.mubr.f32.mxu0 %v24505_v19  ;;  %18524 = vmatpush1.bf16.msra.mxu0 %v18523_v1 }
0x3442   :  { %18526 = vmatprep.subr.bf16.mxu0 %v18525_v4 }
0x3444   :  { %15454 = vmatmul.mubr.f32.gmra.mrb[44].mxu0 %v14928_v13 }
0x3445   :  { %15459 = vmatprep.mubr.f32.mxu0 %v24505_v19  ;;  %18528 = vmatpush1.bf16.msra.mxu0 %v18527_v0 }
0x3446   :  { %18530 = vmatprep.subr.bf16.mxu0 %v23375_v37  ;;  %v14776_v37 = vld [vmem:[%s23993_s10] sm:$0x3] }
0x3448   :  { %15463 = vmatmul.mubr.f32.gmra.mrb[46].mxu0 %v14939_v33 }
0x3449   :  { %15468 = vmatprep.mubr.f32.mxu0 %v24505_v19 }
0x344c   :  { %15472 = vmatmul.mubr.f32.gmra.mrb[48].mxu0 %v14950_v44 }
0x344d   :  { %15477 = vmatprep.mubr.f32.mxu0 %v24505_v19 }
0x3450   :  { %15481 = vmatmul.mubr.f32.gmra.mrb[50].mxu0 %v14961_v49 }
0x3451   :  { %15486 = vmatprep.mubr.f32.mxu0 %v24505_v19 }
0x3454   :  { %15490 = vmatmul.mubr.f32.gmra.mrb[52].mxu0 %v14972_v52 }
0x3455   :  { %15608 = vmatprep.mubr.f32.mxu0 %v24505_v19 }
0x3458   :  { %15610 = vmatmul.mubr.f32.vlgmr.msra.gmra.mrb[38].mxu0 %v23600_v11 }
0x3459   :  { %18532 = vmatpush1.bf16.msra.mxu0 %v23383_v50  ;;  %15615 = vmatprep.mubr.f32.mxu0 %v24505_v19  ;;  %v24888_v50 = vld [vmem:[#allocation26_spill] sm:$0xff] }
0x345a   :  { %18534 = vmatprep.subr.bf16.mxu0 %v23401_v43  ;;  %v23880_v43 = vrot.slane %v14776_v37, %v24888_v50 }
0x345c   :  { %15617 = vmatmul.mubr.f32.gmra.mrb[40].mxu0 %v23579_v40 }
0x345d   :  { %15622 = vmatprep.mubr.f32.mxu0 %v24505_v19  ;;  %18536 = vmatpush1.bf16.msra.mxu0 %v23403_v60  ;;  %v24889_v60 = vld [vmem:[#allocation27_spill] sm:$0xff] }
0x345e   :  { %18538 = vmatprep.subr.bf16.mxu0 %v23419_v31  ;;  %v23883_v31 = vrot.slane %v14776_v37, %v24889_v60 }
0x3460   :  { %15624 = vmatmul.mubr.f32.gmra.mrb[42].mxu0 %v23595_v21 }
0x3461   :  { %15629 = vmatprep.mubr.f32.mxu0 %v24505_v19  ;;  %18540 = vmatpush1.bf16.msra.mxu0 %v23425_v53 }
0x3462   :  { %18542 = vmatprep.subr.bf16.mxu0 %v23453_v63 }
0x3464   :  { %15631 = vmatmul.mubr.f32.gmra.mrb[44].mxu0 %v23615_v3 }
0x3465   :  { %15636 = vmatprep.mubr.f32.mxu0 %v24505_v19  ;;  %18544 = vmatpush1.bf16.msra.mxu0 %v23455_v23 }
0x3468   :  { %15638 = vmatmul.mubr.f32.gmra.mrb[46].mxu0 %v23633_v9 }
0x3469   :  { %15643 = vmatprep.mubr.f32.mxu0 %v24505_v19 }
0x346c   :  { %15645 = vmatmul.mubr.f32.gmra.mrb[48].mxu0 %v23662_v27 }
0x346d   :  { %15650 = vmatprep.mubr.f32.mxu0 %v24505_v19 }
0x3470   :  { %15652 = vmatmul.mubr.f32.gmra.mrb[50].mxu0 %v23678_v51 }
0x3471   :  { %15657 = vmatprep.mubr.f32.mxu0 %v24505_v19 }
0x3474   :  { %15659 = vmatmul.mubr.f32.gmra.mrb[52].mxu0 %v23693_v56 }
0x3475   :  { %15745 = vmatprep.mubr.f32.mxu0 %v24505_v19 }
0x3478   :  { %15747 = vmatmul.mubr.f32.vlgmr.msra.gmra.mrb[38].mxu0 %v23600_v11 }
0x3479   :  { %15752 = vmatprep.mubr.f32.mxu0 %v24505_v19 }
0x347c   :  { %15754 = vmatmul.mubr.f32.gmra.mrb[40].mxu0 %v23579_v40 }
0x347d   :  { %15759 = vmatprep.mubr.f32.mxu0 %v24505_v19 }
0x3480   :  { %15761 = vmatmul.mubr.f32.gmra.mrb[42].mxu0 %v23595_v21 }
0x3481   :  { %15766 = vmatprep.mubr.f32.mxu0 %v24505_v19 }
0x3484   :  { %15768 = vmatmul.mubr.f32.gmra.mrb[44].mxu0 %v23615_v3 }
0x3485   :  { %15773 = vmatprep.mubr.f32.mxu0 %v24505_v19 }
0x3488   :  { %15775 = vmatmul.mubr.f32.gmra.mrb[46].mxu0 %v23633_v9 }
0x3489   :  { %15780 = vmatprep.mubr.f32.mxu0 %v24505_v19 }
0x348c   :  { %15782 = vmatmul.mubr.f32.gmra.mrb[48].mxu0 %v23662_v27 }
0x348d   :  { %15787 = vmatprep.mubr.f32.mxu0 %v24505_v19 }
0x3490   :  { %15789 = vmatmul.mubr.f32.gmra.mrb[50].mxu0 %v23678_v51 }
0x3491   :  { %15794 = vmatprep.mubr.f32.mxu0 %v24505_v19 }
0x3494   :  { %15796 = vmatmul.mubr.f32.gmra.mrb[52].mxu0 %v23693_v56 }
0x354b   :  { %v15748_v53 = vpop.f32.mrb[38].mxu0 }
0x354c   :  { %v18593_v22 = vadd.f32 %v15748_v53, %v23880_v43  ;;  %v15750_v63 = vpop.f32.mrb[39].mxu0 }
0x354d   :  { %v23887_v23 = vadd.f32 %v15750_v63, %v23883_v31 }
0x354e   :  { %15802 = vst [vmem:[%s23994_s11] sm:$0xff] %v18593_v22 }
0x354f   :  { %v15818_v19 = vand.u32 2147483647, %v23887_v23  ;;  %v15755_v61 = vpop.f32.mrb[40].mxu0 }
0x3550   :  { %v18595_v20 = vadd.f32 %v15755_v61, %v23880_v43  ;;  %v15757_v17 = vpop.f32.mrb[41].mxu0 }
0x3551   :  { %v15826_v28 = vsub.f32 0.0, %v15818_v19  ;;  %v23895_v40 = vadd.f32 %v15757_v17, %v23883_v31 }
0x3552   :  { %15803 = vst [vmem:[%s23994_s11 + $0x8] sm:$0xff] %v18595_v20 }
0x3553   :  { %v15834_v21 = vmul.f32 1.442695, %v15826_v28  ;;  %v15819_v11 = vand.u32 2147483647, %v23895_v40  ;;  %v15762_v3 = vpop.f32.mrb[42].mxu0 }
0x3554   :  { %v18597_v26 = vadd.f32 %v15762_v3, %v23880_v43  ;;  %v15764_v6 = vpop.f32.mrb[43].mxu0 }
0x3555   :  { %19301 = vpow2.f32 %v15834_v21  ;;  %v15827_v9 = vsub.f32 0.0, %v15819_v11  ;;  %v23903_v7 = vadd.f32 %v15764_v6, %v23883_v31 }
0x3556   :  { %15804 = vst [vmem:[%s23994_s11 + $0x10] sm:$0xff] %v18597_v26 }
0x3557   :  { %v15836_v10 = vmul.f32 1.442695, %v15827_v9  ;;  %v15820_v35 = vand.u32 2147483647, %v23903_v7  ;;  %v15769_v27 = vpop.f32.mrb[44].mxu0 }
0x3558   :  { %v18599_v13 = vadd.f32 %v15769_v27, %v23880_v43  ;;  %v15771_v33 = vpop.f32.mrb[45].mxu0 }
0x3559   :  { %19303 = vpow2.f32 %v15836_v10  ;;  %v15828_v2 = vsub.f32 0.0, %v15820_v35  ;;  %v23911_v51 = vadd.f32 %v15771_v33, %v23883_v31 }
0x355a   :  { %15805 = vst [vmem:[%s23994_s11 + $0x18] sm:$0xff] %v18599_v13 }
0x355b   :  { %v15838_v14 = vmul.f32 1.442695, %v15828_v2  ;;  %v15821_v56 = vand.u32 2147483647, %v23911_v51  ;;  %v15776_v44 = vpop.f32.mrb[46].mxu0 }
0x355c   :  { %v18601_v58 = vadd.f32 %v15776_v44, %v23880_v43  ;;  %v15778_v49 = vpop.f32.mrb[47].mxu0 }
0x355d   :  { %19305 = vpow2.f32 %v15838_v14  ;;  %v15829_v52 = vsub.f32 0.0, %v15821_v56  ;;  %v23919_v36 = vadd.f32 %v15778_v49, %v23883_v31 }
0x355e   :  { %15806 = vst [vmem:[%s23994_s11 + $0x20] sm:$0xff] %v18601_v58 }
0x355f   :  { %v19302_v39 = vpop.eup %19301  ;;  %v15840_v55 = vmul.f32 1.442695, %v15829_v52  ;;  %v15822_v45 = vand.u32 2147483647, %v23919_v36  ;;  %v15783_v5 = vpop.f32.mrb[48].mxu0 }
0x3560   :  { %v15850_v59 = vadd.f32 1.0, %v19302_v39  ;;  %v18603_v54 = vadd.f32 %v15783_v5, %v23880_v43  ;;  %v15785_v47 = vpop.f32.mrb[49].mxu0  ;;  %v15853_v30 = vmul.f32 -0.5, %v19302_v39  ;;  %v15856_v60 = vand.u32 2147483647, %v19302_v39 }
0x3561   :  { %19307 = vpow2.f32 %v15840_v55  ;;  %v15830_v42 = vsub.f32 0.0, %v15822_v45  ;;  %v23927_v48 = vadd.f32 %v15785_v47, %v23883_v31 }
0x3562   :  { %19309 = vlog2.f32 %v15850_v59  ;;  %15807 = vst [vmem:[%s23994_s11 + $0x28] sm:$0xff] %v18603_v54  ;;  %v15854_v46 = vadd.f32 1.0, %v15853_v30  ;;  %vm15857_vm2 = vcmp.lt.f32.partialorder %v15856_v60, 0.0004427343  ;;  %v15812_v59 = vmax.f32 %v23903_v7, 0.0 }
0x3563   :  { %v19304_v38 = vpop.eup %19303  ;;  %v15842_v25 = vmul.f32 1.442695, %v15830_v42  ;;  %v15823_v24 = vand.u32 2147483647, %v23927_v48  ;;  %v15790_v12 = vpop.f32.mrb[50].mxu0 }
0x3564   :  { %v15859_v29 = vadd.f32 1.0, %v19304_v38  ;;  %v15792_v62 = vpop.f32.mrb[51].mxu0  ;;  %v18605_v18 = vadd.f32 %v15790_v12, %v23880_v43  ;;  %v15862_v4 = vmul.f32 -0.5, %v19304_v38  ;;  %v15855_v61 = vmul.f32 %v19302_v39, %v15854_v46 }
0x3565   :  { %19311 = vpow2.f32 %v15842_v25  ;;  %v15831_v16 = vsub.f32 0.0, %v15823_v24  ;;  %v23935_v15 = vadd.f32 %v15792_v62, %v23883_v31  ;;  %v15865_v11 = vand.u32 2147483647, %v19304_v38 }
0x3566   :  { %19313 = vlog2.f32 %v15859_v29  ;;  %15808 = vst [vmem:[%s23994_s11 + $0x30] sm:$0xff] %v18605_v18  ;;  %v15863_v20 = vadd.f32 1.0, %v15862_v4  ;;  %v15813_v62 = vmax.f32 %v23911_v51, 0.0 }
0x3567   :  { %v19306_v8 = vpop.eup %19305  ;;  %v15844_v57 = vmul.f32 1.442695, %v15831_v16  ;;  %v15824_v1 = vand.u32 2147483647, %v23935_v15  ;;  %v15797_v34 = vpop.f32.mrb[52].mxu0 }
0x3568   :  { %v15868_v32 = vadd.f32 1.0, %v19306_v8  ;;  %v15799_v41 = vpop.f32.mrb[53].mxu0  ;;  %v18607_v37 = vadd.f32 %v15797_v34, %v23880_v43  ;;  %v15871_v21 = vmul.f32 -0.5, %v19306_v8  ;;  %v15864_v35 = vmul.f32 %v19304_v38, %v15863_v20 }
0x3569   :  { %19315 = vpow2.f32 %v15844_v57  ;;  %v15832_v0 = vsub.f32 0.0, %v15824_v1  ;;  %v23943_v50 = vadd.f32 %v15799_v41, %v23883_v31  ;;  %v15810_v31 = vmax.f32 %v23887_v23, 0.0 }
0x356a   :  { %19317 = vlog2.f32 %v15868_v32  ;;  %15809 = vst [vmem:[%s23994_s11 + $0x38] sm:$0xff] %v18607_v37  ;;  %v15872_v33 = vadd.f32 1.0, %v15871_v21  ;;  %v15811_v23 = vmax.f32 %v23895_v40, 0.0  ;;  %vm15866_vm3 = vcmp.lt.f32.partialorder %v15865_v11, 0.0004427343 }
0x356b   :  { %v19308_v53 = vpop.eup %19307  ;;  %v15846_v22 = vmul.f32 1.442695, %v15832_v0  ;;  %v15825_v63 = vand.u32 2147483647, %v23943_v50  ;;  %v15874_v14 = vand.u32 2147483647, %v19306_v8 }
0x356c   :  { %v19310_v19 = vpop.eup %19309  ;;  %v15877_v17 = vadd.f32 1.0, %v19308_v53  ;;  %v15880_v2 = vmul.f32 -0.5, %v19308_v53  ;;  %v15873_v55 = vmul.f32 %v19306_v8, %v15872_v33  ;;  %v15883_v40 = vand.u32 2147483647, %v19308_v53 }
0x356d   :  { %v15852_v28 = vmul.f32 0.6931472, %v19310_v19  ;;  %19319 = vpow2.f32 %v15846_v22  ;;  %v15833_v43 = vsub.f32 0.0, %v15825_v63  ;;  %vm15875_vm4 = vcmp.lt.f32.partialorder %v15874_v14, 0.0004427343 }
0x356e   :  { %19321 = vlog2.f32 %v15877_v17  ;;  %v15881_v45 = vadd.f32 1.0, %v15880_v2  ;;  %vm15884_vm5 = vcmp.lt.f32.partialorder %v15883_v40, 0.0004427343  ;;  %v15814_v41 = vmax.f32 %v23919_v36, 0.0 }
0x356f   :  { %v19312_v3 = vpop.eup %19311  ;;  %v15858_v26 = vsel %vm15857_vm2, %v15855_v61, %v15852_v28  ;;  %v15848_v6 = vmul.f32 1.442695, %v15833_v43  ;;  %v15815_v61 = vmax.f32 %v23927_v48, 0.0  ;;  %v15816_v11 = vmax.f32 %v23935_v15, 0.0 }
0x3570   :  { %v19314_v9 = vpop.eup %19313  ;;  %v15922_v10 = vadd.f32 %v15858_v26, %v15810_v31  ;;  %v15886_v27 = vadd.f32 1.0, %v19312_v3  ;;  %v15889_v5 = vmul.f32 -0.5, %v19312_v3  ;;  %v15882_v12 = vmul.f32 %v19308_v53, %v15881_v45 }
0x3571   :  { %v15861_v13 = vmul.f32 0.6931472, %v19314_v9  ;;  %19323 = vpow2.f32 %v15848_v6  ;;  %v15892_v7 = vand.u32 2147483647, %v19312_v3 }
0x3572   :  { %15930 = vst [vmem:[%s23995_s12] sm:$0xff] %v15922_v10  ;;  %19325 = vlog2.f32 %v15886_v27  ;;  %v15890_v30 = vadd.f32 1.0, %v15889_v5 }
0x3573   :  { %v19316_v56 = vpop.eup %19315  ;;  %v15867_v44 = vsel %vm15866_vm3, %v15864_v35, %v15861_v13  ;;  %vm15893_vm6 = vcmp.lt.f32.partialorder %v15892_v7, 0.0004427343  ;;  %v15817_v35 = vmax.f32 %v23943_v50, 0.0 }
0x3574   :  { %v19318_v58 = vpop.eup %19317  ;;  %v15923_v49 = vadd.f32 %v15867_v44, %v15811_v23  ;;  %v15895_v52 = vadd.f32 1.0, %v19316_v56  ;;  %v15898_v29 = vmul.f32 -0.5, %v19316_v56  ;;  %v15891_v46 = vmul.f32 %v19312_v3, %v15890_v30 }
0x3575   :  { %v15870_v39 = vmul.f32 0.6931472, %v19318_v58  ;;  %v15901_v51 = vand.u32 2147483647, %v19316_v56 }
0x3576   :  { %15931 = vst [vmem:[%s23995_s12 + $0x8] sm:$0xff] %v15923_v49  ;;  %19327 = vlog2.f32 %v15895_v52  ;;  %v15899_v4 = vadd.f32 1.0, %v15898_v29 }
0x3577   :  { %v19320_v54 = vpop.eup %19319  ;;  %v15876_v47 = vsel %vm15875_vm4, %v15873_v55, %v15870_v39  ;;  %vm15902_vm7 = vcmp.lt.f32.partialorder %v15901_v51, 0.0004427343 }
0x3578   :  { %v19322_v42 = vpop.eup %19321  ;;  %v15924_v38 = vadd.f32 %v15876_v47, %v15812_v59  ;;  %v15904_v25 = vadd.f32 1.0, %v19320_v54  ;;  %v15907_v32 = vmul.f32 -0.5, %v19320_v54  ;;  %v15900_v22 = vmul.f32 %v19316_v56, %v15899_v4 }
0x3579   :  { %v15879_v24 = vmul.f32 0.6931472, %v19322_v42  ;;  %v15910_v20 = vand.u32 2147483647, %v19320_v54 }
0x357a   :  { %15932 = vst [vmem:[%s23995_s12 + $0x10] sm:$0xff] %v15924_v38  ;;  %19329 = vlog2.f32 %v15904_v25  ;;  %v15908_v63 = vadd.f32 1.0, %v15907_v32 }
0x357b   :  { %v19324_v16 = vpop.eup %19323  ;;  %v15885_v18 = vsel %vm15884_vm5, %v15882_v12, %v15879_v24  ;;  %vm15911_vm8 = vcmp.lt.f32.partialorder %v15910_v20, 0.0004427343 }
0x357c   :  { %v19326_v8 = vpop.eup %19325  ;;  %v15925_v57 = vadd.f32 %v15885_v18, %v15813_v62  ;;  %v15913_v1 = vadd.f32 1.0, %v19324_v16  ;;  %v15916_v19 = vmul.f32 -0.5, %v19324_v16  ;;  %v15909_v43 = vmul.f32 %v19320_v54, %v15908_v63 }
0x357d   :  { %v15888_v34 = vmul.f32 0.6931472, %v19326_v8  ;;  %v15919_v3 = vand.u32 2147483647, %v19324_v16 }
0x357e   :  { %15933 = vst [vmem:[%s23995_s12 + $0x18] sm:$0xff] %v15925_v57  ;;  %19331 = vlog2.f32 %v15913_v1  ;;  %v15917_v31 = vadd.f32 1.0, %v15916_v19 }
0x357f   :  { %v15894_v0 = vsel %vm15893_vm6, %v15891_v46, %v15888_v34  ;;  %vm15920_vm9 = vcmp.lt.f32.partialorder %v15919_v3, 0.0004427343 }
0x3580   :  { %v19328_v37 = vpop.eup %19327  ;;  %v15926_v60 = vadd.f32 %v15894_v0, %v15814_v41  ;;  %v15918_v10 = vmul.f32 %v19324_v16, %v15917_v31 }
0x3581   :  { %v15897_v53 = vmul.f32 0.6931472, %v19328_v37 }
0x3582   :  { %15934 = vst [vmem:[%s23995_s12 + $0x20] sm:$0xff] %v15926_v60 }
0x3583   :  { %v15903_v17 = vsel %vm15902_vm7, %v15900_v22, %v15897_v53 }
0x3584   :  { %v19330_v36 = vpop.eup %19329  ;;  %v15927_v28 = vadd.f32 %v15903_v17, %v15815_v61 }
0x3585   :  { %v15906_v21 = vmul.f32 0.6931472, %v19330_v36 }
0x3586   :  { %15935 = vst [vmem:[%s23995_s12 + $0x28] sm:$0xff] %v15927_v28 }
0x3587   :  { %v15912_v26 = vsel %vm15911_vm8, %v15909_v43, %v15906_v21 }
0x3588   :  { %v19332_v6 = vpop.eup %19331  ;;  %v15928_v9 = vadd.f32 %v15912_v26, %v15816_v11 }
0x3589   :  { %v15915_v48 = vmul.f32 0.6931472, %v19332_v6 }
0x358a   :  { %15936 = vst [vmem:[%s23995_s12 + $0x30] sm:$0xff] %v15928_v9 }
0x358b   :  { %v15921_v27 = vsel %vm15920_vm9, %v15918_v10, %v15915_v48 }
0x358c   :  { %v15929_v13 = vadd.f32 %v15921_v27, %v15817_v35 }
0x358e   :  { %15937 = vst [vmem:[%s23995_s12 + $0x38] sm:$0xff] %v15929_v13 }

</bundles_post_ra>
